<compile_context>
chip_gen: v7x
topology: tpu7x:2x2x1
jax: 0.10.0
libtpu: 0.0.40
codegen_flags: <defaults>
</compile_context>

<pallas_src>
import math

import jax
import jax.numpy as jnp
from jax.experimental import pallas as pl
from jax.experimental.pallas import tpu as pltpu

# --- scaled-down "t5-small"-style config (real t5-small: 512/2048/8/64/6/32128)
CFG = dict(vocab=64, d_model=32, d_kv=8, n_heads=4, d_ff=64, n_layers=2,
           num_buckets=8, max_distance=16)

# lane-padded sizes for every HBM-visible tensor (128-lane dense loads/stores)
DP = 128   # padded d_model
FP = 128   # padded d_ff
VP = 128   # padded vocab


# ----------------------------- fused Pallas kernel ---------------------------

def _t5_kernel(x_ref, y_ref, enc_bias_ref, dec_bias_ref,
               enc_ln_ref, enc_qkv_ref, enc_ao_ref, enc_wi_ref, enc_wo_ref,
               dec_ln_ref, dec_sqkv_ref, dec_so_ref, dec_cqkv_ref, dec_co_ref,
               dec_wi_ref, dec_wo_ref, fin_ln_ref, lm_ref, out_ref):
    """Whole T5 forward for ONE batch element (grid axis = batch)."""
    D, Dk, H, L = CFG['d_model'], CFG['d_kv'], CFG['n_heads'], CFG['n_layers']

    def rms(x, w):
        # T5 LayerNorm: no mean subtraction, no bias.  Padded lanes of x are
        # zero, so summing over 128 lanes and dividing by the real D is exact.
        var = jnp.sum(x * x, axis=-1, keepdims=True) * (1.0 / D)
        return x * jax.lax.rsqrt(var + 1e-6) * w

    def softmax(s):
        s = s - jnp.max(s, axis=-1, keepdims=True)
        p = jnp.exp(s)
        return p * pl.reciprocal(jnp.sum(p, axis=-1, keepdims=True), approx=True)

    def attention(h_q, h_kv, qkv_ref, o_ref, l, bias_ref):
        # Per-head 2-D matmuls; weights are stored per-head so each slice is a
        # plain leading-index VMEM load.  (T5: no 1/sqrt(d_kv) score scaling.)
        out = None
        base = l * 3 * H
        for hd in range(H):
            q = jnp.dot(h_q, qkv_ref[base + hd],
                        preferred_element_type=jnp.float32)           # (Sq, Dk)
            k = jnp.dot(h_kv, qkv_ref[base + H + hd],
                        preferred_element_type=jnp.float32)           # (Sk, Dk)
            v = jnp.dot(h_kv, qkv_ref[base + 2 * H + hd],
                        preferred_element_type=jnp.float32)           # (Sk, Dk)
            s = jax.lax.dot_general(q, k, (((1,), (1,)), ((), ())),
                                    preferred_element_type=jnp.float32)  # (Sq, Sk)
            if bias_ref is not None:
                s = s + bias_ref[hd]
            p = softmax(s)
            ctx = jnp.dot(p, v, preferred_element_type=jnp.float32)   # (Sq, Dk)
            o_h = jnp.dot(ctx, o_ref[l * H + hd],
                          preferred_element_type=jnp.float32)         # (Sq, DP)
            out = o_h if out is None else out + o_h
        return out

    # ---------------- encoder ----------------
    x = x_ref[0]                                                      # (Se, DP)
    for l in range(L):
        h = rms(x, enc_ln_ref[2 * l + 0])
        x = x + attention(h, h, enc_qkv_ref, enc_ao_ref, l, enc_bias_ref)
        h = rms(x, enc_ln_ref[2 * l + 1])
        ff = jnp.maximum(
            jnp.dot(h, enc_wi_ref[l], preferred_element_type=jnp.float32), 0.0)
        x = x + jnp.dot(ff, enc_wo_ref[l], preferred_element_type=jnp.float32)
    enc_out = rms(x, fin_ln_ref[0])                                   # (Se, DP)

    # ---------------- decoder ----------------
    y = y_ref[0]                                                      # (Sd, DP)
    for l in range(L):
        h = rms(y, dec_ln_ref[3 * l + 0])
        y = y + attention(h, h, dec_sqkv_ref, dec_so_ref, l, dec_bias_ref)
        h = rms(y, dec_ln_ref[3 * l + 1])
        y = y + attention(h, enc_out, dec_cqkv_ref, dec_co_ref, l, None)
        h = rms(y, dec_ln_ref[3 * l + 2])
        ff = jnp.maximum(
            jnp.dot(h, dec_wi_ref[l], preferred_element_type=jnp.float32), 0.0)
        y = y + jnp.dot(ff, dec_wo_ref[l], preferred_element_type=jnp.float32)
    y = rms(y, fin_ln_ref[1])

    # tied-embedding LM head; the d_model**-0.5 scale is folded into lm_ref.
    out_ref[0] = jnp.dot(y, lm_ref[...], preferred_element_type=jnp.float32)


# ----------------------------- T5 glue (plain JAX) ---------------------------

def _relative_position_bucket(rel, bidirectional, num_buckets, max_distance):
    buckets = jnp.zeros_like(rel)
    n = rel
    if bidirectional:
        num_buckets //= 2
        buckets = buckets + (n > 0).astype(jnp.int32) * num_buckets
        n = jnp.abs(n)
    else:
        n = -jnp.minimum(n, 0)
    max_exact = num_buckets // 2
    is_small = n < max_exact
    large = max_exact + (
        jnp.log(jnp.maximum(n, 1).astype(jnp.float32) / max_exact)
        / math.log(max_distance / max_exact)
        * (num_buckets - max_exact)
    ).astype(jnp.int32)
    large = jnp.minimum(large, num_buckets - 1)
    return buckets + jnp.where(is_small, n, large)


def compute_bias(table, q_len, k_len, bidirectional):
    ctx = jnp.arange(q_len)[:, None]
    mem = jnp.arange(k_len)[None, :]
    buckets = _relative_position_bucket(mem - ctx, bidirectional,
                                        CFG['num_buckets'],
                                        CFG['max_distance'])
    return table[buckets].transpose(2, 0, 1)            # (H, q_len, k_len)


def t5_forward(pp, input_ids, decoder_input_ids):
    B, Se = input_ids.shape
    Sd = decoder_input_ids.shape[1]
    H, Dk, L = CFG['n_heads'], CFG['d_kv'], CFG['n_layers']

    # tiny XLA prologue: embedding gathers + relative-position bias tables
    x0 = pp['emb'][input_ids]                            # (B, Se, DP), pad lanes 0
    y0 = pp['emb'][decoder_input_ids]                    # (B, Sd, DP)
    enc_bias = compute_bias(pp['enc_rel'], Se, Se, True)            # (H, Se, Se)
    dec_bias = compute_bias(pp['dec_rel'], Sd, Sd, False)           # (H, Sd, Sd)
    causal = jnp.where(jnp.arange(Sd)[None, :] > jnp.arange(Sd)[:, None],
                       -1e9, 0.0)
    dec_bias = dec_bias + causal[None]

    in_specs = [
        pl.BlockSpec((1, Se, DP), lambda b: (b, 0, 0)),              # x0
        pl.BlockSpec((1, Sd, DP), lambda b: (b, 0, 0)),              # y0
        pl.BlockSpec((H, Se, Se), lambda b: (0, 0, 0)),              # enc_bias
        pl.BlockSpec((H, Sd, Sd), lambda b: (0, 0, 0)),              # dec_bias
        pl.BlockSpec((2 * L, 1, DP), lambda b: (0, 0, 0)),           # enc_ln
        pl.BlockSpec((3 * L * H, DP, Dk), lambda b: (0, 0, 0)),      # enc_qkv
        pl.BlockSpec((L * H, Dk, DP), lambda b: (0, 0, 0)),          # enc_ao
        pl.BlockSpec((L, DP, FP), lambda b: (0, 0, 0)),              # enc_wi
        pl.BlockSpec((L, FP, DP), lambda b: (0, 0, 0)),              # enc_wo
        pl.BlockSpec((3 * L, 1, DP), lambda b: (0, 0, 0)),           # dec_ln
        pl.BlockSpec((3 * L * H, DP, Dk), lambda b: (0, 0, 0)),      # dec_sqkv
        pl.BlockSpec((L * H, Dk, DP), lambda b: (0, 0, 0)),          # dec_so
        pl.BlockSpec((3 * L * H, DP, Dk), lambda b: (0, 0, 0)),      # dec_cqkv
        pl.BlockSpec((L * H, Dk, DP), lambda b: (0, 0, 0)),          # dec_co
        pl.BlockSpec((L, DP, FP), lambda b: (0, 0, 0)),              # dec_wi
        pl.BlockSpec((L, FP, DP), lambda b: (0, 0, 0)),              # dec_wo
        pl.BlockSpec((2, 1, DP), lambda b: (0, 0, 0)),               # final_ln
        pl.BlockSpec((DP, VP), lambda b: (0, 0)),                    # lm_head
    ]

    logits_p = pl.pallas_call(
        _t5_kernel,
        out_shape=jax.ShapeDtypeStruct((B, Sd, VP), jnp.float32),
        grid=(B,),
        in_specs=in_specs,
        out_specs=pl.BlockSpec((1, Sd, VP), lambda b: (b, 0, 0)),
        compiler_params=pltpu.CompilerParams(
            dimension_semantics=("parallel",)),
    )(x0, y0, enc_bias, dec_bias,
      pp['enc_ln'], pp['enc_qkv'], pp['enc_ao'], pp['enc_wi'], pp['enc_wo'],
      pp['dec_ln'], pp['dec_sqkv'], pp['dec_so'], pp['dec_cqkv'], pp['dec_co'],
      pp['dec_wi'], pp['dec_wo'], pp['final_ln'], pp['lm_head'])

    return logits_p[:, :, :CFG['vocab']]


# ----------------------------- parameter init / packing ----------------------

def init_params(key):
    V, D, Dk, H, F, L, NB = (CFG['vocab'], CFG['d_model'], CFG['d_kv'],
                             CFG['n_heads'], CFG['d_ff'], CFG['n_layers'],
                             CFG['num_buckets'])
    inner = H * Dk
    keys = iter(jax.random.split(key, 256))

    def nrm(shape, scale=0.1):
        return (scale * jax.random.normal(next(keys), shape)).astype(jnp.float32)

    def attn_params():
        return dict(q=nrm((D, inner)), k=nrm((D, inner)),
                    v=nrm((D, inner)), o=nrm((inner, D)))

    enc_layers = [dict(ln1=jnp.ones((D,), jnp.float32),
                       attn=attn_params(),
                       ln2=jnp.ones((D,), jnp.float32),
                       wi=nrm((D, F)), wo=nrm((F, D)))
                  for _ in range(L)]
    dec_layers = [dict(ln1=jnp.ones((D,), jnp.float32),
                       self_attn=attn_params(),
                       ln2=jnp.ones((D,), jnp.float32),
                       cross_attn=attn_params(),
                       ln3=jnp.ones((D,), jnp.float32),
                       wi=nrm((D, F)), wo=nrm((F, D)))
                  for _ in range(L)]
    # TODO(synk): pretrained t5-small weights / SentencePiece tokenizer and the
    # requires_grad-freezing logic (training-only) are not reproducible here.
    return dict(shared=nrm((V, D), 1.0),
                enc_rel=nrm((NB, H)),
                dec_rel=nrm((NB, H)),
                enc_layers=enc_layers,
                dec_layers=dec_layers,
                enc_final_ln=jnp.ones((D,), jnp.float32),
                dec_final_ln=jnp.ones((D,), jnp.float32))


def pack_params(p):
    """One-time padding/stacking so every kernel block is 128-lane dense."""
    V, D, Dk, H = CFG['vocab'], CFG['d_model'], CFG['d_kv'], CFG['n_heads']

    def pad2(a, r, c):
        return jnp.zeros((r, c), jnp.float32).at[:a.shape[0], :a.shape[1]].set(a)

    def pack_qkv(attn_list):                      # (L*3*H, DP, Dk)
        mats = []
        for ap in attn_list:
            for w in (ap['q'], ap['k'], ap['v']):
                for hd in range(H):
                    mats.append(pad2(w[:, hd * Dk:(hd + 1) * Dk], DP, Dk))
        return jnp.stack(mats)

    def pack_o(attn_list):                        # (L*H, Dk, DP)
        mats = []
        for ap in attn_list:
            for hd in range(H):
                mats.append(pad2(ap['o'][hd * Dk:(hd + 1) * Dk, :], Dk, DP))
        return jnp.stack(mats)

    def pack_ln(vecs):                            # (n, 1, DP)
        return jnp.stack([pad2(v.reshape(1, -1), 1, DP) for v in vecs])

    enc, dec = p['enc_layers'], p['dec_layers']
    return dict(
        emb=pad2(p['shared'], V, DP),                              # (V, DP)
        lm_head=pad2(p['shared'].T * (D ** -0.5), DP, VP),         # scale folded
        enc_rel=p['enc_rel'], dec_rel=p['dec_rel'],
        enc_ln=pack_ln([w for lp in enc for w in (lp['ln1'], lp['ln2'])]),
        enc_qkv=pack_qkv([lp['attn'] for lp in enc]),
        enc_ao=pack_o([lp['attn'] for lp in enc]),
        enc_wi=jnp.stack([pad2(lp['wi'], DP, FP) for lp in enc]),
        enc_wo=jnp.stack([pad2(lp['wo'], FP, DP) for lp in enc]),
        dec_ln=pack_ln([w for lp in dec
                        for w in (lp['ln1'], lp['ln2'], lp['ln3'])]),
        dec_sqkv=pack_qkv([lp['self_attn'] for lp in dec]),
        dec_so=pack_o([lp['self_attn'] for lp in dec]),
        dec_cqkv=pack_qkv([lp['cross_attn'] for lp in dec]),
        dec_co=pack_o([lp['cross_attn'] for lp in dec]),
        dec_wi=jnp.stack([pad2(lp['wi'], DP, FP) for lp in dec]),
        dec_wo=jnp.stack([pad2(lp['wo'], FP, DP) for lp in dec]),
        final_ln=pack_ln([p['enc_final_ln'], p['dec_final_ln']]),
    )


# ----------------------------------- main ------------------------------------

if __name__ == "__main__":
    key = jax.random.PRNGKey(0)
    pkey, ikey, dkey = jax.random.split(key, 3)
    params = init_params(pkey)
    packed = pack_params(params)

    B, Se, Sd = 2, 8, 8
    input_ids = jax.random.randint(ikey, (B, Se), 0, CFG['vocab'], jnp.int32)
    decoder_input_ids = jax.random.randint(dkey, (B, Sd), 0, CFG['vocab'],
                                           jnp.int32)

    logits = jax.jit(t5_forward)(packed, input_ids, decoder_input_ids)
    jax.block_until_ready(logits)
    assert logits.shape == (B, Sd, CFG['vocab'])
    assert bool(jnp.all(jnp.isfinite(logits)))
    print("KERNEL_OK")
</pallas_src>

<mosaic_0001>
module attributes {stable_mosaic.version = 11 : i64} {
  func.func @_t5_kernel(%arg0: i32, %arg1: memref<1x8x128xf32, #tpu.memory_space<vmem>>, %arg2: memref<1x8x128xf32, #tpu.memory_space<vmem>>, %arg3: memref<4x8x8xf32, #tpu.memory_space<vmem>>, %arg4: memref<4x8x8xf32, #tpu.memory_space<vmem>>, %arg5: memref<4x1x128xf32, #tpu.memory_space<vmem>>, %arg6: memref<24x128x8xf32, #tpu.memory_space<vmem>>, %arg7: memref<8x8x128xf32, #tpu.memory_space<vmem>>, %arg8: memref<2x128x128xf32, #tpu.memory_space<vmem>>, %arg9: memref<2x128x128xf32, #tpu.memory_space<vmem>>, %arg10: memref<6x1x128xf32, #tpu.memory_space<vmem>>, %arg11: memref<24x128x8xf32, #tpu.memory_space<vmem>>, %arg12: memref<8x8x128xf32, #tpu.memory_space<vmem>>, %arg13: memref<24x128x8xf32, #tpu.memory_space<vmem>>, %arg14: memref<8x8x128xf32, #tpu.memory_space<vmem>>, %arg15: memref<2x128x128xf32, #tpu.memory_space<vmem>>, %arg16: memref<2x128x128xf32, #tpu.memory_space<vmem>>, %arg17: memref<2x1x128xf32, #tpu.memory_space<vmem>>, %arg18: memref<128x128xf32, #tpu.memory_space<vmem>>, %arg19: memref<1x8x128xf32, #tpu.memory_space<vmem>>) attributes {dimension_semantics = [#tpu.dimension_semantics<parallel>], iteration_bounds = array<i64: 2>, scalar_prefetch = 0 : i64, scratch_operands = 0 : i64, tpu.core_type = #tpu.core_type<tc>, window_params = [{transform_indices = @transform_0, window_bounds = array<i64: 1, 8, 128>}, {transform_indices = @transform_1, window_bounds = array<i64: 1, 8, 128>}, {pipeline_mode = #tpu.pipeline_mode<synchronous>, transform_indices = @transform_2, window_bounds = array<i64: 4, 8, 8>}, {pipeline_mode = #tpu.pipeline_mode<synchronous>, transform_indices = @transform_3, window_bounds = array<i64: 4, 8, 8>}, {pipeline_mode = #tpu.pipeline_mode<synchronous>, transform_indices = @transform_4, window_bounds = array<i64: 4, 1, 128>}, {pipeline_mode = #tpu.pipeline_mode<synchronous>, transform_indices = @transform_5, window_bounds = array<i64: 24, 128, 8>}, {pipeline_mode = #tpu.pipeline_mode<synchronous>, transform_indices = @transform_6, window_bounds = array<i64: 8, 8, 128>}, {pipeline_mode = #tpu.pipeline_mode<synchronous>, transform_indices = @transform_7, window_bounds = array<i64: 2, 128, 128>}, {pipeline_mode = #tpu.pipeline_mode<synchronous>, transform_indices = @transform_8, window_bounds = array<i64: 2, 128, 128>}, {pipeline_mode = #tpu.pipeline_mode<synchronous>, transform_indices = @transform_9, window_bounds = array<i64: 6, 1, 128>}, {pipeline_mode = #tpu.pipeline_mode<synchronous>, transform_indices = @transform_10, window_bounds = array<i64: 24, 128, 8>}, {pipeline_mode = #tpu.pipeline_mode<synchronous>, transform_indices = @transform_11, window_bounds = array<i64: 8, 8, 128>}, {pipeline_mode = #tpu.pipeline_mode<synchronous>, transform_indices = @transform_12, window_bounds = array<i64: 24, 128, 8>}, {pipeline_mode = #tpu.pipeline_mode<synchronous>, transform_indices = @transform_13, window_bounds = array<i64: 8, 8, 128>}, {pipeline_mode = #tpu.pipeline_mode<synchronous>, transform_indices = @transform_14, window_bounds = array<i64: 2, 128, 128>}, {pipeline_mode = #tpu.pipeline_mode<synchronous>, transform_indices = @transform_15, window_bounds = array<i64: 2, 128, 128>}, {pipeline_mode = #tpu.pipeline_mode<synchronous>, transform_indices = @transform_16, window_bounds = array<i64: 2, 1, 128>}, {pipeline_mode = #tpu.pipeline_mode<synchronous>, transform_indices = @transform_17, window_bounds = array<i64: 128, 128>}, {transform_indices = @transform_18, window_bounds = array<i64: 1, 8, 128>}]} {
    %c0 = arith.constant 0 : index
    %c0_0 = arith.constant 0 : index
    %c0_1 = arith.constant 0 : index
    %0 = vector.load %arg1[%c0, %c0_0, %c0_1] : memref<1x8x128xf32, #tpu.memory_space<vmem>>, vector<1x8x128xf32>
    %1 = vector.shape_cast %0 : vector<1x8x128xf32> to vector<8x128xf32>
    %c0_2 = arith.constant 0 : index
    %c0_3 = arith.constant 0 : index
    %c0_4 = arith.constant 0 : index
    %2 = vector.load %arg5[%c0_2, %c0_3, %c0_4] : memref<4x1x128xf32, #tpu.memory_space<vmem>>, vector<1x1x128xf32>
    %3 = vector.shape_cast %2 : vector<1x1x128xf32> to vector<1x128xf32>
    %4 = arith.mulf %1, %1 : vector<8x128xf32>
    %cst = arith.constant dense<0.000000e+00> : vector<8xf32>
    %5 = vector.multi_reduction <add>, %4, %cst [1] : vector<8x128xf32> to vector<8xf32>
    %6 = vector.shape_cast %5 : vector<8xf32> to vector<8x1xf32>
    %cst_5 = arith.constant 3.125000e-02 : f32
    %7 = vector.broadcast %cst_5 : f32 to vector<8x1xf32>
    %8 = arith.mulf %6, %7 : vector<8x1xf32>
    %cst_6 = arith.constant 9.99999997E-7 : f32
    %9 = vector.broadcast %cst_6 : f32 to vector<8x1xf32>
    %10 = arith.addf %8, %9 : vector<8x1xf32>
    %11 = math.rsqrt %10 : vector<8x1xf32>
    %12 = vector.broadcast %11 : vector<8x1xf32> to vector<8x128xf32>
    %13 = arith.mulf %1, %12 : vector<8x128xf32>
    %14 = vector.broadcast %3 : vector<1x128xf32> to vector<8x128xf32>
    %15 = arith.mulf %13, %14 : vector<8x128xf32>
    %c0_7 = arith.constant 0 : index
    %c0_8 = arith.constant 0 : index
    %c0_9 = arith.constant 0 : index
    %16 = vector.load %arg6[%c0_7, %c0_8, %c0_9] : memref<24x128x8xf32, #tpu.memory_space<vmem>>, vector<1x128x8xf32>
    %17 = vector.shape_cast %16 : vector<1x128x8xf32> to vector<128x8xf32>
    %cst_10 = arith.constant dense<0.000000e+00> : vector<8x8xf32>
    %18 = tpu.matmul %15, %17, %cst_10 {dimension_numbers = #tpu.dot_dimension_numbers<[1], [0], [0], [1], [0, 0, 1, 1], [], []>} : vector<8x128xf32>, vector<128x8xf32>, vector<8x8xf32> -> vector<8x8xf32>
    %c4 = arith.constant 4 : index
    %c0_11 = arith.constant 0 : index
    %c0_12 = arith.constant 0 : index
    %19 = vector.load %arg6[%c4, %c0_11, %c0_12] : memref<24x128x8xf32, #tpu.memory_space<vmem>>, vector<1x128x8xf32>
    %20 = vector.shape_cast %19 : vector<1x128x8xf32> to vector<128x8xf32>
    %cst_13 = arith.constant dense<0.000000e+00> : vector<8x8xf32>
    %21 = tpu.matmul %15, %20, %cst_13 {dimension_numbers = #tpu.dot_dimension_numbers<[1], [0], [0], [1], [0, 0, 1, 1], [], []>} : vector<8x128xf32>, vector<128x8xf32>, vector<8x8xf32> -> vector<8x8xf32>
    %c8 = arith.constant 8 : index
    %c0_14 = arith.constant 0 : index
    %c0_15 = arith.constant 0 : index
    %22 = vector.load %arg6[%c8, %c0_14, %c0_15] : memref<24x128x8xf32, #tpu.memory_space<vmem>>, vector<1x128x8xf32>
    %23 = vector.shape_cast %22 : vector<1x128x8xf32> to vector<128x8xf32>
    %cst_16 = arith.constant dense<0.000000e+00> : vector<8x8xf32>
    %24 = tpu.matmul %15, %23, %cst_16 {dimension_numbers = #tpu.dot_dimension_numbers<[1], [0], [0], [1], [0, 0, 1, 1], [], []>} : vector<8x128xf32>, vector<128x8xf32>, vector<8x8xf32> -> vector<8x8xf32>
    %cst_17 = arith.constant dense<0.000000e+00> : vector<8x8xf32>
    %25 = tpu.matmul %18, %21, %cst_17 {dimension_numbers = #tpu.dot_dimension_numbers<[1], [1], [0], [0], [0, 0, 1, 0], [], []>} : vector<8x8xf32>, vector<8x8xf32>, vector<8x8xf32> -> vector<8x8xf32>
    %c0_18 = arith.constant 0 : index
    %c0_19 = arith.constant 0 : index
    %c0_20 = arith.constant 0 : index
    %26 = vector.load %arg3[%c0_18, %c0_19, %c0_20] : memref<4x8x8xf32, #tpu.memory_space<vmem>>, vector<1x8x8xf32>
    %27 = vector.shape_cast %26 : vector<1x8x8xf32> to vector<8x8xf32>
    %28 = arith.addf %25, %27 : vector<8x8xf32>
    %cst_21 = arith.constant dense<0xFF800000> : vector<8xf32>
    %29 = vector.multi_reduction <maximumf>, %28, %cst_21 [1] : vector<8x8xf32> to vector<8xf32>
    %30 = vector.shape_cast %29 : vector<8xf32> to vector<8x1xf32>
    %31 = vector.broadcast %30 : vector<8x1xf32> to vector<8x8xf32>
    %32 = arith.subf %28, %31 : vector<8x8xf32>
    %33 = math.exp %32 : vector<8x8xf32>
    %cst_22 = arith.constant dense<0.000000e+00> : vector<8xf32>
    %34 = vector.multi_reduction <add>, %33, %cst_22 [1] : vector<8x8xf32> to vector<8xf32>
    %35 = vector.shape_cast %34 : vector<8xf32> to vector<8x1xf32>
    %36 = tpu.reciprocal %35 {approx = true} : vector<8x1xf32> -> vector<8x1xf32>
    %37 = vector.broadcast %36 : vector<8x1xf32> to vector<8x8xf32>
    %38 = arith.mulf %33, %37 : vector<8x8xf32>
    %cst_23 = arith.constant dense<0.000000e+00> : vector<8x8xf32>
    %39 = tpu.matmul %38, %24, %cst_23 {dimension_numbers = #tpu.dot_dimension_numbers<[1], [0], [0], [1], [0, 0, 1, 1], [], []>} : vector<8x8xf32>, vector<8x8xf32>, vector<8x8xf32> -> vector<8x8xf32>
    %c0_24 = arith.constant 0 : index
    %c0_25 = arith.constant 0 : index
    %c0_26 = arith.constant 0 : index
    %40 = vector.load %arg7[%c0_24, %c0_25, %c0_26] : memref<8x8x128xf32, #tpu.memory_space<vmem>>, vector<1x8x128xf32>
    %41 = vector.shape_cast %40 : vector<1x8x128xf32> to vector<8x128xf32>
    %cst_27 = arith.constant dense<0.000000e+00> : vector<8x128xf32>
    %42 = tpu.matmul %39, %41, %cst_27 {dimension_numbers = #tpu.dot_dimension_numbers<[1], [0], [0], [1], [0, 0, 1, 1], [], []>} : vector<8x8xf32>, vector<8x128xf32>, vector<8x128xf32> -> vector<8x128xf32>
    %c1 = arith.constant 1 : index
    %c0_28 = arith.constant 0 : index
    %c0_29 = arith.constant 0 : index
    %43 = vector.load %arg6[%c1, %c0_28, %c0_29] : memref<24x128x8xf32, #tpu.memory_space<vmem>>, vector<1x128x8xf32>
    %44 = vector.shape_cast %43 : vector<1x128x8xf32> to vector<128x8xf32>
    %cst_30 = arith.constant dense<0.000000e+00> : vector<8x8xf32>
    %45 = tpu.matmul %15, %44, %cst_30 {dimension_numbers = #tpu.dot_dimension_numbers<[1], [0], [0], [1], [0, 0, 1, 1], [], []>} : vector<8x128xf32>, vector<128x8xf32>, vector<8x8xf32> -> vector<8x8xf32>
    %c5 = arith.constant 5 : index
    %c0_31 = arith.constant 0 : index
    %c0_32 = arith.constant 0 : index
    %46 = vector.load %arg6[%c5, %c0_31, %c0_32] : memref<24x128x8xf32, #tpu.memory_space<vmem>>, vector<1x128x8xf32>
    %47 = vector.shape_cast %46 : vector<1x128x8xf32> to vector<128x8xf32>
    %cst_33 = arith.constant dense<0.000000e+00> : vector<8x8xf32>
    %48 = tpu.matmul %15, %47, %cst_33 {dimension_numbers = #tpu.dot_dimension_numbers<[1], [0], [0], [1], [0, 0, 1, 1], [], []>} : vector<8x128xf32>, vector<128x8xf32>, vector<8x8xf32> -> vector<8x8xf32>
    %c9 = arith.constant 9 : index
    %c0_34 = arith.constant 0 : index
    %c0_35 = arith.constant 0 : index
    %49 = vector.load %arg6[%c9, %c0_34, %c0_35] : memref<24x128x8xf32, #tpu.memory_space<vmem>>, vector<1x128x8xf32>
    %50 = vector.shape_cast %49 : vector<1x128x8xf32> to vector<128x8xf32>
    %cst_36 = arith.constant dense<0.000000e+00> : vector<8x8xf32>
    %51 = tpu.matmul %15, %50, %cst_36 {dimension_numbers = #tpu.dot_dimension_numbers<[1], [0], [0], [1], [0, 0, 1, 1], [], []>} : vector<8x128xf32>, vector<128x8xf32>, vector<8x8xf32> -> vector<8x8xf32>
    %cst_37 = arith.constant dense<0.000000e+00> : vector<8x8xf32>
    %52 = tpu.matmul %45, %48, %cst_37 {dimension_numbers = #tpu.dot_dimension_numbers<[1], [1], [0], [0], [0, 0, 1, 0], [], []>} : vector<8x8xf32>, vector<8x8xf32>, vector<8x8xf32> -> vector<8x8xf32>
    %c1_38 = arith.constant 1 : index
    %c0_39 = arith.constant 0 : index
    %c0_40 = arith.constant 0 : index
    %53 = vector.load %arg3[%c1_38, %c0_39, %c0_40] : memref<4x8x8xf32, #tpu.memory_space<vmem>>, vector<1x8x8xf32>
    %54 = vector.shape_cast %53 : vector<1x8x8xf32> to vector<8x8xf32>
    %55 = arith.addf %52, %54 : vector<8x8xf32>
    %cst_41 = arith.constant dense<0xFF800000> : vector<8xf32>
    %56 = vector.multi_reduction <maximumf>, %55, %cst_41 [1] : vector<8x8xf32> to vector<8xf32>
    %57 = vector.shape_cast %56 : vector<8xf32> to vector<8x1xf32>
    %58 = vector.broadcast %57 : vector<8x1xf32> to vector<8x8xf32>
    %59 = arith.subf %55, %58 : vector<8x8xf32>
    %60 = math.exp %59 : vector<8x8xf32>
    %cst_42 = arith.constant dense<0.000000e+00> : vector<8xf32>
    %61 = vector.multi_reduction <add>, %60, %cst_42 [1] : vector<8x8xf32> to vector<8xf32>
    %62 = vector.shape_cast %61 : vector<8xf32> to vector<8x1xf32>
    %63 = tpu.reciprocal %62 {approx = true} : vector<8x1xf32> -> vector<8x1xf32>
    %64 = vector.broadcast %63 : vector<8x1xf32> to vector<8x8xf32>
    %65 = arith.mulf %60, %64 : vector<8x8xf32>
    %cst_43 = arith.constant dense<0.000000e+00> : vector<8x8xf32>
    %66 = tpu.matmul %65, %51, %cst_43 {dimension_numbers = #tpu.dot_dimension_numbers<[1], [0], [0], [1], [0, 0, 1, 1], [], []>} : vector<8x8xf32>, vector<8x8xf32>, vector<8x8xf32> -> vector<8x8xf32>
    %c1_44 = arith.constant 1 : index
    %c0_45 = arith.constant 0 : index
    %c0_46 = arith.constant 0 : index
    %67 = vector.load %arg7[%c1_44, %c0_45, %c0_46] : memref<8x8x128xf32, #tpu.memory_space<vmem>>, vector<1x8x128xf32>
    %68 = vector.shape_cast %67 : vector<1x8x128xf32> to vector<8x128xf32>
    %cst_47 = arith.constant dense<0.000000e+00> : vector<8x128xf32>
    %69 = tpu.matmul %66, %68, %cst_47 {dimension_numbers = #tpu.dot_dimension_numbers<[1], [0], [0], [1], [0, 0, 1, 1], [], []>} : vector<8x8xf32>, vector<8x128xf32>, vector<8x128xf32> -> vector<8x128xf32>
    %70 = arith.addf %42, %69 : vector<8x128xf32>
    %c2 = arith.constant 2 : index
    %c0_48 = arith.constant 0 : index
    %c0_49 = arith.constant 0 : index
    %71 = vector.load %arg6[%c2, %c0_48, %c0_49] : memref<24x128x8xf32, #tpu.memory_space<vmem>>, vector<1x128x8xf32>
    %72 = vector.shape_cast %71 : vector<1x128x8xf32> to vector<128x8xf32>
    %cst_50 = arith.constant dense<0.000000e+00> : vector<8x8xf32>
    %73 = tpu.matmul %15, %72, %cst_50 {dimension_numbers = #tpu.dot_dimension_numbers<[1], [0], [0], [1], [0, 0, 1, 1], [], []>} : vector<8x128xf32>, vector<128x8xf32>, vector<8x8xf32> -> vector<8x8xf32>
    %c6 = arith.constant 6 : index
    %c0_51 = arith.constant 0 : index
    %c0_52 = arith.constant 0 : index
    %74 = vector.load %arg6[%c6, %c0_51, %c0_52] : memref<24x128x8xf32, #tpu.memory_space<vmem>>, vector<1x128x8xf32>
    %75 = vector.shape_cast %74 : vector<1x128x8xf32> to vector<128x8xf32>
    %cst_53 = arith.constant dense<0.000000e+00> : vector<8x8xf32>
    %76 = tpu.matmul %15, %75, %cst_53 {dimension_numbers = #tpu.dot_dimension_numbers<[1], [0], [0], [1], [0, 0, 1, 1], [], []>} : vector<8x128xf32>, vector<128x8xf32>, vector<8x8xf32> -> vector<8x8xf32>
    %c10 = arith.constant 10 : index
    %c0_54 = arith.constant 0 : index
    %c0_55 = arith.constant 0 : index
    %77 = vector.load %arg6[%c10, %c0_54, %c0_55] : memref<24x128x8xf32, #tpu.memory_space<vmem>>, vector<1x128x8xf32>
    %78 = vector.shape_cast %77 : vector<1x128x8xf32> to vector<128x8xf32>
    %cst_56 = arith.constant dense<0.000000e+00> : vector<8x8xf32>
    %79 = tpu.matmul %15, %78, %cst_56 {dimension_numbers = #tpu.dot_dimension_numbers<[1], [0], [0], [1], [0, 0, 1, 1], [], []>} : vector<8x128xf32>, vector<128x8xf32>, vector<8x8xf32> -> vector<8x8xf32>
    %cst_57 = arith.constant dense<0.000000e+00> : vector<8x8xf32>
    %80 = tpu.matmul %73, %76, %cst_57 {dimension_numbers = #tpu.dot_dimension_numbers<[1], [1], [0], [0], [0, 0, 1, 0], [], []>} : vector<8x8xf32>, vector<8x8xf32>, vector<8x8xf32> -> vector<8x8xf32>
    %c2_58 = arith.constant 2 : index
    %c0_59 = arith.constant 0 : index
    %c0_60 = arith.constant 0 : index
    %81 = vector.load %arg3[%c2_58, %c0_59, %c0_60] : memref<4x8x8xf32, #tpu.memory_space<vmem>>, vector<1x8x8xf32>
    %82 = vector.shape_cast %81 : vector<1x8x8xf32> to vector<8x8xf32>
    %83 = arith.addf %80, %82 : vector<8x8xf32>
    %cst_61 = arith.constant dense<0xFF800000> : vector<8xf32>
    %84 = vector.multi_reduction <maximumf>, %83, %cst_61 [1] : vector<8x8xf32> to vector<8xf32>
    %85 = vector.shape_cast %84 : vector<8xf32> to vector<8x1xf32>
    %86 = vector.broadcast %85 : vector<8x1xf32> to vector<8x8xf32>
    %87 = arith.subf %83, %86 : vector<8x8xf32>
    %88 = math.exp %87 : vector<8x8xf32>
    %cst_62 = arith.constant dense<0.000000e+00> : vector<8xf32>
    %89 = vector.multi_reduction <add>, %88, %cst_62 [1] : vector<8x8xf32> to vector<8xf32>
    %90 = vector.shape_cast %89 : vector<8xf32> to vector<8x1xf32>
    %91 = tpu.reciprocal %90 {approx = true} : vector<8x1xf32> -> vector<8x1xf32>
    %92 = vector.broadcast %91 : vector<8x1xf32> to vector<8x8xf32>
    %93 = arith.mulf %88, %92 : vector<8x8xf32>
    %cst_63 = arith.constant dense<0.000000e+00> : vector<8x8xf32>
    %94 = tpu.matmul %93, %79, %cst_63 {dimension_numbers = #tpu.dot_dimension_numbers<[1], [0], [0], [1], [0, 0, 1, 1], [], []>} : vector<8x8xf32>, vector<8x8xf32>, vector<8x8xf32> -> vector<8x8xf32>
    %c2_64 = arith.constant 2 : index
    %c0_65 = arith.constant 0 : index
    %c0_66 = arith.constant 0 : index
    %95 = vector.load %arg7[%c2_64, %c0_65, %c0_66] : memref<8x8x128xf32, #tpu.memory_space<vmem>>, vector<1x8x128xf32>
    %96 = vector.shape_cast %95 : vector<1x8x128xf32> to vector<8x128xf32>
    %cst_67 = arith.constant dense<0.000000e+00> : vector<8x128xf32>
    %97 = tpu.matmul %94, %96, %cst_67 {dimension_numbers = #tpu.dot_dimension_numbers<[1], [0], [0], [1], [0, 0, 1, 1], [], []>} : vector<8x8xf32>, vector<8x128xf32>, vector<8x128xf32> -> vector<8x128xf32>
    %98 = arith.addf %70, %97 : vector<8x128xf32>
    %c3 = arith.constant 3 : index
    %c0_68 = arith.constant 0 : index
    %c0_69 = arith.constant 0 : index
    %99 = vector.load %arg6[%c3, %c0_68, %c0_69] : memref<24x128x8xf32, #tpu.memory_space<vmem>>, vector<1x128x8xf32>
    %100 = vector.shape_cast %99 : vector<1x128x8xf32> to vector<128x8xf32>
    %cst_70 = arith.constant dense<0.000000e+00> : vector<8x8xf32>
    %101 = tpu.matmul %15, %100, %cst_70 {dimension_numbers = #tpu.dot_dimension_numbers<[1], [0], [0], [1], [0, 0, 1, 1], [], []>} : vector<8x128xf32>, vector<128x8xf32>, vector<8x8xf32> -> vector<8x8xf32>
    %c7 = arith.constant 7 : index
    %c0_71 = arith.constant 0 : index
    %c0_72 = arith.constant 0 : index
    %102 = vector.load %arg6[%c7, %c0_71, %c0_72] : memref<24x128x8xf32, #tpu.memory_space<vmem>>, vector<1x128x8xf32>
    %103 = vector.shape_cast %102 : vector<1x128x8xf32> to vector<128x8xf32>
    %cst_73 = arith.constant dense<0.000000e+00> : vector<8x8xf32>
    %104 = tpu.matmul %15, %103, %cst_73 {dimension_numbers = #tpu.dot_dimension_numbers<[1], [0], [0], [1], [0, 0, 1, 1], [], []>} : vector<8x128xf32>, vector<128x8xf32>, vector<8x8xf32> -> vector<8x8xf32>
    %c11 = arith.constant 11 : index
    %c0_74 = arith.constant 0 : index
    %c0_75 = arith.constant 0 : index
    %105 = vector.load %arg6[%c11, %c0_74, %c0_75] : memref<24x128x8xf32, #tpu.memory_space<vmem>>, vector<1x128x8xf32>
    %106 = vector.shape_cast %105 : vector<1x128x8xf32> to vector<128x8xf32>
    %cst_76 = arith.constant dense<0.000000e+00> : vector<8x8xf32>
    %107 = tpu.matmul %15, %106, %cst_76 {dimension_numbers = #tpu.dot_dimension_numbers<[1], [0], [0], [1], [0, 0, 1, 1], [], []>} : vector<8x128xf32>, vector<128x8xf32>, vector<8x8xf32> -> vector<8x8xf32>
    %cst_77 = arith.constant dense<0.000000e+00> : vector<8x8xf32>
    %108 = tpu.matmul %101, %104, %cst_77 {dimension_numbers = #tpu.dot_dimension_numbers<[1], [1], [0], [0], [0, 0, 1, 0], [], []>} : vector<8x8xf32>, vector<8x8xf32>, vector<8x8xf32> -> vector<8x8xf32>
    %c3_78 = arith.constant 3 : index
    %c0_79 = arith.constant 0 : index
    %c0_80 = arith.constant 0 : index
    %109 = vector.load %arg3[%c3_78, %c0_79, %c0_80] : memref<4x8x8xf32, #tpu.memory_space<vmem>>, vector<1x8x8xf32>
    %110 = vector.shape_cast %109 : vector<1x8x8xf32> to vector<8x8xf32>
    %111 = arith.addf %108, %110 : vector<8x8xf32>
    %cst_81 = arith.constant dense<0xFF800000> : vector<8xf32>
    %112 = vector.multi_reduction <maximumf>, %111, %cst_81 [1] : vector<8x8xf32> to vector<8xf32>
    %113 = vector.shape_cast %112 : vector<8xf32> to vector<8x1xf32>
    %114 = vector.broadcast %113 : vector<8x1xf32> to vector<8x8xf32>
    %115 = arith.subf %111, %114 : vector<8x8xf32>
    %116 = math.exp %115 : vector<8x8xf32>
    %cst_82 = arith.constant dense<0.000000e+00> : vector<8xf32>
    %117 = vector.multi_reduction <add>, %116, %cst_82 [1] : vector<8x8xf32> to vector<8xf32>
    %118 = vector.shape_cast %117 : vector<8xf32> to vector<8x1xf32>
    %119 = tpu.reciprocal %118 {approx = true} : vector<8x1xf32> -> vector<8x1xf32>
    %120 = vector.broadcast %119 : vector<8x1xf32> to vector<8x8xf32>
    %121 = arith.mulf %116, %120 : vector<8x8xf32>
    %cst_83 = arith.constant dense<0.000000e+00> : vector<8x8xf32>
    %122 = tpu.matmul %121, %107, %cst_83 {dimension_numbers = #tpu.dot_dimension_numbers<[1], [0], [0], [1], [0, 0, 1, 1], [], []>} : vector<8x8xf32>, vector<8x8xf32>, vector<8x8xf32> -> vector<8x8xf32>
    %c3_84 = arith.constant 3 : index
    %c0_85 = arith.constant 0 : index
    %c0_86 = arith.constant 0 : index
    %123 = vector.load %arg7[%c3_84, %c0_85, %c0_86] : memref<8x8x128xf32, #tpu.memory_space<vmem>>, vector<1x8x128xf32>
    %124 = vector.shape_cast %123 : vector<1x8x128xf32> to vector<8x128xf32>
    %cst_87 = arith.constant dense<0.000000e+00> : vector<8x128xf32>
    %125 = tpu.matmul %122, %124, %cst_87 {dimension_numbers = #tpu.dot_dimension_numbers<[1], [0], [0], [1], [0, 0, 1, 1], [], []>} : vector<8x8xf32>, vector<8x128xf32>, vector<8x128xf32> -> vector<8x128xf32>
    %126 = arith.addf %98, %125 : vector<8x128xf32>
    %127 = arith.addf %1, %126 : vector<8x128xf32>
    %c1_88 = arith.constant 1 : index
    %c0_89 = arith.constant 0 : index
    %c0_90 = arith.constant 0 : index
    %128 = vector.load %arg5[%c1_88, %c0_89, %c0_90] : memref<4x1x128xf32, #tpu.memory_space<vmem>>, vector<1x1x128xf32>
    %129 = vector.shape_cast %128 : vector<1x1x128xf32> to vector<1x128xf32>
    %130 = arith.mulf %127, %127 : vector<8x128xf32>
    %cst_91 = arith.constant dense<0.000000e+00> : vector<8xf32>
    %131 = vector.multi_reduction <add>, %130, %cst_91 [1] : vector<8x128xf32> to vector<8xf32>
    %132 = vector.shape_cast %131 : vector<8xf32> to vector<8x1xf32>
    %cst_92 = arith.constant 3.125000e-02 : f32
    %133 = vector.broadcast %cst_92 : f32 to vector<8x1xf32>
    %134 = arith.mulf %132, %133 : vector<8x1xf32>
    %cst_93 = arith.constant 9.99999997E-7 : f32
    %135 = vector.broadcast %cst_93 : f32 to vector<8x1xf32>
    %136 = arith.addf %134, %135 : vector<8x1xf32>
    %137 = math.rsqrt %136 : vector<8x1xf32>
    %138 = vector.broadcast %137 : vector<8x1xf32> to vector<8x128xf32>
    %139 = arith.mulf %127, %138 : vector<8x128xf32>
    %140 = vector.broadcast %129 : vector<1x128xf32> to vector<8x128xf32>
    %141 = arith.mulf %139, %140 : vector<8x128xf32>
    %c0_94 = arith.constant 0 : index
    %c0_95 = arith.constant 0 : index
    %c0_96 = arith.constant 0 : index
    %142 = vector.load %arg8[%c0_94, %c0_95, %c0_96] : memref<2x128x128xf32, #tpu.memory_space<vmem>>, vector<1x128x128xf32>
    %143 = vector.shape_cast %142 : vector<1x128x128xf32> to vector<128x128xf32>
    %cst_97 = arith.constant dense<0.000000e+00> : vector<8x128xf32>
    %144 = tpu.matmul %141, %143, %cst_97 {dimension_numbers = #tpu.dot_dimension_numbers<[1], [0], [0], [1], [0, 0, 1, 1], [], []>} : vector<8x128xf32>, vector<128x128xf32>, vector<8x128xf32> -> vector<8x128xf32>
    %cst_98 = arith.constant 0.000000e+00 : f32
    %145 = vector.broadcast %cst_98 : f32 to vector<8x128xf32>
    %146 = arith.maximumf %144, %145 : vector<8x128xf32>
    %c0_99 = arith.constant 0 : index
    %c0_100 = arith.constant 0 : index
    %c0_101 = arith.constant 0 : index
    %147 = vector.load %arg9[%c0_99, %c0_100, %c0_101] : memref<2x128x128xf32, #tpu.memory_space<vmem>>, vector<1x128x128xf32>
    %148 = vector.shape_cast %147 : vector<1x128x128xf32> to vector<128x128xf32>
    %cst_102 = arith.constant dense<0.000000e+00> : vector<8x128xf32>
    %149 = tpu.matmul %146, %148, %cst_102 {dimension_numbers = #tpu.dot_dimension_numbers<[1], [0], [0], [1], [0, 0, 1, 1], [], []>} : vector<8x128xf32>, vector<128x128xf32>, vector<8x128xf32> -> vector<8x128xf32>
    %150 = arith.addf %127, %149 : vector<8x128xf32>
    %c2_103 = arith.constant 2 : index
    %c0_104 = arith.constant 0 : index
    %c0_105 = arith.constant 0 : index
    %151 = vector.load %arg5[%c2_103, %c0_104, %c0_105] : memref<4x1x128xf32, #tpu.memory_space<vmem>>, vector<1x1x128xf32>
    %152 = vector.shape_cast %151 : vector<1x1x128xf32> to vector<1x128xf32>
    %153 = arith.mulf %150, %150 : vector<8x128xf32>
    %cst_106 = arith.constant dense<0.000000e+00> : vector<8xf32>
    %154 = vector.multi_reduction <add>, %153, %cst_106 [1] : vector<8x128xf32> to vector<8xf32>
    %155 = vector.shape_cast %154 : vector<8xf32> to vector<8x1xf32>
    %cst_107 = arith.constant 3.125000e-02 : f32
    %156 = vector.broadcast %cst_107 : f32 to vector<8x1xf32>
    %157 = arith.mulf %155, %156 : vector<8x1xf32>
    %cst_108 = arith.constant 9.99999997E-7 : f32
    %158 = vector.broadcast %cst_108 : f32 to vector<8x1xf32>
    %159 = arith.addf %157, %158 : vector<8x1xf32>
    %160 = math.rsqrt %159 : vector<8x1xf32>
    %161 = vector.broadcast %160 : vector<8x1xf32> to vector<8x128xf32>
    %162 = arith.mulf %150, %161 : vector<8x128xf32>
    %163 = vector.broadcast %152 : vector<1x128xf32> to vector<8x128xf32>
    %164 = arith.mulf %162, %163 : vector<8x128xf32>
    %c12 = arith.constant 12 : index
    %c0_109 = arith.constant 0 : index
    %c0_110 = arith.constant 0 : index
    %165 = vector.load %arg6[%c12, %c0_109, %c0_110] : memref<24x128x8xf32, #tpu.memory_space<vmem>>, vector<1x128x8xf32>
    %166 = vector.shape_cast %165 : vector<1x128x8xf32> to vector<128x8xf32>
    %cst_111 = arith.constant dense<0.000000e+00> : vector<8x8xf32>
    %167 = tpu.matmul %164, %166, %cst_111 {dimension_numbers = #tpu.dot_dimension_numbers<[1], [0], [0], [1], [0, 0, 1, 1], [], []>} : vector<8x128xf32>, vector<128x8xf32>, vector<8x8xf32> -> vector<8x8xf32>
    %c16 = arith.constant 16 : index
    %c0_112 = arith.constant 0 : index
    %c0_113 = arith.constant 0 : index
    %168 = vector.load %arg6[%c16, %c0_112, %c0_113] : memref<24x128x8xf32, #tpu.memory_space<vmem>>, vector<1x128x8xf32>
    %169 = vector.shape_cast %168 : vector<1x128x8xf32> to vector<128x8xf32>
    %cst_114 = arith.constant dense<0.000000e+00> : vector<8x8xf32>
    %170 = tpu.matmul %164, %169, %cst_114 {dimension_numbers = #tpu.dot_dimension_numbers<[1], [0], [0], [1], [0, 0, 1, 1], [], []>} : vector<8x128xf32>, vector<128x8xf32>, vector<8x8xf32> -> vector<8x8xf32>
    %c20 = arith.constant 20 : index
    %c0_115 = arith.constant 0 : index
    %c0_116 = arith.constant 0 : index
    %171 = vector.load %arg6[%c20, %c0_115, %c0_116] : memref<24x128x8xf32, #tpu.memory_space<vmem>>, vector<1x128x8xf32>
    %172 = vector.shape_cast %171 : vector<1x128x8xf32> to vector<128x8xf32>
    %cst_117 = arith.constant dense<0.000000e+00> : vector<8x8xf32>
    %173 = tpu.matmul %164, %172, %cst_117 {dimension_numbers = #tpu.dot_dimension_numbers<[1], [0], [0], [1], [0, 0, 1, 1], [], []>} : vector<8x128xf32>, vector<128x8xf32>, vector<8x8xf32> -> vector<8x8xf32>
    %cst_118 = arith.constant dense<0.000000e+00> : vector<8x8xf32>
    %174 = tpu.matmul %167, %170, %cst_118 {dimension_numbers = #tpu.dot_dimension_numbers<[1], [1], [0], [0], [0, 0, 1, 0], [], []>} : vector<8x8xf32>, vector<8x8xf32>, vector<8x8xf32> -> vector<8x8xf32>
    %c0_119 = arith.constant 0 : index
    %c0_120 = arith.constant 0 : index
    %c0_121 = arith.constant 0 : index
    %175 = vector.load %arg3[%c0_119, %c0_120, %c0_121] : memref<4x8x8xf32, #tpu.memory_space<vmem>>, vector<1x8x8xf32>
    %176 = vector.shape_cast %175 : vector<1x8x8xf32> to vector<8x8xf32>
    %177 = arith.addf %174, %176 : vector<8x8xf32>
    %cst_122 = arith.constant dense<0xFF800000> : vector<8xf32>
    %178 = vector.multi_reduction <maximumf>, %177, %cst_122 [1] : vector<8x8xf32> to vector<8xf32>
    %179 = vector.shape_cast %178 : vector<8xf32> to vector<8x1xf32>
    %180 = vector.broadcast %179 : vector<8x1xf32> to vector<8x8xf32>
    %181 = arith.subf %177, %180 : vector<8x8xf32>
    %182 = math.exp %181 : vector<8x8xf32>
    %cst_123 = arith.constant dense<0.000000e+00> : vector<8xf32>
    %183 = vector.multi_reduction <add>, %182, %cst_123 [1] : vector<8x8xf32> to vector<8xf32>
    %184 = vector.shape_cast %183 : vector<8xf32> to vector<8x1xf32>
    %185 = tpu.reciprocal %184 {approx = true} : vector<8x1xf32> -> vector<8x1xf32>
    %186 = vector.broadcast %185 : vector<8x1xf32> to vector<8x8xf32>
    %187 = arith.mulf %182, %186 : vector<8x8xf32>
    %cst_124 = arith.constant dense<0.000000e+00> : vector<8x8xf32>
    %188 = tpu.matmul %187, %173, %cst_124 {dimension_numbers = #tpu.dot_dimension_numbers<[1], [0], [0], [1], [0, 0, 1, 1], [], []>} : vector<8x8xf32>, vector<8x8xf32>, vector<8x8xf32> -> vector<8x8xf32>
    %c4_125 = arith.constant 4 : index
    %c0_126 = arith.constant 0 : index
    %c0_127 = arith.constant 0 : index
    %189 = vector.load %arg7[%c4_125, %c0_126, %c0_127] : memref<8x8x128xf32, #tpu.memory_space<vmem>>, vector<1x8x128xf32>
    %190 = vector.shape_cast %189 : vector<1x8x128xf32> to vector<8x128xf32>
    %cst_128 = arith.constant dense<0.000000e+00> : vector<8x128xf32>
    %191 = tpu.matmul %188, %190, %cst_128 {dimension_numbers = #tpu.dot_dimension_numbers<[1], [0], [0], [1], [0, 0, 1, 1], [], []>} : vector<8x8xf32>, vector<8x128xf32>, vector<8x128xf32> -> vector<8x128xf32>
    %c13 = arith.constant 13 : index
    %c0_129 = arith.constant 0 : index
    %c0_130 = arith.constant 0 : index
    %192 = vector.load %arg6[%c13, %c0_129, %c0_130] : memref<24x128x8xf32, #tpu.memory_space<vmem>>, vector<1x128x8xf32>
    %193 = vector.shape_cast %192 : vector<1x128x8xf32> to vector<128x8xf32>
    %cst_131 = arith.constant dense<0.000000e+00> : vector<8x8xf32>
    %194 = tpu.matmul %164, %193, %cst_131 {dimension_numbers = #tpu.dot_dimension_numbers<[1], [0], [0], [1], [0, 0, 1, 1], [], []>} : vector<8x128xf32>, vector<128x8xf32>, vector<8x8xf32> -> vector<8x8xf32>
    %c17 = arith.constant 17 : index
    %c0_132 = arith.constant 0 : index
    %c0_133 = arith.constant 0 : index
    %195 = vector.load %arg6[%c17, %c0_132, %c0_133] : memref<24x128x8xf32, #tpu.memory_space<vmem>>, vector<1x128x8xf32>
    %196 = vector.shape_cast %195 : vector<1x128x8xf32> to vector<128x8xf32>
    %cst_134 = arith.constant dense<0.000000e+00> : vector<8x8xf32>
    %197 = tpu.matmul %164, %196, %cst_134 {dimension_numbers = #tpu.dot_dimension_numbers<[1], [0], [0], [1], [0, 0, 1, 1], [], []>} : vector<8x128xf32>, vector<128x8xf32>, vector<8x8xf32> -> vector<8x8xf32>
    %c21 = arith.constant 21 : index
    %c0_135 = arith.constant 0 : index
    %c0_136 = arith.constant 0 : index
    %198 = vector.load %arg6[%c21, %c0_135, %c0_136] : memref<24x128x8xf32, #tpu.memory_space<vmem>>, vector<1x128x8xf32>
    %199 = vector.shape_cast %198 : vector<1x128x8xf32> to vector<128x8xf32>
    %cst_137 = arith.constant dense<0.000000e+00> : vector<8x8xf32>
    %200 = tpu.matmul %164, %199, %cst_137 {dimension_numbers = #tpu.dot_dimension_numbers<[1], [0], [0], [1], [0, 0, 1, 1], [], []>} : vector<8x128xf32>, vector<128x8xf32>, vector<8x8xf32> -> vector<8x8xf32>
    %cst_138 = arith.constant dense<0.000000e+00> : vector<8x8xf32>
    %201 = tpu.matmul %194, %197, %cst_138 {dimension_numbers = #tpu.dot_dimension_numbers<[1], [1], [0], [0], [0, 0, 1, 0], [], []>} : vector<8x8xf32>, vector<8x8xf32>, vector<8x8xf32> -> vector<8x8xf32>
    %c1_139 = arith.constant 1 : index
    %c0_140 = arith.constant 0 : index
    %c0_141 = arith.constant 0 : index
    %202 = vector.load %arg3[%c1_139, %c0_140, %c0_141] : memref<4x8x8xf32, #tpu.memory_space<vmem>>, vector<1x8x8xf32>
    %203 = vector.shape_cast %202 : vector<1x8x8xf32> to vector<8x8xf32>
    %204 = arith.addf %201, %203 : vector<8x8xf32>
    %cst_142 = arith.constant dense<0xFF800000> : vector<8xf32>
    %205 = vector.multi_reduction <maximumf>, %204, %cst_142 [1] : vector<8x8xf32> to vector<8xf32>
    %206 = vector.shape_cast %205 : vector<8xf32> to vector<8x1xf32>
    %207 = vector.broadcast %206 : vector<8x1xf32> to vector<8x8xf32>
    %208 = arith.subf %204, %207 : vector<8x8xf32>
    %209 = math.exp %208 : vector<8x8xf32>
    %cst_143 = arith.constant dense<0.000000e+00> : vector<8xf32>
    %210 = vector.multi_reduction <add>, %209, %cst_143 [1] : vector<8x8xf32> to vector<8xf32>
    %211 = vector.shape_cast %210 : vector<8xf32> to vector<8x1xf32>
    %212 = tpu.reciprocal %211 {approx = true} : vector<8x1xf32> -> vector<8x1xf32>
    %213 = vector.broadcast %212 : vector<8x1xf32> to vector<8x8xf32>
    %214 = arith.mulf %209, %213 : vector<8x8xf32>
    %cst_144 = arith.constant dense<0.000000e+00> : vector<8x8xf32>
    %215 = tpu.matmul %214, %200, %cst_144 {dimension_numbers = #tpu.dot_dimension_numbers<[1], [0], [0], [1], [0, 0, 1, 1], [], []>} : vector<8x8xf32>, vector<8x8xf32>, vector<8x8xf32> -> vector<8x8xf32>
    %c5_145 = arith.constant 5 : index
    %c0_146 = arith.constant 0 : index
    %c0_147 = arith.constant 0 : index
    %216 = vector.load %arg7[%c5_145, %c0_146, %c0_147] : memref<8x8x128xf32, #tpu.memory_space<vmem>>, vector<1x8x128xf32>
    %217 = vector.shape_cast %216 : vector<1x8x128xf32> to vector<8x128xf32>
    %cst_148 = arith.constant dense<0.000000e+00> : vector<8x128xf32>
    %218 = tpu.matmul %215, %217, %cst_148 {dimension_numbers = #tpu.dot_dimension_numbers<[1], [0], [0], [1], [0, 0, 1, 1], [], []>} : vector<8x8xf32>, vector<8x128xf32>, vector<8x128xf32> -> vector<8x128xf32>
    %219 = arith.addf %191, %218 : vector<8x128xf32>
    %c14 = arith.constant 14 : index
    %c0_149 = arith.constant 0 : index
    %c0_150 = arith.constant 0 : index
    %220 = vector.load %arg6[%c14, %c0_149, %c0_150] : memref<24x128x8xf32, #tpu.memory_space<vmem>>, vector<1x128x8xf32>
    %221 = vector.shape_cast %220 : vector<1x128x8xf32> to vector<128x8xf32>
    %cst_151 = arith.constant dense<0.000000e+00> : vector<8x8xf32>
    %222 = tpu.matmul %164, %221, %cst_151 {dimension_numbers = #tpu.dot_dimension_numbers<[1], [0], [0], [1], [0, 0, 1, 1], [], []>} : vector<8x128xf32>, vector<128x8xf32>, vector<8x8xf32> -> vector<8x8xf32>
    %c18 = arith.constant 18 : index
    %c0_152 = arith.constant 0 : index
    %c0_153 = arith.constant 0 : index
    %223 = vector.load %arg6[%c18, %c0_152, %c0_153] : memref<24x128x8xf32, #tpu.memory_space<vmem>>, vector<1x128x8xf32>
    %224 = vector.shape_cast %223 : vector<1x128x8xf32> to vector<128x8xf32>
    %cst_154 = arith.constant dense<0.000000e+00> : vector<8x8xf32>
    %225 = tpu.matmul %164, %224, %cst_154 {dimension_numbers = #tpu.dot_dimension_numbers<[1], [0], [0], [1], [0, 0, 1, 1], [], []>} : vector<8x128xf32>, vector<128x8xf32>, vector<8x8xf32> -> vector<8x8xf32>
    %c22 = arith.constant 22 : index
    %c0_155 = arith.constant 0 : index
    %c0_156 = arith.constant 0 : index
    %226 = vector.load %arg6[%c22, %c0_155, %c0_156] : memref<24x128x8xf32, #tpu.memory_space<vmem>>, vector<1x128x8xf32>
    %227 = vector.shape_cast %226 : vector<1x128x8xf32> to vector<128x8xf32>
    %cst_157 = arith.constant dense<0.000000e+00> : vector<8x8xf32>
    %228 = tpu.matmul %164, %227, %cst_157 {dimension_numbers = #tpu.dot_dimension_numbers<[1], [0], [0], [1], [0, 0, 1, 1], [], []>} : vector<8x128xf32>, vector<128x8xf32>, vector<8x8xf32> -> vector<8x8xf32>
    %cst_158 = arith.constant dense<0.000000e+00> : vector<8x8xf32>
    %229 = tpu.matmul %222, %225, %cst_158 {dimension_numbers = #tpu.dot_dimension_numbers<[1], [1], [0], [0], [0, 0, 1, 0], [], []>} : vector<8x8xf32>, vector<8x8xf32>, vector<8x8xf32> -> vector<8x8xf32>
    %c2_159 = arith.constant 2 : index
    %c0_160 = arith.constant 0 : index
    %c0_161 = arith.constant 0 : index
    %230 = vector.load %arg3[%c2_159, %c0_160, %c0_161] : memref<4x8x8xf32, #tpu.memory_space<vmem>>, vector<1x8x8xf32>
    %231 = vector.shape_cast %230 : vector<1x8x8xf32> to vector<8x8xf32>
    %232 = arith.addf %229, %231 : vector<8x8xf32>
    %cst_162 = arith.constant dense<0xFF800000> : vector<8xf32>
    %233 = vector.multi_reduction <maximumf>, %232, %cst_162 [1] : vector<8x8xf32> to vector<8xf32>
    %234 = vector.shape_cast %233 : vector<8xf32> to vector<8x1xf32>
    %235 = vector.broadcast %234 : vector<8x1xf32> to vector<8x8xf32>
    %236 = arith.subf %232, %235 : vector<8x8xf32>
    %237 = math.exp %236 : vector<8x8xf32>
    %cst_163 = arith.constant dense<0.000000e+00> : vector<8xf32>
    %238 = vector.multi_reduction <add>, %237, %cst_163 [1] : vector<8x8xf32> to vector<8xf32>
    %239 = vector.shape_cast %238 : vector<8xf32> to vector<8x1xf32>
    %240 = tpu.reciprocal %239 {approx = true} : vector<8x1xf32> -> vector<8x1xf32>
    %241 = vector.broadcast %240 : vector<8x1xf32> to vector<8x8xf32>
    %242 = arith.mulf %237, %241 : vector<8x8xf32>
    %cst_164 = arith.constant dense<0.000000e+00> : vector<8x8xf32>
    %243 = tpu.matmul %242, %228, %cst_164 {dimension_numbers = #tpu.dot_dimension_numbers<[1], [0], [0], [1], [0, 0, 1, 1], [], []>} : vector<8x8xf32>, vector<8x8xf32>, vector<8x8xf32> -> vector<8x8xf32>
    %c6_165 = arith.constant 6 : index
    %c0_166 = arith.constant 0 : index
    %c0_167 = arith.constant 0 : index
    %244 = vector.load %arg7[%c6_165, %c0_166, %c0_167] : memref<8x8x128xf32, #tpu.memory_space<vmem>>, vector<1x8x128xf32>
    %245 = vector.shape_cast %244 : vector<1x8x128xf32> to vector<8x128xf32>
    %cst_168 = arith.constant dense<0.000000e+00> : vector<8x128xf32>
    %246 = tpu.matmul %243, %245, %cst_168 {dimension_numbers = #tpu.dot_dimension_numbers<[1], [0], [0], [1], [0, 0, 1, 1], [], []>} : vector<8x8xf32>, vector<8x128xf32>, vector<8x128xf32> -> vector<8x128xf32>
    %247 = arith.addf %219, %246 : vector<8x128xf32>
    %c15 = arith.constant 15 : index
    %c0_169 = arith.constant 0 : index
    %c0_170 = arith.constant 0 : index
    %248 = vector.load %arg6[%c15, %c0_169, %c0_170] : memref<24x128x8xf32, #tpu.memory_space<vmem>>, vector<1x128x8xf32>
    %249 = vector.shape_cast %248 : vector<1x128x8xf32> to vector<128x8xf32>
    %cst_171 = arith.constant dense<0.000000e+00> : vector<8x8xf32>
    %250 = tpu.matmul %164, %249, %cst_171 {dimension_numbers = #tpu.dot_dimension_numbers<[1], [0], [0], [1], [0, 0, 1, 1], [], []>} : vector<8x128xf32>, vector<128x8xf32>, vector<8x8xf32> -> vector<8x8xf32>
    %c19 = arith.constant 19 : index
    %c0_172 = arith.constant 0 : index
    %c0_173 = arith.constant 0 : index
    %251 = vector.load %arg6[%c19, %c0_172, %c0_173] : memref<24x128x8xf32, #tpu.memory_space<vmem>>, vector<1x128x8xf32>
    %252 = vector.shape_cast %251 : vector<1x128x8xf32> to vector<128x8xf32>
    %cst_174 = arith.constant dense<0.000000e+00> : vector<8x8xf32>
    %253 = tpu.matmul %164, %252, %cst_174 {dimension_numbers = #tpu.dot_dimension_numbers<[1], [0], [0], [1], [0, 0, 1, 1], [], []>} : vector<8x128xf32>, vector<128x8xf32>, vector<8x8xf32> -> vector<8x8xf32>
    %c23 = arith.constant 23 : index
    %c0_175 = arith.constant 0 : index
    %c0_176 = arith.constant 0 : index
    %254 = vector.load %arg6[%c23, %c0_175, %c0_176] : memref<24x128x8xf32, #tpu.memory_space<vmem>>, vector<1x128x8xf32>
    %255 = vector.shape_cast %254 : vector<1x128x8xf32> to vector<128x8xf32>
    %cst_177 = arith.constant dense<0.000000e+00> : vector<8x8xf32>
    %256 = tpu.matmul %164, %255, %cst_177 {dimension_numbers = #tpu.dot_dimension_numbers<[1], [0], [0], [1], [0, 0, 1, 1], [], []>} : vector<8x128xf32>, vector<128x8xf32>, vector<8x8xf32> -> vector<8x8xf32>
    %cst_178 = arith.constant dense<0.000000e+00> : vector<8x8xf32>
    %257 = tpu.matmul %250, %253, %cst_178 {dimension_numbers = #tpu.dot_dimension_numbers<[1], [1], [0], [0], [0, 0, 1, 0], [], []>} : vector<8x8xf32>, vector<8x8xf32>, vector<8x8xf32> -> vector<8x8xf32>
    %c3_179 = arith.constant 3 : index
    %c0_180 = arith.constant 0 : index
    %c0_181 = arith.constant 0 : index
    %258 = vector.load %arg3[%c3_179, %c0_180, %c0_181] : memref<4x8x8xf32, #tpu.memory_space<vmem>>, vector<1x8x8xf32>
    %259 = vector.shape_cast %258 : vector<1x8x8xf32> to vector<8x8xf32>
    %260 = arith.addf %257, %259 : vector<8x8xf32>
    %cst_182 = arith.constant dense<0xFF800000> : vector<8xf32>
    %261 = vector.multi_reduction <maximumf>, %260, %cst_182 [1] : vector<8x8xf32> to vector<8xf32>
    %262 = vector.shape_cast %261 : vector<8xf32> to vector<8x1xf32>
    %263 = vector.broadcast %262 : vector<8x1xf32> to vector<8x8xf32>
    %264 = arith.subf %260, %263 : vector<8x8xf32>
    %265 = math.exp %264 : vector<8x8xf32>
    %cst_183 = arith.constant dense<0.000000e+00> : vector<8xf32>
    %266 = vector.multi_reduction <add>, %265, %cst_183 [1] : vector<8x8xf32> to vector<8xf32>
    %267 = vector.shape_cast %266 : vector<8xf32> to vector<8x1xf32>
    %268 = tpu.reciprocal %267 {approx = true} : vector<8x1xf32> -> vector<8x1xf32>
    %269 = vector.broadcast %268 : vector<8x1xf32> to vector<8x8xf32>
    %270 = arith.mulf %265, %269 : vector<8x8xf32>
    %cst_184 = arith.constant dense<0.000000e+00> : vector<8x8xf32>
    %271 = tpu.matmul %270, %256, %cst_184 {dimension_numbers = #tpu.dot_dimension_numbers<[1], [0], [0], [1], [0, 0, 1, 1], [], []>} : vector<8x8xf32>, vector<8x8xf32>, vector<8x8xf32> -> vector<8x8xf32>
    %c7_185 = arith.constant 7 : index
    %c0_186 = arith.constant 0 : index
    %c0_187 = arith.constant 0 : index
    %272 = vector.load %arg7[%c7_185, %c0_186, %c0_187] : memref<8x8x128xf32, #tpu.memory_space<vmem>>, vector<1x8x128xf32>
    %273 = vector.shape_cast %272 : vector<1x8x128xf32> to vector<8x128xf32>
    %cst_188 = arith.constant dense<0.000000e+00> : vector<8x128xf32>
    %274 = tpu.matmul %271, %273, %cst_188 {dimension_numbers = #tpu.dot_dimension_numbers<[1], [0], [0], [1], [0, 0, 1, 1], [], []>} : vector<8x8xf32>, vector<8x128xf32>, vector<8x128xf32> -> vector<8x128xf32>
    %275 = arith.addf %247, %274 : vector<8x128xf32>
    %276 = arith.addf %150, %275 : vector<8x128xf32>
    %c3_189 = arith.constant 3 : index
    %c0_190 = arith.constant 0 : index
    %c0_191 = arith.constant 0 : index
    %277 = vector.load %arg5[%c3_189, %c0_190, %c0_191] : memref<4x1x128xf32, #tpu.memory_space<vmem>>, vector<1x1x128xf32>
    %278 = vector.shape_cast %277 : vector<1x1x128xf32> to vector<1x128xf32>
    %279 = arith.mulf %276, %276 : vector<8x128xf32>
    %cst_192 = arith.constant dense<0.000000e+00> : vector<8xf32>
    %280 = vector.multi_reduction <add>, %279, %cst_192 [1] : vector<8x128xf32> to vector<8xf32>
    %281 = vector.shape_cast %280 : vector<8xf32> to vector<8x1xf32>
    %cst_193 = arith.constant 3.125000e-02 : f32
    %282 = vector.broadcast %cst_193 : f32 to vector<8x1xf32>
    %283 = arith.mulf %281, %282 : vector<8x1xf32>
    %cst_194 = arith.constant 9.99999997E-7 : f32
    %284 = vector.broadcast %cst_194 : f32 to vector<8x1xf32>
    %285 = arith.addf %283, %284 : vector<8x1xf32>
    %286 = math.rsqrt %285 : vector<8x1xf32>
    %287 = vector.broadcast %286 : vector<8x1xf32> to vector<8x128xf32>
    %288 = arith.mulf %276, %287 : vector<8x128xf32>
    %289 = vector.broadcast %278 : vector<1x128xf32> to vector<8x128xf32>
    %290 = arith.mulf %288, %289 : vector<8x128xf32>
    %c1_195 = arith.constant 1 : index
    %c0_196 = arith.constant 0 : index
    %c0_197 = arith.constant 0 : index
    %291 = vector.load %arg8[%c1_195, %c0_196, %c0_197] : memref<2x128x128xf32, #tpu.memory_space<vmem>>, vector<1x128x128xf32>
    %292 = vector.shape_cast %291 : vector<1x128x128xf32> to vector<128x128xf32>
    %cst_198 = arith.constant dense<0.000000e+00> : vector<8x128xf32>
    %293 = tpu.matmul %290, %292, %cst_198 {dimension_numbers = #tpu.dot_dimension_numbers<[1], [0], [0], [1], [0, 0, 1, 1], [], []>} : vector<8x128xf32>, vector<128x128xf32>, vector<8x128xf32> -> vector<8x128xf32>
    %cst_199 = arith.constant 0.000000e+00 : f32
    %294 = vector.broadcast %cst_199 : f32 to vector<8x128xf32>
    %295 = arith.maximumf %293, %294 : vector<8x128xf32>
    %c1_200 = arith.constant 1 : index
    %c0_201 = arith.constant 0 : index
    %c0_202 = arith.constant 0 : index
    %296 = vector.load %arg9[%c1_200, %c0_201, %c0_202] : memref<2x128x128xf32, #tpu.memory_space<vmem>>, vector<1x128x128xf32>
    %297 = vector.shape_cast %296 : vector<1x128x128xf32> to vector<128x128xf32>
    %cst_203 = arith.constant dense<0.000000e+00> : vector<8x128xf32>
    %298 = tpu.matmul %295, %297, %cst_203 {dimension_numbers = #tpu.dot_dimension_numbers<[1], [0], [0], [1], [0, 0, 1, 1], [], []>} : vector<8x128xf32>, vector<128x128xf32>, vector<8x128xf32> -> vector<8x128xf32>
    %299 = arith.addf %276, %298 : vector<8x128xf32>
    %c0_204 = arith.constant 0 : index
    %c0_205 = arith.constant 0 : index
    %c0_206 = arith.constant 0 : index
    %300 = vector.load %arg17[%c0_204, %c0_205, %c0_206] : memref<2x1x128xf32, #tpu.memory_space<vmem>>, vector<1x1x128xf32>
    %301 = vector.shape_cast %300 : vector<1x1x128xf32> to vector<1x128xf32>
    %302 = arith.mulf %299, %299 : vector<8x128xf32>
    %cst_207 = arith.constant dense<0.000000e+00> : vector<8xf32>
    %303 = vector.multi_reduction <add>, %302, %cst_207 [1] : vector<8x128xf32> to vector<8xf32>
    %304 = vector.shape_cast %303 : vector<8xf32> to vector<8x1xf32>
    %cst_208 = arith.constant 3.125000e-02 : f32
    %305 = vector.broadcast %cst_208 : f32 to vector<8x1xf32>
    %306 = arith.mulf %304, %305 : vector<8x1xf32>
    %cst_209 = arith.constant 9.99999997E-7 : f32
    %307 = vector.broadcast %cst_209 : f32 to vector<8x1xf32>
    %308 = arith.addf %306, %307 : vector<8x1xf32>
    %309 = math.rsqrt %308 : vector<8x1xf32>
    %310 = vector.broadcast %309 : vector<8x1xf32> to vector<8x128xf32>
    %311 = arith.mulf %299, %310 : vector<8x128xf32>
    %312 = vector.broadcast %301 : vector<1x128xf32> to vector<8x128xf32>
    %313 = arith.mulf %311, %312 : vector<8x128xf32>
    %c0_210 = arith.constant 0 : index
    %c0_211 = arith.constant 0 : index
    %c0_212 = arith.constant 0 : index
    %314 = vector.load %arg2[%c0_210, %c0_211, %c0_212] : memref<1x8x128xf32, #tpu.memory_space<vmem>>, vector<1x8x128xf32>
    %315 = vector.shape_cast %314 : vector<1x8x128xf32> to vector<8x128xf32>
    %c0_213 = arith.constant 0 : index
    %c0_214 = arith.constant 0 : index
    %c0_215 = arith.constant 0 : index
    %316 = vector.load %arg10[%c0_213, %c0_214, %c0_215] : memref<6x1x128xf32, #tpu.memory_space<vmem>>, vector<1x1x128xf32>
    %317 = vector.shape_cast %316 : vector<1x1x128xf32> to vector<1x128xf32>
    %318 = arith.mulf %315, %315 : vector<8x128xf32>
    %cst_216 = arith.constant dense<0.000000e+00> : vector<8xf32>
    %319 = vector.multi_reduction <add>, %318, %cst_216 [1] : vector<8x128xf32> to vector<8xf32>
    %320 = vector.shape_cast %319 : vector<8xf32> to vector<8x1xf32>
    %cst_217 = arith.constant 3.125000e-02 : f32
    %321 = vector.broadcast %cst_217 : f32 to vector<8x1xf32>
    %322 = arith.mulf %320, %321 : vector<8x1xf32>
    %cst_218 = arith.constant 9.99999997E-7 : f32
    %323 = vector.broadcast %cst_218 : f32 to vector<8x1xf32>
    %324 = arith.addf %322, %323 : vector<8x1xf32>
    %325 = math.rsqrt %324 : vector<8x1xf32>
    %326 = vector.broadcast %325 : vector<8x1xf32> to vector<8x128xf32>
    %327 = arith.mulf %315, %326 : vector<8x128xf32>
    %328 = vector.broadcast %317 : vector<1x128xf32> to vector<8x128xf32>
    %329 = arith.mulf %327, %328 : vector<8x128xf32>
    %c0_219 = arith.constant 0 : index
    %c0_220 = arith.constant 0 : index
    %c0_221 = arith.constant 0 : index
    %330 = vector.load %arg11[%c0_219, %c0_220, %c0_221] : memref<24x128x8xf32, #tpu.memory_space<vmem>>, vector<1x128x8xf32>
    %331 = vector.shape_cast %330 : vector<1x128x8xf32> to vector<128x8xf32>
    %cst_222 = arith.constant dense<0.000000e+00> : vector<8x8xf32>
    %332 = tpu.matmul %329, %331, %cst_222 {dimension_numbers = #tpu.dot_dimension_numbers<[1], [0], [0], [1], [0, 0, 1, 1], [], []>} : vector<8x128xf32>, vector<128x8xf32>, vector<8x8xf32> -> vector<8x8xf32>
    %c4_223 = arith.constant 4 : index
    %c0_224 = arith.constant 0 : index
    %c0_225 = arith.constant 0 : index
    %333 = vector.load %arg11[%c4_223, %c0_224, %c0_225] : memref<24x128x8xf32, #tpu.memory_space<vmem>>, vector<1x128x8xf32>
    %334 = vector.shape_cast %333 : vector<1x128x8xf32> to vector<128x8xf32>
    %cst_226 = arith.constant dense<0.000000e+00> : vector<8x8xf32>
    %335 = tpu.matmul %329, %334, %cst_226 {dimension_numbers = #tpu.dot_dimension_numbers<[1], [0], [0], [1], [0, 0, 1, 1], [], []>} : vector<8x128xf32>, vector<128x8xf32>, vector<8x8xf32> -> vector<8x8xf32>
    %c8_227 = arith.constant 8 : index
    %c0_228 = arith.constant 0 : index
    %c0_229 = arith.constant 0 : index
    %336 = vector.load %arg11[%c8_227, %c0_228, %c0_229] : memref<24x128x8xf32, #tpu.memory_space<vmem>>, vector<1x128x8xf32>
    %337 = vector.shape_cast %336 : vector<1x128x8xf32> to vector<128x8xf32>
    %cst_230 = arith.constant dense<0.000000e+00> : vector<8x8xf32>
    %338 = tpu.matmul %329, %337, %cst_230 {dimension_numbers = #tpu.dot_dimension_numbers<[1], [0], [0], [1], [0, 0, 1, 1], [], []>} : vector<8x128xf32>, vector<128x8xf32>, vector<8x8xf32> -> vector<8x8xf32>
    %cst_231 = arith.constant dense<0.000000e+00> : vector<8x8xf32>
    %339 = tpu.matmul %332, %335, %cst_231 {dimension_numbers = #tpu.dot_dimension_numbers<[1], [1], [0], [0], [0, 0, 1, 0], [], []>} : vector<8x8xf32>, vector<8x8xf32>, vector<8x8xf32> -> vector<8x8xf32>
    %c0_232 = arith.constant 0 : index
    %c0_233 = arith.constant 0 : index
    %c0_234 = arith.constant 0 : index
    %340 = vector.load %arg4[%c0_232, %c0_233, %c0_234] : memref<4x8x8xf32, #tpu.memory_space<vmem>>, vector<1x8x8xf32>
    %341 = vector.shape_cast %340 : vector<1x8x8xf32> to vector<8x8xf32>
    %342 = arith.addf %339, %341 : vector<8x8xf32>
    %cst_235 = arith.constant dense<0xFF800000> : vector<8xf32>
    %343 = vector.multi_reduction <maximumf>, %342, %cst_235 [1] : vector<8x8xf32> to vector<8xf32>
    %344 = vector.shape_cast %343 : vector<8xf32> to vector<8x1xf32>
    %345 = vector.broadcast %344 : vector<8x1xf32> to vector<8x8xf32>
    %346 = arith.subf %342, %345 : vector<8x8xf32>
    %347 = math.exp %346 : vector<8x8xf32>
    %cst_236 = arith.constant dense<0.000000e+00> : vector<8xf32>
    %348 = vector.multi_reduction <add>, %347, %cst_236 [1] : vector<8x8xf32> to vector<8xf32>
    %349 = vector.shape_cast %348 : vector<8xf32> to vector<8x1xf32>
    %350 = tpu.reciprocal %349 {approx = true} : vector<8x1xf32> -> vector<8x1xf32>
    %351 = vector.broadcast %350 : vector<8x1xf32> to vector<8x8xf32>
    %352 = arith.mulf %347, %351 : vector<8x8xf32>
    %cst_237 = arith.constant dense<0.000000e+00> : vector<8x8xf32>
    %353 = tpu.matmul %352, %338, %cst_237 {dimension_numbers = #tpu.dot_dimension_numbers<[1], [0], [0], [1], [0, 0, 1, 1], [], []>} : vector<8x8xf32>, vector<8x8xf32>, vector<8x8xf32> -> vector<8x8xf32>
    %c0_238 = arith.constant 0 : index
    %c0_239 = arith.constant 0 : index
    %c0_240 = arith.constant 0 : index
    %354 = vector.load %arg12[%c0_238, %c0_239, %c0_240] : memref<8x8x128xf32, #tpu.memory_space<vmem>>, vector<1x8x128xf32>
    %355 = vector.shape_cast %354 : vector<1x8x128xf32> to vector<8x128xf32>
    %cst_241 = arith.constant dense<0.000000e+00> : vector<8x128xf32>
    %356 = tpu.matmul %353, %355, %cst_241 {dimension_numbers = #tpu.dot_dimension_numbers<[1], [0], [0], [1], [0, 0, 1, 1], [], []>} : vector<8x8xf32>, vector<8x128xf32>, vector<8x128xf32> -> vector<8x128xf32>
    %c1_242 = arith.constant 1 : index
    %c0_243 = arith.constant 0 : index
    %c0_244 = arith.constant 0 : index
    %357 = vector.load %arg11[%c1_242, %c0_243, %c0_244] : memref<24x128x8xf32, #tpu.memory_space<vmem>>, vector<1x128x8xf32>
    %358 = vector.shape_cast %357 : vector<1x128x8xf32> to vector<128x8xf32>
    %cst_245 = arith.constant dense<0.000000e+00> : vector<8x8xf32>
    %359 = tpu.matmul %329, %358, %cst_245 {dimension_numbers = #tpu.dot_dimension_numbers<[1], [0], [0], [1], [0, 0, 1, 1], [], []>} : vector<8x128xf32>, vector<128x8xf32>, vector<8x8xf32> -> vector<8x8xf32>
    %c5_246 = arith.constant 5 : index
    %c0_247 = arith.constant 0 : index
    %c0_248 = arith.constant 0 : index
    %360 = vector.load %arg11[%c5_246, %c0_247, %c0_248] : memref<24x128x8xf32, #tpu.memory_space<vmem>>, vector<1x128x8xf32>
    %361 = vector.shape_cast %360 : vector<1x128x8xf32> to vector<128x8xf32>
    %cst_249 = arith.constant dense<0.000000e+00> : vector<8x8xf32>
    %362 = tpu.matmul %329, %361, %cst_249 {dimension_numbers = #tpu.dot_dimension_numbers<[1], [0], [0], [1], [0, 0, 1, 1], [], []>} : vector<8x128xf32>, vector<128x8xf32>, vector<8x8xf32> -> vector<8x8xf32>
    %c9_250 = arith.constant 9 : index
    %c0_251 = arith.constant 0 : index
    %c0_252 = arith.constant 0 : index
    %363 = vector.load %arg11[%c9_250, %c0_251, %c0_252] : memref<24x128x8xf32, #tpu.memory_space<vmem>>, vector<1x128x8xf32>
    %364 = vector.shape_cast %363 : vector<1x128x8xf32> to vector<128x8xf32>
    %cst_253 = arith.constant dense<0.000000e+00> : vector<8x8xf32>
    %365 = tpu.matmul %329, %364, %cst_253 {dimension_numbers = #tpu.dot_dimension_numbers<[1], [0], [0], [1], [0, 0, 1, 1], [], []>} : vector<8x128xf32>, vector<128x8xf32>, vector<8x8xf32> -> vector<8x8xf32>
    %cst_254 = arith.constant dense<0.000000e+00> : vector<8x8xf32>
    %366 = tpu.matmul %359, %362, %cst_254 {dimension_numbers = #tpu.dot_dimension_numbers<[1], [1], [0], [0], [0, 0, 1, 0], [], []>} : vector<8x8xf32>, vector<8x8xf32>, vector<8x8xf32> -> vector<8x8xf32>
    %c1_255 = arith.constant 1 : index
    %c0_256 = arith.constant 0 : index
    %c0_257 = arith.constant 0 : index
    %367 = vector.load %arg4[%c1_255, %c0_256, %c0_257] : memref<4x8x8xf32, #tpu.memory_space<vmem>>, vector<1x8x8xf32>
    %368 = vector.shape_cast %367 : vector<1x8x8xf32> to vector<8x8xf32>
    %369 = arith.addf %366, %368 : vector<8x8xf32>
    %cst_258 = arith.constant dense<0xFF800000> : vector<8xf32>
    %370 = vector.multi_reduction <maximumf>, %369, %cst_258 [1] : vector<8x8xf32> to vector<8xf32>
    %371 = vector.shape_cast %370 : vector<8xf32> to vector<8x1xf32>
    %372 = vector.broadcast %371 : vector<8x1xf32> to vector<8x8xf32>
    %373 = arith.subf %369, %372 : vector<8x8xf32>
    %374 = math.exp %373 : vector<8x8xf32>
    %cst_259 = arith.constant dense<0.000000e+00> : vector<8xf32>
    %375 = vector.multi_reduction <add>, %374, %cst_259 [1] : vector<8x8xf32> to vector<8xf32>
    %376 = vector.shape_cast %375 : vector<8xf32> to vector<8x1xf32>
    %377 = tpu.reciprocal %376 {approx = true} : vector<8x1xf32> -> vector<8x1xf32>
    %378 = vector.broadcast %377 : vector<8x1xf32> to vector<8x8xf32>
    %379 = arith.mulf %374, %378 : vector<8x8xf32>
    %cst_260 = arith.constant dense<0.000000e+00> : vector<8x8xf32>
    %380 = tpu.matmul %379, %365, %cst_260 {dimension_numbers = #tpu.dot_dimension_numbers<[1], [0], [0], [1], [0, 0, 1, 1], [], []>} : vector<8x8xf32>, vector<8x8xf32>, vector<8x8xf32> -> vector<8x8xf32>
    %c1_261 = arith.constant 1 : index
    %c0_262 = arith.constant 0 : index
    %c0_263 = arith.constant 0 : index
    %381 = vector.load %arg12[%c1_261, %c0_262, %c0_263] : memref<8x8x128xf32, #tpu.memory_space<vmem>>, vector<1x8x128xf32>
    %382 = vector.shape_cast %381 : vector<1x8x128xf32> to vector<8x128xf32>
    %cst_264 = arith.constant dense<0.000000e+00> : vector<8x128xf32>
    %383 = tpu.matmul %380, %382, %cst_264 {dimension_numbers = #tpu.dot_dimension_numbers<[1], [0], [0], [1], [0, 0, 1, 1], [], []>} : vector<8x8xf32>, vector<8x128xf32>, vector<8x128xf32> -> vector<8x128xf32>
    %384 = arith.addf %356, %383 : vector<8x128xf32>
    %c2_265 = arith.constant 2 : index
    %c0_266 = arith.constant 0 : index
    %c0_267 = arith.constant 0 : index
    %385 = vector.load %arg11[%c2_265, %c0_266, %c0_267] : memref<24x128x8xf32, #tpu.memory_space<vmem>>, vector<1x128x8xf32>
    %386 = vector.shape_cast %385 : vector<1x128x8xf32> to vector<128x8xf32>
    %cst_268 = arith.constant dense<0.000000e+00> : vector<8x8xf32>
    %387 = tpu.matmul %329, %386, %cst_268 {dimension_numbers = #tpu.dot_dimension_numbers<[1], [0], [0], [1], [0, 0, 1, 1], [], []>} : vector<8x128xf32>, vector<128x8xf32>, vector<8x8xf32> -> vector<8x8xf32>
    %c6_269 = arith.constant 6 : index
    %c0_270 = arith.constant 0 : index
    %c0_271 = arith.constant 0 : index
    %388 = vector.load %arg11[%c6_269, %c0_270, %c0_271] : memref<24x128x8xf32, #tpu.memory_space<vmem>>, vector<1x128x8xf32>
    %389 = vector.shape_cast %388 : vector<1x128x8xf32> to vector<128x8xf32>
    %cst_272 = arith.constant dense<0.000000e+00> : vector<8x8xf32>
    %390 = tpu.matmul %329, %389, %cst_272 {dimension_numbers = #tpu.dot_dimension_numbers<[1], [0], [0], [1], [0, 0, 1, 1], [], []>} : vector<8x128xf32>, vector<128x8xf32>, vector<8x8xf32> -> vector<8x8xf32>
    %c10_273 = arith.constant 10 : index
    %c0_274 = arith.constant 0 : index
    %c0_275 = arith.constant 0 : index
    %391 = vector.load %arg11[%c10_273, %c0_274, %c0_275] : memref<24x128x8xf32, #tpu.memory_space<vmem>>, vector<1x128x8xf32>
    %392 = vector.shape_cast %391 : vector<1x128x8xf32> to vector<128x8xf32>
    %cst_276 = arith.constant dense<0.000000e+00> : vector<8x8xf32>
    %393 = tpu.matmul %329, %392, %cst_276 {dimension_numbers = #tpu.dot_dimension_numbers<[1], [0], [0], [1], [0, 0, 1, 1], [], []>} : vector<8x128xf32>, vector<128x8xf32>, vector<8x8xf32> -> vector<8x8xf32>
    %cst_277 = arith.constant dense<0.000000e+00> : vector<8x8xf32>
    %394 = tpu.matmul %387, %390, %cst_277 {dimension_numbers = #tpu.dot_dimension_numbers<[1], [1], [0], [0], [0, 0, 1, 0], [], []>} : vector<8x8xf32>, vector<8x8xf32>, vector<8x8xf32> -> vector<8x8xf32>
    %c2_278 = arith.constant 2 : index
    %c0_279 = arith.constant 0 : index
    %c0_280 = arith.constant 0 : index
    %395 = vector.load %arg4[%c2_278, %c0_279, %c0_280] : memref<4x8x8xf32, #tpu.memory_space<vmem>>, vector<1x8x8xf32>
    %396 = vector.shape_cast %395 : vector<1x8x8xf32> to vector<8x8xf32>
    %397 = arith.addf %394, %396 : vector<8x8xf32>
    %cst_281 = arith.constant dense<0xFF800000> : vector<8xf32>
    %398 = vector.multi_reduction <maximumf>, %397, %cst_281 [1] : vector<8x8xf32> to vector<8xf32>
    %399 = vector.shape_cast %398 : vector<8xf32> to vector<8x1xf32>
    %400 = vector.broadcast %399 : vector<8x1xf32> to vector<8x8xf32>
    %401 = arith.subf %397, %400 : vector<8x8xf32>
    %402 = math.exp %401 : vector<8x8xf32>
    %cst_282 = arith.constant dense<0.000000e+00> : vector<8xf32>
    %403 = vector.multi_reduction <add>, %402, %cst_282 [1] : vector<8x8xf32> to vector<8xf32>
    %404 = vector.shape_cast %403 : vector<8xf32> to vector<8x1xf32>
    %405 = tpu.reciprocal %404 {approx = true} : vector<8x1xf32> -> vector<8x1xf32>
    %406 = vector.broadcast %405 : vector<8x1xf32> to vector<8x8xf32>
    %407 = arith.mulf %402, %406 : vector<8x8xf32>
    %cst_283 = arith.constant dense<0.000000e+00> : vector<8x8xf32>
    %408 = tpu.matmul %407, %393, %cst_283 {dimension_numbers = #tpu.dot_dimension_numbers<[1], [0], [0], [1], [0, 0, 1, 1], [], []>} : vector<8x8xf32>, vector<8x8xf32>, vector<8x8xf32> -> vector<8x8xf32>
    %c2_284 = arith.constant 2 : index
    %c0_285 = arith.constant 0 : index
    %c0_286 = arith.constant 0 : index
    %409 = vector.load %arg12[%c2_284, %c0_285, %c0_286] : memref<8x8x128xf32, #tpu.memory_space<vmem>>, vector<1x8x128xf32>
    %410 = vector.shape_cast %409 : vector<1x8x128xf32> to vector<8x128xf32>
    %cst_287 = arith.constant dense<0.000000e+00> : vector<8x128xf32>
    %411 = tpu.matmul %408, %410, %cst_287 {dimension_numbers = #tpu.dot_dimension_numbers<[1], [0], [0], [1], [0, 0, 1, 1], [], []>} : vector<8x8xf32>, vector<8x128xf32>, vector<8x128xf32> -> vector<8x128xf32>
    %412 = arith.addf %384, %411 : vector<8x128xf32>
    %c3_288 = arith.constant 3 : index
    %c0_289 = arith.constant 0 : index
    %c0_290 = arith.constant 0 : index
    %413 = vector.load %arg11[%c3_288, %c0_289, %c0_290] : memref<24x128x8xf32, #tpu.memory_space<vmem>>, vector<1x128x8xf32>
    %414 = vector.shape_cast %413 : vector<1x128x8xf32> to vector<128x8xf32>
    %cst_291 = arith.constant dense<0.000000e+00> : vector<8x8xf32>
    %415 = tpu.matmul %329, %414, %cst_291 {dimension_numbers = #tpu.dot_dimension_numbers<[1], [0], [0], [1], [0, 0, 1, 1], [], []>} : vector<8x128xf32>, vector<128x8xf32>, vector<8x8xf32> -> vector<8x8xf32>
    %c7_292 = arith.constant 7 : index
    %c0_293 = arith.constant 0 : index
    %c0_294 = arith.constant 0 : index
    %416 = vector.load %arg11[%c7_292, %c0_293, %c0_294] : memref<24x128x8xf32, #tpu.memory_space<vmem>>, vector<1x128x8xf32>
    %417 = vector.shape_cast %416 : vector<1x128x8xf32> to vector<128x8xf32>
    %cst_295 = arith.constant dense<0.000000e+00> : vector<8x8xf32>
    %418 = tpu.matmul %329, %417, %cst_295 {dimension_numbers = #tpu.dot_dimension_numbers<[1], [0], [0], [1], [0, 0, 1, 1], [], []>} : vector<8x128xf32>, vector<128x8xf32>, vector<8x8xf32> -> vector<8x8xf32>
    %c11_296 = arith.constant 11 : index
    %c0_297 = arith.constant 0 : index
    %c0_298 = arith.constant 0 : index
    %419 = vector.load %arg11[%c11_296, %c0_297, %c0_298] : memref<24x128x8xf32, #tpu.memory_space<vmem>>, vector<1x128x8xf32>
    %420 = vector.shape_cast %419 : vector<1x128x8xf32> to vector<128x8xf32>
    %cst_299 = arith.constant dense<0.000000e+00> : vector<8x8xf32>
    %421 = tpu.matmul %329, %420, %cst_299 {dimension_numbers = #tpu.dot_dimension_numbers<[1], [0], [0], [1], [0, 0, 1, 1], [], []>} : vector<8x128xf32>, vector<128x8xf32>, vector<8x8xf32> -> vector<8x8xf32>
    %cst_300 = arith.constant dense<0.000000e+00> : vector<8x8xf32>
    %422 = tpu.matmul %415, %418, %cst_300 {dimension_numbers = #tpu.dot_dimension_numbers<[1], [1], [0], [0], [0, 0, 1, 0], [], []>} : vector<8x8xf32>, vector<8x8xf32>, vector<8x8xf32> -> vector<8x8xf32>
    %c3_301 = arith.constant 3 : index
    %c0_302 = arith.constant 0 : index
    %c0_303 = arith.constant 0 : index
    %423 = vector.load %arg4[%c3_301, %c0_302, %c0_303] : memref<4x8x8xf32, #tpu.memory_space<vmem>>, vector<1x8x8xf32>
    %424 = vector.shape_cast %423 : vector<1x8x8xf32> to vector<8x8xf32>
    %425 = arith.addf %422, %424 : vector<8x8xf32>
    %cst_304 = arith.constant dense<0xFF800000> : vector<8xf32>
    %426 = vector.multi_reduction <maximumf>, %425, %cst_304 [1] : vector<8x8xf32> to vector<8xf32>
    %427 = vector.shape_cast %426 : vector<8xf32> to vector<8x1xf32>
    %428 = vector.broadcast %427 : vector<8x1xf32> to vector<8x8xf32>
    %429 = arith.subf %425, %428 : vector<8x8xf32>
    %430 = math.exp %429 : vector<8x8xf32>
    %cst_305 = arith.constant dense<0.000000e+00> : vector<8xf32>
    %431 = vector.multi_reduction <add>, %430, %cst_305 [1] : vector<8x8xf32> to vector<8xf32>
    %432 = vector.shape_cast %431 : vector<8xf32> to vector<8x1xf32>
    %433 = tpu.reciprocal %432 {approx = true} : vector<8x1xf32> -> vector<8x1xf32>
    %434 = vector.broadcast %433 : vector<8x1xf32> to vector<8x8xf32>
    %435 = arith.mulf %430, %434 : vector<8x8xf32>
    %cst_306 = arith.constant dense<0.000000e+00> : vector<8x8xf32>
    %436 = tpu.matmul %435, %421, %cst_306 {dimension_numbers = #tpu.dot_dimension_numbers<[1], [0], [0], [1], [0, 0, 1, 1], [], []>} : vector<8x8xf32>, vector<8x8xf32>, vector<8x8xf32> -> vector<8x8xf32>
    %c3_307 = arith.constant 3 : index
    %c0_308 = arith.constant 0 : index
    %c0_309 = arith.constant 0 : index
    %437 = vector.load %arg12[%c3_307, %c0_308, %c0_309] : memref<8x8x128xf32, #tpu.memory_space<vmem>>, vector<1x8x128xf32>
    %438 = vector.shape_cast %437 : vector<1x8x128xf32> to vector<8x128xf32>
    %cst_310 = arith.constant dense<0.000000e+00> : vector<8x128xf32>
    %439 = tpu.matmul %436, %438, %cst_310 {dimension_numbers = #tpu.dot_dimension_numbers<[1], [0], [0], [1], [0, 0, 1, 1], [], []>} : vector<8x8xf32>, vector<8x128xf32>, vector<8x128xf32> -> vector<8x128xf32>
    %440 = arith.addf %412, %439 : vector<8x128xf32>
    %441 = arith.addf %315, %440 : vector<8x128xf32>
    %c1_311 = arith.constant 1 : index
    %c0_312 = arith.constant 0 : index
    %c0_313 = arith.constant 0 : index
    %442 = vector.load %arg10[%c1_311, %c0_312, %c0_313] : memref<6x1x128xf32, #tpu.memory_space<vmem>>, vector<1x1x128xf32>
    %443 = vector.shape_cast %442 : vector<1x1x128xf32> to vector<1x128xf32>
    %444 = arith.mulf %441, %441 : vector<8x128xf32>
    %cst_314 = arith.constant dense<0.000000e+00> : vector<8xf32>
    %445 = vector.multi_reduction <add>, %444, %cst_314 [1] : vector<8x128xf32> to vector<8xf32>
    %446 = vector.shape_cast %445 : vector<8xf32> to vector<8x1xf32>
    %cst_315 = arith.constant 3.125000e-02 : f32
    %447 = vector.broadcast %cst_315 : f32 to vector<8x1xf32>
    %448 = arith.mulf %446, %447 : vector<8x1xf32>
    %cst_316 = arith.constant 9.99999997E-7 : f32
    %449 = vector.broadcast %cst_316 : f32 to vector<8x1xf32>
    %450 = arith.addf %448, %449 : vector<8x1xf32>
    %451 = math.rsqrt %450 : vector<8x1xf32>
    %452 = vector.broadcast %451 : vector<8x1xf32> to vector<8x128xf32>
    %453 = arith.mulf %441, %452 : vector<8x128xf32>
    %454 = vector.broadcast %443 : vector<1x128xf32> to vector<8x128xf32>
    %455 = arith.mulf %453, %454 : vector<8x128xf32>
    %c0_317 = arith.constant 0 : index
    %c0_318 = arith.constant 0 : index
    %c0_319 = arith.constant 0 : index
    %456 = vector.load %arg13[%c0_317, %c0_318, %c0_319] : memref<24x128x8xf32, #tpu.memory_space<vmem>>, vector<1x128x8xf32>
    %457 = vector.shape_cast %456 : vector<1x128x8xf32> to vector<128x8xf32>
    %cst_320 = arith.constant dense<0.000000e+00> : vector<8x8xf32>
    %458 = tpu.matmul %455, %457, %cst_320 {dimension_numbers = #tpu.dot_dimension_numbers<[1], [0], [0], [1], [0, 0, 1, 1], [], []>} : vector<8x128xf32>, vector<128x8xf32>, vector<8x8xf32> -> vector<8x8xf32>
    %c4_321 = arith.constant 4 : index
    %c0_322 = arith.constant 0 : index
    %c0_323 = arith.constant 0 : index
    %459 = vector.load %arg13[%c4_321, %c0_322, %c0_323] : memref<24x128x8xf32, #tpu.memory_space<vmem>>, vector<1x128x8xf32>
    %460 = vector.shape_cast %459 : vector<1x128x8xf32> to vector<128x8xf32>
    %cst_324 = arith.constant dense<0.000000e+00> : vector<8x8xf32>
    %461 = tpu.matmul %313, %460, %cst_324 {dimension_numbers = #tpu.dot_dimension_numbers<[1], [0], [0], [1], [0, 0, 1, 1], [], []>} : vector<8x128xf32>, vector<128x8xf32>, vector<8x8xf32> -> vector<8x8xf32>
    %c8_325 = arith.constant 8 : index
    %c0_326 = arith.constant 0 : index
    %c0_327 = arith.constant 0 : index
    %462 = vector.load %arg13[%c8_325, %c0_326, %c0_327] : memref<24x128x8xf32, #tpu.memory_space<vmem>>, vector<1x128x8xf32>
    %463 = vector.shape_cast %462 : vector<1x128x8xf32> to vector<128x8xf32>
    %cst_328 = arith.constant dense<0.000000e+00> : vector<8x8xf32>
    %464 = tpu.matmul %313, %463, %cst_328 {dimension_numbers = #tpu.dot_dimension_numbers<[1], [0], [0], [1], [0, 0, 1, 1], [], []>} : vector<8x128xf32>, vector<128x8xf32>, vector<8x8xf32> -> vector<8x8xf32>
    %cst_329 = arith.constant dense<0.000000e+00> : vector<8x8xf32>
    %465 = tpu.matmul %458, %461, %cst_329 {dimension_numbers = #tpu.dot_dimension_numbers<[1], [1], [0], [0], [0, 0, 1, 0], [], []>} : vector<8x8xf32>, vector<8x8xf32>, vector<8x8xf32> -> vector<8x8xf32>
    %cst_330 = arith.constant dense<0xFF800000> : vector<8xf32>
    %466 = vector.multi_reduction <maximumf>, %465, %cst_330 [1] : vector<8x8xf32> to vector<8xf32>
    %467 = vector.shape_cast %466 : vector<8xf32> to vector<8x1xf32>
    %468 = vector.broadcast %467 : vector<8x1xf32> to vector<8x8xf32>
    %469 = arith.subf %465, %468 : vector<8x8xf32>
    %470 = math.exp %469 : vector<8x8xf32>
    %cst_331 = arith.constant dense<0.000000e+00> : vector<8xf32>
    %471 = vector.multi_reduction <add>, %470, %cst_331 [1] : vector<8x8xf32> to vector<8xf32>
    %472 = vector.shape_cast %471 : vector<8xf32> to vector<8x1xf32>
    %473 = tpu.reciprocal %472 {approx = true} : vector<8x1xf32> -> vector<8x1xf32>
    %474 = vector.broadcast %473 : vector<8x1xf32> to vector<8x8xf32>
    %475 = arith.mulf %470, %474 : vector<8x8xf32>
    %cst_332 = arith.constant dense<0.000000e+00> : vector<8x8xf32>
    %476 = tpu.matmul %475, %464, %cst_332 {dimension_numbers = #tpu.dot_dimension_numbers<[1], [0], [0], [1], [0, 0, 1, 1], [], []>} : vector<8x8xf32>, vector<8x8xf32>, vector<8x8xf32> -> vector<8x8xf32>
    %c0_333 = arith.constant 0 : index
    %c0_334 = arith.constant 0 : index
    %c0_335 = arith.constant 0 : index
    %477 = vector.load %arg14[%c0_333, %c0_334, %c0_335] : memref<8x8x128xf32, #tpu.memory_space<vmem>>, vector<1x8x128xf32>
    %478 = vector.shape_cast %477 : vector<1x8x128xf32> to vector<8x128xf32>
    %cst_336 = arith.constant dense<0.000000e+00> : vector<8x128xf32>
    %479 = tpu.matmul %476, %478, %cst_336 {dimension_numbers = #tpu.dot_dimension_numbers<[1], [0], [0], [1], [0, 0, 1, 1], [], []>} : vector<8x8xf32>, vector<8x128xf32>, vector<8x128xf32> -> vector<8x128xf32>
    %c1_337 = arith.constant 1 : index
    %c0_338 = arith.constant 0 : index
    %c0_339 = arith.constant 0 : index
    %480 = vector.load %arg13[%c1_337, %c0_338, %c0_339] : memref<24x128x8xf32, #tpu.memory_space<vmem>>, vector<1x128x8xf32>
    %481 = vector.shape_cast %480 : vector<1x128x8xf32> to vector<128x8xf32>
    %cst_340 = arith.constant dense<0.000000e+00> : vector<8x8xf32>
    %482 = tpu.matmul %455, %481, %cst_340 {dimension_numbers = #tpu.dot_dimension_numbers<[1], [0], [0], [1], [0, 0, 1, 1], [], []>} : vector<8x128xf32>, vector<128x8xf32>, vector<8x8xf32> -> vector<8x8xf32>
    %c5_341 = arith.constant 5 : index
    %c0_342 = arith.constant 0 : index
    %c0_343 = arith.constant 0 : index
    %483 = vector.load %arg13[%c5_341, %c0_342, %c0_343] : memref<24x128x8xf32, #tpu.memory_space<vmem>>, vector<1x128x8xf32>
    %484 = vector.shape_cast %483 : vector<1x128x8xf32> to vector<128x8xf32>
    %cst_344 = arith.constant dense<0.000000e+00> : vector<8x8xf32>
    %485 = tpu.matmul %313, %484, %cst_344 {dimension_numbers = #tpu.dot_dimension_numbers<[1], [0], [0], [1], [0, 0, 1, 1], [], []>} : vector<8x128xf32>, vector<128x8xf32>, vector<8x8xf32> -> vector<8x8xf32>
    %c9_345 = arith.constant 9 : index
    %c0_346 = arith.constant 0 : index
    %c0_347 = arith.constant 0 : index
    %486 = vector.load %arg13[%c9_345, %c0_346, %c0_347] : memref<24x128x8xf32, #tpu.memory_space<vmem>>, vector<1x128x8xf32>
    %487 = vector.shape_cast %486 : vector<1x128x8xf32> to vector<128x8xf32>
    %cst_348 = arith.constant dense<0.000000e+00> : vector<8x8xf32>
    %488 = tpu.matmul %313, %487, %cst_348 {dimension_numbers = #tpu.dot_dimension_numbers<[1], [0], [0], [1], [0, 0, 1, 1], [], []>} : vector<8x128xf32>, vector<128x8xf32>, vector<8x8xf32> -> vector<8x8xf32>
    %cst_349 = arith.constant dense<0.000000e+00> : vector<8x8xf32>
    %489 = tpu.matmul %482, %485, %cst_349 {dimension_numbers = #tpu.dot_dimension_numbers<[1], [1], [0], [0], [0, 0, 1, 0], [], []>} : vector<8x8xf32>, vector<8x8xf32>, vector<8x8xf32> -> vector<8x8xf32>
    %cst_350 = arith.constant dense<0xFF800000> : vector<8xf32>
    %490 = vector.multi_reduction <maximumf>, %489, %cst_350 [1] : vector<8x8xf32> to vector<8xf32>
    %491 = vector.shape_cast %490 : vector<8xf32> to vector<8x1xf32>
    %492 = vector.broadcast %491 : vector<8x1xf32> to vector<8x8xf32>
    %493 = arith.subf %489, %492 : vector<8x8xf32>
    %494 = math.exp %493 : vector<8x8xf32>
    %cst_351 = arith.constant dense<0.000000e+00> : vector<8xf32>
    %495 = vector.multi_reduction <add>, %494, %cst_351 [1] : vector<8x8xf32> to vector<8xf32>
    %496 = vector.shape_cast %495 : vector<8xf32> to vector<8x1xf32>
    %497 = tpu.reciprocal %496 {approx = true} : vector<8x1xf32> -> vector<8x1xf32>
    %498 = vector.broadcast %497 : vector<8x1xf32> to vector<8x8xf32>
    %499 = arith.mulf %494, %498 : vector<8x8xf32>
    %cst_352 = arith.constant dense<0.000000e+00> : vector<8x8xf32>
    %500 = tpu.matmul %499, %488, %cst_352 {dimension_numbers = #tpu.dot_dimension_numbers<[1], [0], [0], [1], [0, 0, 1, 1], [], []>} : vector<8x8xf32>, vector<8x8xf32>, vector<8x8xf32> -> vector<8x8xf32>
    %c1_353 = arith.constant 1 : index
    %c0_354 = arith.constant 0 : index
    %c0_355 = arith.constant 0 : index
    %501 = vector.load %arg14[%c1_353, %c0_354, %c0_355] : memref<8x8x128xf32, #tpu.memory_space<vmem>>, vector<1x8x128xf32>
    %502 = vector.shape_cast %501 : vector<1x8x128xf32> to vector<8x128xf32>
    %cst_356 = arith.constant dense<0.000000e+00> : vector<8x128xf32>
    %503 = tpu.matmul %500, %502, %cst_356 {dimension_numbers = #tpu.dot_dimension_numbers<[1], [0], [0], [1], [0, 0, 1, 1], [], []>} : vector<8x8xf32>, vector<8x128xf32>, vector<8x128xf32> -> vector<8x128xf32>
    %504 = arith.addf %479, %503 : vector<8x128xf32>
    %c2_357 = arith.constant 2 : index
    %c0_358 = arith.constant 0 : index
    %c0_359 = arith.constant 0 : index
    %505 = vector.load %arg13[%c2_357, %c0_358, %c0_359] : memref<24x128x8xf32, #tpu.memory_space<vmem>>, vector<1x128x8xf32>
    %506 = vector.shape_cast %505 : vector<1x128x8xf32> to vector<128x8xf32>
    %cst_360 = arith.constant dense<0.000000e+00> : vector<8x8xf32>
    %507 = tpu.matmul %455, %506, %cst_360 {dimension_numbers = #tpu.dot_dimension_numbers<[1], [0], [0], [1], [0, 0, 1, 1], [], []>} : vector<8x128xf32>, vector<128x8xf32>, vector<8x8xf32> -> vector<8x8xf32>
    %c6_361 = arith.constant 6 : index
    %c0_362 = arith.constant 0 : index
    %c0_363 = arith.constant 0 : index
    %508 = vector.load %arg13[%c6_361, %c0_362, %c0_363] : memref<24x128x8xf32, #tpu.memory_space<vmem>>, vector<1x128x8xf32>
    %509 = vector.shape_cast %508 : vector<1x128x8xf32> to vector<128x8xf32>
    %cst_364 = arith.constant dense<0.000000e+00> : vector<8x8xf32>
    %510 = tpu.matmul %313, %509, %cst_364 {dimension_numbers = #tpu.dot_dimension_numbers<[1], [0], [0], [1], [0, 0, 1, 1], [], []>} : vector<8x128xf32>, vector<128x8xf32>, vector<8x8xf32> -> vector<8x8xf32>
    %c10_365 = arith.constant 10 : index
    %c0_366 = arith.constant 0 : index
    %c0_367 = arith.constant 0 : index
    %511 = vector.load %arg13[%c10_365, %c0_366, %c0_367] : memref<24x128x8xf32, #tpu.memory_space<vmem>>, vector<1x128x8xf32>
    %512 = vector.shape_cast %511 : vector<1x128x8xf32> to vector<128x8xf32>
    %cst_368 = arith.constant dense<0.000000e+00> : vector<8x8xf32>
    %513 = tpu.matmul %313, %512, %cst_368 {dimension_numbers = #tpu.dot_dimension_numbers<[1], [0], [0], [1], [0, 0, 1, 1], [], []>} : vector<8x128xf32>, vector<128x8xf32>, vector<8x8xf32> -> vector<8x8xf32>
    %cst_369 = arith.constant dense<0.000000e+00> : vector<8x8xf32>
    %514 = tpu.matmul %507, %510, %cst_369 {dimension_numbers = #tpu.dot_dimension_numbers<[1], [1], [0], [0], [0, 0, 1, 0], [], []>} : vector<8x8xf32>, vector<8x8xf32>, vector<8x8xf32> -> vector<8x8xf32>
    %cst_370 = arith.constant dense<0xFF800000> : vector<8xf32>
    %515 = vector.multi_reduction <maximumf>, %514, %cst_370 [1] : vector<8x8xf32> to vector<8xf32>
    %516 = vector.shape_cast %515 : vector<8xf32> to vector<8x1xf32>
    %517 = vector.broadcast %516 : vector<8x1xf32> to vector<8x8xf32>
    %518 = arith.subf %514, %517 : vector<8x8xf32>
    %519 = math.exp %518 : vector<8x8xf32>
    %cst_371 = arith.constant dense<0.000000e+00> : vector<8xf32>
    %520 = vector.multi_reduction <add>, %519, %cst_371 [1] : vector<8x8xf32> to vector<8xf32>
    %521 = vector.shape_cast %520 : vector<8xf32> to vector<8x1xf32>
    %522 = tpu.reciprocal %521 {approx = true} : vector<8x1xf32> -> vector<8x1xf32>
    %523 = vector.broadcast %522 : vector<8x1xf32> to vector<8x8xf32>
    %524 = arith.mulf %519, %523 : vector<8x8xf32>
    %cst_372 = arith.constant dense<0.000000e+00> : vector<8x8xf32>
    %525 = tpu.matmul %524, %513, %cst_372 {dimension_numbers = #tpu.dot_dimension_numbers<[1], [0], [0], [1], [0, 0, 1, 1], [], []>} : vector<8x8xf32>, vector<8x8xf32>, vector<8x8xf32> -> vector<8x8xf32>
    %c2_373 = arith.constant 2 : index
    %c0_374 = arith.constant 0 : index
    %c0_375 = arith.constant 0 : index
    %526 = vector.load %arg14[%c2_373, %c0_374, %c0_375] : memref<8x8x128xf32, #tpu.memory_space<vmem>>, vector<1x8x128xf32>
    %527 = vector.shape_cast %526 : vector<1x8x128xf32> to vector<8x128xf32>
    %cst_376 = arith.constant dense<0.000000e+00> : vector<8x128xf32>
    %528 = tpu.matmul %525, %527, %cst_376 {dimension_numbers = #tpu.dot_dimension_numbers<[1], [0], [0], [1], [0, 0, 1, 1], [], []>} : vector<8x8xf32>, vector<8x128xf32>, vector<8x128xf32> -> vector<8x128xf32>
    %529 = arith.addf %504, %528 : vector<8x128xf32>
    %c3_377 = arith.constant 3 : index
    %c0_378 = arith.constant 0 : index
    %c0_379 = arith.constant 0 : index
    %530 = vector.load %arg13[%c3_377, %c0_378, %c0_379] : memref<24x128x8xf32, #tpu.memory_space<vmem>>, vector<1x128x8xf32>
    %531 = vector.shape_cast %530 : vector<1x128x8xf32> to vector<128x8xf32>
    %cst_380 = arith.constant dense<0.000000e+00> : vector<8x8xf32>
    %532 = tpu.matmul %455, %531, %cst_380 {dimension_numbers = #tpu.dot_dimension_numbers<[1], [0], [0], [1], [0, 0, 1, 1], [], []>} : vector<8x128xf32>, vector<128x8xf32>, vector<8x8xf32> -> vector<8x8xf32>
    %c7_381 = arith.constant 7 : index
    %c0_382 = arith.constant 0 : index
    %c0_383 = arith.constant 0 : index
    %533 = vector.load %arg13[%c7_381, %c0_382, %c0_383] : memref<24x128x8xf32, #tpu.memory_space<vmem>>, vector<1x128x8xf32>
    %534 = vector.shape_cast %533 : vector<1x128x8xf32> to vector<128x8xf32>
    %cst_384 = arith.constant dense<0.000000e+00> : vector<8x8xf32>
    %535 = tpu.matmul %313, %534, %cst_384 {dimension_numbers = #tpu.dot_dimension_numbers<[1], [0], [0], [1], [0, 0, 1, 1], [], []>} : vector<8x128xf32>, vector<128x8xf32>, vector<8x8xf32> -> vector<8x8xf32>
    %c11_385 = arith.constant 11 : index
    %c0_386 = arith.constant 0 : index
    %c0_387 = arith.constant 0 : index
    %536 = vector.load %arg13[%c11_385, %c0_386, %c0_387] : memref<24x128x8xf32, #tpu.memory_space<vmem>>, vector<1x128x8xf32>
    %537 = vector.shape_cast %536 : vector<1x128x8xf32> to vector<128x8xf32>
    %cst_388 = arith.constant dense<0.000000e+00> : vector<8x8xf32>
    %538 = tpu.matmul %313, %537, %cst_388 {dimension_numbers = #tpu.dot_dimension_numbers<[1], [0], [0], [1], [0, 0, 1, 1], [], []>} : vector<8x128xf32>, vector<128x8xf32>, vector<8x8xf32> -> vector<8x8xf32>
    %cst_389 = arith.constant dense<0.000000e+00> : vector<8x8xf32>
    %539 = tpu.matmul %532, %535, %cst_389 {dimension_numbers = #tpu.dot_dimension_numbers<[1], [1], [0], [0], [0, 0, 1, 0], [], []>} : vector<8x8xf32>, vector<8x8xf32>, vector<8x8xf32> -> vector<8x8xf32>
    %cst_390 = arith.constant dense<0xFF800000> : vector<8xf32>
    %540 = vector.multi_reduction <maximumf>, %539, %cst_390 [1] : vector<8x8xf32> to vector<8xf32>
    %541 = vector.shape_cast %540 : vector<8xf32> to vector<8x1xf32>
    %542 = vector.broadcast %541 : vector<8x1xf32> to vector<8x8xf32>
    %543 = arith.subf %539, %542 : vector<8x8xf32>
    %544 = math.exp %543 : vector<8x8xf32>
    %cst_391 = arith.constant dense<0.000000e+00> : vector<8xf32>
    %545 = vector.multi_reduction <add>, %544, %cst_391 [1] : vector<8x8xf32> to vector<8xf32>
    %546 = vector.shape_cast %545 : vector<8xf32> to vector<8x1xf32>
    %547 = tpu.reciprocal %546 {approx = true} : vector<8x1xf32> -> vector<8x1xf32>
    %548 = vector.broadcast %547 : vector<8x1xf32> to vector<8x8xf32>
    %549 = arith.mulf %544, %548 : vector<8x8xf32>
    %cst_392 = arith.constant dense<0.000000e+00> : vector<8x8xf32>
    %550 = tpu.matmul %549, %538, %cst_392 {dimension_numbers = #tpu.dot_dimension_numbers<[1], [0], [0], [1], [0, 0, 1, 1], [], []>} : vector<8x8xf32>, vector<8x8xf32>, vector<8x8xf32> -> vector<8x8xf32>
    %c3_393 = arith.constant 3 : index
    %c0_394 = arith.constant 0 : index
    %c0_395 = arith.constant 0 : index
    %551 = vector.load %arg14[%c3_393, %c0_394, %c0_395] : memref<8x8x128xf32, #tpu.memory_space<vmem>>, vector<1x8x128xf32>
    %552 = vector.shape_cast %551 : vector<1x8x128xf32> to vector<8x128xf32>
    %cst_396 = arith.constant dense<0.000000e+00> : vector<8x128xf32>
    %553 = tpu.matmul %550, %552, %cst_396 {dimension_numbers = #tpu.dot_dimension_numbers<[1], [0], [0], [1], [0, 0, 1, 1], [], []>} : vector<8x8xf32>, vector<8x128xf32>, vector<8x128xf32> -> vector<8x128xf32>
    %554 = arith.addf %529, %553 : vector<8x128xf32>
    %555 = arith.addf %441, %554 : vector<8x128xf32>
    %c2_397 = arith.constant 2 : index
    %c0_398 = arith.constant 0 : index
    %c0_399 = arith.constant 0 : index
    %556 = vector.load %arg10[%c2_397, %c0_398, %c0_399] : memref<6x1x128xf32, #tpu.memory_space<vmem>>, vector<1x1x128xf32>
    %557 = vector.shape_cast %556 : vector<1x1x128xf32> to vector<1x128xf32>
    %558 = arith.mulf %555, %555 : vector<8x128xf32>
    %cst_400 = arith.constant dense<0.000000e+00> : vector<8xf32>
    %559 = vector.multi_reduction <add>, %558, %cst_400 [1] : vector<8x128xf32> to vector<8xf32>
    %560 = vector.shape_cast %559 : vector<8xf32> to vector<8x1xf32>
    %cst_401 = arith.constant 3.125000e-02 : f32
    %561 = vector.broadcast %cst_401 : f32 to vector<8x1xf32>
    %562 = arith.mulf %560, %561 : vector<8x1xf32>
    %cst_402 = arith.constant 9.99999997E-7 : f32
    %563 = vector.broadcast %cst_402 : f32 to vector<8x1xf32>
    %564 = arith.addf %562, %563 : vector<8x1xf32>
    %565 = math.rsqrt %564 : vector<8x1xf32>
    %566 = vector.broadcast %565 : vector<8x1xf32> to vector<8x128xf32>
    %567 = arith.mulf %555, %566 : vector<8x128xf32>
    %568 = vector.broadcast %557 : vector<1x128xf32> to vector<8x128xf32>
    %569 = arith.mulf %567, %568 : vector<8x128xf32>
    %c0_403 = arith.constant 0 : index
    %c0_404 = arith.constant 0 : index
    %c0_405 = arith.constant 0 : index
    %570 = vector.load %arg15[%c0_403, %c0_404, %c0_405] : memref<2x128x128xf32, #tpu.memory_space<vmem>>, vector<1x128x128xf32>
    %571 = vector.shape_cast %570 : vector<1x128x128xf32> to vector<128x128xf32>
    %cst_406 = arith.constant dense<0.000000e+00> : vector<8x128xf32>
    %572 = tpu.matmul %569, %571, %cst_406 {dimension_numbers = #tpu.dot_dimension_numbers<[1], [0], [0], [1], [0, 0, 1, 1], [], []>} : vector<8x128xf32>, vector<128x128xf32>, vector<8x128xf32> -> vector<8x128xf32>
    %cst_407 = arith.constant 0.000000e+00 : f32
    %573 = vector.broadcast %cst_407 : f32 to vector<8x128xf32>
    %574 = arith.maximumf %572, %573 : vector<8x128xf32>
    %c0_408 = arith.constant 0 : index
    %c0_409 = arith.constant 0 : index
    %c0_410 = arith.constant 0 : index
    %575 = vector.load %arg16[%c0_408, %c0_409, %c0_410] : memref<2x128x128xf32, #tpu.memory_space<vmem>>, vector<1x128x128xf32>
    %576 = vector.shape_cast %575 : vector<1x128x128xf32> to vector<128x128xf32>
    %cst_411 = arith.constant dense<0.000000e+00> : vector<8x128xf32>
    %577 = tpu.matmul %574, %576, %cst_411 {dimension_numbers = #tpu.dot_dimension_numbers<[1], [0], [0], [1], [0, 0, 1, 1], [], []>} : vector<8x128xf32>, vector<128x128xf32>, vector<8x128xf32> -> vector<8x128xf32>
    %578 = arith.addf %555, %577 : vector<8x128xf32>
    %c3_412 = arith.constant 3 : index
    %c0_413 = arith.constant 0 : index
    %c0_414 = arith.constant 0 : index
    %579 = vector.load %arg10[%c3_412, %c0_413, %c0_414] : memref<6x1x128xf32, #tpu.memory_space<vmem>>, vector<1x1x128xf32>
    %580 = vector.shape_cast %579 : vector<1x1x128xf32> to vector<1x128xf32>
    %581 = arith.mulf %578, %578 : vector<8x128xf32>
    %cst_415 = arith.constant dense<0.000000e+00> : vector<8xf32>
    %582 = vector.multi_reduction <add>, %581, %cst_415 [1] : vector<8x128xf32> to vector<8xf32>
    %583 = vector.shape_cast %582 : vector<8xf32> to vector<8x1xf32>
    %cst_416 = arith.constant 3.125000e-02 : f32
    %584 = vector.broadcast %cst_416 : f32 to vector<8x1xf32>
    %585 = arith.mulf %583, %584 : vector<8x1xf32>
    %cst_417 = arith.constant 9.99999997E-7 : f32
    %586 = vector.broadcast %cst_417 : f32 to vector<8x1xf32>
    %587 = arith.addf %585, %586 : vector<8x1xf32>
    %588 = math.rsqrt %587 : vector<8x1xf32>
    %589 = vector.broadcast %588 : vector<8x1xf32> to vector<8x128xf32>
    %590 = arith.mulf %578, %589 : vector<8x128xf32>
    %591 = vector.broadcast %580 : vector<1x128xf32> to vector<8x128xf32>
    %592 = arith.mulf %590, %591 : vector<8x128xf32>
    %c12_418 = arith.constant 12 : index
    %c0_419 = arith.constant 0 : index
    %c0_420 = arith.constant 0 : index
    %593 = vector.load %arg11[%c12_418, %c0_419, %c0_420] : memref<24x128x8xf32, #tpu.memory_space<vmem>>, vector<1x128x8xf32>
    %594 = vector.shape_cast %593 : vector<1x128x8xf32> to vector<128x8xf32>
    %cst_421 = arith.constant dense<0.000000e+00> : vector<8x8xf32>
    %595 = tpu.matmul %592, %594, %cst_421 {dimension_numbers = #tpu.dot_dimension_numbers<[1], [0], [0], [1], [0, 0, 1, 1], [], []>} : vector<8x128xf32>, vector<128x8xf32>, vector<8x8xf32> -> vector<8x8xf32>
    %c16_422 = arith.constant 16 : index
    %c0_423 = arith.constant 0 : index
    %c0_424 = arith.constant 0 : index
    %596 = vector.load %arg11[%c16_422, %c0_423, %c0_424] : memref<24x128x8xf32, #tpu.memory_space<vmem>>, vector<1x128x8xf32>
    %597 = vector.shape_cast %596 : vector<1x128x8xf32> to vector<128x8xf32>
    %cst_425 = arith.constant dense<0.000000e+00> : vector<8x8xf32>
    %598 = tpu.matmul %592, %597, %cst_425 {dimension_numbers = #tpu.dot_dimension_numbers<[1], [0], [0], [1], [0, 0, 1, 1], [], []>} : vector<8x128xf32>, vector<128x8xf32>, vector<8x8xf32> -> vector<8x8xf32>
    %c20_426 = arith.constant 20 : index
    %c0_427 = arith.constant 0 : index
    %c0_428 = arith.constant 0 : index
    %599 = vector.load %arg11[%c20_426, %c0_427, %c0_428] : memref<24x128x8xf32, #tpu.memory_space<vmem>>, vector<1x128x8xf32>
    %600 = vector.shape_cast %599 : vector<1x128x8xf32> to vector<128x8xf32>
    %cst_429 = arith.constant dense<0.000000e+00> : vector<8x8xf32>
    %601 = tpu.matmul %592, %600, %cst_429 {dimension_numbers = #tpu.dot_dimension_numbers<[1], [0], [0], [1], [0, 0, 1, 1], [], []>} : vector<8x128xf32>, vector<128x8xf32>, vector<8x8xf32> -> vector<8x8xf32>
    %cst_430 = arith.constant dense<0.000000e+00> : vector<8x8xf32>
    %602 = tpu.matmul %595, %598, %cst_430 {dimension_numbers = #tpu.dot_dimension_numbers<[1], [1], [0], [0], [0, 0, 1, 0], [], []>} : vector<8x8xf32>, vector<8x8xf32>, vector<8x8xf32> -> vector<8x8xf32>
    %c0_431 = arith.constant 0 : index
    %c0_432 = arith.constant 0 : index
    %c0_433 = arith.constant 0 : index
    %603 = vector.load %arg4[%c0_431, %c0_432, %c0_433] : memref<4x8x8xf32, #tpu.memory_space<vmem>>, vector<1x8x8xf32>
    %604 = vector.shape_cast %603 : vector<1x8x8xf32> to vector<8x8xf32>
    %605 = arith.addf %602, %604 : vector<8x8xf32>
    %cst_434 = arith.constant dense<0xFF800000> : vector<8xf32>
    %606 = vector.multi_reduction <maximumf>, %605, %cst_434 [1] : vector<8x8xf32> to vector<8xf32>
    %607 = vector.shape_cast %606 : vector<8xf32> to vector<8x1xf32>
    %608 = vector.broadcast %607 : vector<8x1xf32> to vector<8x8xf32>
    %609 = arith.subf %605, %608 : vector<8x8xf32>
    %610 = math.exp %609 : vector<8x8xf32>
    %cst_435 = arith.constant dense<0.000000e+00> : vector<8xf32>
    %611 = vector.multi_reduction <add>, %610, %cst_435 [1] : vector<8x8xf32> to vector<8xf32>
    %612 = vector.shape_cast %611 : vector<8xf32> to vector<8x1xf32>
    %613 = tpu.reciprocal %612 {approx = true} : vector<8x1xf32> -> vector<8x1xf32>
    %614 = vector.broadcast %613 : vector<8x1xf32> to vector<8x8xf32>
    %615 = arith.mulf %610, %614 : vector<8x8xf32>
    %cst_436 = arith.constant dense<0.000000e+00> : vector<8x8xf32>
    %616 = tpu.matmul %615, %601, %cst_436 {dimension_numbers = #tpu.dot_dimension_numbers<[1], [0], [0], [1], [0, 0, 1, 1], [], []>} : vector<8x8xf32>, vector<8x8xf32>, vector<8x8xf32> -> vector<8x8xf32>
    %c4_437 = arith.constant 4 : index
    %c0_438 = arith.constant 0 : index
    %c0_439 = arith.constant 0 : index
    %617 = vector.load %arg12[%c4_437, %c0_438, %c0_439] : memref<8x8x128xf32, #tpu.memory_space<vmem>>, vector<1x8x128xf32>
    %618 = vector.shape_cast %617 : vector<1x8x128xf32> to vector<8x128xf32>
    %cst_440 = arith.constant dense<0.000000e+00> : vector<8x128xf32>
    %619 = tpu.matmul %616, %618, %cst_440 {dimension_numbers = #tpu.dot_dimension_numbers<[1], [0], [0], [1], [0, 0, 1, 1], [], []>} : vector<8x8xf32>, vector<8x128xf32>, vector<8x128xf32> -> vector<8x128xf32>
    %c13_441 = arith.constant 13 : index
    %c0_442 = arith.constant 0 : index
    %c0_443 = arith.constant 0 : index
    %620 = vector.load %arg11[%c13_441, %c0_442, %c0_443] : memref<24x128x8xf32, #tpu.memory_space<vmem>>, vector<1x128x8xf32>
    %621 = vector.shape_cast %620 : vector<1x128x8xf32> to vector<128x8xf32>
    %cst_444 = arith.constant dense<0.000000e+00> : vector<8x8xf32>
    %622 = tpu.matmul %592, %621, %cst_444 {dimension_numbers = #tpu.dot_dimension_numbers<[1], [0], [0], [1], [0, 0, 1, 1], [], []>} : vector<8x128xf32>, vector<128x8xf32>, vector<8x8xf32> -> vector<8x8xf32>
    %c17_445 = arith.constant 17 : index
    %c0_446 = arith.constant 0 : index
    %c0_447 = arith.constant 0 : index
    %623 = vector.load %arg11[%c17_445, %c0_446, %c0_447] : memref<24x128x8xf32, #tpu.memory_space<vmem>>, vector<1x128x8xf32>
    %624 = vector.shape_cast %623 : vector<1x128x8xf32> to vector<128x8xf32>
    %cst_448 = arith.constant dense<0.000000e+00> : vector<8x8xf32>
    %625 = tpu.matmul %592, %624, %cst_448 {dimension_numbers = #tpu.dot_dimension_numbers<[1], [0], [0], [1], [0, 0, 1, 1], [], []>} : vector<8x128xf32>, vector<128x8xf32>, vector<8x8xf32> -> vector<8x8xf32>
    %c21_449 = arith.constant 21 : index
    %c0_450 = arith.constant 0 : index
    %c0_451 = arith.constant 0 : index
    %626 = vector.load %arg11[%c21_449, %c0_450, %c0_451] : memref<24x128x8xf32, #tpu.memory_space<vmem>>, vector<1x128x8xf32>
    %627 = vector.shape_cast %626 : vector<1x128x8xf32> to vector<128x8xf32>
    %cst_452 = arith.constant dense<0.000000e+00> : vector<8x8xf32>
    %628 = tpu.matmul %592, %627, %cst_452 {dimension_numbers = #tpu.dot_dimension_numbers<[1], [0], [0], [1], [0, 0, 1, 1], [], []>} : vector<8x128xf32>, vector<128x8xf32>, vector<8x8xf32> -> vector<8x8xf32>
    %cst_453 = arith.constant dense<0.000000e+00> : vector<8x8xf32>
    %629 = tpu.matmul %622, %625, %cst_453 {dimension_numbers = #tpu.dot_dimension_numbers<[1], [1], [0], [0], [0, 0, 1, 0], [], []>} : vector<8x8xf32>, vector<8x8xf32>, vector<8x8xf32> -> vector<8x8xf32>
    %c1_454 = arith.constant 1 : index
    %c0_455 = arith.constant 0 : index
    %c0_456 = arith.constant 0 : index
    %630 = vector.load %arg4[%c1_454, %c0_455, %c0_456] : memref<4x8x8xf32, #tpu.memory_space<vmem>>, vector<1x8x8xf32>
    %631 = vector.shape_cast %630 : vector<1x8x8xf32> to vector<8x8xf32>
    %632 = arith.addf %629, %631 : vector<8x8xf32>
    %cst_457 = arith.constant dense<0xFF800000> : vector<8xf32>
    %633 = vector.multi_reduction <maximumf>, %632, %cst_457 [1] : vector<8x8xf32> to vector<8xf32>
    %634 = vector.shape_cast %633 : vector<8xf32> to vector<8x1xf32>
    %635 = vector.broadcast %634 : vector<8x1xf32> to vector<8x8xf32>
    %636 = arith.subf %632, %635 : vector<8x8xf32>
    %637 = math.exp %636 : vector<8x8xf32>
    %cst_458 = arith.constant dense<0.000000e+00> : vector<8xf32>
    %638 = vector.multi_reduction <add>, %637, %cst_458 [1] : vector<8x8xf32> to vector<8xf32>
    %639 = vector.shape_cast %638 : vector<8xf32> to vector<8x1xf32>
    %640 = tpu.reciprocal %639 {approx = true} : vector<8x1xf32> -> vector<8x1xf32>
    %641 = vector.broadcast %640 : vector<8x1xf32> to vector<8x8xf32>
    %642 = arith.mulf %637, %641 : vector<8x8xf32>
    %cst_459 = arith.constant dense<0.000000e+00> : vector<8x8xf32>
    %643 = tpu.matmul %642, %628, %cst_459 {dimension_numbers = #tpu.dot_dimension_numbers<[1], [0], [0], [1], [0, 0, 1, 1], [], []>} : vector<8x8xf32>, vector<8x8xf32>, vector<8x8xf32> -> vector<8x8xf32>
    %c5_460 = arith.constant 5 : index
    %c0_461 = arith.constant 0 : index
    %c0_462 = arith.constant 0 : index
    %644 = vector.load %arg12[%c5_460, %c0_461, %c0_462] : memref<8x8x128xf32, #tpu.memory_space<vmem>>, vector<1x8x128xf32>
    %645 = vector.shape_cast %644 : vector<1x8x128xf32> to vector<8x128xf32>
    %cst_463 = arith.constant dense<0.000000e+00> : vector<8x128xf32>
    %646 = tpu.matmul %643, %645, %cst_463 {dimension_numbers = #tpu.dot_dimension_numbers<[1], [0], [0], [1], [0, 0, 1, 1], [], []>} : vector<8x8xf32>, vector<8x128xf32>, vector<8x128xf32> -> vector<8x128xf32>
    %647 = arith.addf %619, %646 : vector<8x128xf32>
    %c14_464 = arith.constant 14 : index
    %c0_465 = arith.constant 0 : index
    %c0_466 = arith.constant 0 : index
    %648 = vector.load %arg11[%c14_464, %c0_465, %c0_466] : memref<24x128x8xf32, #tpu.memory_space<vmem>>, vector<1x128x8xf32>
    %649 = vector.shape_cast %648 : vector<1x128x8xf32> to vector<128x8xf32>
    %cst_467 = arith.constant dense<0.000000e+00> : vector<8x8xf32>
    %650 = tpu.matmul %592, %649, %cst_467 {dimension_numbers = #tpu.dot_dimension_numbers<[1], [0], [0], [1], [0, 0, 1, 1], [], []>} : vector<8x128xf32>, vector<128x8xf32>, vector<8x8xf32> -> vector<8x8xf32>
    %c18_468 = arith.constant 18 : index
    %c0_469 = arith.constant 0 : index
    %c0_470 = arith.constant 0 : index
    %651 = vector.load %arg11[%c18_468, %c0_469, %c0_470] : memref<24x128x8xf32, #tpu.memory_space<vmem>>, vector<1x128x8xf32>
    %652 = vector.shape_cast %651 : vector<1x128x8xf32> to vector<128x8xf32>
    %cst_471 = arith.constant dense<0.000000e+00> : vector<8x8xf32>
    %653 = tpu.matmul %592, %652, %cst_471 {dimension_numbers = #tpu.dot_dimension_numbers<[1], [0], [0], [1], [0, 0, 1, 1], [], []>} : vector<8x128xf32>, vector<128x8xf32>, vector<8x8xf32> -> vector<8x8xf32>
    %c22_472 = arith.constant 22 : index
    %c0_473 = arith.constant 0 : index
    %c0_474 = arith.constant 0 : index
    %654 = vector.load %arg11[%c22_472, %c0_473, %c0_474] : memref<24x128x8xf32, #tpu.memory_space<vmem>>, vector<1x128x8xf32>
    %655 = vector.shape_cast %654 : vector<1x128x8xf32> to vector<128x8xf32>
    %cst_475 = arith.constant dense<0.000000e+00> : vector<8x8xf32>
    %656 = tpu.matmul %592, %655, %cst_475 {dimension_numbers = #tpu.dot_dimension_numbers<[1], [0], [0], [1], [0, 0, 1, 1], [], []>} : vector<8x128xf32>, vector<128x8xf32>, vector<8x8xf32> -> vector<8x8xf32>
    %cst_476 = arith.constant dense<0.000000e+00> : vector<8x8xf32>
    %657 = tpu.matmul %650, %653, %cst_476 {dimension_numbers = #tpu.dot_dimension_numbers<[1], [1], [0], [0], [0, 0, 1, 0], [], []>} : vector<8x8xf32>, vector<8x8xf32>, vector<8x8xf32> -> vector<8x8xf32>
    %c2_477 = arith.constant 2 : index
    %c0_478 = arith.constant 0 : index
    %c0_479 = arith.constant 0 : index
    %658 = vector.load %arg4[%c2_477, %c0_478, %c0_479] : memref<4x8x8xf32, #tpu.memory_space<vmem>>, vector<1x8x8xf32>
    %659 = vector.shape_cast %658 : vector<1x8x8xf32> to vector<8x8xf32>
    %660 = arith.addf %657, %659 : vector<8x8xf32>
    %cst_480 = arith.constant dense<0xFF800000> : vector<8xf32>
    %661 = vector.multi_reduction <maximumf>, %660, %cst_480 [1] : vector<8x8xf32> to vector<8xf32>
    %662 = vector.shape_cast %661 : vector<8xf32> to vector<8x1xf32>
    %663 = vector.broadcast %662 : vector<8x1xf32> to vector<8x8xf32>
    %664 = arith.subf %660, %663 : vector<8x8xf32>
    %665 = math.exp %664 : vector<8x8xf32>
    %cst_481 = arith.constant dense<0.000000e+00> : vector<8xf32>
    %666 = vector.multi_reduction <add>, %665, %cst_481 [1] : vector<8x8xf32> to vector<8xf32>
    %667 = vector.shape_cast %666 : vector<8xf32> to vector<8x1xf32>
    %668 = tpu.reciprocal %667 {approx = true} : vector<8x1xf32> -> vector<8x1xf32>
    %669 = vector.broadcast %668 : vector<8x1xf32> to vector<8x8xf32>
    %670 = arith.mulf %665, %669 : vector<8x8xf32>
    %cst_482 = arith.constant dense<0.000000e+00> : vector<8x8xf32>
    %671 = tpu.matmul %670, %656, %cst_482 {dimension_numbers = #tpu.dot_dimension_numbers<[1], [0], [0], [1], [0, 0, 1, 1], [], []>} : vector<8x8xf32>, vector<8x8xf32>, vector<8x8xf32> -> vector<8x8xf32>
    %c6_483 = arith.constant 6 : index
    %c0_484 = arith.constant 0 : index
    %c0_485 = arith.constant 0 : index
    %672 = vector.load %arg12[%c6_483, %c0_484, %c0_485] : memref<8x8x128xf32, #tpu.memory_space<vmem>>, vector<1x8x128xf32>
    %673 = vector.shape_cast %672 : vector<1x8x128xf32> to vector<8x128xf32>
    %cst_486 = arith.constant dense<0.000000e+00> : vector<8x128xf32>
    %674 = tpu.matmul %671, %673, %cst_486 {dimension_numbers = #tpu.dot_dimension_numbers<[1], [0], [0], [1], [0, 0, 1, 1], [], []>} : vector<8x8xf32>, vector<8x128xf32>, vector<8x128xf32> -> vector<8x128xf32>
    %675 = arith.addf %647, %674 : vector<8x128xf32>
    %c15_487 = arith.constant 15 : index
    %c0_488 = arith.constant 0 : index
    %c0_489 = arith.constant 0 : index
    %676 = vector.load %arg11[%c15_487, %c0_488, %c0_489] : memref<24x128x8xf32, #tpu.memory_space<vmem>>, vector<1x128x8xf32>
    %677 = vector.shape_cast %676 : vector<1x128x8xf32> to vector<128x8xf32>
    %cst_490 = arith.constant dense<0.000000e+00> : vector<8x8xf32>
    %678 = tpu.matmul %592, %677, %cst_490 {dimension_numbers = #tpu.dot_dimension_numbers<[1], [0], [0], [1], [0, 0, 1, 1], [], []>} : vector<8x128xf32>, vector<128x8xf32>, vector<8x8xf32> -> vector<8x8xf32>
    %c19_491 = arith.constant 19 : index
    %c0_492 = arith.constant 0 : index
    %c0_493 = arith.constant 0 : index
    %679 = vector.load %arg11[%c19_491, %c0_492, %c0_493] : memref<24x128x8xf32, #tpu.memory_space<vmem>>, vector<1x128x8xf32>
    %680 = vector.shape_cast %679 : vector<1x128x8xf32> to vector<128x8xf32>
    %cst_494 = arith.constant dense<0.000000e+00> : vector<8x8xf32>
    %681 = tpu.matmul %592, %680, %cst_494 {dimension_numbers = #tpu.dot_dimension_numbers<[1], [0], [0], [1], [0, 0, 1, 1], [], []>} : vector<8x128xf32>, vector<128x8xf32>, vector<8x8xf32> -> vector<8x8xf32>
    %c23_495 = arith.constant 23 : index
    %c0_496 = arith.constant 0 : index
    %c0_497 = arith.constant 0 : index
    %682 = vector.load %arg11[%c23_495, %c0_496, %c0_497] : memref<24x128x8xf32, #tpu.memory_space<vmem>>, vector<1x128x8xf32>
    %683 = vector.shape_cast %682 : vector<1x128x8xf32> to vector<128x8xf32>
    %cst_498 = arith.constant dense<0.000000e+00> : vector<8x8xf32>
    %684 = tpu.matmul %592, %683, %cst_498 {dimension_numbers = #tpu.dot_dimension_numbers<[1], [0], [0], [1], [0, 0, 1, 1], [], []>} : vector<8x128xf32>, vector<128x8xf32>, vector<8x8xf32> -> vector<8x8xf32>
    %cst_499 = arith.constant dense<0.000000e+00> : vector<8x8xf32>
    %685 = tpu.matmul %678, %681, %cst_499 {dimension_numbers = #tpu.dot_dimension_numbers<[1], [1], [0], [0], [0, 0, 1, 0], [], []>} : vector<8x8xf32>, vector<8x8xf32>, vector<8x8xf32> -> vector<8x8xf32>
    %c3_500 = arith.constant 3 : index
    %c0_501 = arith.constant 0 : index
    %c0_502 = arith.constant 0 : index
    %686 = vector.load %arg4[%c3_500, %c0_501, %c0_502] : memref<4x8x8xf32, #tpu.memory_space<vmem>>, vector<1x8x8xf32>
    %687 = vector.shape_cast %686 : vector<1x8x8xf32> to vector<8x8xf32>
    %688 = arith.addf %685, %687 : vector<8x8xf32>
    %cst_503 = arith.constant dense<0xFF800000> : vector<8xf32>
    %689 = vector.multi_reduction <maximumf>, %688, %cst_503 [1] : vector<8x8xf32> to vector<8xf32>
    %690 = vector.shape_cast %689 : vector<8xf32> to vector<8x1xf32>
    %691 = vector.broadcast %690 : vector<8x1xf32> to vector<8x8xf32>
    %692 = arith.subf %688, %691 : vector<8x8xf32>
    %693 = math.exp %692 : vector<8x8xf32>
    %cst_504 = arith.constant dense<0.000000e+00> : vector<8xf32>
    %694 = vector.multi_reduction <add>, %693, %cst_504 [1] : vector<8x8xf32> to vector<8xf32>
    %695 = vector.shape_cast %694 : vector<8xf32> to vector<8x1xf32>
    %696 = tpu.reciprocal %695 {approx = true} : vector<8x1xf32> -> vector<8x1xf32>
    %697 = vector.broadcast %696 : vector<8x1xf32> to vector<8x8xf32>
    %698 = arith.mulf %693, %697 : vector<8x8xf32>
    %cst_505 = arith.constant dense<0.000000e+00> : vector<8x8xf32>
    %699 = tpu.matmul %698, %684, %cst_505 {dimension_numbers = #tpu.dot_dimension_numbers<[1], [0], [0], [1], [0, 0, 1, 1], [], []>} : vector<8x8xf32>, vector<8x8xf32>, vector<8x8xf32> -> vector<8x8xf32>
    %c7_506 = arith.constant 7 : index
    %c0_507 = arith.constant 0 : index
    %c0_508 = arith.constant 0 : index
    %700 = vector.load %arg12[%c7_506, %c0_507, %c0_508] : memref<8x8x128xf32, #tpu.memory_space<vmem>>, vector<1x8x128xf32>
    %701 = vector.shape_cast %700 : vector<1x8x128xf32> to vector<8x128xf32>
    %cst_509 = arith.constant dense<0.000000e+00> : vector<8x128xf32>
    %702 = tpu.matmul %699, %701, %cst_509 {dimension_numbers = #tpu.dot_dimension_numbers<[1], [0], [0], [1], [0, 0, 1, 1], [], []>} : vector<8x8xf32>, vector<8x128xf32>, vector<8x128xf32> -> vector<8x128xf32>
    %703 = arith.addf %675, %702 : vector<8x128xf32>
    %704 = arith.addf %578, %703 : vector<8x128xf32>
    %c4_510 = arith.constant 4 : index
    %c0_511 = arith.constant 0 : index
    %c0_512 = arith.constant 0 : index
    %705 = vector.load %arg10[%c4_510, %c0_511, %c0_512] : memref<6x1x128xf32, #tpu.memory_space<vmem>>, vector<1x1x128xf32>
    %706 = vector.shape_cast %705 : vector<1x1x128xf32> to vector<1x128xf32>
    %707 = arith.mulf %704, %704 : vector<8x128xf32>
    %cst_513 = arith.constant dense<0.000000e+00> : vector<8xf32>
    %708 = vector.multi_reduction <add>, %707, %cst_513 [1] : vector<8x128xf32> to vector<8xf32>
    %709 = vector.shape_cast %708 : vector<8xf32> to vector<8x1xf32>
    %cst_514 = arith.constant 3.125000e-02 : f32
    %710 = vector.broadcast %cst_514 : f32 to vector<8x1xf32>
    %711 = arith.mulf %709, %710 : vector<8x1xf32>
    %cst_515 = arith.constant 9.99999997E-7 : f32
    %712 = vector.broadcast %cst_515 : f32 to vector<8x1xf32>
    %713 = arith.addf %711, %712 : vector<8x1xf32>
    %714 = math.rsqrt %713 : vector<8x1xf32>
    %715 = vector.broadcast %714 : vector<8x1xf32> to vector<8x128xf32>
    %716 = arith.mulf %704, %715 : vector<8x128xf32>
    %717 = vector.broadcast %706 : vector<1x128xf32> to vector<8x128xf32>
    %718 = arith.mulf %716, %717 : vector<8x128xf32>
    %c12_516 = arith.constant 12 : index
    %c0_517 = arith.constant 0 : index
    %c0_518 = arith.constant 0 : index
    %719 = vector.load %arg13[%c12_516, %c0_517, %c0_518] : memref<24x128x8xf32, #tpu.memory_space<vmem>>, vector<1x128x8xf32>
    %720 = vector.shape_cast %719 : vector<1x128x8xf32> to vector<128x8xf32>
    %cst_519 = arith.constant dense<0.000000e+00> : vector<8x8xf32>
    %721 = tpu.matmul %718, %720, %cst_519 {dimension_numbers = #tpu.dot_dimension_numbers<[1], [0], [0], [1], [0, 0, 1, 1], [], []>} : vector<8x128xf32>, vector<128x8xf32>, vector<8x8xf32> -> vector<8x8xf32>
    %c16_520 = arith.constant 16 : index
    %c0_521 = arith.constant 0 : index
    %c0_522 = arith.constant 0 : index
    %722 = vector.load %arg13[%c16_520, %c0_521, %c0_522] : memref<24x128x8xf32, #tpu.memory_space<vmem>>, vector<1x128x8xf32>
    %723 = vector.shape_cast %722 : vector<1x128x8xf32> to vector<128x8xf32>
    %cst_523 = arith.constant dense<0.000000e+00> : vector<8x8xf32>
    %724 = tpu.matmul %313, %723, %cst_523 {dimension_numbers = #tpu.dot_dimension_numbers<[1], [0], [0], [1], [0, 0, 1, 1], [], []>} : vector<8x128xf32>, vector<128x8xf32>, vector<8x8xf32> -> vector<8x8xf32>
    %c20_524 = arith.constant 20 : index
    %c0_525 = arith.constant 0 : index
    %c0_526 = arith.constant 0 : index
    %725 = vector.load %arg13[%c20_524, %c0_525, %c0_526] : memref<24x128x8xf32, #tpu.memory_space<vmem>>, vector<1x128x8xf32>
    %726 = vector.shape_cast %725 : vector<1x128x8xf32> to vector<128x8xf32>
    %cst_527 = arith.constant dense<0.000000e+00> : vector<8x8xf32>
    %727 = tpu.matmul %313, %726, %cst_527 {dimension_numbers = #tpu.dot_dimension_numbers<[1], [0], [0], [1], [0, 0, 1, 1], [], []>} : vector<8x128xf32>, vector<128x8xf32>, vector<8x8xf32> -> vector<8x8xf32>
    %cst_528 = arith.constant dense<0.000000e+00> : vector<8x8xf32>
    %728 = tpu.matmul %721, %724, %cst_528 {dimension_numbers = #tpu.dot_dimension_numbers<[1], [1], [0], [0], [0, 0, 1, 0], [], []>} : vector<8x8xf32>, vector<8x8xf32>, vector<8x8xf32> -> vector<8x8xf32>
    %cst_529 = arith.constant dense<0xFF800000> : vector<8xf32>
    %729 = vector.multi_reduction <maximumf>, %728, %cst_529 [1] : vector<8x8xf32> to vector<8xf32>
    %730 = vector.shape_cast %729 : vector<8xf32> to vector<8x1xf32>
    %731 = vector.broadcast %730 : vector<8x1xf32> to vector<8x8xf32>
    %732 = arith.subf %728, %731 : vector<8x8xf32>
    %733 = math.exp %732 : vector<8x8xf32>
    %cst_530 = arith.constant dense<0.000000e+00> : vector<8xf32>
    %734 = vector.multi_reduction <add>, %733, %cst_530 [1] : vector<8x8xf32> to vector<8xf32>
    %735 = vector.shape_cast %734 : vector<8xf32> to vector<8x1xf32>
    %736 = tpu.reciprocal %735 {approx = true} : vector<8x1xf32> -> vector<8x1xf32>
    %737 = vector.broadcast %736 : vector<8x1xf32> to vector<8x8xf32>
    %738 = arith.mulf %733, %737 : vector<8x8xf32>
    %cst_531 = arith.constant dense<0.000000e+00> : vector<8x8xf32>
    %739 = tpu.matmul %738, %727, %cst_531 {dimension_numbers = #tpu.dot_dimension_numbers<[1], [0], [0], [1], [0, 0, 1, 1], [], []>} : vector<8x8xf32>, vector<8x8xf32>, vector<8x8xf32> -> vector<8x8xf32>
    %c4_532 = arith.constant 4 : index
    %c0_533 = arith.constant 0 : index
    %c0_534 = arith.constant 0 : index
    %740 = vector.load %arg14[%c4_532, %c0_533, %c0_534] : memref<8x8x128xf32, #tpu.memory_space<vmem>>, vector<1x8x128xf32>
    %741 = vector.shape_cast %740 : vector<1x8x128xf32> to vector<8x128xf32>
    %cst_535 = arith.constant dense<0.000000e+00> : vector<8x128xf32>
    %742 = tpu.matmul %739, %741, %cst_535 {dimension_numbers = #tpu.dot_dimension_numbers<[1], [0], [0], [1], [0, 0, 1, 1], [], []>} : vector<8x8xf32>, vector<8x128xf32>, vector<8x128xf32> -> vector<8x128xf32>
    %c13_536 = arith.constant 13 : index
    %c0_537 = arith.constant 0 : index
    %c0_538 = arith.constant 0 : index
    %743 = vector.load %arg13[%c13_536, %c0_537, %c0_538] : memref<24x128x8xf32, #tpu.memory_space<vmem>>, vector<1x128x8xf32>
    %744 = vector.shape_cast %743 : vector<1x128x8xf32> to vector<128x8xf32>
    %cst_539 = arith.constant dense<0.000000e+00> : vector<8x8xf32>
    %745 = tpu.matmul %718, %744, %cst_539 {dimension_numbers = #tpu.dot_dimension_numbers<[1], [0], [0], [1], [0, 0, 1, 1], [], []>} : vector<8x128xf32>, vector<128x8xf32>, vector<8x8xf32> -> vector<8x8xf32>
    %c17_540 = arith.constant 17 : index
    %c0_541 = arith.constant 0 : index
    %c0_542 = arith.constant 0 : index
    %746 = vector.load %arg13[%c17_540, %c0_541, %c0_542] : memref<24x128x8xf32, #tpu.memory_space<vmem>>, vector<1x128x8xf32>
    %747 = vector.shape_cast %746 : vector<1x128x8xf32> to vector<128x8xf32>
    %cst_543 = arith.constant dense<0.000000e+00> : vector<8x8xf32>
    %748 = tpu.matmul %313, %747, %cst_543 {dimension_numbers = #tpu.dot_dimension_numbers<[1], [0], [0], [1], [0, 0, 1, 1], [], []>} : vector<8x128xf32>, vector<128x8xf32>, vector<8x8xf32> -> vector<8x8xf32>
    %c21_544 = arith.constant 21 : index
    %c0_545 = arith.constant 0 : index
    %c0_546 = arith.constant 0 : index
    %749 = vector.load %arg13[%c21_544, %c0_545, %c0_546] : memref<24x128x8xf32, #tpu.memory_space<vmem>>, vector<1x128x8xf32>
    %750 = vector.shape_cast %749 : vector<1x128x8xf32> to vector<128x8xf32>
    %cst_547 = arith.constant dense<0.000000e+00> : vector<8x8xf32>
    %751 = tpu.matmul %313, %750, %cst_547 {dimension_numbers = #tpu.dot_dimension_numbers<[1], [0], [0], [1], [0, 0, 1, 1], [], []>} : vector<8x128xf32>, vector<128x8xf32>, vector<8x8xf32> -> vector<8x8xf32>
    %cst_548 = arith.constant dense<0.000000e+00> : vector<8x8xf32>
    %752 = tpu.matmul %745, %748, %cst_548 {dimension_numbers = #tpu.dot_dimension_numbers<[1], [1], [0], [0], [0, 0, 1, 0], [], []>} : vector<8x8xf32>, vector<8x8xf32>, vector<8x8xf32> -> vector<8x8xf32>
    %cst_549 = arith.constant dense<0xFF800000> : vector<8xf32>
    %753 = vector.multi_reduction <maximumf>, %752, %cst_549 [1] : vector<8x8xf32> to vector<8xf32>
    %754 = vector.shape_cast %753 : vector<8xf32> to vector<8x1xf32>
    %755 = vector.broadcast %754 : vector<8x1xf32> to vector<8x8xf32>
    %756 = arith.subf %752, %755 : vector<8x8xf32>
    %757 = math.exp %756 : vector<8x8xf32>
    %cst_550 = arith.constant dense<0.000000e+00> : vector<8xf32>
    %758 = vector.multi_reduction <add>, %757, %cst_550 [1] : vector<8x8xf32> to vector<8xf32>
    %759 = vector.shape_cast %758 : vector<8xf32> to vector<8x1xf32>
    %760 = tpu.reciprocal %759 {approx = true} : vector<8x1xf32> -> vector<8x1xf32>
    %761 = vector.broadcast %760 : vector<8x1xf32> to vector<8x8xf32>
    %762 = arith.mulf %757, %761 : vector<8x8xf32>
    %cst_551 = arith.constant dense<0.000000e+00> : vector<8x8xf32>
    %763 = tpu.matmul %762, %751, %cst_551 {dimension_numbers = #tpu.dot_dimension_numbers<[1], [0], [0], [1], [0, 0, 1, 1], [], []>} : vector<8x8xf32>, vector<8x8xf32>, vector<8x8xf32> -> vector<8x8xf32>
    %c5_552 = arith.constant 5 : index
    %c0_553 = arith.constant 0 : index
    %c0_554 = arith.constant 0 : index
    %764 = vector.load %arg14[%c5_552, %c0_553, %c0_554] : memref<8x8x128xf32, #tpu.memory_space<vmem>>, vector<1x8x128xf32>
    %765 = vector.shape_cast %764 : vector<1x8x128xf32> to vector<8x128xf32>
    %cst_555 = arith.constant dense<0.000000e+00> : vector<8x128xf32>
    %766 = tpu.matmul %763, %765, %cst_555 {dimension_numbers = #tpu.dot_dimension_numbers<[1], [0], [0], [1], [0, 0, 1, 1], [], []>} : vector<8x8xf32>, vector<8x128xf32>, vector<8x128xf32> -> vector<8x128xf32>
    %767 = arith.addf %742, %766 : vector<8x128xf32>
    %c14_556 = arith.constant 14 : index
    %c0_557 = arith.constant 0 : index
    %c0_558 = arith.constant 0 : index
    %768 = vector.load %arg13[%c14_556, %c0_557, %c0_558] : memref<24x128x8xf32, #tpu.memory_space<vmem>>, vector<1x128x8xf32>
    %769 = vector.shape_cast %768 : vector<1x128x8xf32> to vector<128x8xf32>
    %cst_559 = arith.constant dense<0.000000e+00> : vector<8x8xf32>
    %770 = tpu.matmul %718, %769, %cst_559 {dimension_numbers = #tpu.dot_dimension_numbers<[1], [0], [0], [1], [0, 0, 1, 1], [], []>} : vector<8x128xf32>, vector<128x8xf32>, vector<8x8xf32> -> vector<8x8xf32>
    %c18_560 = arith.constant 18 : index
    %c0_561 = arith.constant 0 : index
    %c0_562 = arith.constant 0 : index
    %771 = vector.load %arg13[%c18_560, %c0_561, %c0_562] : memref<24x128x8xf32, #tpu.memory_space<vmem>>, vector<1x128x8xf32>
    %772 = vector.shape_cast %771 : vector<1x128x8xf32> to vector<128x8xf32>
    %cst_563 = arith.constant dense<0.000000e+00> : vector<8x8xf32>
    %773 = tpu.matmul %313, %772, %cst_563 {dimension_numbers = #tpu.dot_dimension_numbers<[1], [0], [0], [1], [0, 0, 1, 1], [], []>} : vector<8x128xf32>, vector<128x8xf32>, vector<8x8xf32> -> vector<8x8xf32>
    %c22_564 = arith.constant 22 : index
    %c0_565 = arith.constant 0 : index
    %c0_566 = arith.constant 0 : index
    %774 = vector.load %arg13[%c22_564, %c0_565, %c0_566] : memref<24x128x8xf32, #tpu.memory_space<vmem>>, vector<1x128x8xf32>
    %775 = vector.shape_cast %774 : vector<1x128x8xf32> to vector<128x8xf32>
    %cst_567 = arith.constant dense<0.000000e+00> : vector<8x8xf32>
    %776 = tpu.matmul %313, %775, %cst_567 {dimension_numbers = #tpu.dot_dimension_numbers<[1], [0], [0], [1], [0, 0, 1, 1], [], []>} : vector<8x128xf32>, vector<128x8xf32>, vector<8x8xf32> -> vector<8x8xf32>
    %cst_568 = arith.constant dense<0.000000e+00> : vector<8x8xf32>
    %777 = tpu.matmul %770, %773, %cst_568 {dimension_numbers = #tpu.dot_dimension_numbers<[1], [1], [0], [0], [0, 0, 1, 0], [], []>} : vector<8x8xf32>, vector<8x8xf32>, vector<8x8xf32> -> vector<8x8xf32>
    %cst_569 = arith.constant dense<0xFF800000> : vector<8xf32>
    %778 = vector.multi_reduction <maximumf>, %777, %cst_569 [1] : vector<8x8xf32> to vector<8xf32>
    %779 = vector.shape_cast %778 : vector<8xf32> to vector<8x1xf32>
    %780 = vector.broadcast %779 : vector<8x1xf32> to vector<8x8xf32>
    %781 = arith.subf %777, %780 : vector<8x8xf32>
    %782 = math.exp %781 : vector<8x8xf32>
    %cst_570 = arith.constant dense<0.000000e+00> : vector<8xf32>
    %783 = vector.multi_reduction <add>, %782, %cst_570 [1] : vector<8x8xf32> to vector<8xf32>
    %784 = vector.shape_cast %783 : vector<8xf32> to vector<8x1xf32>
    %785 = tpu.reciprocal %784 {approx = true} : vector<8x1xf32> -> vector<8x1xf32>
    %786 = vector.broadcast %785 : vector<8x1xf32> to vector<8x8xf32>
    %787 = arith.mulf %782, %786 : vector<8x8xf32>
    %cst_571 = arith.constant dense<0.000000e+00> : vector<8x8xf32>
    %788 = tpu.matmul %787, %776, %cst_571 {dimension_numbers = #tpu.dot_dimension_numbers<[1], [0], [0], [1], [0, 0, 1, 1], [], []>} : vector<8x8xf32>, vector<8x8xf32>, vector<8x8xf32> -> vector<8x8xf32>
    %c6_572 = arith.constant 6 : index
    %c0_573 = arith.constant 0 : index
    %c0_574 = arith.constant 0 : index
    %789 = vector.load %arg14[%c6_572, %c0_573, %c0_574] : memref<8x8x128xf32, #tpu.memory_space<vmem>>, vector<1x8x128xf32>
    %790 = vector.shape_cast %789 : vector<1x8x128xf32> to vector<8x128xf32>
    %cst_575 = arith.constant dense<0.000000e+00> : vector<8x128xf32>
    %791 = tpu.matmul %788, %790, %cst_575 {dimension_numbers = #tpu.dot_dimension_numbers<[1], [0], [0], [1], [0, 0, 1, 1], [], []>} : vector<8x8xf32>, vector<8x128xf32>, vector<8x128xf32> -> vector<8x128xf32>
    %792 = arith.addf %767, %791 : vector<8x128xf32>
    %c15_576 = arith.constant 15 : index
    %c0_577 = arith.constant 0 : index
    %c0_578 = arith.constant 0 : index
    %793 = vector.load %arg13[%c15_576, %c0_577, %c0_578] : memref<24x128x8xf32, #tpu.memory_space<vmem>>, vector<1x128x8xf32>
    %794 = vector.shape_cast %793 : vector<1x128x8xf32> to vector<128x8xf32>
    %cst_579 = arith.constant dense<0.000000e+00> : vector<8x8xf32>
    %795 = tpu.matmul %718, %794, %cst_579 {dimension_numbers = #tpu.dot_dimension_numbers<[1], [0], [0], [1], [0, 0, 1, 1], [], []>} : vector<8x128xf32>, vector<128x8xf32>, vector<8x8xf32> -> vector<8x8xf32>
    %c19_580 = arith.constant 19 : index
    %c0_581 = arith.constant 0 : index
    %c0_582 = arith.constant 0 : index
    %796 = vector.load %arg13[%c19_580, %c0_581, %c0_582] : memref<24x128x8xf32, #tpu.memory_space<vmem>>, vector<1x128x8xf32>
    %797 = vector.shape_cast %796 : vector<1x128x8xf32> to vector<128x8xf32>
    %cst_583 = arith.constant dense<0.000000e+00> : vector<8x8xf32>
    %798 = tpu.matmul %313, %797, %cst_583 {dimension_numbers = #tpu.dot_dimension_numbers<[1], [0], [0], [1], [0, 0, 1, 1], [], []>} : vector<8x128xf32>, vector<128x8xf32>, vector<8x8xf32> -> vector<8x8xf32>
    %c23_584 = arith.constant 23 : index
    %c0_585 = arith.constant 0 : index
    %c0_586 = arith.constant 0 : index
    %799 = vector.load %arg13[%c23_584, %c0_585, %c0_586] : memref<24x128x8xf32, #tpu.memory_space<vmem>>, vector<1x128x8xf32>
    %800 = vector.shape_cast %799 : vector<1x128x8xf32> to vector<128x8xf32>
    %cst_587 = arith.constant dense<0.000000e+00> : vector<8x8xf32>
    %801 = tpu.matmul %313, %800, %cst_587 {dimension_numbers = #tpu.dot_dimension_numbers<[1], [0], [0], [1], [0, 0, 1, 1], [], []>} : vector<8x128xf32>, vector<128x8xf32>, vector<8x8xf32> -> vector<8x8xf32>
    %cst_588 = arith.constant dense<0.000000e+00> : vector<8x8xf32>
    %802 = tpu.matmul %795, %798, %cst_588 {dimension_numbers = #tpu.dot_dimension_numbers<[1], [1], [0], [0], [0, 0, 1, 0], [], []>} : vector<8x8xf32>, vector<8x8xf32>, vector<8x8xf32> -> vector<8x8xf32>
    %cst_589 = arith.constant dense<0xFF800000> : vector<8xf32>
    %803 = vector.multi_reduction <maximumf>, %802, %cst_589 [1] : vector<8x8xf32> to vector<8xf32>
    %804 = vector.shape_cast %803 : vector<8xf32> to vector<8x1xf32>
    %805 = vector.broadcast %804 : vector<8x1xf32> to vector<8x8xf32>
    %806 = arith.subf %802, %805 : vector<8x8xf32>
    %807 = math.exp %806 : vector<8x8xf32>
    %cst_590 = arith.constant dense<0.000000e+00> : vector<8xf32>
    %808 = vector.multi_reduction <add>, %807, %cst_590 [1] : vector<8x8xf32> to vector<8xf32>
    %809 = vector.shape_cast %808 : vector<8xf32> to vector<8x1xf32>
    %810 = tpu.reciprocal %809 {approx = true} : vector<8x1xf32> -> vector<8x1xf32>
    %811 = vector.broadcast %810 : vector<8x1xf32> to vector<8x8xf32>
    %812 = arith.mulf %807, %811 : vector<8x8xf32>
    %cst_591 = arith.constant dense<0.000000e+00> : vector<8x8xf32>
    %813 = tpu.matmul %812, %801, %cst_591 {dimension_numbers = #tpu.dot_dimension_numbers<[1], [0], [0], [1], [0, 0, 1, 1], [], []>} : vector<8x8xf32>, vector<8x8xf32>, vector<8x8xf32> -> vector<8x8xf32>
    %c7_592 = arith.constant 7 : index
    %c0_593 = arith.constant 0 : index
    %c0_594 = arith.constant 0 : index
    %814 = vector.load %arg14[%c7_592, %c0_593, %c0_594] : memref<8x8x128xf32, #tpu.memory_space<vmem>>, vector<1x8x128xf32>
    %815 = vector.shape_cast %814 : vector<1x8x128xf32> to vector<8x128xf32>
    %cst_595 = arith.constant dense<0.000000e+00> : vector<8x128xf32>
    %816 = tpu.matmul %813, %815, %cst_595 {dimension_numbers = #tpu.dot_dimension_numbers<[1], [0], [0], [1], [0, 0, 1, 1], [], []>} : vector<8x8xf32>, vector<8x128xf32>, vector<8x128xf32> -> vector<8x128xf32>
    %817 = arith.addf %792, %816 : vector<8x128xf32>
    %818 = arith.addf %704, %817 : vector<8x128xf32>
    %c5_596 = arith.constant 5 : index
    %c0_597 = arith.constant 0 : index
    %c0_598 = arith.constant 0 : index
    %819 = vector.load %arg10[%c5_596, %c0_597, %c0_598] : memref<6x1x128xf32, #tpu.memory_space<vmem>>, vector<1x1x128xf32>
    %820 = vector.shape_cast %819 : vector<1x1x128xf32> to vector<1x128xf32>
    %821 = arith.mulf %818, %818 : vector<8x128xf32>
    %cst_599 = arith.constant dense<0.000000e+00> : vector<8xf32>
    %822 = vector.multi_reduction <add>, %821, %cst_599 [1] : vector<8x128xf32> to vector<8xf32>
    %823 = vector.shape_cast %822 : vector<8xf32> to vector<8x1xf32>
    %cst_600 = arith.constant 3.125000e-02 : f32
    %824 = vector.broadcast %cst_600 : f32 to vector<8x1xf32>
    %825 = arith.mulf %823, %824 : vector<8x1xf32>
    %cst_601 = arith.constant 9.99999997E-7 : f32
    %826 = vector.broadcast %cst_601 : f32 to vector<8x1xf32>
    %827 = arith.addf %825, %826 : vector<8x1xf32>
    %828 = math.rsqrt %827 : vector<8x1xf32>
    %829 = vector.broadcast %828 : vector<8x1xf32> to vector<8x128xf32>
    %830 = arith.mulf %818, %829 : vector<8x128xf32>
    %831 = vector.broadcast %820 : vector<1x128xf32> to vector<8x128xf32>
    %832 = arith.mulf %830, %831 : vector<8x128xf32>
    %c1_602 = arith.constant 1 : index
    %c0_603 = arith.constant 0 : index
    %c0_604 = arith.constant 0 : index
    %833 = vector.load %arg15[%c1_602, %c0_603, %c0_604] : memref<2x128x128xf32, #tpu.memory_space<vmem>>, vector<1x128x128xf32>
    %834 = vector.shape_cast %833 : vector<1x128x128xf32> to vector<128x128xf32>
    %cst_605 = arith.constant dense<0.000000e+00> : vector<8x128xf32>
    %835 = tpu.matmul %832, %834, %cst_605 {dimension_numbers = #tpu.dot_dimension_numbers<[1], [0], [0], [1], [0, 0, 1, 1], [], []>} : vector<8x128xf32>, vector<128x128xf32>, vector<8x128xf32> -> vector<8x128xf32>
    %cst_606 = arith.constant 0.000000e+00 : f32
    %836 = vector.broadcast %cst_606 : f32 to vector<8x128xf32>
    %837 = arith.maximumf %835, %836 : vector<8x128xf32>
    %c1_607 = arith.constant 1 : index
    %c0_608 = arith.constant 0 : index
    %c0_609 = arith.constant 0 : index
    %838 = vector.load %arg16[%c1_607, %c0_608, %c0_609] : memref<2x128x128xf32, #tpu.memory_space<vmem>>, vector<1x128x128xf32>
    %839 = vector.shape_cast %838 : vector<1x128x128xf32> to vector<128x128xf32>
    %cst_610 = arith.constant dense<0.000000e+00> : vector<8x128xf32>
    %840 = tpu.matmul %837, %839, %cst_610 {dimension_numbers = #tpu.dot_dimension_numbers<[1], [0], [0], [1], [0, 0, 1, 1], [], []>} : vector<8x128xf32>, vector<128x128xf32>, vector<8x128xf32> -> vector<8x128xf32>
    %841 = arith.addf %818, %840 : vector<8x128xf32>
    %c1_611 = arith.constant 1 : index
    %c0_612 = arith.constant 0 : index
    %c0_613 = arith.constant 0 : index
    %842 = vector.load %arg17[%c1_611, %c0_612, %c0_613] : memref<2x1x128xf32, #tpu.memory_space<vmem>>, vector<1x1x128xf32>
    %843 = vector.shape_cast %842 : vector<1x1x128xf32> to vector<1x128xf32>
    %844 = arith.mulf %841, %841 : vector<8x128xf32>
    %cst_614 = arith.constant dense<0.000000e+00> : vector<8xf32>
    %845 = vector.multi_reduction <add>, %844, %cst_614 [1] : vector<8x128xf32> to vector<8xf32>
    %846 = vector.shape_cast %845 : vector<8xf32> to vector<8x1xf32>
    %cst_615 = arith.constant 3.125000e-02 : f32
    %847 = vector.broadcast %cst_615 : f32 to vector<8x1xf32>
    %848 = arith.mulf %846, %847 : vector<8x1xf32>
    %cst_616 = arith.constant 9.99999997E-7 : f32
    %849 = vector.broadcast %cst_616 : f32 to vector<8x1xf32>
    %850 = arith.addf %848, %849 : vector<8x1xf32>
    %851 = math.rsqrt %850 : vector<8x1xf32>
    %852 = vector.broadcast %851 : vector<8x1xf32> to vector<8x128xf32>
    %853 = arith.mulf %841, %852 : vector<8x128xf32>
    %854 = vector.broadcast %843 : vector<1x128xf32> to vector<8x128xf32>
    %855 = arith.mulf %853, %854 : vector<8x128xf32>
    %c0_617 = arith.constant 0 : index
    %c0_618 = arith.constant 0 : index
    %856 = vector.load %arg18[%c0_617, %c0_618] : memref<128x128xf32, #tpu.memory_space<vmem>>, vector<128x128xf32>
    %cst_619 = arith.constant dense<0.000000e+00> : vector<8x128xf32>
    %857 = tpu.matmul %855, %856, %cst_619 {dimension_numbers = #tpu.dot_dimension_numbers<[1], [0], [0], [1], [0, 0, 1, 1], [], []>} : vector<8x128xf32>, vector<128x128xf32>, vector<8x128xf32> -> vector<8x128xf32>
    %c0_620 = arith.constant 0 : index
    %c0_621 = arith.constant 0 : index
    %c0_622 = arith.constant 0 : index
    %858 = vector.load %arg19[%c0_620, %c0_621, %c0_622] : memref<1x8x128xf32, #tpu.memory_space<vmem>>, vector<1x8x128xf32>
    %859 = vector.shape_cast %858 : vector<1x8x128xf32> to vector<8x128xf32>
    %860 = vector.shape_cast %857 : vector<8x128xf32> to vector<1x8x128xf32>
    tpu.vector_store %arg19[%c0_620, %c0_621, %c0_622], %860 {strides = array<i32>} : memref<1x8x128xf32, #tpu.memory_space<vmem>>, vector<1x8x128xf32>,
    return
  }
  func.func @transform_0(%arg0: i32) -> (i32, i32, i32) {
    %c0_i32 = arith.constant 0 : i32
    %c0_i32_0 = arith.constant 0 : i32
    %c0_i32_1 = arith.constant 0 : i32
    return %arg0, %c0_i32, %c0_i32_0 : i32, i32, i32
  }
  func.func @transform_1(%arg0: i32) -> (i32, i32, i32) {
    %c0_i32 = arith.constant 0 : i32
    %c0_i32_0 = arith.constant 0 : i32
    %c0_i32_1 = arith.constant 0 : i32
    return %arg0, %c0_i32, %c0_i32_0 : i32, i32, i32
  }
  func.func @transform_2(%arg0: i32) -> (i32, i32, i32) {
    %c0_i32 = arith.constant 0 : i32
    %c0_i32_0 = arith.constant 0 : i32
    %c0_i32_1 = arith.constant 0 : i32
    %c0_i32_2 = arith.constant 0 : i32
    return %c0_i32, %c0_i32_0, %c0_i32_1 : i32, i32, i32
  }
  func.func @transform_3(%arg0: i32) -> (i32, i32, i32) {
    %c0_i32 = arith.constant 0 : i32
    %c0_i32_0 = arith.constant 0 : i32
    %c0_i32_1 = arith.constant 0 : i32
    %c0_i32_2 = arith.constant 0 : i32
    return %c0_i32, %c0_i32_0, %c0_i32_1 : i32, i32, i32
  }
  func.func @transform_4(%arg0: i32) -> (i32, i32, i32) {
    %c0_i32 = arith.constant 0 : i32
    %c0_i32_0 = arith.constant 0 : i32
    %c0_i32_1 = arith.constant 0 : i32
    %c0_i32_2 = arith.constant 0 : i32
    return %c0_i32, %c0_i32_0, %c0_i32_1 : i32, i32, i32
  }
  func.func @transform_5(%arg0: i32) -> (i32, i32, i32) {
    %c0_i32 = arith.constant 0 : i32
    %c0_i32_0 = arith.constant 0 : i32
    %c0_i32_1 = arith.constant 0 : i32
    %c0_i32_2 = arith.constant 0 : i32
    return %c0_i32, %c0_i32_0, %c0_i32_1 : i32, i32, i32
  }
  func.func @transform_6(%arg0: i32) -> (i32, i32, i32) {
    %c0_i32 = arith.constant 0 : i32
    %c0_i32_0 = arith.constant 0 : i32
    %c0_i32_1 = arith.constant 0 : i32
    %c0_i32_2 = arith.constant 0 : i32
    return %c0_i32, %c0_i32_0, %c0_i32_1 : i32, i32, i32
  }
  func.func @transform_7(%arg0: i32) -> (i32, i32, i32) {
    %c0_i32 = arith.constant 0 : i32
    %c0_i32_0 = arith.constant 0 : i32
    %c0_i32_1 = arith.constant 0 : i32
    %c0_i32_2 = arith.constant 0 : i32
    return %c0_i32, %c0_i32_0, %c0_i32_1 : i32, i32, i32
  }
  func.func @transform_8(%arg0: i32) -> (i32, i32, i32) {
    %c0_i32 = arith.constant 0 : i32
    %c0_i32_0 = arith.constant 0 : i32
    %c0_i32_1 = arith.constant 0 : i32
    %c0_i32_2 = arith.constant 0 : i32
    return %c0_i32, %c0_i32_0, %c0_i32_1 : i32, i32, i32
  }
  func.func @transform_9(%arg0: i32) -> (i32, i32, i32) {
    %c0_i32 = arith.constant 0 : i32
    %c0_i32_0 = arith.constant 0 : i32
    %c0_i32_1 = arith.constant 0 : i32
    %c0_i32_2 = arith.constant 0 : i32
    return %c0_i32, %c0_i32_0, %c0_i32_1 : i32, i32, i32
  }
  func.func @transform_10(%arg0: i32) -> (i32, i32, i32) {
    %c0_i32 = arith.constant 0 : i32
    %c0_i32_0 = arith.constant 0 : i32
    %c0_i32_1 = arith.constant 0 : i32
    %c0_i32_2 = arith.constant 0 : i32
    return %c0_i32, %c0_i32_0, %c0_i32_1 : i32, i32, i32
  }
  func.func @transform_11(%arg0: i32) -> (i32, i32, i32) {
    %c0_i32 = arith.constant 0 : i32
    %c0_i32_0 = arith.constant 0 : i32
    %c0_i32_1 = arith.constant 0 : i32
    %c0_i32_2 = arith.constant 0 : i32
    return %c0_i32, %c0_i32_0, %c0_i32_1 : i32, i32, i32
  }
  func.func @transform_12(%arg0: i32) -> (i32, i32, i32) {
    %c0_i32 = arith.constant 0 : i32
    %c0_i32_0 = arith.constant 0 : i32
    %c0_i32_1 = arith.constant 0 : i32
    %c0_i32_2 = arith.constant 0 : i32
    return %c0_i32, %c0_i32_0, %c0_i32_1 : i32, i32, i32
  }
  func.func @transform_13(%arg0: i32) -> (i32, i32, i32) {
    %c0_i32 = arith.constant 0 : i32
    %c0_i32_0 = arith.constant 0 : i32
    %c0_i32_1 = arith.constant 0 : i32
    %c0_i32_2 = arith.constant 0 : i32
    return %c0_i32, %c0_i32_0, %c0_i32_1 : i32, i32, i32
  }
  func.func @transform_14(%arg0: i32) -> (i32, i32, i32) {
    %c0_i32 = arith.constant 0 : i32
    %c0_i32_0 = arith.constant 0 : i32
    %c0_i32_1 = arith.constant 0 : i32
    %c0_i32_2 = arith.constant 0 : i32
    return %c0_i32, %c0_i32_0, %c0_i32_1 : i32, i32, i32
  }
  func.func @transform_15(%arg0: i32) -> (i32, i32, i32) {
    %c0_i32 = arith.constant 0 : i32
    %c0_i32_0 = arith.constant 0 : i32
    %c0_i32_1 = arith.constant 0 : i32
    %c0_i32_2 = arith.constant 0 : i32
    return %c0_i32, %c0_i32_0, %c0_i32_1 : i32, i32, i32
  }
  func.func @transform_16(%arg0: i32) -> (i32, i32, i32) {
    %c0_i32 = arith.constant 0 : i32
    %c0_i32_0 = arith.constant 0 : i32
    %c0_i32_1 = arith.constant 0 : i32
    %c0_i32_2 = arith.constant 0 : i32
    return %c0_i32, %c0_i32_0, %c0_i32_1 : i32, i32, i32
  }
  func.func @transform_17(%arg0: i32) -> (i32, i32) {
    %c0_i32 = arith.constant 0 : i32
    %c0_i32_0 = arith.constant 0 : i32
    %c0_i32_1 = arith.constant 0 : i32
    return %c0_i32, %c0_i32_0 : i32, i32
  }
  func.func @transform_18(%arg0: i32) -> (i32, i32, i32) {
    %c0_i32 = arith.constant 0 : i32
    %c0_i32_0 = arith.constant 0 : i32
    %c0_i32_1 = arith.constant 0 : i32
    return %arg0, %c0_i32, %c0_i32_0 : i32, i32, i32
  }
}

</mosaic_0001>

<bundles_post_ra>
// kernel: t5_forward.1
= control target key start
LH: loop header
LB: loop body
LE: loop exit
PB: predicated region body
PF: predicated region fallthrough
CT: control target
= control target key end

     0   :  { %s27427_s0 = inlined_call_operand.vmem [shape: f32[2,8,128], index: 0, kind: input, shape index: {}]   ;;  %s27428_s1 = inlined_call_operand.vmem [shape: f32[2,8,128], index: 1, kind: input, shape index: {}]   ;;  %s27429_s2 = inlined_call_operand.vmem [shape: f32[4,8,8], index: 2, kind: input, shape index: {}]   ;;  %s27430_s3 = inlined_call_operand.vmem [shape: f32[4,8,8], index: 3, kind: input, shape index: {}]   ;;  %s27431_s4 = inlined_call_operand.vmem [shape: f32[4,1,128], index: 4, kind: input, shape index: {}]   ;;  %s27432_s5 = inlined_call_operand.vmem [shape: f32[24,128,8], index: 5, kind: input, shape index: {}]   ;;  %s27433_s6 = inlined_call_operand.vmem [shape: f32[8,8,128], index: 6, kind: input, shape index: {}]   ;;  %s27434_s7 = inlined_call_operand.vmem [shape: f32[2,128,128], index: 7, kind: input, shape index: {}]   ;;  %s27435_s8 = inlined_call_operand.vmem [shape: f32[2,128,128], index: 8, kind: input, shape index: {}]   ;;  %s27436_s9 = inlined_call_operand.vmem [shape: f32[6,1,128], index: 9, kind: input, shape index: {}]   ;;  %s27437_s10 = inlined_call_operand.vmem [shape: f32[24,128,8], index: 10, kind: input, shape index: {}]   ;;  %s27438_s11 = inlined_call_operand.vmem [shape: f32[8,8,128], index: 11, kind: input, shape index: {}]   ;;  %s27439_s12 = inlined_call_operand.vmem [shape: f32[24,128,8], index: 12, kind: input, shape index: {}]   ;;  %s27440_s13 = inlined_call_operand.vmem [shape: f32[8,8,128], index: 13, kind: input, shape index: {}]   ;;  %s27441_s14 = inlined_call_operand.vmem [shape: f32[2,128,128], index: 14, kind: input, shape index: {}]   ;;  %s27442_s15 = inlined_call_operand.vmem [shape: f32[2,128,128], index: 15, kind: input, shape index: {}]   ;;  %s27443_s16 = inlined_call_operand.vmem [shape: f32[2,1,128], index: 16, kind: input, shape index: {}]   ;;  %s27444_s17 = inlined_call_operand.vmem [shape: f32[128,128], index: 17, kind: input, shape index: {}]   ;;  %s27445_s18 = inlined_call_operand.hbm [shape: f32[2,8,128], index: 18, kind: output, shape index: {}]  }
   0x1   :  { %27455 = sst [smem:[#allocation11_spill]] %s27427_s0 }
   0x2   :  { %27456 = sst [smem:[#allocation12_spill]] %s27428_s1 }
   0x3   :  { %27457 = sst [smem:[#allocation13_spill]] %s27429_s2 }
   0x4   :  { %27458 = sst [smem:[#allocation14_spill]] %s27445_s18 }
   0x5   :  { %23 = vsyncpa [#allocation3], 0 }
   0x6   :  { %25 = vsyncpa [#allocation3 + $0x1], 0  ;;  %s21900_s27 = smov 0   ;;  %s21902_s28 = smov 0  }
   0x7   :  { %s21904_s29 = smov 0   ;;  %s21906_s30 = smov 0  }
   0x8 LB: > { %27459 = sst [smem:[#allocation5_spill]] %s21787_s27  ;;  %s21921_s0 = sadd.s32 4294967295, %s21799_s30   ;;  %s21799_s30 = sphi %s21906_s30, %s27475_s30   ;;  %s21795_s29 = sphi %s21904_s29, %s27480_s29   ;;  %s21791_s28 = sphi %s21902_s28, %s27479_s28   ;;  %s21787_s27 = sphi %s21900_s27, %s27478_s27  }
   0x9   : > { %27460 = sst [smem:[#allocation6_spill]] %s21795_s29  ;;  %s13582_s19 = sadd.s32 4294967294, %s21799_s30  }
   0xa   : > { %27461 = sst [smem:[#allocation7_spill]] %s21799_s30  ;;  %s21925_s1 = sadd.s32 1, %s21799_s30  }
   0xb   : > { %27462 = sst [smem:[#allocation8_spill]] %s21925_s1  ;;  %s426_s20 = sadd.s32 1, %s21795_s29 }
   0xc   : > { %s423_s21 = ssub.s32 %s21799_s30, %s21925_s1  ;;  %p436_p0 = scmp.ne.s32.totalorder %s21795_s29, %s21791_s28 }
   0xd   : > { %p424_p1 = scmp.eq.s32.totalorder %s423_s21, 0  ;;  %p437_p2 = scmp.eq.s32.totalorder %s21921_s0, 1 }
   0xe   : > { %p442_p3 = scmp.ne.s32.totalorder %s21791_s28, %s21787_s27  ;;  %p443_p4 = scmp.eq.s32.totalorder %s13582_s19, 1 }
   0xf   : > { %s21936_s22 = scalar_select %p424_p1, %s21795_s29, %s426_s20  }
  0x10   : > { %p21938_p5 = por %p437_p2, %p436_p0  ;;  %p21942_p6 = por %p443_p4, %p442_p3 }
  0x11   : > { %27463 = sst [smem:[#allocation9_spill]] %s21936_s22  ;;  %p13585_p7 = scmp.ge.s32.totalorder %s21799_s30, 1 }
  0x12   : > { %s27465_s23 = scalar_select %p21942_p6, 1, 0 }
  0x13   : > { %p523_p8 = scmp.lt.s32.totalorder %s21799_s30, 3 }
  0x14   : > { %27466 = sst [smem:[#allocation10_spill]] %s27465_s23 }
  0x15   : > { %p524_p9 = pnand %p13585_p7, %p523_p8 }
  0x16   : > { %p580_p10 = scmp.lt.s32.totalorder (!%p524_p9), %s21921_s0, 1  ;;  %v604_v0 = vld [vmem:[%s27432_s5] sm:$0xff] (!%p524_p9)  ;;  %v605_v1 = vld [vmem:[%s27432_s5 + $0x8] sm:$0xff] (!%p524_p9)  ;;  %v21801_v3 = vmov (!%p524_p9), 0.0|0.0   ;;  %v606_v6 = vld [vmem:[%s27432_s5 + $0x10] sm:$0xff] (!%p524_p9)  ;;  %s27467_s23 = sld [smem:[#allocation11_spill]] (!%p524_p9) }
  0x17   : > { %527 = sbr.rel (%p524_p9) target bundleno = 26872 (0x68f8), region = 92  ;;  %v13590_v2 = vld [vmem:[%s27432_s5 + $0x200] sm:$0xff] (!%p524_p9)  ;;  %19621 = vmatprep.subr.bf16.mxu0 (!%p524_p9), %v21801_v3  ;;  %v19622_v4 = vpack.c.bf16 (!%p524_p9), %v605_v1, %v604_v0  ;;  %19645 = vmatprep.subr.bf16.mxu1 (!%p524_p9), %v21801_v3  ;;  %v13591_v5 = vld [vmem:[%s27432_s5 + $0x208] sm:$0xff] (!%p524_p9)  ;;  %v607_v7 = vld [vmem:[%s27432_s5 + $0x18] sm:$0xff] (!%p524_p9)  ;;  %vm21802_vm0 = vmmov (!%p524_p9), 0   ;;  %v21803_v51 = vmov (!%p524_p9), 0.0  }
  0x18   : > { %v19646_v8 = vpack.c.bf16 (!%p524_p9), %v13591_v5, %v13590_v2  ;;  %v13592_v9 = vld [vmem:[%s27432_s5 + $0x210] sm:$0xff] (!%p524_p9)  ;;  %v13593_v10 = vld [vmem:[%s27432_s5 + $0x218] sm:$0xff] (!%p524_p9)  ;;  %v19625_v11 = vpack.c.bf16 (!%p524_p9), %v607_v7, %v606_v6  ;;  %v608_v13 = vld [vmem:[%s27432_s5 + $0x20] sm:$0xff] (!%p524_p9)  ;;  %16458 = vmatprep.mubr.msk.f32.mxu0 (!%p524_p9), %vm21802_vm0, %v21803_v51  ;;  %16493 = vmatprep.mubr.msk.f32.mxu1 (!%p524_p9), %vm21802_vm0, %v21803_v51  ;;  %vm865_vm1 = vcmask (!%p524_p9), 64512   ;;  %s27468_s18 = sld [smem:[#allocation13_spill]] (!%p524_p9)  ;;  %s27470_s27 = sld [smem:[#allocation12_spill]] (!%p524_p9) }
  0x19   : > { %19623 = vmatpush3.bf16.msra.mxu0 (!%p524_p9), %v19622_v4  ;;  %v19649_v12 = vpack.c.bf16 (!%p524_p9), %v13593_v10, %v13592_v9  ;;  %v609_v14 = vld [vmem:[%s27432_s5 + $0x28] sm:$0xff] (!%p524_p9)  ;;  %v13594_v15 = vld [vmem:[%s27432_s5 + $0x220] sm:$0xff] (!%p524_p9)  ;;  %v610_v21 = vld [vmem:[%s27432_s5 + $0x30] sm:$0xff] (!%p524_p9)  ;;  %s14902_s24 = sshll.u32 (!%p524_p9), %s21921_s0, 7  ;;  %s27471_s26 = sld [smem:[#allocation14_spill]] (!%p524_p9) }
  0x1a   : > { %19647 = vmatpush3.bf16.msra.mxu1 (!%p524_p9), %v19646_v8  ;;  %19624 = vmatprep.subr.bf16.mxu0 (!%p524_p9), %v21801_v3  ;;  %v13595_v16 = vld [vmem:[%s27432_s5 + $0x228] sm:$0xff] (!%p524_p9)  ;;  %v19628_v19 = vpack.c.bf16 (!%p524_p9), %v609_v14, %v608_v13  ;;  %v611_v22 = vld [vmem:[%s27432_s5 + $0x38] sm:$0xff] (!%p524_p9)  ;;  %v13596_v24 = vld [vmem:[%s27432_s5 + $0x230] sm:$0xff] (!%p524_p9) }
  0x1b   : > { %19648 = vmatprep.subr.bf16.mxu1 (!%p524_p9), %v21801_v3  ;;  %v19652_v20 = vpack.c.bf16 (!%p524_p9), %v13595_v16, %v13594_v15  ;;  %v19631_v23 = vpack.c.bf16 (!%p524_p9), %v611_v22, %v610_v21  ;;  %v13597_v25 = vld [vmem:[%s27432_s5 + $0x238] sm:$0xff] (!%p524_p9)  ;;  %v612_v27 = vld [vmem:[%s27432_s5 + $0x40] sm:$0xff] (!%p524_p9)  ;;  %v613_v28 = vld [vmem:[%s27432_s5 + $0x48] sm:$0xff] (!%p524_p9) }
  0x1c   : > { %v19655_v26 = vpack.c.bf16 (!%p524_p9), %v13597_v25, %v13596_v24  ;;  %v19634_v29 = vpack.c.bf16 (!%p524_p9), %v613_v28, %v612_v27  ;;  %v13598_v30 = vld [vmem:[%s27432_s5 + $0x240] sm:$0xff] (!%p524_p9)  ;;  %v13599_v31 = vld [vmem:[%s27432_s5 + $0x248] sm:$0xff] (!%p524_p9)  ;;  %v614_v33 = vld [vmem:[%s27432_s5 + $0x50] sm:$0xff] (!%p524_p9) }
  0x1d   : > { %19626 = vmatpush3.bf16.msra.mxu0 (!%p524_p9), %v19625_v11  ;;  %v19658_v32 = vpack.c.bf16 (!%p524_p9), %v13599_v31, %v13598_v30  ;;  %v615_v34 = vld [vmem:[%s27432_s5 + $0x58] sm:$0xff] (!%p524_p9)  ;;  %v13600_v36 = vld [vmem:[%s27432_s5 + $0x250] sm:$0xff] (!%p524_p9)  ;;  %v616_v39 = vld [vmem:[%s27432_s5 + $0x60] sm:$0xff] (!%p524_p9) }
  0x1e   : > { %s21970_s20 = scalar_select %p580_p10, %s21921_s0, 1  ;;  %19650 = vmatpush3.bf16.msra.mxu1 %v19649_v12  ;;  %19627 = vmatprep.subr.bf16.mxu0 %v21801_v3  ;;  %v19637_v35 = vpack.c.bf16 %v615_v34, %v614_v33  ;;  %v13601_v37 = vld [vmem:[%s27432_s5 + $0x258] sm:$0xff]  ;;  %v617_v40 = vld [vmem:[%s27432_s5 + $0x68] sm:$0xff]  ;;  %v13602_v42 = vld [vmem:[%s27432_s5 + $0x260] sm:$0xff] }
  0x1f   : > { %19651 = vmatprep.subr.bf16.mxu1 %v21801_v3  ;;  %v19661_v38 = vpack.c.bf16 %v13601_v37, %v13600_v36  ;;  %v19640_v41 = vpack.c.bf16 %v617_v40, %v616_v39  ;;  %v13603_v43 = vld [vmem:[%s27432_s5 + $0x268] sm:$0xff]  ;;  %v618_v45 = vld [vmem:[%s27432_s5 + $0x70] sm:$0xff]  ;;  %v619_v46 = vld [vmem:[%s27432_s5 + $0x78] sm:$0xff]  ;;  %s21804_s0 = smov [#allocation2]  }
  0x20   : > { %s27454_s22 = sshll.u32 %s21970_s20, 3  ;;  %v19664_v44 = vpack.c.bf16 %v13603_v43, %v13602_v42  ;;  %v19643_v47 = vpack.c.bf16 %v619_v46, %v618_v45  ;;  %v13604_v48 = vld [vmem:[%s27432_s5 + $0x270] sm:$0xff]  ;;  %v13605_v49 = vld [vmem:[%s27432_s5 + $0x278] sm:$0xff]  ;;  %v13606_v55 = vld [vmem:[%s27432_s5 + $0x400] sm:$0xff]  ;;  %s27469_s25 = sshll.u32 %s21970_s20, 3 }
  0x21   : > { %s21991_s29 = scalar_lea.vmem %s27467_s23, %s27454_s22  ;;  %19629 = vmatpush3.bf16.msra.mxu0 %v19628_v19  ;;  %v19667_v50 = vpack.c.bf16 %v13605_v49, %v13604_v48  ;;  %v13607_v56 = vld [vmem:[%s27432_s5 + $0x408] sm:$0xff]  ;;  %v13589_v58 = vld [vmem:[%s27431_s4] ss:$0 sm:$0xff]  ;;  %v13608_v62 = vld [vmem:[%s27432_s5 + $0x410] sm:$0xff]  ;;  %s23784_s30 = scalar_lea.vmem %s27470_s27, %s27469_s25 }
  0x22   : > { %v22001_v17 = vld [vmem:[%s21991_s29] sm:$0xff]  ;;  %19653 = vmatpush3.bf16.msra.mxu1 %v19652_v20  ;;  %19630 = vmatprep.subr.bf16.mxu0 %v21801_v3  ;;  %v19670_v60 = vpack.c.bf16 %v13607_v56, %v13606_v55  ;;  %v13609_v63 = vld [vmem:[%s27432_s5 + $0x418] sm:$0xff]  ;;  %v13611_v2 = vld [vmem:[%s27432_s5 + $0x428] sm:$0xff]  ;;  %s27387_s22 = scalar_lea.hbm %s27471_s26, %s14902_s24  ;;  %s21741_s1 = sshll.u32 %s21804_s0, 4  ;;  %s21742_s1 = int_to_ptr.vmem [resolvable:$false] %s21741_s1 }
  0x23   : > { %v590_v18 = vmul.f32 %v22001_v17, %v22001_v17  ;;  %19654 = vmatprep.subr.bf16.mxu1 %v21801_v3  ;;  %v19673_v0 = vpack.c.bf16 %v13609_v63, %v13608_v62  ;;  %v13610_v1 = vld [vmem:[%s27432_s5 + $0x420] sm:$0xff]  ;;  %v13612_v5 = vld [vmem:[%s27432_s5 + $0x430] sm:$0xff]  ;;  %v13613_v6 = vld [vmem:[%s27432_s5 + $0x438] sm:$0xff] }
  0x24   : > { %v19676_v4 = vpack.c.bf16 %v13611_v2, %v13610_v1  ;;  %v19679_v7 = vpack.c.bf16 %v13613_v6, %v13612_v5  ;;  %v13614_v8 = vld [vmem:[%s27432_s5 + $0x440] sm:$0xff]  ;;  %v13615_v9 = vld [vmem:[%s27432_s5 + $0x448] sm:$0xff]  ;;  %v13616_v11 = vld [vmem:[%s27432_s5 + $0x450] sm:$0xff] }
  0x25   : > { %591 = vadd.xlane.f32.xlu0 %v590_v18  ;;  %19632 = vmatpush3.bf16.msra.mxu0 %v19631_v23  ;;  %v19682_v10 = vpack.c.bf16 %v13615_v9, %v13614_v8  ;;  %v13617_v12 = vld [vmem:[%s27432_s5 + $0x458] sm:$0xff]  ;;  %v13618_v14 = vld [vmem:[%s27432_s5 + $0x460] sm:$0xff]  ;;  %v13619_v15 = vld [vmem:[%s27432_s5 + $0x468] sm:$0xff] }
  0x26   : > { %19633 = vmatprep.subr.bf16.mxu0 %v21801_v3  ;;  %19656 = vmatpush3.bf16.msra.mxu1 %v19655_v26  ;;  %v19685_v13 = vpack.c.bf16 %v13617_v12, %v13616_v11  ;;  %v19688_v16 = vpack.c.bf16 %v13619_v15, %v13618_v14  ;;  %v13621_v18 = vld [vmem:[%s27432_s5 + $0x478] sm:$0xff]  ;;  %v13641_v20 = vld [vmem:[%s27432_s5 + $0x280] sm:$0xff]  ;;  %v13642_v21 = vld [vmem:[%s27432_s5 + $0x288] sm:$0xff] }
  0x27   : > { %19657 = vmatprep.subr.bf16.mxu1 %v21801_v3  ;;  %v19718_v22 = vpack.c.bf16 %v13642_v21, %v13641_v20  ;;  %v13643_v23 = vld [vmem:[%s27432_s5 + $0x290] sm:$0xff]  ;;  %v13644_v24 = vld [vmem:[%s27432_s5 + $0x298] sm:$0xff]  ;;  %v13645_v26 = vld [vmem:[%s27432_s5 + $0x2a0] sm:$0xff] }
  0x28   : > { %v19721_v25 = vpack.c.bf16 %v13644_v24, %v13643_v23  ;;  %v13646_v27 = vld [vmem:[%s27432_s5 + $0x2a8] sm:$0xff]  ;;  %v13648_v30 = vld [vmem:[%s27432_s5 + $0x2b8] sm:$0xff] }
  0x29   : > { %19635 = vmatpush3.bf16.msra.mxu0 %v19634_v29  ;;  %v19724_v28 = vpack.c.bf16 %v13646_v27, %v13645_v26  ;;  %v13647_v29 = vld [vmem:[%s27432_s5 + $0x2b0] sm:$0xff]  ;;  %v13650_v33 = vld [vmem:[%s27432_s5 + $0x2c8] sm:$0xff]  ;;  %v13652_v36 = vld [vmem:[%s27432_s5 + $0x2d8] sm:$0xff] }
  0x2a   : > { %19659 = vmatpush3.bf16.msra.mxu1 %v19658_v32  ;;  %19636 = vmatprep.subr.bf16.mxu0 %v21801_v3  ;;  %v19727_v31 = vpack.c.bf16 %v13648_v30, %v13647_v29  ;;  %v13649_v32 = vld [vmem:[%s27432_s5 + $0x2c0] sm:$0xff]  ;;  %v13654_v39 = vld [vmem:[%s27432_s5 + $0x2e8] sm:$0xff]  ;;  %v13656_v42 = vld [vmem:[%s27432_s5 + $0x2f8] sm:$0xff] }
  0x2b   : > { %19660 = vmatprep.subr.bf16.mxu1 %v21801_v3  ;;  %v19730_v34 = vpack.c.bf16 %v13650_v33, %v13649_v32  ;;  %v13681_v45 = vld [vmem:[%s27432_s5 + $0x108] sm:$0xff]  ;;  %v13683_v48 = vld [vmem:[%s27432_s5 + $0x118] sm:$0xff] }
  0x2c   : > { %v13687_v55 = vld [vmem:[%s27432_s5 + $0x138] sm:$0xff]  ;;  %v13693_v1 = vld [vmem:[%s27432_s5 + $0x168] sm:$0xff] }
  0x2d   : > { %19638 = vmatpush3.bf16.msra.mxu0 %v19637_v35  ;;  %v13651_v35 = vld [vmem:[%s27432_s5 + $0x2d0] sm:$0xff]  ;;  %v13691_v62 = vld [vmem:[%s27432_s5 + $0x158] sm:$0xff]  ;;  %v13713_v8 = vld [vmem:[%s27432_s5 + $0x508] sm:$0xff] }
  0x2e   : > { %19662 = vmatpush3.bf16.msra.mxu1 %v19661_v38  ;;  %19639 = vmatprep.subr.bf16.mxu0 %v21801_v3  ;;  %v19733_v37 = vpack.c.bf16 %v13652_v36, %v13651_v35  ;;  %v13653_v38 = vld [vmem:[%s27432_s5 + $0x2e0] sm:$0xff]  ;;  %v13695_v5 = vld [vmem:[%s27432_s5 + $0x178] sm:$0xff]  ;;  %v13717_v14 = vld [vmem:[%s27432_s5 + $0x528] sm:$0xff] }
  0x2f   : > { %19663 = vmatprep.subr.bf16.mxu1 %v21801_v3  ;;  %v19736_v40 = vpack.c.bf16 %v13654_v39, %v13653_v38  ;;  %v13715_v11 = vld [vmem:[%s27432_s5 + $0x518] sm:$0xff]  ;;  %v13721_v20 = vld [vmem:[%s27432_s5 + $0x548] sm:$0xff] }
  0x30   : > { %v13723_v23 = vld [vmem:[%s27432_s5 + $0x558] sm:$0xff]  ;;  %v13725_v26 = vld [vmem:[%s27432_s5 + $0x568] sm:$0xff] }
  0x31   : > { %19641 = vmatpush3.bf16.msra.mxu0 %v19640_v41  ;;  %v13655_v41 = vld [vmem:[%s27432_s5 + $0x2f0] sm:$0xff]  ;;  %v13727_v29 = vld [vmem:[%s27432_s5 + $0x578] sm:$0xff]  ;;  %v13751_v32 = vld [vmem:[%s27432_s5 + $0x388] sm:$0xff] }
  0x32   : > { %19665 = vmatpush3.bf16.msra.mxu1 %v19664_v44  ;;  %19642 = vmatprep.subr.bf16.mxu0 %v21801_v3  ;;  %v19739_v43 = vpack.c.bf16 %v13656_v42, %v13655_v41  ;;  %v13680_v44 = vld [vmem:[%s27432_s5 + $0x100] sm:$0xff]  ;;  %v13753_v35 = vld [vmem:[%s27432_s5 + $0x398] sm:$0xff]  ;;  %v13755_v38 = vld [vmem:[%s27432_s5 + $0x3a8] sm:$0xff] }
  0x33   : > { %19666 = vmatprep.subr.bf16.mxu1 %v21801_v3  ;;  %v19766_v46 = vpack.c.bf16 %v13681_v45, %v13680_v44  ;;  %v13757_v41 = vld [vmem:[%s27432_s5 + $0x3b8] sm:$0xff]  ;;  %v13759_v44 = vld [vmem:[%s27432_s5 + $0x3c8] sm:$0xff] }
  0x35   : > { %19644 = vmatpush3.bf16.msra.mxu0 %v19643_v47  ;;  %v13682_v47 = vld [vmem:[%s27432_s5 + $0x110] sm:$0xff] }
  0x36   : > { %19668 = vmatpush3.bf16.msra.mxu1 %v19667_v50  ;;  %19669 = vmatprep.subr.bf16.mxu0 %v21801_v3  ;;  %v19769_v49 = vpack.c.bf16 %v13683_v48, %v13682_v47  ;;  %v13684_v50 = vld [vmem:[%s27432_s5 + $0x120] sm:$0xff]  ;;  %v13761_v47 = vld [vmem:[%s27432_s5 + $0x3d8] sm:$0xff] }
  0x37   : > { %16531 = vmatprep.subr.mxu1 %v21803_v51 }
  0xb2   : > { %v592_v52 = vpop.xlane.xlu0 %591 }
  0xb3   : > { %v593_v53 = vmul.f32 0.03125, %v592_v52  ;;  %v13685_v52 = vld [vmem:[%s27432_s5 + $0x128] sm:$0xff] }
  0xb5   : > { %v594_v54 = vadd.f32 1e-06, %v593_v53  ;;  %v19772_v53 = vpack.c.bf16 %v13685_v52, %v13684_v50  ;;  %v13763_v50 = vld [vmem:[%s27432_s5 + $0x3e8] sm:$0xff] }
  0xb7   : > { %21607 = vrsqrt.f32 %v594_v54  ;;  %v13686_v54 = vld [vmem:[%s27432_s5 + $0x130] sm:$0xff] }
  0xb8   : > { %v19775_v56 = vpack.c.bf16 %v13687_v55, %v13686_v54  ;;  %v13765_v54 = vld [vmem:[%s27432_s5 + $0x3f8] sm:$0xff] }
  0xc1   : > { %v21608_v57 = vpop.eup %21607 }
  0xc2   : > { %v596_v59 = vmul.f32 %v21608_v57, %v22001_v17  ;;  %v13620_v17 = vld [vmem:[%s27432_s5 + $0x470] sm:$0xff]  ;;  %v13688_v57 = vld [vmem:[%s27432_s5 + $0x140] sm:$0xff] }
  0xc3   : > { %v19691_v19 = vpack.c.bf16 %v13621_v18, %v13620_v17  ;;  %v13719_v17 = vld [vmem:[%s27432_s5 + $0x538] sm:$0xff] }
  0xc4   : > { %v22093_v61 = vmul.f32 %v13589_v58, %v596_v59  ;;  %v13689_v58 = vld [vmem:[%s27432_s5 + $0x148] sm:$0xff] }
  0xc5   : > { %v19778_v59 = vpack.c.bf16 %v13689_v58, %v13688_v57 }
  0xc6   : > { %16459 = vmatmul.mubr.f32.vlgmr.msra.gmra.mrb[0].mxu0 %v22093_v61  ;;  %16494 = vmatmul.mubr.f32.vlgmr.msra.gmra.mrb[0].mxu1 %v22093_v61 }
  0xc7   : > { %19671 = vmatpush3.bf16.msra.mxu0 %v19670_v60  ;;  %16528 = vmatprep.mubr.msk.f32.mxu0 %vm21802_vm0, %v21803_v51  ;;  %v13690_v60 = vld [vmem:[%s27432_s5 + $0x150] sm:$0xff] }
  0xc8   : > { %19672 = vmatprep.subr.bf16.mxu0 %v21801_v3  ;;  %16533 = vmatprep.mubr.msk.f32.mxu1 %vm21802_vm0, %v21803_v51  ;;  %v19781_v63 = vpack.c.bf16 %v13691_v62, %v13690_v60 }
  0xcb   : > { %19674 = vmatpush3.bf16.msra.mxu0 %v19673_v0  ;;  %v13692_v0 = vld [vmem:[%s27432_s5 + $0x160] sm:$0xff] }
  0xcc   : > { %19675 = vmatprep.subr.bf16.mxu0 %v21801_v3  ;;  %v19784_v2 = vpack.c.bf16 %v13693_v1, %v13692_v0 }
  0xcf   : > { %19677 = vmatpush3.bf16.msra.mxu0 %v19676_v4  ;;  %v13694_v4 = vld [vmem:[%s27432_s5 + $0x170] sm:$0xff] }
  0xd0   : > { %19678 = vmatprep.subr.bf16.mxu0 %v21801_v3  ;;  %v19787_v6 = vpack.c.bf16 %v13695_v5, %v13694_v4 }
  0xd3   : > { %19680 = vmatpush3.bf16.msra.mxu0 %v19679_v7  ;;  %v13712_v7 = vld [vmem:[%s27432_s5 + $0x500] sm:$0xff] }
  0xd4   : > { %19681 = vmatprep.subr.bf16.mxu0 %v21801_v3  ;;  %v19814_v9 = vpack.c.bf16 %v13713_v8, %v13712_v7  ;;  %v864_v8 = vld [vmem:[%s27468_s18] sm:$0xff] }
  0xd7   : > { %19683 = vmatpush3.bf16.msra.mxu0 %v19682_v10  ;;  %v13714_v10 = vld [vmem:[%s27432_s5 + $0x510] sm:$0xff] }
  0xd8   : > { %19684 = vmatprep.subr.bf16.mxu0 %v21801_v3  ;;  %v19817_v12 = vpack.c.bf16 %v13715_v11, %v13714_v10 }
  0xdb   : > { %19686 = vmatpush3.bf16.msra.mxu0 %v19685_v13  ;;  %v13716_v13 = vld [vmem:[%s27432_s5 + $0x520] sm:$0xff] }
  0xdc   : > { %19687 = vmatprep.subr.bf16.mxu0 %v21801_v3  ;;  %v19820_v15 = vpack.c.bf16 %v13717_v14, %v13716_v13 }
  0xdf   : > { %19689 = vmatpush3.bf16.msra.mxu0 %v19688_v16  ;;  %v13718_v16 = vld [vmem:[%s27432_s5 + $0x530] sm:$0xff] }
  0xe0   : > { %19690 = vmatprep.subr.bf16.mxu0 %v21801_v3  ;;  %v19823_v18 = vpack.c.bf16 %v13719_v17, %v13718_v16 }
  0xe3   : > { %19692 = vmatpush3.bf16.msra.mxu0 %v19691_v19  ;;  %v13720_v19 = vld [vmem:[%s27432_s5 + $0x540] sm:$0xff] }
  0xe4   : > { %19717 = vmatprep.subr.bf16.mxu0 %v21801_v3  ;;  %v19826_v21 = vpack.c.bf16 %v13721_v20, %v13720_v19  ;;  %v13625_v19 = vld [vmem:[%s27432_s5 + $0x80] sm:$0xff]  ;;  %v13626_v20 = vld [vmem:[%s27432_s5 + $0x88] sm:$0xff] }
  0xe6   : > { %16529 = vmatmul.mubr.f32.vlgmr.msra.gmra.mrb[2].mxu0 %v22093_v61 }
  0xe7   : > { %19719 = vmatpush3.bf16.msra.mxu0 %v19718_v22  ;;  %16608 = vmatprep.mubr.msk.f32.mxu0 %vm21802_vm0, %v21803_v51  ;;  %v13722_v22 = vld [vmem:[%s27432_s5 + $0x550] sm:$0xff] }
  0xe8   : > { %19720 = vmatprep.subr.bf16.mxu0 %v21801_v3  ;;  %v19829_v24 = vpack.c.bf16 %v13723_v23, %v13722_v22  ;;  %v19694_v22 = vpack.c.bf16 %v13626_v20, %v13625_v19 }
  0xeb   : > { %19722 = vmatpush3.bf16.msra.mxu0 %v19721_v25  ;;  %v13724_v25 = vld [vmem:[%s27432_s5 + $0x560] sm:$0xff] }
  0xec   : > { %19723 = vmatprep.subr.bf16.mxu0 %v21801_v3  ;;  %v19832_v27 = vpack.c.bf16 %v13725_v26, %v13724_v25  ;;  %v13628_v25 = vld [vmem:[%s27432_s5 + $0x98] sm:$0xff] }
  0xef   : > { %19725 = vmatpush3.bf16.msra.mxu0 %v19724_v28  ;;  %v13726_v28 = vld [vmem:[%s27432_s5 + $0x570] sm:$0xff] }
  0xf0   : > { %19726 = vmatprep.subr.bf16.mxu0 %v21801_v3  ;;  %v19835_v30 = vpack.c.bf16 %v13727_v29, %v13726_v28  ;;  %v13630_v28 = vld [vmem:[%s27432_s5 + $0xa8] sm:$0xff] }
  0xf3   : > { %19728 = vmatpush3.bf16.msra.mxu0 %v19727_v31  ;;  %v13750_v31 = vld [vmem:[%s27432_s5 + $0x380] sm:$0xff] }
  0xf4   : > { %19729 = vmatprep.subr.bf16.mxu0 %v21801_v3  ;;  %v19862_v33 = vpack.c.bf16 %v13751_v32, %v13750_v31  ;;  %v13632_v31 = vld [vmem:[%s27432_s5 + $0xb8] sm:$0xff] }
  0xf7   : > { %19731 = vmatpush3.bf16.msra.mxu0 %v19730_v34  ;;  %v13752_v34 = vld [vmem:[%s27432_s5 + $0x390] sm:$0xff] }
  0xf8   : > { %19732 = vmatprep.subr.bf16.mxu0 %v21801_v3  ;;  %v19865_v36 = vpack.c.bf16 %v13753_v35, %v13752_v34  ;;  %v13634_v34 = vld [vmem:[%s27432_s5 + $0xc8] sm:$0xff] }
  0xfb   : > { %19734 = vmatpush3.bf16.msra.mxu0 %v19733_v37  ;;  %v13754_v37 = vld [vmem:[%s27432_s5 + $0x3a0] sm:$0xff] }
  0xfc   : > { %19735 = vmatprep.subr.bf16.mxu0 %v21801_v3  ;;  %v19868_v39 = vpack.c.bf16 %v13755_v38, %v13754_v37  ;;  %v13636_v37 = vld [vmem:[%s27432_s5 + $0xd8] sm:$0xff] }
  0xff   : > { %19737 = vmatpush3.bf16.msra.mxu0 %v19736_v40  ;;  %v13756_v40 = vld [vmem:[%s27432_s5 + $0x3b0] sm:$0xff] }
 0x100   : > { %19738 = vmatprep.subr.bf16.mxu0 %v21801_v3  ;;  %v19871_v42 = vpack.c.bf16 %v13757_v41, %v13756_v40  ;;  %v13638_v40 = vld [vmem:[%s27432_s5 + $0xe8] sm:$0xff] }
 0x103   : > { %19740 = vmatpush3.bf16.msra.mxu0 %v19739_v43  ;;  %v13758_v43 = vld [vmem:[%s27432_s5 + $0x3c0] sm:$0xff] }
 0x104   : > { %19765 = vmatprep.subr.bf16.mxu0 %v21801_v3  ;;  %v19874_v45 = vpack.c.bf16 %v13759_v44, %v13758_v43  ;;  %v13640_v43 = vld [vmem:[%s27432_s5 + $0xf8] sm:$0xff] }
 0x106   : > { %16609 = vmatmul.mubr.f32.vlgmr.msra.gmra.mrb[4].mxu0 %v22093_v61 }
 0x107   : > { %19767 = vmatpush3.bf16.msra.mxu0 %v19766_v46  ;;  %16698 = vmatprep.mubr.msk.f32.mxu0 %vm21802_vm0, %v21803_v51  ;;  %v13760_v46 = vld [vmem:[%s27432_s5 + $0x3d0] sm:$0xff] }
 0x108   : > { %19768 = vmatprep.subr.bf16.mxu0 %v21801_v3  ;;  %v19877_v48 = vpack.c.bf16 %v13761_v47, %v13760_v46  ;;  %v13658_v46 = vld [vmem:[%s27432_s5 + $0x488] sm:$0xff] }
 0x10b   : > { %19770 = vmatpush3.bf16.msra.mxu0 %v19769_v49  ;;  %v13762_v49 = vld [vmem:[%s27432_s5 + $0x3e0] sm:$0xff] }
 0x10c   : > { %19771 = vmatprep.subr.bf16.mxu0 %v21801_v3  ;;  %v19880_v52 = vpack.c.bf16 %v13763_v50, %v13762_v49  ;;  %v13660_v49 = vld [vmem:[%s27432_s5 + $0x498] sm:$0xff] }
 0x10f   : > { %19773 = vmatpush3.bf16.msra.mxu0 %v19772_v53  ;;  %v13764_v53 = vld [vmem:[%s27432_s5 + $0x3f0] sm:$0xff] }
 0x110   : > { %19774 = vmatprep.subr.bf16.mxu0 %v21801_v3  ;;  %v19883_v55 = vpack.c.bf16 %v13765_v54, %v13764_v53  ;;  %v13662_v53 = vld [vmem:[%s27432_s5 + $0x4a8] sm:$0xff] }
 0x113   : > { %19776 = vmatpush3.bf16.msra.mxu0 %v19775_v56 }
 0x114   : > { %19777 = vmatprep.subr.bf16.mxu0 %v21801_v3 }
 0x117   : > { %19779 = vmatpush3.bf16.msra.mxu0 %v19778_v59 }
 0x118   : > { %19780 = vmatprep.subr.bf16.mxu0 %v21801_v3 }
 0x11b   : > { %19782 = vmatpush3.bf16.msra.mxu0 %v19781_v63 }
 0x11c   : > { %19783 = vmatprep.subr.bf16.mxu0 %v21801_v3 }
 0x11f   : > { %19785 = vmatpush3.bf16.msra.mxu0 %v19784_v2 }
 0x120   : > { %19786 = vmatprep.subr.bf16.mxu0 %v21801_v3 }
 0x123   : > { %19788 = vmatpush3.bf16.msra.mxu0 %v19787_v6 }
 0x124   : > { %19813 = vmatprep.subr.bf16.mxu0 %v21801_v3 }
 0x126   : > { %16699 = vmatmul.mubr.f32.vlgmr.msra.gmra.mrb[6].mxu0 %v22093_v61 }
 0x127   : > { %19815 = vmatpush3.bf16.msra.mxu0 %v19814_v9  ;;  %16768 = vmatprep.mubr.msk.f32.mxu0 %vm21802_vm0, %v21803_v51 }
 0x128   : > { %19816 = vmatprep.subr.bf16.mxu0 %v21801_v3 }
 0x12b   : > { %19818 = vmatpush3.bf16.msra.mxu0 %v19817_v12 }
 0x12c   : > { %19819 = vmatprep.subr.bf16.mxu0 %v21801_v3 }
 0x12f   : > { %19821 = vmatpush3.bf16.msra.mxu0 %v19820_v15 }
 0x130   : > { %19822 = vmatprep.subr.bf16.mxu0 %v21801_v3 }
 0x133   : > { %19824 = vmatpush3.bf16.msra.mxu0 %v19823_v18 }
 0x134   : > { %19825 = vmatprep.subr.bf16.mxu0 %v21801_v3 }
 0x137   : > { %19827 = vmatpush3.bf16.msra.mxu0 %v19826_v21 }
 0x138   : > { %19828 = vmatprep.subr.bf16.mxu0 %v21801_v3 }
 0x13b   : > { %19830 = vmatpush3.bf16.msra.mxu0 %v19829_v24  ;;  %v13627_v24 = vld [vmem:[%s27432_s5 + $0x90] sm:$0xff] }
 0x13c   : > { %19831 = vmatprep.subr.bf16.mxu0 %v21801_v3  ;;  %v19697_v26 = vpack.c.bf16 %v13628_v25, %v13627_v24 }
 0x13f   : > { %19833 = vmatpush3.bf16.msra.mxu0 %v19832_v27  ;;  %v13629_v27 = vld [vmem:[%s27432_s5 + $0xa0] sm:$0xff] }
 0x140   : > { %19834 = vmatprep.subr.bf16.mxu0 %v21801_v3  ;;  %v19700_v29 = vpack.c.bf16 %v13630_v28, %v13629_v27 }
 0x143   : > { %19836 = vmatpush3.bf16.msra.mxu0 %v19835_v30  ;;  %v13631_v30 = vld [vmem:[%s27432_s5 + $0xb0] sm:$0xff] }
 0x144   : > { %19861 = vmatprep.subr.bf16.mxu0 %v21801_v3  ;;  %v19703_v32 = vpack.c.bf16 %v13632_v31, %v13631_v30  ;;  %v13677_v30 = vld [vmem:[%s27433_s6 + $0x8] sm:$0xff]  ;;  %v1026_v31 = vld [vmem:[%s27433_s6] sm:$0xff] }
 0x146   : > { %16769 = vmatmul.mubr.f32.vlgmr.msra.gmra.mrb[8].mxu0 %v22093_v61 }
 0x147   : > { %19863 = vmatpush3.bf16.msra.mxu0 %v19862_v33  ;;  %16853 = vmatprep.mubr.msk.f32.mxu0 %vm21802_vm0, %v21803_v51  ;;  %v13633_v33 = vld [vmem:[%s27432_s5 + $0xc0] sm:$0xff] }
 0x148   : > { %19864 = vmatprep.subr.bf16.mxu0 %v21801_v3  ;;  %v19706_v35 = vpack.c.bf16 %v13634_v34, %v13633_v33  ;;  %v13697_v33 = vld [vmem:[%s27432_s5 + $0x308] sm:$0xff] }
 0x14b   : > { %19866 = vmatpush3.bf16.msra.mxu0 %v19865_v36  ;;  %v13635_v36 = vld [vmem:[%s27432_s5 + $0xd0] sm:$0xff] }
 0x14c   : > { %19867 = vmatprep.subr.bf16.mxu0 %v21801_v3  ;;  %v19709_v38 = vpack.c.bf16 %v13636_v37, %v13635_v36  ;;  %v13698_v37 = vld [vmem:[%s27432_s5 + $0x310] sm:$0xff] }
 0x14f   : > { %19869 = vmatpush3.bf16.msra.mxu0 %v19868_v39  ;;  %v13637_v39 = vld [vmem:[%s27432_s5 + $0xe0] sm:$0xff] }
 0x150   : > { %19870 = vmatprep.subr.bf16.mxu0 %v21801_v3  ;;  %v19712_v41 = vpack.c.bf16 %v13638_v40, %v13637_v39  ;;  %v13700_v40 = vld [vmem:[%s27432_s5 + $0x320] sm:$0xff] }
 0x153   : > { %19872 = vmatpush3.bf16.msra.mxu0 %v19871_v42  ;;  %v13639_v42 = vld [vmem:[%s27432_s5 + $0xf0] sm:$0xff] }
 0x154   : > { %19873 = vmatprep.subr.bf16.mxu0 %v21801_v3  ;;  %v19715_v44 = vpack.c.bf16 %v13640_v43, %v13639_v42  ;;  %v13702_v43 = vld [vmem:[%s27432_s5 + $0x330] sm:$0xff] }
 0x157   : > { %19875 = vmatpush3.bf16.msra.mxu0 %v19874_v45  ;;  %v13657_v45 = vld [vmem:[%s27432_s5 + $0x480] sm:$0xff] }
 0x158   : > { %19876 = vmatprep.subr.bf16.mxu0 %v21801_v3  ;;  %v19742_v47 = vpack.c.bf16 %v13658_v46, %v13657_v45  ;;  %v13704_v46 = vld [vmem:[%s27432_s5 + $0x340] sm:$0xff] }
 0x15b   : > { %19878 = vmatpush3.bf16.msra.mxu0 %v19877_v48  ;;  %v13659_v48 = vld [vmem:[%s27432_s5 + $0x490] sm:$0xff] }
 0x15c   : > { %19879 = vmatprep.subr.bf16.mxu0 %v21801_v3  ;;  %v19745_v50 = vpack.c.bf16 %v13660_v49, %v13659_v48  ;;  %v13706_v49 = vld [vmem:[%s27432_s5 + $0x350] sm:$0xff] }
 0x15f   : > { %19881 = vmatpush3.bf16.msra.mxu0 %v19880_v52  ;;  %v13661_v52 = vld [vmem:[%s27432_s5 + $0x4a0] sm:$0xff] }
 0x160   : > { %19882 = vmatprep.subr.bf16.mxu0 %v21801_v3  ;;  %v19748_v54 = vpack.c.bf16 %v13662_v53, %v13661_v52  ;;  %v13708_v53 = vld [vmem:[%s27432_s5 + $0x360] sm:$0xff] }
 0x163   : > { %19884 = vmatpush3.bf16.msra.mxu0 %v19883_v55  ;;  %v13663_v55 = vld [vmem:[%s27432_s5 + $0x4b0] sm:$0xff] }
 0x164   : > { %16896 = vmatprep.subr.mxu0 %v21803_v51 }
 0x166   : > { %16854 = vmatmul.mubr.f32.vlgmr.msra.gmra.mrb[10].mxu0 %v22093_v61 }
 0x167   : > { %16898 = vmatprep.mubr.msk.f32.mxu0 %vm21802_vm0, %v21803_v51 }
 0x199   : > { %v686_v56 = vpop.f32.mrb[0].mxu0  ;;  %v773_v57 = vpop.f32.mrb[0].mxu1 }
 0x19a   : > { %v16460_v58 = vpop.f32.mrb[1].mxu0  ;;  %v16495_v59 = vpop.f32.mrb[1].mxu1  ;;  %16532 = vmatpush3.xpose.msk.msra.mxu1 %vm865_vm1, %v773_v57 }
 0x19b   : > { %16536 = vmatprep.subr.mxu1 %v21803_v51  ;;  %v13665_v58 = vld [vmem:[%s27432_s5 + $0x4c0] sm:$0xff]  ;;  %v13666_v59 = vld [vmem:[%s27432_s5 + $0x4c8] sm:$0xff] }
 0x19d   : > { %16534 = vmatmul.mubr.msk.f32.vlgmr.msra.gmra.mrb[2].mxu1 %vm865_vm1, %v686_v56  ;;  %v13664_v56 = vld [vmem:[%s27432_s5 + $0x4b8] sm:$0xff] }
 0x19e   : > { %16538 = vmatprep.mubr.msk.f32.mxu1 %vm21802_vm0, %v21803_v51  ;;  %v19751_v57 = vpack.c.bf16 %v13664_v56, %v13663_v55  ;;  %v13710_v56 = vld [vmem:[%s27432_s5 + $0x370] sm:$0xff] }
 0x1b9   : > { %v860_v60 = vpop.f32.mrb[2].mxu0 }
 0x1ba   : > { %v16530_v62 = vpop.f32.mrb[3].mxu0  ;;  %16537 = vmatpush3.msra.mxu1 %v860_v60  ;;  %v19754_v60 = vpack.c.bf16 %v13666_v59, %v13665_v58 }
 0x1bb   : > { %19693 = vmatprep.subr.bf16.mxu1 %v21801_v3  ;;  %v13667_v62 = vld [vmem:[%s27432_s5 + $0x4d0] sm:$0xff] }
 0x1d9   : > { %v22396_v63 = vpop.f32.mrb[4].mxu0 }
 0x1da   : > { %v16610_v0 = vpop.f32.mrb[5].mxu0 }
 0x1db   : > { %v13668_v0 = vld [vmem:[%s27432_s5 + $0x4d8] sm:$0xff] }
 0x1f9   : > { %v22398_v1 = vpop.f32.mrb[6].mxu0 }
 0x1fa   : > { %v16700_v2 = vpop.f32.mrb[7].mxu0 }
 0x1fb   : > { %v19757_v2 = vpack.c.bf16 %v13668_v0, %v13667_v62 }
 0x219   : > { %v22400_v4 = vpop.f32.mrb[8].mxu0 }
 0x21a   : > { %v16770_v5 = vpop.f32.mrb[9].mxu0 }
 0x21b   : > { %v13669_v5 = vld [vmem:[%s27432_s5 + $0x4e0] sm:$0xff] }
 0x239   : > { %v22402_v6 = vpop.f32.mrb[10].mxu0 }
 0x23a   : > { %v16855_v7 = vpop.f32.mrb[11].mxu0 }
 0x23b   : > { %v13670_v7 = vld [vmem:[%s27432_s5 + $0x4e8] sm:$0xff] }
 0x270   : > { %v938_v9 = vpop.f32.mrb[2].mxu1 }
 0x271   : > { %v939_v10 = vadd.f32 %v938_v9, %v864_v8  ;;  %v16535_v11 = vpop.f32.mrb[3].mxu1  ;;  %v19760_v8 = vpack.c.bf16 %v13670_v7, %v13669_v5  ;;  %v13671_v9 = vld [vmem:[%s27432_s5 + $0x4f0] sm:$0xff] }
 0x273   : > { %v942_v12 = vsel %vm865_vm1, %v939_v10, -inf }
 0x274   : > { %943 = vmax.xlane.f32.xlu0 %v942_v12 }
 0x301   : > { %v944_v13 = vpop.xlane.xlu0 %943 }
 0x302   : > { %v945_v14 = vsub.f32 %v939_v10, %v944_v13  ;;  %v13672_v10 = vld [vmem:[%s27432_s5 + $0x4f8] sm:$0xff] }
 0x303   : > { %v19763_v11 = vpack.c.bf16 %v13672_v10, %v13671_v9 }
 0x304   : > { %v946_v15 = vmul.f32 1.442695, %v945_v14 }
 0x306   : > { %21609 = vpow2.f32 %v946_v15 }
 0x310   : > { %v21610_v16 = vpop.eup %21609 }
 0x311   : > { %v948_v17 = vsel %vm865_vm1, %v21610_v16, 0.0 }
 0x312   : > { %949 = vadd.xlane.f32.xlu1 %v948_v17 }
 0x39f   : > { %v950_v18 = vpop.xlane.xlu1 %949 }
 0x3a0   : > { %21611 = vrcp.f32 %v950_v18 }
 0x3aa   : > { %v21612_v21 = vpop.eup %21611 }
 0x3ab   : > { %v952_v23 = vmul.f32 %v21612_v21, %v21610_v16 }
 0x3ad   : > { %16539 = vmatmul.mubr.msk.f32.vlgmr.msra.gmra.mrb[4].mxu1 %vm865_vm1, %v952_v23 }
 0x3ae   : > { %19695 = vmatpush3.bf16.msra.mxu1 %v19694_v22  ;;  %16573 = vmatprep.mubr.msk.f32.mxu1 %vm21802_vm0, %v21803_v51 }
 0x3af   : > { %19696 = vmatprep.subr.bf16.mxu1 %v21801_v3 }
 0x3b2   : > { %19698 = vmatpush3.bf16.msra.mxu1 %v19697_v26 }
 0x3b3   : > { %19699 = vmatprep.subr.bf16.mxu1 %v21801_v3 }
 0x3b6   : > { %19701 = vmatpush3.bf16.msra.mxu1 %v19700_v29 }
 0x3b7   : > { %19702 = vmatprep.subr.bf16.mxu1 %v21801_v3 }
 0x3ba   : > { %19704 = vmatpush3.bf16.msra.mxu1 %v19703_v32  ;;  %v13696_v32 = vld [vmem:[%s27432_s5 + $0x300] sm:$0xff] }
 0x3bb   : > { %19705 = vmatprep.subr.bf16.mxu1 %v21801_v3  ;;  %v19790_v36 = vpack.c.bf16 %v13697_v33, %v13696_v32  ;;  %v13742_v33 = vld [vmem:[%s27432_s5 + $0x1c0] sm:$0xff] }
 0x3be   : > { %19707 = vmatpush3.bf16.msra.mxu1 %v19706_v35 }
 0x3bf   : > { %19708 = vmatprep.subr.bf16.mxu1 %v21801_v3 }
 0x3c2   : > { %19710 = vmatpush3.bf16.msra.mxu1 %v19709_v38  ;;  %v13699_v38 = vld [vmem:[%s27432_s5 + $0x318] sm:$0xff] }
 0x3c3   : > { %19711 = vmatprep.subr.bf16.mxu1 %v21801_v3  ;;  %v19793_v39 = vpack.c.bf16 %v13699_v38, %v13698_v37  ;;  %v13745_v37 = vld [vmem:[%s27432_s5 + $0x1d8] sm:$0xff] }
 0x3c6   : > { %19713 = vmatpush3.bf16.msra.mxu1 %v19712_v41  ;;  %v13701_v41 = vld [vmem:[%s27432_s5 + $0x328] sm:$0xff] }
 0x3c7   : > { %19714 = vmatprep.subr.bf16.mxu1 %v21801_v3  ;;  %v19796_v42 = vpack.c.bf16 %v13701_v41, %v13700_v40  ;;  %v13747_v40 = vld [vmem:[%s27432_s5 + $0x1e8] sm:$0xff] }
 0x3ca   : > { %19716 = vmatpush3.bf16.msra.mxu1 %v19715_v44  ;;  %v13703_v44 = vld [vmem:[%s27432_s5 + $0x338] sm:$0xff] }
 0x3cb   : > { %19741 = vmatprep.subr.bf16.mxu1 %v21801_v3  ;;  %v19799_v45 = vpack.c.bf16 %v13703_v44, %v13702_v43  ;;  %v13749_v43 = vld [vmem:[%s27432_s5 + $0x1f8] sm:$0xff] }
 0x3cd   : > { %16574 = vmatmul.mubr.f32.vlgmr.msra.gmra.mrb[6].mxu1 %v22093_v61 }
 0x3ce   : > { %19743 = vmatpush3.bf16.msra.mxu1 %v19742_v47  ;;  %16643 = vmatprep.mubr.msk.f32.mxu1 %vm21802_vm0, %v21803_v51  ;;  %v13705_v47 = vld [vmem:[%s27432_s5 + $0x348] sm:$0xff] }
 0x3cf   : > { %19744 = vmatprep.subr.bf16.mxu1 %v21801_v3  ;;  %v19802_v48 = vpack.c.bf16 %v13705_v47, %v13704_v46  ;;  %v13767_v46 = vld [vmem:[%s27432_s5 + $0x588] sm:$0xff] }
 0x3d2   : > { %19746 = vmatpush3.bf16.msra.mxu1 %v19745_v50  ;;  %v13707_v50 = vld [vmem:[%s27432_s5 + $0x358] sm:$0xff] }
 0x3d3   : > { %19747 = vmatprep.subr.bf16.mxu1 %v21801_v3  ;;  %v19805_v52 = vpack.c.bf16 %v13707_v50, %v13706_v49  ;;  %v13769_v49 = vld [vmem:[%s27432_s5 + $0x598] sm:$0xff] }
 0x3d6   : > { %19749 = vmatpush3.bf16.msra.mxu1 %v19748_v54  ;;  %v13709_v54 = vld [vmem:[%s27432_s5 + $0x368] sm:$0xff] }
 0x3d7   : > { %19750 = vmatprep.subr.bf16.mxu1 %v21801_v3  ;;  %v19808_v55 = vpack.c.bf16 %v13709_v54, %v13708_v53  ;;  %v13771_v53 = vld [vmem:[%s27432_s5 + $0x5a8] sm:$0xff] }
 0x3da   : > { %19752 = vmatpush3.bf16.msra.mxu1 %v19751_v57  ;;  %v13711_v57 = vld [vmem:[%s27432_s5 + $0x378] sm:$0xff] }
 0x3db   : > { %19753 = vmatprep.subr.bf16.mxu1 %v21801_v3  ;;  %v19811_v58 = vpack.c.bf16 %v13711_v57, %v13710_v56  ;;  %v13773_v56 = vld [vmem:[%s27432_s5 + $0x5b8] sm:$0xff] }
 0x3de   : > { %19755 = vmatpush3.bf16.msra.mxu1 %v19754_v60 }
 0x3df   : > { %19756 = vmatprep.subr.bf16.mxu1 %v21801_v3 }
 0x3e2   : > { %19758 = vmatpush3.bf16.msra.mxu1 %v19757_v2 }
 0x3e3   : > { %19759 = vmatprep.subr.bf16.mxu1 %v21801_v3 }
 0x3e6   : > { %19761 = vmatpush3.bf16.msra.mxu1 %v19760_v8  ;;  %v13728_v8 = vld [vmem:[%s27468_s18 + $0x10] sm:$0xff] }
 0x3e7   : > { %19762 = vmatprep.subr.bf16.mxu1 %v21801_v3 }
 0x3ea   : > { %19764 = vmatpush3.bf16.msra.mxu1 %v19763_v11 }
 0x3eb   : > { %16646 = vmatprep.subr.mxu1 %v21803_v51 }
 0x3ed   : > { %16644 = vmatmul.mubr.f32.vlgmr.msra.gmra.mrb[8].mxu1 %v22093_v61 }
 0x3ee   : > { %16648 = vmatprep.mubr.msk.f32.mxu1 %vm21802_vm0, %v21803_v51 }
 0x3f3   : > { %16647 = vmatpush3.xpose.msk.msra.mxu1 %vm865_vm1, %v22396_v63  ;;  %v13673_v63 = vld [vmem:[%s27468_s18 + $0x8] sm:$0xff] }
 0x3f4   : > { %16651 = vmatprep.subr.mxu1 %v21803_v51 }
 0x480   : > { %v1022_v12 = vpop.f32.mrb[4].mxu1 }
 0x481   : > { %v16540_v13 = vpop.f32.mrb[5].mxu1 }
 0x4a0   : > { %v1110_v14 = vpop.f32.mrb[6].mxu1 }
 0x4a1   : > { %v16575_v15 = vpop.f32.mrb[7].mxu1  ;;  %16649 = vmatmul.mubr.msk.f32.vlgmr.msra.gmra.mrb[10].mxu1 %vm865_vm1, %v1110_v14 }
 0x4a2   : > { %16653 = vmatprep.mubr.msk.f32.mxu1 %vm21802_vm0, %v21803_v51 }
 0x4c0   : > { %v1284_v16 = vpop.f32.mrb[8].mxu1 }
 0x4c1   : > { %v16645_v17 = vpop.f32.mrb[9].mxu1  ;;  %16652 = vmatpush3.msra.mxu1 %v1284_v16 }
 0x4c2   : > { %16656 = vmatprep.subr.mxu1 %v21803_v51 }
 0x574   : > { %v1362_v18 = vpop.f32.mrb[10].mxu1 }
 0x575   : > { %v1363_v19 = vadd.f32 %v13673_v63, %v1362_v18  ;;  %v16650_v20 = vpop.f32.mrb[11].mxu1  ;;  %v13732_v18 = vld [vmem:[%s27433_s6 + $0x10] sm:$0xff] }
 0x576   : > { %v13735_v20 = vld [vmem:[%s27432_s5 + $0x188] sm:$0xff] }
 0x577   : > { %v1366_v21 = vsel %vm865_vm1, %v1363_v19, -inf }
 0x578   : > { %1367 = vmax.xlane.f32.xlu1 %v1366_v21 }
 0x605   : > { %v1368_v22 = vpop.xlane.xlu1 %1367 }
 0x606   : > { %v1369_v23 = vsub.f32 %v1363_v19, %v1368_v22  ;;  %v13734_v19 = vld [vmem:[%s27432_s5 + $0x180] sm:$0xff]  ;;  %v13736_v22 = vld [vmem:[%s27432_s5 + $0x190] sm:$0xff] }
 0x607   : > { %v19838_v21 = vpack.c.bf16 %v13735_v20, %v13734_v19 }
 0x608   : > { %v1370_v24 = vmul.f32 1.442695, %v1369_v23  ;;  %v13737_v23 = vld [vmem:[%s27432_s5 + $0x198] sm:$0xff] }
 0x60a   : > { %21613 = vpow2.f32 %v1370_v24 }
 0x614   : > { %v21614_v25 = vpop.eup %21613 }
 0x615   : > { %v1372_v26 = vsel %vm865_vm1, %v21614_v25, 0.0 }
 0x616   : > { %1373 = vadd.xlane.f32.xlu0 %v1372_v26  ;;  %v19841_v26 = vpack.c.bf16 %v13737_v23, %v13736_v22 }
 0x6a3   : > { %v1374_v27 = vpop.xlane.xlu0 %1373 }
 0x6a4   : > { %21615 = vrcp.f32 %v1374_v27  ;;  %v13738_v27 = vld [vmem:[%s27432_s5 + $0x1a0] sm:$0xff] }
 0x6ae   : > { %v21616_v28 = vpop.eup %21615 }
 0x6af   : > { %v1376_v29 = vmul.f32 %v21616_v28, %v21614_v25  ;;  %v13739_v28 = vld [vmem:[%s27432_s5 + $0x1a8] sm:$0xff] }
 0x6b1   : > { %16654 = vmatmul.mubr.msk.f32.vlgmr.msra.gmra.mrb[12].mxu1 %vm865_vm1, %v1376_v29  ;;  %v19844_v29 = vpack.c.bf16 %v13739_v28, %v13738_v27  ;;  %v13786_v27 = vld [vmem:[%s27433_s6 + $0x18] sm:$0xff] }
 0x6b2   : > { %16657 = vmatpush3.msra.mxu1 %v13677_v30  ;;  %16658 = vmatprep.mubr.msk.f32.mxu1 %vm21802_vm0, %v21803_v51  ;;  %v13740_v30 = vld [vmem:[%s27432_s5 + $0x1b0] sm:$0xff] }
 0x6b3   : > { %16661 = vmatprep.subr.mxu1 %v21803_v51 }
 0x784   : > { %v1446_v34 = vpop.f32.mrb[12].mxu1 }
 0x785   : > { %v16655_v35 = vpop.f32.mrb[13].mxu1  ;;  %16659 = vmatmul.mubr.msk.f32.vlgmr.msra.gmra.mrb[14].mxu1 %vm865_vm1, %v1446_v34  ;;  %v13743_v34 = vld [vmem:[%s27432_s5 + $0x1c8] sm:$0xff] }
 0x786   : > { %16662 = vmatpush3.msra.mxu1 %v1026_v31  ;;  %16663 = vmatprep.mubr.msk.f32.mxu1 %vm21802_vm0, %v21803_v51  ;;  %v13741_v31 = vld [vmem:[%s27432_s5 + $0x1b8] sm:$0xff]  ;;  %v19850_v35 = vpack.c.bf16 %v13743_v34, %v13742_v33 }
 0x787   : > { %19789 = vmatprep.subr.bf16.mxu1 %v21801_v3  ;;  %v19847_v32 = vpack.c.bf16 %v13741_v31, %v13740_v30  ;;  %v2613_v30 = vld [vmem:[%s27434_s7] sm:$0xff]  ;;  %v2614_v31 = vld [vmem:[%s27434_s7 + $0x8] sm:$0xff]  ;;  %v2616_v34 = vld [vmem:[%s27434_s7 + $0x18] sm:$0xff] }
 0x788   : > { %v19910_v33 = vpack.c.bf16 %v2614_v31, %v2613_v30 }
 0x789   : > { %16664 = vmatmul.mubr.msk.f32.vlgmr.msra.gmra.mrb[16].mxu1 %vm865_vm1, %v1022_v12 }
 0x78a   : > { %19791 = vmatpush3.bf16.msra.mxu1 %v19790_v36  ;;  %16733 = vmatprep.mubr.msk.f32.mxu1 %vm21802_vm0, %v21803_v51  ;;  %v13744_v36 = vld [vmem:[%s27432_s5 + $0x1d0] sm:$0xff] }
 0x78b   : > { %19792 = vmatprep.subr.bf16.mxu1 %v21801_v3  ;;  %v19853_v38 = vpack.c.bf16 %v13745_v37, %v13744_v36  ;;  %v2617_v36 = vld [vmem:[%s27434_s7 + $0x20] sm:$0xff]  ;;  %v2618_v37 = vld [vmem:[%s27434_s7 + $0x28] sm:$0xff] }
 0x78e   : > { %19794 = vmatpush3.bf16.msra.mxu1 %v19793_v39  ;;  %v13746_v39 = vld [vmem:[%s27432_s5 + $0x1e0] sm:$0xff] }
 0x78f   : > { %19795 = vmatprep.subr.bf16.mxu1 %v21801_v3  ;;  %v19856_v41 = vpack.c.bf16 %v13747_v40, %v13746_v39 }
 0x792   : > { %19797 = vmatpush3.bf16.msra.mxu1 %v19796_v42  ;;  %v13748_v42 = vld [vmem:[%s27432_s5 + $0x1f0] sm:$0xff] }
 0x793   : > { %19798 = vmatprep.subr.bf16.mxu1 %v21801_v3  ;;  %v19859_v44 = vpack.c.bf16 %v13749_v43, %v13748_v42  ;;  %v21727_v42 = vld [vmem:[%s21991_s29] sm:$0xff]  ;;  %s577_s29 = sand.u32 1, %s21791_s28  }
 0x794   : > { %s13586_s21 = sshll.u32 %s577_s29, 3  ;;  %s13498_s27 = scalar_lea.sflag [#allocation3], %s577_s29 }
 0x795   : > { %s579_s20 = scalar_lea.vmem [#allocation2], %s13586_s21  ;;  %s21743_s21 = scalar_lea.vmem %s21742_s1, 256 }
 0x796   : > { %19800 = vmatpush3.bf16.msra.mxu1 %v19799_v45  ;;  %v13766_v45 = vld [vmem:[%s27432_s5 + $0x580] sm:$0xff]  ;;  %s13511_s23 = sshll.u32 %s579_s20, 4  ;;  %s27382_s23 = int_to_ptr.vmem [resolvable:$true] %s13511_s23 }
 0x797   : > { %19801 = vmatprep.subr.bf16.mxu1 %v21801_v3  ;;  %v19886_v47 = vpack.c.bf16 %v13767_v46, %v13766_v45  ;;  %v2619_v45 = vld [vmem:[%s27434_s7 + $0x30] sm:$0xff]  ;;  %v2620_v46 = vld [vmem:[%s27434_s7 + $0x38] sm:$0xff]  ;;  %s21737_s19 = scalar_lea.vmem %s27382_s23, 128  ;;  %p21744_p0 = scmp.lt.s32.totalorder %s27382_s23, %s21742_s1 }
 0x798   : > { %p21738_p11 = scmp.ne.s32.totalorder %s27382_s23, %s21737_s19  ;;  %p21745_p1 = scmp.lt.s32.totalorder %s21743_s21, %s21737_s19 }
 0x79a   : > { %19803 = vmatpush3.bf16.msra.mxu1 %v19802_v48  ;;  %v13768_v48 = vld [vmem:[%s27432_s5 + $0x590] sm:$0xff]  ;;  %p21739_p12 = pnand %p21738_p11, %p21938_p5  ;;  %p21746_p2 = por %p21745_p1, %p21744_p0 }
 0x79b   : > { %19804 = vmatprep.subr.bf16.mxu1 %v21801_v3  ;;  %v19889_v50 = vpack.c.bf16 %v13769_v49, %v13768_v48  ;;  %v2621_v48 = vld [vmem:[%s27434_s7 + $0x40] sm:$0xff]  ;;  %v2622_v49 = vld [vmem:[%s27434_s7 + $0x48] sm:$0xff] }
 0x79c   : > { %p21740_p13 = pneg %p21739_p12 }
 0x79e   : > { %19806 = vmatpush3.bf16.msra.mxu1 %v19805_v52  ;;  %v13770_v52 = vld [vmem:[%s27432_s5 + $0x5a0] sm:$0xff]  ;;  %p21747_p3 = pnand %p21746_p2, %p21740_p13 }
 0x79f   : > { %19807 = vmatprep.subr.bf16.mxu1 %v21801_v3  ;;  %v19892_v54 = vpack.c.bf16 %v13771_v53, %v13770_v52  ;;  %v2623_v52 = vld [vmem:[%s27434_s7 + $0x50] sm:$0xff]  ;;  %v2624_v53 = vld [vmem:[%s27434_s7 + $0x58] sm:$0xff] }
 0x7a2   : > { %19809 = vmatpush3.bf16.msra.mxu1 %v19808_v55  ;;  %v13772_v55 = vld [vmem:[%s27432_s5 + $0x5b0] sm:$0xff] }
 0x7a3   : > { %19810 = vmatprep.subr.bf16.mxu1 %v21801_v3  ;;  %v19895_v57 = vpack.c.bf16 %v13773_v56, %v13772_v55  ;;  %v2625_v55 = vld [vmem:[%s27434_s7 + $0x60] sm:$0xff]  ;;  %v2626_v56 = vld [vmem:[%s27434_s7 + $0x68] sm:$0xff] }
 0x7a6   : > { %19812 = vmatpush3.bf16.msra.mxu1 %v19811_v58  ;;  %v13774_v58 = vld [vmem:[%s27432_s5 + $0x5c0] sm:$0xff] }
 0x7a7   : > { %16771 = vmatprep.subr.mxu1 %v21803_v51 }
 0x7a9   : > { %16734 = vmatmul.mubr.f32.vlgmr.msra.gmra.mrb[18].mxu1 %v22093_v61 }
 0x7aa   : > { %16773 = vmatprep.mubr.msk.f32.mxu1 %vm21802_vm0, %v21803_v51 }
 0x858   : > { %v1521_v59 = vpop.f32.mrb[14].mxu1 }
 0x859   : > { %v16660_v60 = vpop.f32.mrb[15].mxu1 }
 0x85c   : > { %v1594_v62 = vpop.f32.mrb[16].mxu1 }
 0x85d   : > { %v22618_v0 = vadd.f32 %v1594_v62, %v1521_v59  ;;  %v16665_v2 = vpop.f32.mrb[17].mxu1  ;;  %v13775_v59 = vld [vmem:[%s27432_s5 + $0x5c8] sm:$0xff]  ;;  %v13776_v62 = vld [vmem:[%s27432_s5 + $0x5d0] sm:$0xff] }
 0x85e   : > { %v19898_v60 = vpack.c.bf16 %v13775_v59, %v13774_v58  ;;  %v13777_v2 = vld [vmem:[%s27432_s5 + $0x5d8] sm:$0xff]  ;;  %v2627_v58 = vld [vmem:[%s27434_s7 + $0x70] sm:$0xff] }
 0x85f   : > { %v2628_v59 = vld [vmem:[%s27434_s7 + $0x78] sm:$0xff] }
 0x87c   : > { %v1768_v5 = vpop.f32.mrb[18].mxu1 }
 0x87d   : > { %v16735_v7 = vpop.f32.mrb[19].mxu1  ;;  %16772 = vmatpush3.xpose.msk.msra.mxu1 %vm865_vm1, %v1768_v5  ;;  %v19901_v5 = vpack.c.bf16 %v13777_v2, %v13776_v62  ;;  %v2700_v62 = vld [vmem:[%s27435_s8] sm:$0xff]  ;;  %v2701_v2 = vld [vmem:[%s27435_s8 + $0x8] sm:$0xff] }
 0x87e   : > { %16776 = vmatprep.subr.mxu1 %v21803_v51  ;;  %v13778_v7 = vld [vmem:[%s27432_s5 + $0x5e0] sm:$0xff] }
 0x880   : > { %16774 = vmatmul.mubr.msk.f32.vlgmr.msra.gmra.mrb[20].mxu1 %vm865_vm1, %v22398_v1 }
 0x881   : > { %16777 = vmatpush3.msra.mxu1 %v22400_v4  ;;  %16778 = vmatprep.mubr.msk.f32.mxu1 %vm21802_vm0, %v21803_v51 }
 0x882   : > { %16781 = vmatprep.subr.mxu1 %v21803_v51 }
 0x953   : > { %v1933_v9 = vpop.f32.mrb[20].mxu1 }
 0x954   : > { %v1934_v10 = vadd.f32 %v13728_v8, %v1933_v9  ;;  %v16775_v11 = vpop.f32.mrb[21].mxu1  ;;  %v13779_v8 = vld [vmem:[%s27432_s5 + $0x5e8] sm:$0xff] }
 0x955   : > { %v19904_v9 = vpack.c.bf16 %v13779_v8, %v13778_v7  ;;  %v13781_v11 = vld [vmem:[%s27432_s5 + $0x5f8] sm:$0xff]  ;;  %v19934_v7 = vpack.c.bf16 %v2701_v2, %v2700_v62  ;;  %v13801_v2 = vld [vmem:[%s27432_s5 + $0x648] sm:$0xff] }
 0x956   : > { %v1937_v12 = vsel %vm865_vm1, %v1934_v10, -inf  ;;  %v2703_v8 = vld [vmem:[%s27435_s8 + $0x18] sm:$0xff] }
 0x957   : > { %1938 = vmax.xlane.f32.xlu1 %v1937_v12 }
 0x9e4   : > { %v1939_v13 = vpop.xlane.xlu1 %1938 }
 0x9e5   : > { %v1940_v14 = vsub.f32 %v1934_v10, %v1939_v13  ;;  %v13780_v10 = vld [vmem:[%s27432_s5 + $0x5f0] sm:$0xff] }
 0x9e6   : > { %v19907_v12 = vpack.c.bf16 %v13781_v11, %v13780_v10  ;;  %v2704_v10 = vld [vmem:[%s27435_s8 + $0x20] sm:$0xff]  ;;  %v2705_v11 = vld [vmem:[%s27435_s8 + $0x28] sm:$0xff] }
 0x9e7   : > { %v1941_v1 = vmul.f32 1.442695, %v1940_v14 }
 0x9e9   : > { %21617 = vpow2.f32 %v1941_v1 }
 0x9f3   : > { %v21618_v4 = vpop.eup %21617 }
 0x9f4   : > { %v1943_v15 = vsel %vm865_vm1, %v21618_v4, 0.0 }
 0x9f5   : > { %1944 = vadd.xlane.f32.xlu0 %v1943_v15 }
 0xa82   : > { %v1945_v16 = vpop.xlane.xlu0 %1944 }
 0xa83   : > { %21619 = vrcp.f32 %v1945_v16 }
 0xa8d   : > { %v21620_v17 = vpop.eup %21619 }
 0xa8e   : > { %v1947_v63 = vmul.f32 %v21620_v17, %v21618_v4 }
 0xa90   : > { %16779 = vmatmul.mubr.msk.f32.vlgmr.msra.gmra.mrb[22].mxu1 %vm865_vm1, %v1947_v63 }
 0xa91   : > { %16782 = vmatpush3.msra.mxu1 %v13732_v18  ;;  %16783 = vmatprep.mubr.msk.f32.mxu1 %vm21802_vm0, %v21803_v51 }
 0xa92   : > { %19837 = vmatprep.subr.bf16.mxu1 %v21801_v3 }
 0xb63   : > { %v2017_v24 = vpop.f32.mrb[22].mxu1 }
 0xb64   : > { %v16780_v25 = vpop.f32.mrb[23].mxu1  ;;  %16784 = vmatmul.mubr.msk.f32.vlgmr.msra.gmra.mrb[24].mxu1 %vm865_vm1, %v2017_v24 }
 0xb65   : > { %19839 = vmatpush3.bf16.msra.mxu1 %v19838_v21  ;;  %16818 = vmatprep.mubr.msk.f32.mxu1 %vm21802_vm0, %v21803_v51 }
 0xb66   : > { %19840 = vmatprep.subr.bf16.mxu1 %v21801_v3 }
 0xb69   : > { %19842 = vmatpush3.bf16.msra.mxu1 %v19841_v26 }
 0xb6a   : > { %19843 = vmatprep.subr.bf16.mxu1 %v21801_v3 }
 0xb6d   : > { %19845 = vmatpush3.bf16.msra.mxu1 %v19844_v29 }
 0xb6e   : > { %19846 = vmatprep.subr.bf16.mxu1 %v21801_v3 }
 0xb71   : > { %19848 = vmatpush3.bf16.msra.mxu1 %v19847_v32  ;;  %v2615_v32 = vld [vmem:[%s27434_s7 + $0x10] sm:$0xff] }
 0xb72   : > { %19849 = vmatprep.subr.bf16.mxu1 %v21801_v3 }
 0xb75   : > { %19851 = vmatpush3.bf16.msra.mxu1 %v19850_v35  ;;  %v19913_v35 = vpack.c.bf16 %v2616_v34, %v2615_v32  ;;  %v13792_v32 = vld [vmem:[%s27432_s5 + $0x600] sm:$0xff] }
 0xb76   : > { %19852 = vmatprep.subr.bf16.mxu1 %v21801_v3  ;;  %v13808_v34 = vld [vmem:[%s27432_s5 + $0x800] sm:$0xff] }
 0xb79   : > { %19854 = vmatpush3.bf16.msra.mxu1 %v19853_v38  ;;  %v19916_v38 = vpack.c.bf16 %v2618_v37, %v2617_v36  ;;  %v13809_v36 = vld [vmem:[%s27432_s5 + $0x808] sm:$0xff]  ;;  %v13794_v37 = vld [vmem:[%s27432_s5 + $0x610] sm:$0xff] }
 0xb7a   : > { %19855 = vmatprep.subr.bf16.mxu1 %v21801_v3 }
 0xb7d   : > { %19857 = vmatpush3.bf16.msra.mxu1 %v19856_v41 }
 0xb7e   : > { %19858 = vmatprep.subr.bf16.mxu1 %v21801_v3 }
 0xb81   : > { %19860 = vmatpush3.bf16.msra.mxu1 %v19859_v44 }
 0xb82   : > { %19885 = vmatprep.subr.bf16.mxu1 %v21801_v3 }
 0xb84   : > { %16819 = vmatmul.mubr.f32.vlgmr.msra.gmra.mrb[26].mxu1 %v22093_v61 }
 0xb85   : > { %19887 = vmatpush3.bf16.msra.mxu1 %v19886_v47  ;;  %16888 = vmatprep.mubr.msk.f32.mxu1 %vm21802_vm0, %v21803_v51  ;;  %v19919_v47 = vpack.c.bf16 %v2620_v46, %v2619_v45  ;;  %v13796_v45 = vld [vmem:[%s27432_s5 + $0x620] sm:$0xff]  ;;  %v13797_v46 = vld [vmem:[%s27432_s5 + $0x628] sm:$0xff] }
 0xb86   : > { %19888 = vmatprep.subr.bf16.mxu1 %v21801_v3 }
 0xb89   : > { %19890 = vmatpush3.bf16.msra.mxu1 %v19889_v50  ;;  %v19922_v50 = vpack.c.bf16 %v2622_v49, %v2621_v48  ;;  %v13813_v48 = vld [vmem:[%s27432_s5 + $0x828] sm:$0xff]  ;;  %v19964_v49 = vpack.c.bf16 %v13797_v46, %v13796_v45  ;;  %v13834_v45 = vld [vmem:[%s27432_s5 + $0xa50] sm:$0xff]  ;;  %v13835_v46 = vld [vmem:[%s27432_s5 + $0xa58] sm:$0xff] }
 0xb8a   : > { %19891 = vmatprep.subr.bf16.mxu1 %v21801_v3 }
 0xb8d   : > { %19893 = vmatpush3.bf16.msra.mxu1 %v19892_v54  ;;  %v19925_v54 = vpack.c.bf16 %v2624_v53, %v2623_v52  ;;  %v13798_v52 = vld [vmem:[%s27432_s5 + $0x630] sm:$0xff]  ;;  %v13799_v53 = vld [vmem:[%s27432_s5 + $0x638] sm:$0xff] }
 0xb8e   : > { %19894 = vmatprep.subr.bf16.mxu1 %v21801_v3 }
 0xb91   : > { %19896 = vmatpush3.bf16.msra.mxu1 %v19895_v57  ;;  %v19928_v57 = vpack.c.bf16 %v2626_v56, %v2625_v55 }
 0xb92   : > { %19897 = vmatprep.subr.bf16.mxu1 %v21801_v3 }
 0xb95   : > { %19899 = vmatpush3.bf16.msra.mxu1 %v19898_v60  ;;  %v19931_v60 = vpack.c.bf16 %v2628_v59, %v2627_v58  ;;  %v13814_v59 = vld [vmem:[%s27432_s5 + $0x830] sm:$0xff] }
 0xb96   : > { %19900 = vmatprep.subr.bf16.mxu1 %v21801_v3 }
 0xb99   : > { %19902 = vmatpush3.bf16.msra.mxu1 %v19901_v5  ;;  %v2702_v5 = vld [vmem:[%s27435_s8 + $0x10] sm:$0xff] }
 0xb9a   : > { %19903 = vmatprep.subr.bf16.mxu1 %v21801_v3 }
 0xb9d   : > { %19905 = vmatpush3.bf16.msra.mxu1 %v19904_v9  ;;  %v19937_v9 = vpack.c.bf16 %v2703_v8, %v2702_v5  ;;  %v13817_v8 = vld [vmem:[%s27432_s5 + $0x848] sm:$0xff] }
 0xb9e   : > { %19906 = vmatprep.subr.bf16.mxu1 %v21801_v3 }
 0xba1   : > { %19908 = vmatpush3.bf16.msra.mxu1 %v19907_v12  ;;  %v19940_v12 = vpack.c.bf16 %v2705_v11, %v2704_v10  ;;  %v13802_v10 = vld [vmem:[%s27432_s5 + $0x650] sm:$0xff]  ;;  %v13803_v11 = vld [vmem:[%s27432_s5 + $0x658] sm:$0xff] }
 0xba2   : > { %16891 = vmatprep.subr.mxu1 %v21803_v51 }
 0xba4   : > { %16889 = vmatmul.mubr.f32.vlgmr.msra.gmra.mrb[28].mxu1 %v22093_v61 }
 0xba5   : > { %16893 = vmatprep.mubr.msk.f32.mxu1 %vm21802_vm0, %v21803_v51 }
 0xbaa   : > { %16892 = vmatpush3.xpose.msk.msra.mxu1 %vm865_vm1, %v22402_v6  ;;  %v13782_v6 = vld [vmem:[%s27468_s18 + $0x18] sm:$0xff] }
 0xbab   : > { %19933 = vmatprep.subr.bf16.mxu1 %v21801_v3 }
 0xc37   : > { %v2092_v13 = vpop.f32.mrb[24].mxu1 }
 0xc38   : > { %v2096_v14 = vadd.f32 %v2092_v13, %v22618_v0  ;;  %v16785_v1 = vpop.f32.mrb[25].mxu1  ;;  %v2706_v13 = vld [vmem:[%s27435_s8 + $0x30] sm:$0xff] }
 0xc57   : > { %v2180_v4 = vpop.f32.mrb[26].mxu1 }
 0xc58   : > { %v16820_v15 = vpop.f32.mrb[27].mxu1  ;;  %16894 = vmatmul.mubr.msk.f32.vlgmr.msra.gmra.mrb[30].mxu1 %vm865_vm1, %v2180_v4  ;;  %v2708_v4 = vld [vmem:[%s27435_s8 + $0x40] sm:$0xff] }
 0xc59   : > { %16973 = vmatprep.mubr.msk.f32.mxu1 %vm21802_vm0, %v21803_v51  ;;  %19935 = vmatpush3.bf16.msra.mxu1 %v19934_v7  ;;  %v2709_v15 = vld [vmem:[%s27435_s8 + $0x48] sm:$0xff]  ;;  %v13816_v7 = vld [vmem:[%s27432_s5 + $0x840] sm:$0xff] }
 0xc5a   : > { %19936 = vmatprep.subr.bf16.mxu1 %v21801_v3 }
 0xc5d   : > { %19938 = vmatpush3.bf16.msra.mxu1 %v19937_v9  ;;  %v19994_v9 = vpack.c.bf16 %v13817_v8, %v13816_v7  ;;  %v13866_v7 = vld [vmem:[%s27432_s5 + $0x8b0] sm:$0xff]  ;;  %v13867_v8 = vld [vmem:[%s27432_s5 + $0x8b8] sm:$0xff] }
 0xc5e   : > { %19939 = vmatprep.subr.bf16.mxu1 %v21801_v3 }
 0xc61   : > { %19941 = vmatpush3.bf16.msra.mxu1 %v19940_v12  ;;  %v19973_v12 = vpack.c.bf16 %v13803_v11, %v13802_v10  ;;  %v13868_v10 = vld [vmem:[%s27432_s5 + $0x8c0] sm:$0xff]  ;;  %v13869_v11 = vld [vmem:[%s27432_s5 + $0x8c8] sm:$0xff] }
 0xc62   : > { %19942 = vmatprep.subr.bf16.mxu1 %v21801_v3 }
 0xc77   : > { %v2354_v61 = vpop.f32.mrb[28].mxu1 }
 0xc78   : > { %v16890_v16 = vpop.f32.mrb[29].mxu1  ;;  %16897 = vmatpush3.msra.mxu0 %v2354_v61  ;;  %v19946_v61 = vpack.c.bf16 %v2709_v15, %v2708_v4  ;;  %v13804_v4 = vld [vmem:[%s27432_s5 + $0x660] sm:$0xff]  ;;  %v13805_v15 = vld [vmem:[%s27432_s5 + $0x668] sm:$0xff] }
 0xc79   : > { %16901 = vmatprep.subr.mxu0 %v21803_v51  ;;  %v2710_v16 = vld [vmem:[%s27435_s8 + $0x50] sm:$0xff] }
 0xd2b   : > { %v2432_v17 = vpop.f32.mrb[30].mxu1 }
 0xd2c   : > { %v2433_v63 = vadd.f32 %v13782_v6, %v2432_v17  ;;  %v16895_v0 = vpop.f32.mrb[31].mxu1  ;;  %v2711_v6 = vld [vmem:[%s27435_s8 + $0x58] sm:$0xff] }
 0xd2d   : > { %v19949_v17 = vpack.c.bf16 %v2711_v6, %v2710_v16  ;;  %v2713_v0 = vld [vmem:[%s27435_s8 + $0x68] sm:$0xff]  ;;  %v13820_v16 = vld [vmem:[%s27432_s5 + $0x860] sm:$0xff] }
 0xd2e   : > { %v2436_v18 = vsel %vm865_vm1, %v2433_v63, -inf  ;;  %v13821_v6 = vld [vmem:[%s27432_s5 + $0x868] sm:$0xff] }
 0xd2f   : > { %2437 = vmax.xlane.f32.xlu1 %v2436_v18 }
 0xdbc   : > { %v2438_v19 = vpop.xlane.xlu1 %2437 }
 0xdbd   : > { %v2439_v20 = vsub.f32 %v2433_v63, %v2438_v19  ;;  %v2712_v63 = vld [vmem:[%s27435_s8 + $0x60] sm:$0xff] }
 0xdbe   : > { %v19952_v18 = vpack.c.bf16 %v2713_v0, %v2712_v63  ;;  %v13806_v63 = vld [vmem:[%s27432_s5 + $0x670] sm:$0xff]  ;;  %v13807_v0 = vld [vmem:[%s27432_s5 + $0x678] sm:$0xff] }
 0xdbf   : > { %v2440_v21 = vmul.f32 1.442695, %v2439_v20 }
 0xdc1   : > { %21621 = vpow2.f32 %v2440_v21 }
 0xdcb   : > { %v21622_v22 = vpop.eup %21621 }
 0xdcc   : > { %v2442_v23 = vsel %vm865_vm1, %v21622_v22, 0.0 }
 0xdcd   : > { %2443 = vadd.xlane.f32.xlu0 %v2442_v23  ;;  %v13789_v23 = vld [vmem:[%s27431_s4 + $0x1] ss:$0 sm:$0xff] }
 0xe5a   : > { %v2444_v24 = vpop.xlane.xlu0 %2443 }
 0xe5b   : > { %21623 = vrcp.f32 %v2444_v24 }
 0xe65   : > { %v21624_v25 = vpop.eup %21623 }
 0xe66   : > { %v2446_v26 = vmul.f32 %v21624_v25, %v21622_v22 }
 0xe68   : > { %16899 = vmatmul.mubr.msk.f32.vlgmr.msra.gmra.mrb[12].mxu0 %vm865_vm1, %v2446_v26  ;;  %v2714_v26 = vld [vmem:[%s27435_s8 + $0x70] sm:$0xff] }
 0xe69   : > { %16902 = vmatpush3.msra.mxu0 %v13786_v27  ;;  %16903 = vmatprep.mubr.msk.f32.mxu0 %vm21802_vm0, %v21803_v51  ;;  %v2715_v27 = vld [vmem:[%s27435_s8 + $0x78] sm:$0xff] }
 0xe6a   : > { %19909 = vmatprep.subr.bf16.mxu0 %v21801_v3 }
 0xf3b   : > { %v2516_v28 = vpop.f32.mrb[12].mxu0 }
 0xf3c   : > { %v16900_v29 = vpop.f32.mrb[13].mxu0  ;;  %16904 = vmatmul.mubr.msk.f32.vlgmr.msra.gmra.mrb[14].mxu0 %vm865_vm1, %v2516_v28  ;;  %v19955_v28 = vpack.c.bf16 %v2715_v27, %v2714_v26  ;;  %v13825_v26 = vld [vmem:[%s27432_s5 + $0xa08] sm:$0xff] }
 0xf3d   : > { %16938 = vmatprep.mubr.msk.f32.mxu0 %vm21802_vm0, %v21803_v51  ;;  %19911 = vmatpush3.bf16.msra.mxu0 %v19910_v33  ;;  %v13793_v33 = vld [vmem:[%s27432_s5 + $0x608] sm:$0xff] }
 0xf3e   : > { %19912 = vmatprep.subr.bf16.mxu0 %v21801_v3 }
 0xf41   : > { %19914 = vmatpush3.bf16.msra.mxu0 %v19913_v35  ;;  %v19958_v35 = vpack.c.bf16 %v13793_v33, %v13792_v32  ;;  %v13826_v32 = vld [vmem:[%s27432_s5 + $0xa10] sm:$0xff]  ;;  %v13827_v33 = vld [vmem:[%s27432_s5 + $0xa18] sm:$0xff] }
 0xf42   : > { %19915 = vmatprep.subr.bf16.mxu0 %v21801_v3 }
 0xf45   : > { %19917 = vmatpush3.bf16.msra.mxu0 %v19916_v38  ;;  %v13795_v38 = vld [vmem:[%s27432_s5 + $0x618] sm:$0xff] }
 0xf46   : > { %19918 = vmatprep.subr.bf16.mxu0 %v21801_v3 }
 0xf49   : > { %19920 = vmatpush3.bf16.msra.mxu0 %v19919_v47  ;;  %v13812_v47 = vld [vmem:[%s27432_s5 + $0x820] sm:$0xff] }
 0xf4a   : > { %19921 = vmatprep.subr.bf16.mxu0 %v21801_v3 }
 0xf4d   : > { %19923 = vmatpush3.bf16.msra.mxu0 %v19922_v50  ;;  %v19988_v50 = vpack.c.bf16 %v13813_v48, %v13812_v47  ;;  %v20021_v47 = vpack.c.bf16 %v13835_v46, %v13834_v45  ;;  %v13836_v48 = vld [vmem:[%s27432_s5 + $0xa60] sm:$0xff]  ;;  %v13849_v46 = vld [vmem:[%s27432_s5 + $0x6a8] sm:$0xff] }
 0xf4e   : > { %19924 = vmatprep.subr.bf16.mxu0 %v21801_v3  ;;  %v13848_v45 = vld [vmem:[%s27432_s5 + $0x6a0] sm:$0xff] }
 0xf51   : > { %19926 = vmatpush3.bf16.msra.mxu0 %v19925_v54  ;;  %v19967_v54 = vpack.c.bf16 %v13799_v53, %v13798_v52  ;;  %v13838_v52 = vld [vmem:[%s27432_s5 + $0xa70] sm:$0xff]  ;;  %v13839_v53 = vld [vmem:[%s27432_s5 + $0xa78] sm:$0xff] }
 0xf52   : > { %19927 = vmatprep.subr.bf16.mxu0 %v21801_v3 }
 0xf55   : > { %19929 = vmatpush3.bf16.msra.mxu0 %v19928_v57 }
 0xf56   : > { %19930 = vmatprep.subr.bf16.mxu0 %v21801_v3 }
 0xf59   : > { %19932 = vmatpush3.bf16.msra.mxu0 %v19931_v60  ;;  %v13815_v60 = vld [vmem:[%s27432_s5 + $0x838] sm:$0xff] }
 0xf5a   : > { %19957 = vmatprep.subr.bf16.mxu0 %v21801_v3  ;;  %v19991_v62 = vpack.c.bf16 %v13815_v60, %v13814_v59  ;;  %v13862_v59 = vld [vmem:[%s27432_s5 + $0x890] sm:$0xff]  ;;  %v13863_v60 = vld [vmem:[%s27432_s5 + $0x898] sm:$0xff] }
0x100f   : > { %v2591_v39 = vpop.f32.mrb[14].mxu0 }
0x1010   : > { %v2595_v40 = vadd.f32 %v2591_v39, %v2096_v14  ;;  %v16905_v41 = vpop.f32.mrb[15].mxu0  ;;  %v2707_v14 = vld [vmem:[%s27435_s8 + $0x38] sm:$0xff]  ;;  %v19982_v39 = vpack.c.bf16 %v13809_v36, %v13808_v34  ;;  %v20009_v34 = vpack.c.bf16 %v13827_v33, %v13826_v32  ;;  %v13829_v36 = vld [vmem:[%s27432_s5 + $0xa28] sm:$0xff] }
0x1011   : > { %v19943_v1 = vpack.c.bf16 %v2707_v14, %v2706_v13  ;;  %v13811_v41 = vld [vmem:[%s27432_s5 + $0x818] sm:$0xff]  ;;  %v13818_v13 = vld [vmem:[%s27432_s5 + $0x850] sm:$0xff] }
0x1012   : > { %v22806_v43 = vadd.f32 %v21727_v42, %v2595_v40  ;;  %v13810_v40 = vld [vmem:[%s27432_s5 + $0x810] sm:$0xff]  ;;  %v19961_v42 = vpack.c.bf16 %v13795_v38, %v13794_v37  ;;  %v13819_v14 = vld [vmem:[%s27432_s5 + $0x858] sm:$0xff] }
0x1013   : > { %19944 = vmatpush3.bf16.msra.mxu1 %v19943_v1  ;;  %v19997_v1 = vpack.c.bf16 %v13819_v14, %v13818_v13  ;;  %v13830_v38 = vld [vmem:[%s27432_s5 + $0xa30] sm:$0xff]  ;;  %v13871_v14 = vld [vmem:[%s27432_s5 + $0x8d8] sm:$0xff] }
0x1014   : > { %v2599_v44 = vmul.f32 %v22806_v43, %v22806_v43  ;;  %19945 = vmatprep.subr.bf16.mxu1 %v21801_v3  ;;  %v13870_v13 = vld [vmem:[%s27432_s5 + $0x8d0] sm:$0xff] }
0x1016   : > { %2600 = vadd.xlane.f32.xlu1 %v2599_v44  ;;  %v19985_v44 = vpack.c.bf16 %v13811_v41, %v13810_v40  ;;  %v13832_v41 = vld [vmem:[%s27432_s5 + $0xa40] sm:$0xff] }
0x1017   : > { %19947 = vmatpush3.bf16.msra.mxu1 %v19946_v61  ;;  %v19976_v61 = vpack.c.bf16 %v13805_v15, %v13804_v4  ;;  %v13872_v4 = vld [vmem:[%s27432_s5 + $0x8e0] sm:$0xff]  ;;  %v13873_v15 = vld [vmem:[%s27432_s5 + $0x8e8] sm:$0xff] }
0x1018   : > { %19948 = vmatprep.subr.bf16.mxu1 %v21801_v3 }
0x101b   : > { %19950 = vmatpush3.bf16.msra.mxu1 %v19949_v17  ;;  %v20000_v17 = vpack.c.bf16 %v13821_v6, %v13820_v16  ;;  %v13874_v16 = vld [vmem:[%s27432_s5 + $0x8f0] sm:$0xff]  ;;  %v13875_v6 = vld [vmem:[%s27432_s5 + $0x8f8] sm:$0xff] }
0x101c   : > { %19951 = vmatprep.subr.bf16.mxu1 %v21801_v3 }
0x101f   : > { %19953 = vmatpush3.bf16.msra.mxu1 %v19952_v18  ;;  %v19979_v18 = vpack.c.bf16 %v13807_v0, %v13806_v63 }
0x1020   : > { %19954 = vmatprep.subr.bf16.mxu1 %v21801_v3 }
0x1023   : > { %19956 = vmatpush3.bf16.msra.mxu1 %v19955_v28  ;;  %v13791_v28 = vld [vmem:[%s27431_s4 + $0x2] ss:$0 sm:$0xff] }
0x1024   : > { %19981 = vmatprep.subr.bf16.mxu1 %v21801_v3 }
0x10a3   : > { %v2601_v19 = vpop.xlane.xlu1 %2600 }
0x10a4   : > { %v2602_v20 = vmul.f32 0.03125, %v2601_v19  ;;  %v13822_v19 = vld [vmem:[%s27432_s5 + $0x870] sm:$0xff] }
0x10a6   : > { %v2603_v21 = vadd.f32 1e-06, %v2602_v20  ;;  %v13823_v20 = vld [vmem:[%s27432_s5 + $0x878] sm:$0xff] }
0x10a8   : > { %21625 = vrsqrt.f32 %v2603_v21  ;;  %v20003_v21 = vpack.c.bf16 %v13823_v20, %v13822_v19 }
0x10b2   : > { %v21626_v22 = vpop.eup %21625 }
0x10b3   : > { %v2605_v24 = vmul.f32 %v21626_v22, %v22806_v43 }
0x10b5   : > { %v2612_v25 = vmul.f32 %v13789_v23, %v2605_v24 }
0x10b7   : > { %16939 = vmatmul.mubr.f32.vlgmr.msra.gmra.mrb[16].mxu0 %v2612_v25  ;;  %v13824_v25 = vld [vmem:[%s27432_s5 + $0xa00] sm:$0xff] }
0x10b8   : > { %17008 = vmatprep.mubr.msk.f32.mxu0 %vm21802_vm0, %v21803_v51  ;;  %19959 = vmatpush3.bf16.msra.mxu0 %v19958_v35  ;;  %v13828_v35 = vld [vmem:[%s27432_s5 + $0xa20] sm:$0xff] }
0x10b9   : > { %19960 = vmatprep.subr.bf16.mxu0 %v21801_v3  ;;  %v20012_v37 = vpack.c.bf16 %v13829_v36, %v13828_v35  ;;  %v13844_v36 = vld [vmem:[%s27432_s5 + $0x680] sm:$0xff] }
0x10bc   : > { %19962 = vmatpush3.bf16.msra.mxu0 %v19961_v42  ;;  %v13833_v42 = vld [vmem:[%s27432_s5 + $0xa48] sm:$0xff] }
0x10bd   : > { %19963 = vmatprep.subr.bf16.mxu0 %v21801_v3 }
0x10c0   : > { %19965 = vmatpush3.bf16.msra.mxu0 %v19964_v49  ;;  %v13837_v49 = vld [vmem:[%s27432_s5 + $0xa68] sm:$0xff] }
0x10c1   : > { %19966 = vmatprep.subr.bf16.mxu0 %v21801_v3 }
0x10c4   : > { %19968 = vmatpush3.bf16.msra.mxu0 %v19967_v54  ;;  %v20027_v54 = vpack.c.bf16 %v13839_v53, %v13838_v52  ;;  %v13852_v52 = vld [vmem:[%s27432_s5 + $0x6c0] sm:$0xff]  ;;  %v13853_v53 = vld [vmem:[%s27432_s5 + $0x6c8] sm:$0xff] }
0x10c5   : > { %19969 = vmatprep.subr.bf16.mxu0 %v21801_v3 }
0x118a   : > { %v2695_v29 = vpop.f32.mrb[16].mxu0 }
0x118b   : > { %v2699_v30 = vmax.f32 %v2695_v29, 0.0  ;;  %v16940_v31 = vpop.f32.mrb[17].mxu0 }
0x118d   : > { %16974 = vmatmul.mubr.f32.vlgmr.msra.gmra.mrb[32].mxu1 %v2699_v30  ;;  %v20006_v30 = vpack.c.bf16 %v13825_v26, %v13824_v25  ;;  %v21728_v25 = vld [vmem:[%s27468_s18] sm:$0xff] }
0x118e   : > { %17043 = vmatprep.mubr.msk.f32.mxu1 %vm21802_vm0, %v21803_v51  ;;  %19983 = vmatpush3.bf16.msra.mxu1 %v19982_v39  ;;  %v13831_v39 = vld [vmem:[%s27432_s5 + $0xa38] sm:$0xff] }
0x118f   : > { %19984 = vmatprep.subr.bf16.mxu1 %v21801_v3  ;;  %v20015_v40 = vpack.c.bf16 %v13831_v39, %v13830_v38 }
0x1192   : > { %19986 = vmatpush3.bf16.msra.mxu1 %v19985_v44  ;;  %v20018_v44 = vpack.c.bf16 %v13833_v42, %v13832_v41  ;;  %v13846_v41 = vld [vmem:[%s27432_s5 + $0x690] sm:$0xff]  ;;  %v13847_v42 = vld [vmem:[%s27432_s5 + $0x698] sm:$0xff] }
0x1193   : > { %19987 = vmatprep.subr.bf16.mxu1 %v21801_v3 }
0x1196   : > { %19989 = vmatpush3.bf16.msra.mxu1 %v19988_v50  ;;  %v20024_v50 = vpack.c.bf16 %v13837_v49, %v13836_v48  ;;  %v13850_v48 = vld [vmem:[%s27432_s5 + $0x6b0] sm:$0xff]  ;;  %v13851_v49 = vld [vmem:[%s27432_s5 + $0x6b8] sm:$0xff] }
0x1197   : > { %19990 = vmatprep.subr.bf16.mxu1 %v21801_v3 }
0x119a   : > { %19992 = vmatpush3.bf16.msra.mxu1 %v19991_v62  ;;  %v20057_v62 = vpack.c.bf16 %v13863_v60, %v13862_v59  ;;  %v13856_v59 = vld [vmem:[%s27432_s5 + $0x6e0] sm:$0xff]  ;;  %v13857_v60 = vld [vmem:[%s27432_s5 + $0x6e8] sm:$0xff] }
0x119b   : > { %19993 = vmatprep.subr.bf16.mxu1 %v21801_v3 }
0x119e   : > { %19995 = vmatpush3.bf16.msra.mxu1 %v19994_v9  ;;  %v20063_v9 = vpack.c.bf16 %v13867_v8, %v13866_v7  ;;  %v13876_v7 = vld [vmem:[%s27432_s5 + $0xa80] sm:$0xff]  ;;  %v13877_v8 = vld [vmem:[%s27432_s5 + $0xa88] sm:$0xff] }
0x119f   : > { %19996 = vmatprep.subr.bf16.mxu1 %v21801_v3 }
0x11a2   : > { %19998 = vmatpush3.bf16.msra.mxu1 %v19997_v1  ;;  %v20069_v1 = vpack.c.bf16 %v13871_v14, %v13870_v13  ;;  %v13880_v13 = vld [vmem:[%s27432_s5 + $0xaa0] sm:$0xff]  ;;  %v13881_v14 = vld [vmem:[%s27432_s5 + $0xaa8] sm:$0xff] }
0x11a3   : > { %19999 = vmatprep.subr.bf16.mxu1 %v21801_v3 }
0x11a6   : > { %20001 = vmatpush3.bf16.msra.mxu1 %v20000_v17  ;;  %v20075_v17 = vpack.c.bf16 %v13875_v6, %v13874_v16  ;;  %v13884_v16 = vld [vmem:[%s27432_s5 + $0xac0] sm:$0xff]  ;;  %v13885_v6 = vld [vmem:[%s27432_s5 + $0xac8] sm:$0xff] }
0x11a7   : > { %20002 = vmatprep.subr.bf16.mxu1 %v21801_v3 }
0x11aa   : > { %20004 = vmatpush3.bf16.msra.mxu1 %v20003_v21 }
0x11ab   : > { %17081 = vmatprep.subr.mxu1 %v21803_v51 }
0x1260   : > { %v2782_v55 = vpop.f32.mrb[32].mxu1 }
0x1261   : > { %v22959_v56 = vadd.f32 %v2782_v55, %v22806_v43  ;;  %v16975_v57 = vpop.f32.mrb[33].mxu1  ;;  %v13800_v43 = vld [vmem:[%s27432_s5 + $0x640] sm:$0xff] }
0x1262   : > { %v19970_v5 = vpack.c.bf16 %v13801_v2, %v13800_v43  ;;  %v13860_v55 = vld [vmem:[%s27432_s5 + $0x880] sm:$0xff]  ;;  %v13861_v57 = vld [vmem:[%s27432_s5 + $0x888] sm:$0xff] }
0x1263   : > { %v2789_v58 = vmul.f32 %v22959_v56, %v22959_v56  ;;  %v13864_v43 = vld [vmem:[%s27432_s5 + $0x8a0] sm:$0xff]  ;;  %v13865_v2 = vld [vmem:[%s27432_s5 + $0x8a8] sm:$0xff] }
0x1264   : > { %19971 = vmatpush3.bf16.msra.mxu0 %v19970_v5  ;;  %v20060_v5 = vpack.c.bf16 %v13865_v2, %v13864_v43  ;;  %v13858_v43 = vld [vmem:[%s27432_s5 + $0x6f0] sm:$0xff]  ;;  %v13859_v2 = vld [vmem:[%s27432_s5 + $0x6f8] sm:$0xff] }
0x1265   : > { %2790 = vadd.xlane.f32.xlu0 %v2789_v58  ;;  %19972 = vmatprep.subr.bf16.mxu0 %v21801_v3  ;;  %v20054_v58 = vpack.c.bf16 %v13861_v57, %v13860_v55  ;;  %v13854_v55 = vld [vmem:[%s27432_s5 + $0x6d0] sm:$0xff]  ;;  %v13855_v57 = vld [vmem:[%s27432_s5 + $0x6d8] sm:$0xff] }
0x1268   : > { %19974 = vmatpush3.bf16.msra.mxu0 %v19973_v12  ;;  %v20066_v12 = vpack.c.bf16 %v13869_v11, %v13868_v10  ;;  %v13878_v10 = vld [vmem:[%s27432_s5 + $0xa90] sm:$0xff]  ;;  %v13879_v11 = vld [vmem:[%s27432_s5 + $0xa98] sm:$0xff] }
0x1269   : > { %19975 = vmatprep.subr.bf16.mxu0 %v21801_v3 }
0x126c   : > { %19977 = vmatpush3.bf16.msra.mxu0 %v19976_v61  ;;  %v20072_v61 = vpack.c.bf16 %v13873_v15, %v13872_v4  ;;  %v13882_v4 = vld [vmem:[%s27432_s5 + $0xab0] sm:$0xff]  ;;  %v13883_v15 = vld [vmem:[%s27432_s5 + $0xab8] sm:$0xff] }
0x126d   : > { %19978 = vmatprep.subr.bf16.mxu0 %v21801_v3 }
0x1270   : > { %19980 = vmatpush3.bf16.msra.mxu0 %v19979_v18 }
0x1271   : > { %20005 = vmatprep.subr.bf16.mxu0 %v21801_v3 }
0x12f2   : > { %v2791_v22 = vpop.xlane.xlu0 %2790 }
0x12f3   : > { %v2792_v23 = vmul.f32 0.03125, %v2791_v22 }
0x12f5   : > { %v2793_v24 = vadd.f32 1e-06, %v2792_v23 }
0x12f7   : > { %21627 = vrsqrt.f32 %v2793_v24 }
0x1301   : > { %v21628_v27 = vpop.eup %21627 }
0x1302   : > { %v2795_v29 = vmul.f32 %v21628_v27, %v22959_v56 }
0x1304   : > { %v23036_v31 = vmul.f32 %v13791_v28, %v2795_v29 }
0x1306   : > { %17009 = vmatmul.mubr.f32.vlgmr.msra.gmra.mrb[18].mxu0 %v23036_v31  ;;  %17044 = vmatmul.mubr.f32.vlgmr.msra.gmra.mrb[34].mxu1 %v23036_v31 }
0x1307   : > { %20007 = vmatpush3.bf16.msra.mxu0 %v20006_v30  ;;  %17078 = vmatprep.mubr.msk.f32.mxu0 %vm21802_vm0, %v21803_v51 }
0x1308   : > { %20008 = vmatprep.subr.bf16.mxu0 %v21801_v3  ;;  %17083 = vmatprep.mubr.msk.f32.mxu1 %vm21802_vm0, %v21803_v51 }
0x130b   : > { %20010 = vmatpush3.bf16.msra.mxu0 %v20009_v34 }
0x130c   : > { %20011 = vmatprep.subr.bf16.mxu0 %v21801_v3 }
0x130f   : > { %20013 = vmatpush3.bf16.msra.mxu0 %v20012_v37  ;;  %v13845_v37 = vld [vmem:[%s27432_s5 + $0x688] sm:$0xff] }
0x1310   : > { %20014 = vmatprep.subr.bf16.mxu0 %v21801_v3  ;;  %v20030_v39 = vpack.c.bf16 %v13845_v37, %v13844_v36  ;;  %v13919_v36 = vld [vmem:[%s27432_s5 + $0x928] sm:$0xff] }
0x1313   : > { %20016 = vmatpush3.bf16.msra.mxu0 %v20015_v40 }
0x1314   : > { %20017 = vmatprep.subr.bf16.mxu0 %v21801_v3 }
0x1317   : > { %20019 = vmatpush3.bf16.msra.mxu0 %v20018_v44  ;;  %v20033_v44 = vpack.c.bf16 %v13847_v42, %v13846_v41  ;;  %v13922_v41 = vld [vmem:[%s27432_s5 + $0x940] sm:$0xff]  ;;  %v13923_v42 = vld [vmem:[%s27432_s5 + $0x948] sm:$0xff] }
0x1318   : > { %20020 = vmatprep.subr.bf16.mxu0 %v21801_v3 }
0x131b   : > { %20022 = vmatpush3.bf16.msra.mxu0 %v20021_v47  ;;  %v20036_v47 = vpack.c.bf16 %v13849_v46, %v13848_v45  ;;  %v13924_v45 = vld [vmem:[%s27432_s5 + $0x950] sm:$0xff]  ;;  %v13925_v46 = vld [vmem:[%s27432_s5 + $0x958] sm:$0xff] }
0x131c   : > { %20023 = vmatprep.subr.bf16.mxu0 %v21801_v3 }
0x131f   : > { %20025 = vmatpush3.bf16.msra.mxu0 %v20024_v50  ;;  %v20039_v50 = vpack.c.bf16 %v13851_v49, %v13850_v48  ;;  %v13926_v48 = vld [vmem:[%s27432_s5 + $0x960] sm:$0xff]  ;;  %v13927_v49 = vld [vmem:[%s27432_s5 + $0x968] sm:$0xff] }
0x1320   : > { %20026 = vmatprep.subr.bf16.mxu0 %v21801_v3 }
0x1323   : > { %20028 = vmatpush3.bf16.msra.mxu0 %v20027_v54  ;;  %v20042_v54 = vpack.c.bf16 %v13853_v53, %v13852_v52  ;;  %v13928_v52 = vld [vmem:[%s27432_s5 + $0x970] sm:$0xff]  ;;  %v13929_v53 = vld [vmem:[%s27432_s5 + $0x978] sm:$0xff] }
0x1324   : > { %20053 = vmatprep.subr.bf16.mxu0 %v21801_v3 }
0x1326   : > { %17079 = vmatmul.mubr.f32.vlgmr.msra.gmra.mrb[20].mxu0 %v23036_v31 }
0x1327   : > { %20055 = vmatpush3.bf16.msra.mxu0 %v20054_v58  ;;  %17158 = vmatprep.mubr.msk.f32.mxu0 %vm21802_vm0, %v21803_v51  ;;  %v20045_v58 = vpack.c.bf16 %v13855_v57, %v13854_v55 }
0x1328   : > { %20056 = vmatprep.subr.bf16.mxu0 %v21801_v3 }
0x132b   : > { %20058 = vmatpush3.bf16.msra.mxu0 %v20057_v62  ;;  %v20048_v62 = vpack.c.bf16 %v13857_v60, %v13856_v59 }
0x132c   : > { %20059 = vmatprep.subr.bf16.mxu0 %v21801_v3 }
0x132f   : > { %20061 = vmatpush3.bf16.msra.mxu0 %v20060_v5  ;;  %v20051_v5 = vpack.c.bf16 %v13859_v2, %v13858_v43 }
0x1330   : > { %20062 = vmatprep.subr.bf16.mxu0 %v21801_v3 }
0x1333   : > { %20064 = vmatpush3.bf16.msra.mxu0 %v20063_v9  ;;  %v20078_v9 = vpack.c.bf16 %v13877_v8, %v13876_v7 }
0x1334   : > { %20065 = vmatprep.subr.bf16.mxu0 %v21801_v3 }
0x1337   : > { %20067 = vmatpush3.bf16.msra.mxu0 %v20066_v12  ;;  %v20081_v12 = vpack.c.bf16 %v13879_v11, %v13878_v10 }
0x1338   : > { %20068 = vmatprep.subr.bf16.mxu0 %v21801_v3 }
0x133b   : > { %20070 = vmatpush3.bf16.msra.mxu0 %v20069_v1  ;;  %v20084_v1 = vpack.c.bf16 %v13881_v14, %v13880_v13 }
0x133c   : > { %20071 = vmatprep.subr.bf16.mxu0 %v21801_v3 }
0x133f   : > { %20073 = vmatpush3.bf16.msra.mxu0 %v20072_v61  ;;  %v20087_v61 = vpack.c.bf16 %v13883_v15, %v13882_v4 }
0x1340   : > { %20074 = vmatprep.subr.bf16.mxu0 %v21801_v3 }
0x1343   : > { %20076 = vmatpush3.bf16.msra.mxu0 %v20075_v17  ;;  %v20090_v17 = vpack.c.bf16 %v13885_v6, %v13884_v16  ;;  %v13895_v16 = vld [vmem:[%s27433_s6 + $0x28] sm:$0xff]  ;;  %v13898_v6 = vld [vmem:[%s27432_s5 + $0x700] sm:$0xff] }
0x1344   : > { %17196 = vmatprep.subr.mxu0 %v21803_v51 }
0x1346   : > { %17159 = vmatmul.mubr.f32.vlgmr.msra.gmra.mrb[22].mxu0 %v23036_v31 }
0x1347   : > { %17198 = vmatprep.mubr.msk.f32.mxu0 %vm21802_vm0, %v21803_v51 }
0x13d9   : > { %v2886_v63 = vpop.f32.mrb[18].mxu0  ;;  %v2973_v0 = vpop.f32.mrb[34].mxu1 }
0x13da   : > { %v17010_v18 = vpop.f32.mrb[19].mxu0  ;;  %v17045_v19 = vpop.f32.mrb[35].mxu1  ;;  %17082 = vmatpush3.xpose.msk.msra.mxu1 %vm865_vm1, %v2973_v0  ;;  %v13887_v0 = vld [vmem:[%s27432_s5 + $0xad8] sm:$0xff] }
0x13db   : > { %17086 = vmatprep.subr.mxu1 %v21803_v51  ;;  %v13888_v19 = vld [vmem:[%s27432_s5 + $0xae0] sm:$0xff] }
0x13dd   : > { %17084 = vmatmul.mubr.msk.f32.vlgmr.msra.gmra.mrb[36].mxu1 %vm865_vm1, %v2886_v63  ;;  %v13886_v63 = vld [vmem:[%s27432_s5 + $0xad0] sm:$0xff] }
0x13de   : > { %17088 = vmatprep.mubr.msk.f32.mxu1 %vm21802_vm0, %v21803_v51  ;;  %v20093_v18 = vpack.c.bf16 %v13887_v0, %v13886_v63  ;;  %v13900_v0 = vld [vmem:[%s27432_s5 + $0x710] sm:$0xff] }
0x13f9   : > { %v3060_v20 = vpop.f32.mrb[20].mxu0 }
0x13fa   : > { %v17080_v21 = vpop.f32.mrb[21].mxu0  ;;  %17087 = vmatpush3.msra.mxu1 %v3060_v20  ;;  %v13889_v20 = vld [vmem:[%s27432_s5 + $0xae8] sm:$0xff] }
0x13fb   : > { %20029 = vmatprep.subr.bf16.mxu1 %v21801_v3  ;;  %v20096_v21 = vpack.c.bf16 %v13889_v20, %v13888_v19 }
0x1419   : > { %v3396_v22 = vpop.f32.mrb[22].mxu0 }
0x141a   : > { %v17160_v23 = vpop.f32.mrb[23].mxu0  ;;  %17197 = vmatpush3.xpose.msk.msra.mxu0 %vm865_vm1, %v3396_v22  ;;  %v13890_v22 = vld [vmem:[%s27432_s5 + $0xaf0] sm:$0xff] }
0x141b   : > { %17201 = vmatprep.subr.mxu0 %v21803_v51  ;;  %v13891_v23 = vld [vmem:[%s27432_s5 + $0xaf8] sm:$0xff] }
0x14b0   : > { %v3136_v24 = vpop.f32.mrb[36].mxu1 }
0x14b1   : > { %v3137_v26 = vadd.f32 %v21728_v25, %v3136_v24  ;;  %v17085_v27 = vpop.f32.mrb[37].mxu1  ;;  %v20099_v24 = vpack.c.bf16 %v13891_v23, %v13890_v22  ;;  %v13843_v25 = vld [vmem:[%s27433_s6 + $0x20] sm:$0xff]  ;;  %v13903_v23 = vld [vmem:[%s27432_s5 + $0x728] sm:$0xff] }
0x14b2   : > { %v13915_v27 = vld [vmem:[%s27432_s5 + $0x908] sm:$0xff]  ;;  %v13902_v22 = vld [vmem:[%s27432_s5 + $0x720] sm:$0xff] }
0x14b3   : > { %v3140_v28 = vsel %vm865_vm1, %v3137_v26, -inf }
0x14b4   : > { %3141 = vmax.xlane.f32.xlu1 %v3140_v28 }
0x1541   : > { %v3142_v29 = vpop.xlane.xlu1 %3141 }
0x1542   : > { %v3143_v30 = vsub.f32 %v3137_v26, %v3142_v29  ;;  %v13914_v26 = vld [vmem:[%s27432_s5 + $0x900] sm:$0xff]  ;;  %v13916_v29 = vld [vmem:[%s27432_s5 + $0x910] sm:$0xff] }
0x1543   : > { %v20126_v28 = vpack.c.bf16 %v13915_v27, %v13914_v26  ;;  %v13905_v26 = vld [vmem:[%s27432_s5 + $0x738] sm:$0xff] }
0x1544   : > { %v3144_v32 = vmul.f32 1.442695, %v3143_v30  ;;  %v13917_v30 = vld [vmem:[%s27432_s5 + $0x918] sm:$0xff] }
0x1546   : > { %21629 = vpow2.f32 %v3144_v32 }
0x1550   : > { %v21630_v33 = vpop.eup %21629 }
0x1551   : > { %v3146_v34 = vsel %vm865_vm1, %v21630_v33, 0.0 }
0x1552   : > { %3147 = vadd.xlane.f32.xlu0 %v3146_v34  ;;  %v20129_v34 = vpack.c.bf16 %v13917_v30, %v13916_v29  ;;  %v13907_v29 = vld [vmem:[%s27432_s5 + $0x748] sm:$0xff] }
0x15df   : > { %v3148_v35 = vpop.xlane.xlu0 %3147 }
0x15e0   : > { %21631 = vrcp.f32 %v3148_v35  ;;  %v13918_v35 = vld [vmem:[%s27432_s5 + $0x920] sm:$0xff] }
0x15e1   : > { %v20132_v37 = vpack.c.bf16 %v13919_v36, %v13918_v35  ;;  %v13910_v35 = vld [vmem:[%s27432_s5 + $0x760] sm:$0xff]  ;;  %v13911_v36 = vld [vmem:[%s27432_s5 + $0x768] sm:$0xff] }
0x15ea   : > { %v21632_v38 = vpop.eup %21631 }
0x15eb   : > { %v3150_v40 = vmul.f32 %v21632_v38, %v21630_v33  ;;  %v13920_v38 = vld [vmem:[%s27432_s5 + $0x930] sm:$0xff] }
0x15ed   : > { %17089 = vmatmul.mubr.msk.f32.vlgmr.msra.gmra.mrb[38].mxu1 %vm865_vm1, %v3150_v40 }
0x15ee   : > { %20031 = vmatpush3.bf16.msra.mxu1 %v20030_v39  ;;  %17123 = vmatprep.mubr.msk.f32.mxu1 %vm21802_vm0, %v21803_v51  ;;  %v13921_v39 = vld [vmem:[%s27432_s5 + $0x938] sm:$0xff] }
0x15ef   : > { %20032 = vmatprep.subr.bf16.mxu1 %v21801_v3  ;;  %v20135_v40 = vpack.c.bf16 %v13921_v39, %v13920_v38  ;;  %v13912_v38 = vld [vmem:[%s27432_s5 + $0x770] sm:$0xff]  ;;  %v13913_v39 = vld [vmem:[%s27432_s5 + $0x778] sm:$0xff] }
0x15f2   : > { %20034 = vmatpush3.bf16.msra.mxu1 %v20033_v44  ;;  %v20138_v44 = vpack.c.bf16 %v13923_v42, %v13922_v41  ;;  %v13930_v41 = vld [vmem:[%s27432_s5 + $0xb00] sm:$0xff]  ;;  %v13931_v42 = vld [vmem:[%s27432_s5 + $0xb08] sm:$0xff] }
0x15f3   : > { %20035 = vmatprep.subr.bf16.mxu1 %v21801_v3 }
0x15f6   : > { %20037 = vmatpush3.bf16.msra.mxu1 %v20036_v47  ;;  %v20141_v47 = vpack.c.bf16 %v13925_v46, %v13924_v45  ;;  %v13932_v45 = vld [vmem:[%s27432_s5 + $0xb10] sm:$0xff]  ;;  %v13933_v46 = vld [vmem:[%s27432_s5 + $0xb18] sm:$0xff] }
0x15f7   : > { %20038 = vmatprep.subr.bf16.mxu1 %v21801_v3 }
0x15fa   : > { %20040 = vmatpush3.bf16.msra.mxu1 %v20039_v50  ;;  %v20144_v50 = vpack.c.bf16 %v13927_v49, %v13926_v48  ;;  %v13934_v48 = vld [vmem:[%s27432_s5 + $0xb20] sm:$0xff]  ;;  %v13935_v49 = vld [vmem:[%s27432_s5 + $0xb28] sm:$0xff] }
0x15fb   : > { %20041 = vmatprep.subr.bf16.mxu1 %v21801_v3 }
0x15fe   : > { %20043 = vmatpush3.bf16.msra.mxu1 %v20042_v54  ;;  %v20147_v54 = vpack.c.bf16 %v13929_v53, %v13928_v52  ;;  %v13936_v52 = vld [vmem:[%s27432_s5 + $0xb30] sm:$0xff]  ;;  %v13937_v53 = vld [vmem:[%s27432_s5 + $0xb38] sm:$0xff] }
0x15ff   : > { %20044 = vmatprep.subr.bf16.mxu1 %v21801_v3 }
0x1602   : > { %20046 = vmatpush3.bf16.msra.mxu1 %v20045_v58 }
0x1603   : > { %20047 = vmatprep.subr.bf16.mxu1 %v21801_v3 }
0x1606   : > { %20049 = vmatpush3.bf16.msra.mxu1 %v20048_v62 }
0x1607   : > { %20050 = vmatprep.subr.bf16.mxu1 %v21801_v3 }
0x160a   : > { %20052 = vmatpush3.bf16.msra.mxu1 %v20051_v5  ;;  %v21729_v5 = vld [vmem:[%s27468_s18 + $0x8] sm:$0xff] }
0x160b   : > { %20077 = vmatprep.subr.bf16.mxu1 %v21801_v3 }
0x160d   : > { %17124 = vmatmul.mubr.f32.vlgmr.msra.gmra.mrb[40].mxu1 %v23036_v31 }
0x160e   : > { %20079 = vmatpush3.bf16.msra.mxu1 %v20078_v9  ;;  %17193 = vmatprep.mubr.msk.f32.mxu1 %vm21802_vm0, %v21803_v51 }
0x160f   : > { %20080 = vmatprep.subr.bf16.mxu1 %v21801_v3 }
0x1612   : > { %20082 = vmatpush3.bf16.msra.mxu1 %v20081_v12 }
0x1613   : > { %20083 = vmatprep.subr.bf16.mxu1 %v21801_v3 }
0x1616   : > { %20085 = vmatpush3.bf16.msra.mxu1 %v20084_v1 }
0x1617   : > { %20086 = vmatprep.subr.bf16.mxu1 %v21801_v3 }
0x161a   : > { %20088 = vmatpush3.bf16.msra.mxu1 %v20087_v61 }
0x161b   : > { %20089 = vmatprep.subr.bf16.mxu1 %v21801_v3 }
0x161e   : > { %20091 = vmatpush3.bf16.msra.mxu1 %v20090_v17  ;;  %v13899_v17 = vld [vmem:[%s27432_s5 + $0x708] sm:$0xff] }
0x161f   : > { %20092 = vmatprep.subr.bf16.mxu1 %v21801_v3  ;;  %v20102_v63 = vpack.c.bf16 %v13899_v17, %v13898_v6  ;;  %v13973_v6 = vld [vmem:[%s27432_s5 + $0x9b0] sm:$0xff]  ;;  %v13974_v17 = vld [vmem:[%s27432_s5 + $0x9b8] sm:$0xff] }
0x1622   : > { %20094 = vmatpush3.bf16.msra.mxu1 %v20093_v18  ;;  %v13901_v18 = vld [vmem:[%s27432_s5 + $0x718] sm:$0xff] }
0x1623   : > { %20095 = vmatprep.subr.bf16.mxu1 %v21801_v3 }
0x1626   : > { %20097 = vmatpush3.bf16.msra.mxu1 %v20096_v21  ;;  %v20105_v21 = vpack.c.bf16 %v13901_v18, %v13900_v0  ;;  %v13975_v0 = vld [vmem:[%s27432_s5 + $0x9c0] sm:$0xff]  ;;  %v13976_v18 = vld [vmem:[%s27432_s5 + $0x9c8] sm:$0xff] }
0x1627   : > { %20098 = vmatprep.subr.bf16.mxu1 %v21801_v3 }
0x162a   : > { %20100 = vmatpush3.bf16.msra.mxu1 %v20099_v24  ;;  %v20108_v24 = vpack.c.bf16 %v13903_v23, %v13902_v22  ;;  %v13979_v23 = vld [vmem:[%s27432_s5 + $0x9e0] sm:$0xff] }
0x162b   : > { %17211 = vmatprep.subr.mxu1 %v21803_v51 }
0x162d   : > { %17194 = vmatmul.mubr.f32.vlgmr.msra.gmra.mrb[42].mxu1 %v23036_v31 }
0x162e   : > { %17212 = vmatpush3.msra.mxu1 %v13843_v25  ;;  %17213 = vmatprep.mubr.msk.f32.mxu1 %vm21802_vm0, %v21803_v51  ;;  %v13904_v25 = vld [vmem:[%s27432_s5 + $0x730] sm:$0xff] }
0x162f   : > { %20125 = vmatprep.subr.bf16.mxu1 %v21801_v3  ;;  %v20111_v27 = vpack.c.bf16 %v13905_v26, %v13904_v25  ;;  %v13981_v26 = vld [vmem:[%s27432_s5 + $0x9f0] sm:$0xff] }
0x16c0   : > { %v3220_v32 = vpop.f32.mrb[38].mxu1 }
0x16c1   : > { %v17090_v33 = vpop.f32.mrb[39].mxu1  ;;  %17214 = vmatmul.mubr.msk.f32.vlgmr.msra.gmra.mrb[44].mxu1 %vm865_vm1, %v3220_v32  ;;  %v13908_v32 = vld [vmem:[%s27432_s5 + $0x750] sm:$0xff] }
0x16c2   : > { %20127 = vmatpush3.bf16.msra.mxu1 %v20126_v28  ;;  %17283 = vmatprep.mubr.msk.f32.mxu1 %vm21802_vm0, %v21803_v51  ;;  %v13906_v28 = vld [vmem:[%s27432_s5 + $0x740] sm:$0xff]  ;;  %v13909_v33 = vld [vmem:[%s27432_s5 + $0x758] sm:$0xff] }
0x16c3   : > { %20128 = vmatprep.subr.bf16.mxu1 %v21801_v3  ;;  %v20114_v30 = vpack.c.bf16 %v13907_v29, %v13906_v28 }
0x16c6   : > { %20130 = vmatpush3.bf16.msra.mxu1 %v20129_v34  ;;  %v20117_v34 = vpack.c.bf16 %v13909_v33, %v13908_v32 }
0x16c7   : > { %20131 = vmatprep.subr.bf16.mxu1 %v21801_v3 }
0x16ca   : > { %20133 = vmatpush3.bf16.msra.mxu1 %v20132_v37  ;;  %v20120_v37 = vpack.c.bf16 %v13911_v36, %v13910_v35 }
0x16cb   : > { %20134 = vmatprep.subr.bf16.mxu1 %v21801_v3 }
0x16ce   : > { %20136 = vmatpush3.bf16.msra.mxu1 %v20135_v40  ;;  %v20123_v40 = vpack.c.bf16 %v13913_v39, %v13912_v38  ;;  %v21730_v39 = vld [vmem:[%s27468_s18 + $0x10] sm:$0xff] }
0x16cf   : > { %20137 = vmatprep.subr.bf16.mxu1 %v21801_v3 }
0x16d2   : > { %20139 = vmatpush3.bf16.msra.mxu1 %v20138_v44  ;;  %v20150_v44 = vpack.c.bf16 %v13931_v42, %v13930_v41 }
0x16d3   : > { %20140 = vmatprep.subr.bf16.mxu1 %v21801_v3 }
0x16d6   : > { %20142 = vmatpush3.bf16.msra.mxu1 %v20141_v47  ;;  %v20153_v47 = vpack.c.bf16 %v13933_v46, %v13932_v45 }
0x16d7   : > { %20143 = vmatprep.subr.bf16.mxu1 %v21801_v3 }
0x16da   : > { %20145 = vmatpush3.bf16.msra.mxu1 %v20144_v50  ;;  %v20156_v50 = vpack.c.bf16 %v13935_v49, %v13934_v48 }
0x16db   : > { %20146 = vmatprep.subr.bf16.mxu1 %v21801_v3 }
0x16de   : > { %20148 = vmatpush3.bf16.msra.mxu1 %v20147_v54  ;;  %v20159_v54 = vpack.c.bf16 %v13937_v53, %v13936_v52  ;;  %v13949_v53 = vld [vmem:[%s27433_s6 + $0x30] sm:$0xff] }
0x16df   : > { %17321 = vmatprep.subr.mxu1 %v21803_v51 }
0x16e0   : > { %v3309_v55 = vpop.f32.mrb[40].mxu1 }
0x16e1   : > { %v17125_v57 = vpop.f32.mrb[41].mxu1  ;;  %17199 = vmatmul.mubr.msk.f32.vlgmr.msra.gmra.mrb[24].mxu0 %vm865_vm1, %v3309_v55  ;;  %17284 = vmatmul.mubr.f32.vlgmr.msra.gmra.mrb[46].mxu1 %v23036_v31  ;;  %v13938_v55 = vld [vmem:[%s27432_s5 + $0xb40] sm:$0xff] }
0x16e2   : > { %17203 = vmatprep.mubr.msk.f32.mxu0 %vm21802_vm0, %v21803_v51  ;;  %17323 = vmatprep.mubr.msk.f32.mxu1 %vm21802_vm0, %v21803_v51  ;;  %v13939_v57 = vld [vmem:[%s27432_s5 + $0xb48] sm:$0xff] }
0x1700   : > { %v3483_v58 = vpop.f32.mrb[42].mxu1 }
0x1701   : > { %v17195_v59 = vpop.f32.mrb[43].mxu1  ;;  %17202 = vmatpush3.msra.mxu0 %v3483_v58  ;;  %v20162_v58 = vpack.c.bf16 %v13939_v57, %v13938_v55  ;;  %v13952_v55 = vld [vmem:[%s27432_s5 + $0x788] sm:$0xff] }
0x1702   : > { %17206 = vmatprep.subr.mxu0 %v21803_v51  ;;  %v13940_v59 = vld [vmem:[%s27432_s5 + $0xb50] sm:$0xff] }
0x1794   : > { %v23360_v60 = vpop.f32.mrb[44].mxu1 }
0x1795   : > { %v17215_v62 = vpop.f32.mrb[45].mxu1 }
0x1796   : > { %v13941_v62 = vld [vmem:[%s27432_s5 + $0xb58] sm:$0xff] }
0x17b4   : > { %v3559_v43 = vpop.f32.mrb[24].mxu0  ;;  %v3965_v2 = vpop.f32.mrb[46].mxu1 }
0x17b5   : > { %v3560_v7 = vadd.f32 %v21729_v5, %v3559_v43  ;;  %v17200_v8 = vpop.f32.mrb[25].mxu0  ;;  %v17285_v9 = vpop.f32.mrb[47].mxu1  ;;  %17322 = vmatpush3.xpose.msk.msra.mxu1 %vm865_vm1, %v3965_v2  ;;  %v20165_v43 = vpack.c.bf16 %v13941_v62, %v13940_v59  ;;  %v13942_v2 = vld [vmem:[%s27432_s5 + $0xb60] sm:$0xff]  ;;  %v13943_v5 = vld [vmem:[%s27432_s5 + $0xb68] sm:$0xff]  ;;  %v13954_v59 = vld [vmem:[%s27432_s5 + $0x798] sm:$0xff] }
0x17b6   : > { %17326 = vmatprep.subr.mxu1 %v21803_v51  ;;  %v13944_v8 = vld [vmem:[%s27432_s5 + $0xb70] sm:$0xff]  ;;  %v13945_v9 = vld [vmem:[%s27432_s5 + $0xb78] sm:$0xff] }
0x17b7   : > { %v3563_v10 = vsel %vm865_vm1, %v3560_v7, -inf }
0x17b8   : > { %3564 = vmax.xlane.f32.xlu1 %v3563_v10  ;;  %v20171_v10 = vpack.c.bf16 %v13945_v9, %v13944_v8  ;;  %v13957_v9 = vld [vmem:[%s27432_s5 + $0x7b0] sm:$0xff] }
0x1845   : > { %v3565_v11 = vpop.xlane.xlu1 %3564 }
0x1846   : > { %v3566_v12 = vsub.f32 %v3560_v7, %v3565_v11  ;;  %v20168_v7 = vpack.c.bf16 %v13943_v5, %v13942_v2  ;;  %v13967_v11 = vld [vmem:[%s27432_s5 + $0x980] sm:$0xff] }
0x1847   : > { %v13955_v5 = vld [vmem:[%s27432_s5 + $0x7a0] sm:$0xff] }
0x1848   : > { %v3567_v13 = vmul.f32 1.442695, %v3566_v12  ;;  %v13968_v12 = vld [vmem:[%s27432_s5 + $0x988] sm:$0xff] }
0x184a   : > { %21633 = vpow2.f32 %v3567_v13  ;;  %v20198_v13 = vpack.c.bf16 %v13968_v12, %v13967_v11  ;;  %v13959_v12 = vld [vmem:[%s27432_s5 + $0x7c0] sm:$0xff] }
0x1854   : > { %v21634_v14 = vpop.eup %21633 }
0x1855   : > { %v3569_v1 = vsel %vm865_vm1, %v21634_v14, 0.0 }
0x1856   : > { %3570 = vadd.xlane.f32.xlu0 %v3569_v1  ;;  %v13970_v1 = vld [vmem:[%s27432_s5 + $0x998] sm:$0xff] }
0x18e3   : > { %v3571_v4 = vpop.xlane.xlu0 %3570 }
0x18e4   : > { %21635 = vrcp.f32 %v3571_v4 }
0x18ee   : > { %v21636_v15 = vpop.eup %21635 }
0x18ef   : > { %v3573_v61 = vmul.f32 %v21636_v15, %v21634_v14  ;;  %v13969_v14 = vld [vmem:[%s27432_s5 + $0x990] sm:$0xff]  ;;  %v13971_v15 = vld [vmem:[%s27432_s5 + $0x9a0] sm:$0xff] }
0x18f0   : > { %v20201_v4 = vpack.c.bf16 %v13970_v1, %v13969_v14  ;;  %v13961_v1 = vld [vmem:[%s27432_s5 + $0x7d0] sm:$0xff] }
0x18f1   : > { %17204 = vmatmul.mubr.msk.f32.vlgmr.msra.gmra.mrb[26].mxu0 %vm865_vm1, %v3573_v61  ;;  %v13972_v61 = vld [vmem:[%s27432_s5 + $0x9a8] sm:$0xff] }
0x18f2   : > { %17207 = vmatpush3.msra.mxu0 %v13895_v16  ;;  %17208 = vmatprep.mubr.msk.f32.mxu0 %vm21802_vm0, %v21803_v51  ;;  %v20204_v16 = vpack.c.bf16 %v13972_v61, %v13971_v15  ;;  %v13963_v61 = vld [vmem:[%s27432_s5 + $0x7e0] sm:$0xff] }
0x18f3   : > { %20101 = vmatprep.subr.bf16.mxu0 %v21801_v3 }
0x19c4   : > { %v3643_v19 = vpop.f32.mrb[26].mxu0 }
0x19c5   : > { %v17205_v20 = vpop.f32.mrb[27].mxu0  ;;  %17209 = vmatmul.mubr.msk.f32.vlgmr.msra.gmra.mrb[28].mxu0 %vm865_vm1, %v3643_v19  ;;  %v20210_v19 = vpack.c.bf16 %v13976_v18, %v13975_v0  ;;  %v13983_v18 = vld [vmem:[%s27432_s5 + $0xb80] sm:$0xff] }
0x19c6   : > { %20103 = vmatpush3.bf16.msra.mxu0 %v20102_v63  ;;  %17248 = vmatprep.mubr.msk.f32.mxu0 %vm21802_vm0, %v21803_v51  ;;  %v20207_v63 = vpack.c.bf16 %v13974_v17, %v13973_v6  ;;  %v13977_v20 = vld [vmem:[%s27432_s5 + $0x9d0] sm:$0xff] }
0x19c7   : > { %20104 = vmatprep.subr.bf16.mxu0 %v21801_v3  ;;  %v13965_v17 = vld [vmem:[%s27432_s5 + $0x7f0] sm:$0xff] }
0x19ca   : > { %20106 = vmatpush3.bf16.msra.mxu0 %v20105_v21  ;;  %v13978_v21 = vld [vmem:[%s27432_s5 + $0x9d8] sm:$0xff] }
0x19cb   : > { %20107 = vmatprep.subr.bf16.mxu0 %v21801_v3  ;;  %v20213_v22 = vpack.c.bf16 %v13978_v21, %v13977_v20  ;;  %v13985_v21 = vld [vmem:[%s27432_s5 + $0xb90] sm:$0xff] }
0x19ce   : > { %20109 = vmatpush3.bf16.msra.mxu0 %v20108_v24  ;;  %v13980_v24 = vld [vmem:[%s27432_s5 + $0x9e8] sm:$0xff] }
0x19cf   : > { %20110 = vmatprep.subr.bf16.mxu0 %v21801_v3  ;;  %v20216_v25 = vpack.c.bf16 %v13980_v24, %v13979_v23  ;;  %v13987_v24 = vld [vmem:[%s27432_s5 + $0xba0] sm:$0xff] }
0x19d2   : > { %20112 = vmatpush3.bf16.msra.mxu0 %v20111_v27  ;;  %v13982_v27 = vld [vmem:[%s27432_s5 + $0x9f8] sm:$0xff] }
0x19d3   : > { %20113 = vmatprep.subr.bf16.mxu0 %v21801_v3  ;;  %v20219_v28 = vpack.c.bf16 %v13982_v27, %v13981_v26  ;;  %v13989_v27 = vld [vmem:[%s27432_s5 + $0xbb0] sm:$0xff] }
0x19d6   : > { %20115 = vmatpush3.bf16.msra.mxu0 %v20114_v30 }
0x19d7   : > { %20116 = vmatprep.subr.bf16.mxu0 %v21801_v3 }
0x19da   : > { %20118 = vmatpush3.bf16.msra.mxu0 %v20117_v34 }
0x19db   : > { %20119 = vmatprep.subr.bf16.mxu0 %v21801_v3 }
0x19de   : > { %20121 = vmatpush3.bf16.msra.mxu0 %v20120_v37 }
0x19df   : > { %20122 = vmatprep.subr.bf16.mxu0 %v21801_v3 }
0x19e2   : > { %20124 = vmatpush3.bf16.msra.mxu0 %v20123_v40 }
0x19e3   : > { %20149 = vmatprep.subr.bf16.mxu0 %v21801_v3 }
0x19e5   : > { %17249 = vmatmul.mubr.f32.vlgmr.msra.gmra.mrb[30].mxu0 %v23036_v31 }
0x19e6   : > { %20151 = vmatpush3.bf16.msra.mxu0 %v20150_v44  ;;  %17318 = vmatprep.mubr.msk.f32.mxu0 %vm21802_vm0, %v21803_v51 }
0x19e7   : > { %20152 = vmatprep.subr.bf16.mxu0 %v21801_v3 }
0x19ea   : > { %20154 = vmatpush3.bf16.msra.mxu0 %v20153_v47 }
0x19eb   : > { %20155 = vmatprep.subr.bf16.mxu0 %v21801_v3 }
0x19ee   : > { %20157 = vmatpush3.bf16.msra.mxu0 %v20156_v50 }
0x19ef   : > { %20158 = vmatprep.subr.bf16.mxu0 %v21801_v3 }
0x19f2   : > { %20160 = vmatpush3.bf16.msra.mxu0 %v20159_v54  ;;  %v13951_v54 = vld [vmem:[%s27432_s5 + $0x780] sm:$0xff] }
0x19f3   : > { %20161 = vmatprep.subr.bf16.mxu0 %v21801_v3  ;;  %v20174_v57 = vpack.c.bf16 %v13952_v55, %v13951_v54 }
0x19f6   : > { %20163 = vmatpush3.bf16.msra.mxu0 %v20162_v58  ;;  %v13953_v58 = vld [vmem:[%s27432_s5 + $0x790] sm:$0xff] }
0x19f7   : > { %20164 = vmatprep.subr.bf16.mxu0 %v21801_v3  ;;  %v20177_v2 = vpack.c.bf16 %v13954_v59, %v13953_v58 }
0x19fa   : > { %20166 = vmatpush3.bf16.msra.mxu0 %v20165_v43 }
0x19fb   : > { %20167 = vmatprep.subr.bf16.mxu0 %v21801_v3 }
0x19fe   : > { %20169 = vmatpush3.bf16.msra.mxu0 %v20168_v7  ;;  %v13956_v7 = vld [vmem:[%s27432_s5 + $0x7a8] sm:$0xff] }
0x19ff   : > { %20170 = vmatprep.subr.bf16.mxu0 %v21801_v3  ;;  %v20180_v8 = vpack.c.bf16 %v13956_v7, %v13955_v5  ;;  %v14002_v7 = vld [vmem:[%s27433_s6 + $0x38] sm:$0xff] }
0x1a02   : > { %20172 = vmatpush3.bf16.msra.mxu0 %v20171_v10  ;;  %v13958_v10 = vld [vmem:[%s27432_s5 + $0x7b8] sm:$0xff] }
0x1a03   : > { %20197 = vmatprep.subr.bf16.mxu0 %v21801_v3  ;;  %v20183_v11 = vpack.c.bf16 %v13958_v10, %v13957_v9  ;;  %v14006_v10 = vld [vmem:[%s27434_s7 + $0x80] sm:$0xff] }
0x1a05   : > { %17319 = vmatmul.mubr.f32.vlgmr.msra.gmra.mrb[32].mxu0 %v23036_v31 }
0x1a06   : > { %20199 = vmatpush3.bf16.msra.mxu0 %v20198_v13  ;;  %17403 = vmatprep.mubr.msk.f32.mxu0 %vm21802_vm0, %v21803_v51  ;;  %v13960_v13 = vld [vmem:[%s27432_s5 + $0x7c8] sm:$0xff] }
0x1a07   : > { %20200 = vmatprep.subr.bf16.mxu0 %v21801_v3  ;;  %v20186_v14 = vpack.c.bf16 %v13960_v13, %v13959_v12  ;;  %v14008_v12 = vld [vmem:[%s27434_s7 + $0x90] sm:$0xff] }
0x1a0a   : > { %20202 = vmatpush3.bf16.msra.mxu0 %v20201_v4  ;;  %v13962_v4 = vld [vmem:[%s27432_s5 + $0x7d8] sm:$0xff] }
0x1a0b   : > { %20203 = vmatprep.subr.bf16.mxu0 %v21801_v3  ;;  %v20189_v15 = vpack.c.bf16 %v13962_v4, %v13961_v1  ;;  %v14010_v4 = vld [vmem:[%s27434_s7 + $0xa0] sm:$0xff] }
0x1a0e   : > { %20205 = vmatpush3.bf16.msra.mxu0 %v20204_v16  ;;  %v13964_v16 = vld [vmem:[%s27432_s5 + $0x7e8] sm:$0xff] }
0x1a0f   : > { %20206 = vmatprep.subr.bf16.mxu0 %v21801_v3  ;;  %v20192_v6 = vpack.c.bf16 %v13964_v16, %v13963_v61 }
0x1a12   : > { %20208 = vmatpush3.bf16.msra.mxu0 %v20207_v63  ;;  %v13966_v63 = vld [vmem:[%s27432_s5 + $0x7f8] sm:$0xff] }
0x1a13   : > { %20209 = vmatprep.subr.bf16.mxu0 %v21801_v3  ;;  %v20195_v0 = vpack.c.bf16 %v13966_v63, %v13965_v17 }
0x1a16   : > { %20211 = vmatpush3.bf16.msra.mxu0 %v20210_v19  ;;  %v13984_v19 = vld [vmem:[%s27432_s5 + $0xb88] sm:$0xff] }
0x1a17   : > { %20212 = vmatprep.subr.bf16.mxu0 %v21801_v3  ;;  %v20222_v20 = vpack.c.bf16 %v13984_v19, %v13983_v18  ;;  %v14012_v18 = vld [vmem:[%s27434_s7 + $0xb0] sm:$0xff]  ;;  %v14013_v19 = vld [vmem:[%s27434_s7 + $0xb8] sm:$0xff] }
0x1a1a   : > { %20214 = vmatpush3.bf16.msra.mxu0 %v20213_v22  ;;  %v13986_v22 = vld [vmem:[%s27432_s5 + $0xb98] sm:$0xff] }
0x1a1b   : > { %20215 = vmatprep.subr.bf16.mxu0 %v21801_v3  ;;  %v20225_v23 = vpack.c.bf16 %v13986_v22, %v13985_v21  ;;  %v14015_v21 = vld [vmem:[%s27434_s7 + $0xc8] sm:$0xff] }
0x1a1e   : > { %20217 = vmatpush3.bf16.msra.mxu0 %v20216_v25  ;;  %v13988_v25 = vld [vmem:[%s27432_s5 + $0xba8] sm:$0xff] }
0x1a1f   : > { %20218 = vmatprep.subr.bf16.mxu0 %v21801_v3  ;;  %v20228_v26 = vpack.c.bf16 %v13988_v25, %v13987_v24  ;;  %v14017_v24 = vld [vmem:[%s27434_s7 + $0xd8] sm:$0xff] }
0x1a22   : > { %20220 = vmatpush3.bf16.msra.mxu0 %v20219_v28  ;;  %v13990_v28 = vld [vmem:[%s27432_s5 + $0xbb8] sm:$0xff] }
0x1a23   : > { %17441 = vmatprep.subr.mxu0 %v21803_v51 }
0x1a25   : > { %17404 = vmatmul.mubr.f32.vlgmr.msra.gmra.mrb[34].mxu0 %v23036_v31 }
0x1a26   : > { %17443 = vmatprep.mubr.msk.f32.mxu0 %vm21802_vm0, %v21803_v51 }
0x1a98   : > { %v3718_v29 = vpop.f32.mrb[28].mxu0 }
0x1a99   : > { %v23557_v30 = vadd.f32 %v23360_v60, %v3718_v29  ;;  %v17210_v32 = vpop.f32.mrb[29].mxu0  ;;  %v20231_v29 = vpack.c.bf16 %v13990_v28, %v13989_v27  ;;  %v14019_v27 = vld [vmem:[%s27434_s7 + $0xe8] sm:$0xff] }
0x1a9a   : > { %v13991_v32 = vld [vmem:[%s27432_s5 + $0xbc0] sm:$0xff] }
0x1ab8   : > { %v3878_v33 = vpop.f32.mrb[30].mxu0 }
0x1ab9   : > { %v17250_v34 = vpop.f32.mrb[31].mxu0  ;;  %17324 = vmatmul.mubr.msk.f32.vlgmr.msra.gmra.mrb[48].mxu1 %vm865_vm1, %v3878_v33  ;;  %v13992_v33 = vld [vmem:[%s27432_s5 + $0xbc8] sm:$0xff] }
0x1aba   : > { %17328 = vmatprep.mubr.msk.f32.mxu1 %vm21802_vm0, %v21803_v51  ;;  %v20234_v34 = vpack.c.bf16 %v13992_v33, %v13991_v32  ;;  %v14021_v32 = vld [vmem:[%s27434_s7 + $0xf8] sm:$0xff] }
0x1ad8   : > { %v4052_v35 = vpop.f32.mrb[32].mxu0 }
0x1ad9   : > { %v17320_v36 = vpop.f32.mrb[33].mxu0  ;;  %17327 = vmatpush3.msra.mxu1 %v4052_v35  ;;  %v13993_v35 = vld [vmem:[%s27432_s5 + $0xbd0] sm:$0xff] }
0x1ada   : > { %17331 = vmatprep.subr.mxu1 %v21803_v51  ;;  %v13994_v36 = vld [vmem:[%s27432_s5 + $0xbd8] sm:$0xff] }
0x1af8   : > { %v4462_v37 = vpop.f32.mrb[34].mxu0 }
0x1af9   : > { %v17405_v38 = vpop.f32.mrb[35].mxu0  ;;  %17442 = vmatpush3.xpose.msk.msra.mxu0 %vm865_vm1, %v4462_v37  ;;  %v20237_v37 = vpack.c.bf16 %v13994_v36, %v13993_v35  ;;  %v14022_v36 = vld [vmem:[%s27435_s8 + $0x80] sm:$0xff] }
0x1afa   : > { %17446 = vmatprep.subr.mxu0 %v21803_v51  ;;  %v13995_v38 = vld [vmem:[%s27432_s5 + $0xbe0] sm:$0xff] }
0x1b8c   : > { %v4128_v60 = vpop.f32.mrb[48].mxu1 }
0x1b8d   : > { %v4129_v40 = vadd.f32 %v21730_v39, %v4128_v60  ;;  %v17325_v41 = vpop.f32.mrb[49].mxu1  ;;  %v13996_v60 = vld [vmem:[%s27432_s5 + $0xbe8] sm:$0xff] }
0x1b8e   : > { %v20240_v39 = vpack.c.bf16 %v13996_v60, %v13995_v38  ;;  %v13998_v41 = vld [vmem:[%s27432_s5 + $0xbf8] sm:$0xff]  ;;  %v14024_v60 = vld [vmem:[%s27435_s8 + $0x90] sm:$0xff] }
0x1b8f   : > { %v4132_v42 = vsel %vm865_vm1, %v4129_v40, -inf }
0x1b90   : > { %4133 = vmax.xlane.f32.xlu1 %v4132_v42 }
0x1c1d   : > { %v4134_v44 = vpop.xlane.xlu1 %4133 }
0x1c1e   : > { %v4135_v45 = vsub.f32 %v4129_v40, %v4134_v44  ;;  %v13997_v40 = vld [vmem:[%s27432_s5 + $0xbf0] sm:$0xff] }
0x1c1f   : > { %v20243_v42 = vpack.c.bf16 %v13998_v41, %v13997_v40  ;;  %v14026_v41 = vld [vmem:[%s27435_s8 + $0xa0] sm:$0xff] }
0x1c20   : > { %v4136_v46 = vmul.f32 1.442695, %v4135_v45 }
0x1c22   : > { %21637 = vpow2.f32 %v4136_v46 }
0x1c2c   : > { %v21638_v47 = vpop.eup %21637 }
0x1c2d   : > { %v4138_v48 = vsel %vm865_vm1, %v21638_v47, 0.0 }
0x1c2e   : > { %4139 = vadd.xlane.f32.xlu0 %v4138_v48 }
0x1cbb   : > { %v4140_v49 = vpop.xlane.xlu0 %4139 }
0x1cbc   : > { %21639 = vrcp.f32 %v4140_v49 }
0x1cc6   : > { %v21640_v50 = vpop.eup %21639 }
0x1cc7   : > { %v4142_v52 = vmul.f32 %v21640_v50, %v21638_v47 }
0x1cc9   : > { %17329 = vmatmul.mubr.msk.f32.vlgmr.msra.gmra.mrb[50].mxu1 %vm865_vm1, %v4142_v52  ;;  %v21731_v52 = vld [vmem:[%s27468_s18 + $0x18] sm:$0xff] }
0x1cca   : > { %17332 = vmatpush3.msra.mxu1 %v13949_v53  ;;  %17333 = vmatprep.mubr.msk.f32.mxu1 %vm21802_vm0, %v21803_v51 }
0x1ccb   : > { %20173 = vmatprep.subr.bf16.mxu1 %v21801_v3 }
0x1d9c   : > { %v4212_v62 = vpop.f32.mrb[50].mxu1 }
0x1d9d   : > { %v17330_v43 = vpop.f32.mrb[51].mxu1  ;;  %17334 = vmatmul.mubr.msk.f32.vlgmr.msra.gmra.mrb[52].mxu1 %vm865_vm1, %v4212_v62 }
0x1d9e   : > { %20175 = vmatpush3.bf16.msra.mxu1 %v20174_v57  ;;  %17368 = vmatprep.mubr.msk.f32.mxu1 %vm21802_vm0, %v21803_v51 }
0x1d9f   : > { %20176 = vmatprep.subr.bf16.mxu1 %v21801_v3 }
0x1da2   : > { %20178 = vmatpush3.bf16.msra.mxu1 %v20177_v2 }
0x1da3   : > { %20179 = vmatprep.subr.bf16.mxu1 %v21801_v3 }
0x1da6   : > { %20181 = vmatpush3.bf16.msra.mxu1 %v20180_v8 }
0x1da7   : > { %20182 = vmatprep.subr.bf16.mxu1 %v21801_v3 }
0x1daa   : > { %20184 = vmatpush3.bf16.msra.mxu1 %v20183_v11  ;;  %v14007_v11 = vld [vmem:[%s27434_s7 + $0x88] sm:$0xff] }
0x1dab   : > { %20185 = vmatprep.subr.bf16.mxu1 %v21801_v3  ;;  %v20246_v13 = vpack.c.bf16 %v14007_v11, %v14006_v10 }
0x1dae   : > { %20187 = vmatpush3.bf16.msra.mxu1 %v20186_v14  ;;  %v14009_v14 = vld [vmem:[%s27434_s7 + $0x98] sm:$0xff] }
0x1daf   : > { %20188 = vmatprep.subr.bf16.mxu1 %v21801_v3  ;;  %v20249_v1 = vpack.c.bf16 %v14009_v14, %v14008_v12  ;;  %v5016_v14 = vld [vmem:[%s27437_s10 + $0x18] sm:$0xff] }
0x1db2   : > { %20190 = vmatpush3.bf16.msra.mxu1 %v20189_v15  ;;  %v14011_v15 = vld [vmem:[%s27434_s7 + $0xa8] sm:$0xff] }
0x1db3   : > { %20191 = vmatprep.subr.bf16.mxu1 %v21801_v3  ;;  %v20252_v61 = vpack.c.bf16 %v14011_v15, %v14010_v4  ;;  %v5017_v4 = vld [vmem:[%s27437_s10 + $0x20] sm:$0xff]  ;;  %v5018_v15 = vld [vmem:[%s27437_s10 + $0x28] sm:$0xff] }
0x1db6   : > { %20193 = vmatpush3.bf16.msra.mxu1 %v20192_v6 }
0x1db7   : > { %20194 = vmatprep.subr.bf16.mxu1 %v21801_v3 }
0x1dba   : > { %20196 = vmatpush3.bf16.msra.mxu1 %v20195_v0 }
0x1dbb   : > { %20221 = vmatprep.subr.bf16.mxu1 %v21801_v3 }
0x1dbd   : > { %17369 = vmatmul.mubr.f32.vlgmr.msra.gmra.mrb[54].mxu1 %v23036_v31 }
0x1dbe   : > { %20223 = vmatpush3.bf16.msra.mxu1 %v20222_v20  ;;  %17438 = vmatprep.mubr.msk.f32.mxu1 %vm21802_vm0, %v21803_v51  ;;  %v20255_v20 = vpack.c.bf16 %v14013_v19, %v14012_v18  ;;  %v5022_v18 = vld [vmem:[%s27437_s10 + $0x48] sm:$0xff] }
0x1dbf   : > { %20224 = vmatprep.subr.bf16.mxu1 %v21801_v3 }
0x1dc2   : > { %20226 = vmatpush3.bf16.msra.mxu1 %v20225_v23  ;;  %v14016_v23 = vld [vmem:[%s27434_s7 + $0xd0] sm:$0xff] }
0x1dc3   : > { %20227 = vmatprep.subr.bf16.mxu1 %v21801_v3  ;;  %v20261_v25 = vpack.c.bf16 %v14017_v24, %v14016_v23  ;;  %v5025_v24 = vld [vmem:[%s27437_s10 + $0x60] sm:$0xff] }
0x1dc6   : > { %20229 = vmatpush3.bf16.msra.mxu1 %v20228_v26  ;;  %v14018_v26 = vld [vmem:[%s27434_s7 + $0xe0] sm:$0xff] }
0x1dc7   : > { %20230 = vmatprep.subr.bf16.mxu1 %v21801_v3  ;;  %v20264_v28 = vpack.c.bf16 %v14019_v27, %v14018_v26 }
0x1dca   : > { %20232 = vmatpush3.bf16.msra.mxu1 %v20231_v29  ;;  %v14020_v29 = vld [vmem:[%s27434_s7 + $0xf0] sm:$0xff] }
0x1dcb   : > { %20233 = vmatprep.subr.bf16.mxu1 %v21801_v3  ;;  %v20267_v33 = vpack.c.bf16 %v14021_v32, %v14020_v29  ;;  %v5028_v29 = vld [vmem:[%s27437_s10 + $0x78] sm:$0xff] }
0x1dce   : > { %20235 = vmatpush3.bf16.msra.mxu1 %v20234_v34  ;;  %v23787_v34 = vld [vmem:[%s23784_s30] sm:$0xff] }
0x1dcf   : > { %20236 = vmatprep.subr.bf16.mxu1 %v21801_v3  ;;  %v4999_v35 = vmul.f32 %v23787_v34, %v23787_v34 }
0x1dd2   : > { %20238 = vmatpush3.bf16.msra.mxu1 %v20237_v37  ;;  %v14023_v37 = vld [vmem:[%s27435_s8 + $0x88] sm:$0xff] }
0x1dd3   : > { %20239 = vmatprep.subr.bf16.mxu1 %v21801_v3  ;;  %v20270_v38 = vpack.c.bf16 %v14023_v37, %v14022_v36  ;;  %v14039_v37 = vld [vmem:[%s27436_s9] ss:$0 sm:$0xff] }
0x1dd6   : > { %20241 = vmatpush3.bf16.msra.mxu1 %v20240_v39  ;;  %v14025_v39 = vld [vmem:[%s27435_s8 + $0x98] sm:$0xff] }
0x1dd7   : > { %20242 = vmatprep.subr.bf16.mxu1 %v21801_v3  ;;  %v20273_v40 = vpack.c.bf16 %v14025_v39, %v14024_v60 }
0x1dda   : > { %20244 = vmatpush3.bf16.msra.mxu1 %v20243_v42  ;;  %v14027_v42 = vld [vmem:[%s27435_s8 + $0xa8] sm:$0xff] }
0x1ddb   : > { %20269 = vmatprep.subr.bf16.mxu1 %v21801_v3 }
0x1ddd   : > { %17439 = vmatmul.mubr.f32.vlgmr.msra.gmra.mrb[56].mxu1 %v23036_v31 }
0x1dde   : > { %17523 = vmatprep.mubr.msk.f32.mxu1 %vm21802_vm0, %v21803_v51  ;;  %20271 = vmatpush3.bf16.msra.mxu1 %v20270_v38 }
0x1ddf   : > { %20272 = vmatprep.subr.bf16.mxu1 %v21801_v3 }
0x1de2   : > { %20274 = vmatpush3.bf16.msra.mxu1 %v20273_v40  ;;  %v14058_v40 = vld [vmem:[%s27437_s10 + $0x410] sm:$0xff] }
0x1de3   : > { %20275 = vmatprep.subr.bf16.mxu1 %v21801_v3 }
0x1e70   : > { %v4287_v44 = vpop.f32.mrb[52].mxu1 }
0x1e71   : > { %v4291_v45 = vadd.f32 %v4287_v44, %v23557_v30  ;;  %v17335_v46 = vpop.f32.mrb[53].mxu1  ;;  %v20276_v44 = vpack.c.bf16 %v14027_v42, %v14026_v41  ;;  %v14059_v41 = vld [vmem:[%s27437_s10 + $0x418] sm:$0xff] }
0x1e72   : > { %v14029_v46 = vld [vmem:[%s27435_s8 + $0xb8] sm:$0xff]  ;;  %v20345_v42 = vpack.c.bf16 %v14059_v41, %v14058_v40  ;;  %v14048_v40 = vld [vmem:[%s27437_s10 + $0x240] sm:$0xff]  ;;  %v14049_v41 = vld [vmem:[%s27437_s10 + $0x248] sm:$0xff] }
0x1e73   : > { %20277 = vmatpush3.bf16.msra.mxu1 %v20276_v44  ;;  %v14061_v44 = vld [vmem:[%s27437_s10 + $0x428] sm:$0xff] }
0x1e74   : > { %20278 = vmatprep.subr.bf16.mxu1 %v21801_v3 }
0x1e90   : > { %v4375_v47 = vpop.f32.mrb[54].mxu1 }
0x1e91   : > { %v17370_v48 = vpop.f32.mrb[55].mxu1  ;;  %17444 = vmatmul.mubr.msk.f32.vlgmr.msra.gmra.mrb[36].mxu0 %vm865_vm1, %v4375_v47 }
0x1e92   : > { %17448 = vmatprep.mubr.msk.f32.mxu0 %vm21802_vm0, %v21803_v51  ;;  %v14030_v48 = vld [vmem:[%s27435_s8 + $0xc0] sm:$0xff] }
0x1eb0   : > { %v4549_v49 = vpop.f32.mrb[56].mxu1 }
0x1eb1   : > { %v17440_v50 = vpop.f32.mrb[57].mxu1  ;;  %17447 = vmatpush3.msra.mxu0 %v4549_v49  ;;  %v14031_v49 = vld [vmem:[%s27435_s8 + $0xc8] sm:$0xff] }
0x1eb2   : > { %17451 = vmatprep.subr.mxu0 %v21803_v51  ;;  %v20282_v50 = vpack.c.bf16 %v14031_v49, %v14030_v48  ;;  %v14064_v49 = vld [vmem:[%s27437_s10 + $0x440] sm:$0xff] }
0x1f64   : > { %v4625_v31 = vpop.f32.mrb[36].mxu0 }
0x1f65   : > { %v4626_v53 = vadd.f32 %v21731_v52, %v4625_v31  ;;  %v17445_v30 = vpop.f32.mrb[37].mxu0  ;;  %v14032_v31 = vld [vmem:[%s27435_s8 + $0xd0] sm:$0xff]  ;;  %v14033_v52 = vld [vmem:[%s27435_s8 + $0xd8] sm:$0xff] }
0x1f66   : > { %v14034_v30 = vld [vmem:[%s27435_s8 + $0xe0] sm:$0xff] }
0x1f67   : > { %v4629_v54 = vsel %vm865_vm1, %v4626_v53, -inf }
0x1f68   : > { %4630 = vmax.xlane.f32.xlu1 %v4629_v54  ;;  %v14035_v54 = vld [vmem:[%s27435_s8 + $0xe8] sm:$0xff] }
0x1ff5   : > { %v4631_v55 = vpop.xlane.xlu1 %4630 }
0x1ff6   : > { %v4632_v57 = vsub.f32 %v4626_v53, %v4631_v55  ;;  %v20285_v53 = vpack.c.bf16 %v14033_v52, %v14032_v31  ;;  %v20288_v55 = vpack.c.bf16 %v14035_v54, %v14034_v30  ;;  %v14066_v52 = vld [vmem:[%s27437_s10 + $0x450] sm:$0xff]  ;;  %v14068_v54 = vld [vmem:[%s27437_s10 + $0x460] sm:$0xff] }
0x1ff8   : > { %v4633_v58 = vmul.f32 1.442695, %v4632_v57  ;;  %v14036_v57 = vld [vmem:[%s27435_s8 + $0xf0] sm:$0xff] }
0x1ffa   : > { %21641 = vpow2.f32 %v4633_v58  ;;  %v14037_v58 = vld [vmem:[%s27435_s8 + $0xf8] sm:$0xff] }
0x2004   : > { %v21642_v59 = vpop.eup %21641 }
0x2005   : > { %v4635_v62 = vsel %vm865_vm1, %v21642_v59, 0.0 }
0x2006   : > { %4636 = vadd.xlane.f32.xlu0 %v4635_v62 }
0x200a   : > { %5000 = vadd.xlane.f32.xlu0 %v4999_v35  ;;  %v14057_v35 = vld [vmem:[%s27437_s10 + $0x408] sm:$0xff] }
0x2093   : > { %v4637_v43 = vpop.xlane.xlu0 %4636 }
0x2094   : > { %21643 = vrcp.f32 %v4637_v43 }
0x209e   : > { %v21644_v2 = vpop.eup %21643 }
0x209f   : > { %v4639_v5 = vmul.f32 %v21644_v2, %v21642_v59  ;;  %v20291_v59 = vpack.c.bf16 %v14037_v58, %v14036_v57  ;;  %v14070_v58 = vld [vmem:[%s27437_s10 + $0x470] sm:$0xff] }
0x20a1   : > { %17449 = vmatmul.mubr.msk.f32.vlgmr.msra.gmra.mrb[38].mxu0 %vm865_vm1, %v4639_v5  ;;  %v5013_v5 = vld [vmem:[%s27437_s10] sm:$0xff] }
0x20a2   : > { %17452 = vmatpush3.msra.mxu0 %v14002_v7  ;;  %17453 = vmatprep.mubr.msk.f32.mxu0 %vm21802_vm0, %v21803_v51  ;;  %v5014_v7 = vld [vmem:[%s27437_s10 + $0x8] sm:$0xff] }
0x20a3   : > { %20245 = vmatprep.subr.bf16.mxu0 %v21801_v3  ;;  %v20294_v11 = vpack.c.bf16 %v5014_v7, %v5013_v5  ;;  %v14093_v7 = vld [vmem:[%s27437_s10 + $0x290] sm:$0xff] }
0x2174   : > { %v4709_v8 = vpop.f32.mrb[38].mxu0 }
0x2175   : > { %v17450_v9 = vpop.f32.mrb[39].mxu0  ;;  %17454 = vmatmul.mubr.msk.f32.vlgmr.msra.gmra.mrb[40].mxu0 %vm865_vm1, %v4709_v8 }
0x2176   : > { %17488 = vmatprep.mubr.msk.f32.mxu0 %vm21802_vm0, %v21803_v51  ;;  %20247 = vmatpush3.bf16.msra.mxu0 %v20246_v13  ;;  %v14005_v9 = vld [vmem:[%s27431_s4 + $0x3] ss:$0 sm:$0xff]  ;;  %v5015_v13 = vld [vmem:[%s27437_s10 + $0x10] sm:$0xff] }
0x2177   : > { %20248 = vmatprep.subr.bf16.mxu0 %v21801_v3 }
0x217a   : > { %20250 = vmatpush3.bf16.msra.mxu0 %v20249_v1  ;;  %v20297_v1 = vpack.c.bf16 %v5016_v14, %v5015_v13  ;;  %v14097_v13 = vld [vmem:[%s27437_s10 + $0x2b0] sm:$0xff]  ;;  %v14098_v14 = vld [vmem:[%s27437_s10 + $0x2b8] sm:$0xff] }
0x217b   : > { %20251 = vmatprep.subr.bf16.mxu0 %v21801_v3 }
0x217e   : > { %20253 = vmatpush3.bf16.msra.mxu0 %v20252_v61  ;;  %v20300_v61 = vpack.c.bf16 %v5018_v15, %v5017_v4  ;;  %v14099_v4 = vld [vmem:[%s27437_s10 + $0x2c0] sm:$0xff]  ;;  %v14100_v15 = vld [vmem:[%s27437_s10 + $0x2c8] sm:$0xff] }
0x217f   : > { %20254 = vmatprep.subr.bf16.mxu0 %v21801_v3 }
0x2182   : > { %20256 = vmatpush3.bf16.msra.mxu0 %v20255_v20  ;;  %v5023_v20 = vld [vmem:[%s27437_s10 + $0x50] sm:$0xff] }
0x2183   : > { %20257 = vmatprep.subr.bf16.mxu0 %v21801_v3 }
0x2248   : > { %v4784_v16 = vpop.f32.mrb[40].mxu0 }
0x2249   : > { %v4788_v6 = vadd.f32 %v4784_v16, %v4291_v45  ;;  %v17455_v17 = vpop.f32.mrb[41].mxu0  ;;  %v14028_v45 = vld [vmem:[%s27435_s8 + $0xb0] sm:$0xff] }
0x224a   : > { %v20279_v47 = vpack.c.bf16 %v14029_v46, %v14028_v45  ;;  %v5019_v16 = vld [vmem:[%s27437_s10 + $0x30] sm:$0xff] }
0x224b   : > { %v23740_v63 = vadd.f32 %v4788_v6, %v22959_v56  ;;  %v14014_v56 = vld [vmem:[%s27434_s7 + $0xc0] sm:$0xff]  ;;  %v5020_v6 = vld [vmem:[%s27437_s10 + $0x38] sm:$0xff]  ;;  %v14062_v46 = vld [vmem:[%s27437_s10 + $0x430] sm:$0xff] }
0x224c   : > { %v20258_v22 = vpack.c.bf16 %v14015_v21, %v14014_v56  ;;  %20280 = vmatpush3.bf16.msra.mxu1 %v20279_v47  ;;  %v20303_v17 = vpack.c.bf16 %v5020_v6, %v5019_v16  ;;  %v5024_v56 = vld [vmem:[%s27437_s10 + $0x58] sm:$0xff]  ;;  %v5001_v21 = vpop.xlane.xlu0 %5000  ;;  %v14101_v16 = vld [vmem:[%s27437_s10 + $0x2d0] sm:$0xff] }
0x224d   : > { %v4792_v0 = vmul.f32 %v23740_v63, %v23740_v63  ;;  %20281 = vmatprep.subr.bf16.mxu1 %v21801_v3  ;;  %v5002_v23 = vmul.f32 0.03125, %v5001_v21  ;;  %v14063_v47 = vld [vmem:[%s27437_s10 + $0x438] sm:$0xff] }
0x224e   : > { %20259 = vmatpush3.bf16.msra.mxu0 %v20258_v22  ;;  %v20309_v22 = vpack.c.bf16 %v5024_v56, %v5023_v20  ;;  %v20351_v48 = vpack.c.bf16 %v14063_v47, %v14062_v46  ;;  %v14102_v6 = vld [vmem:[%s27437_s10 + $0x2d8] sm:$0xff]  ;;  %v14105_v20 = vld [vmem:[%s27437_s10 + $0x2f0] sm:$0xff]  ;;  %v14052_v46 = vld [vmem:[%s27437_s10 + $0x260] sm:$0xff] }
0x224f   : > { %4793 = vadd.xlane.f32.xlu1 %v4792_v0  ;;  %20260 = vmatprep.subr.bf16.mxu0 %v21801_v3  ;;  %v5021_v0 = vld [vmem:[%s27437_s10 + $0x40] sm:$0xff]  ;;  %v5003_v26 = vadd.f32 1e-06, %v5002_v23  ;;  %v14106_v56 = vld [vmem:[%s27437_s10 + $0x2f8] sm:$0xff]  ;;  %v14041_v23 = vld [vmem:[%s27437_s10 + $0x208] sm:$0xff] }
0x2250   : > { %20283 = vmatpush3.bf16.msra.mxu1 %v20282_v50  ;;  %v20306_v19 = vpack.c.bf16 %v5022_v18, %v5021_v0  ;;  %v14065_v50 = vld [vmem:[%s27437_s10 + $0x448] sm:$0xff]  ;;  %v14103_v0 = vld [vmem:[%s27437_s10 + $0x2e0] sm:$0xff]  ;;  %v20411_v21 = vpack.c.bf16 %v14106_v56, %v14105_v20 }
0x2251   : > { %20284 = vmatprep.subr.bf16.mxu1 %v21801_v3  ;;  %v20354_v31 = vpack.c.bf16 %v14065_v50, %v14064_v49  ;;  %v14104_v18 = vld [vmem:[%s27437_s10 + $0x2e8] sm:$0xff]  ;;  %v14054_v49 = vld [vmem:[%s27437_s10 + $0x270] sm:$0xff]  ;;  %v14055_v50 = vld [vmem:[%s27437_s10 + $0x278] sm:$0xff] }
0x2252   : > { %20262 = vmatpush3.bf16.msra.mxu0 %v20261_v25  ;;  %v5026_v25 = vld [vmem:[%s27437_s10 + $0x68] sm:$0xff] }
0x2253   : > { %20263 = vmatprep.subr.bf16.mxu0 %v21801_v3  ;;  %v20312_v27 = vpack.c.bf16 %v5026_v25, %v5025_v24  ;;  %v14053_v47 = vld [vmem:[%s27437_s10 + $0x268] sm:$0xff] }
0x2254   : > { %20286 = vmatpush3.bf16.msra.mxu1 %v20285_v53  ;;  %v14067_v53 = vld [vmem:[%s27437_s10 + $0x458] sm:$0xff]  ;;  %v14080_v20 = vld [vmem:[%s27437_s10 + $0xa8] sm:$0xff] }
0x2255   : > { %20287 = vmatprep.subr.bf16.mxu1 %v21801_v3  ;;  %v20357_v30 = vpack.c.bf16 %v14067_v53, %v14066_v52 }
0x2256   : > { %20265 = vmatpush3.bf16.msra.mxu0 %v20264_v28  ;;  %v5027_v28 = vld [vmem:[%s27437_s10 + $0x70] sm:$0xff] }
0x2257   : > { %20266 = vmatprep.subr.bf16.mxu0 %v21801_v3  ;;  %v20315_v32 = vpack.c.bf16 %v5028_v29, %v5027_v28  ;;  %v14042_v28 = vld [vmem:[%s27437_s10 + $0x210] sm:$0xff]  ;;  %v14043_v29 = vld [vmem:[%s27437_s10 + $0x218] sm:$0xff] }
0x2258   : > { %20289 = vmatpush3.bf16.msra.mxu1 %v20288_v55  ;;  %v14069_v55 = vld [vmem:[%s27437_s10 + $0x468] sm:$0xff] }
0x2259   : > { %20290 = vmatprep.subr.bf16.mxu1 %v21801_v3  ;;  %v20360_v57 = vpack.c.bf16 %v14069_v55, %v14068_v54 }
0x225a   : > { %20268 = vmatpush3.bf16.msra.mxu0 %v20267_v33  ;;  %v14056_v33 = vld [vmem:[%s27437_s10 + $0x400] sm:$0xff] }
0x225b   : > { %20293 = vmatprep.subr.bf16.mxu0 %v21801_v3  ;;  %v20342_v60 = vpack.c.bf16 %v14057_v35, %v14056_v33  ;;  %v14044_v33 = vld [vmem:[%s27437_s10 + $0x220] sm:$0xff]  ;;  %v14045_v35 = vld [vmem:[%s27437_s10 + $0x228] sm:$0xff] }
0x225c   : > { %20292 = vmatpush3.bf16.msra.mxu1 %v20291_v59  ;;  %v14071_v59 = vld [vmem:[%s27437_s10 + $0x478] sm:$0xff] }
0x225d   : > { %20317 = vmatprep.subr.bf16.mxu1 %v21801_v3 }
0x22dc   : > { %v4794_v62 = vpop.xlane.xlu1 %4793 }
0x22dd   : > { %v4795_v43 = vmul.f32 0.03125, %v4794_v62  ;;  %v20363_v62 = vpack.c.bf16 %v14071_v59, %v14070_v58 }
0x22df   : > { %v4796_v2 = vadd.f32 1e-06, %v4795_v43  ;;  %v14091_v43 = vld [vmem:[%s27437_s10 + $0x280] sm:$0xff] }
0x22e1   : > { %21645 = vrsqrt.f32 %v4796_v2  ;;  %v14092_v2 = vld [vmem:[%s27437_s10 + $0x288] sm:$0xff] }
0x22e2   : > { %21647 = vrsqrt.f32 %v5003_v26  ;;  %v20390_v5 = vpack.c.bf16 %v14092_v2, %v14091_v43  ;;  %v5273_v2 = vld [vmem:[%s27430_s3] sm:$0xff] }
0x22eb   : > { %v21646_v8 = vpop.eup %21645 }
0x22ec   : > { %v4798_v10 = vmul.f32 %v21646_v8, %v23740_v63  ;;  %v21648_v36 = vpop.eup %21647  ;;  %v14094_v8 = vld [vmem:[%s27437_s10 + $0x298] sm:$0xff] }
0x22ed   : > { %v5005_v38 = vmul.f32 %v21648_v36, %v23787_v34  ;;  %v14060_v34 = vld [vmem:[%s27437_s10 + $0x420] sm:$0xff]  ;;  %v20324_v36 = vpack.c.bf16 %v14045_v35, %v14044_v33  ;;  %v14088_v33 = vld [vmem:[%s27437_s10 + $0xe8] sm:$0xff] }
0x22ee   : > { %v4805_v12 = vmul.f32 %v14005_v9, %v4798_v10  ;;  %v20348_v45 = vpack.c.bf16 %v14061_v44, %v14060_v34  ;;  %v20393_v9 = vpack.c.bf16 %v14094_v8, %v14093_v7  ;;  %v14095_v10 = vld [vmem:[%s27437_s10 + $0x2a0] sm:$0xff]  ;;  %v14050_v34 = vld [vmem:[%s27437_s10 + $0x250] sm:$0xff]  ;;  %v14051_v44 = vld [vmem:[%s27437_s10 + $0x258] sm:$0xff] }
0x22ef   : > { %v23919_v39 = vmul.f32 %v14039_v37, %v5005_v38  ;;  %v14046_v37 = vld [vmem:[%s27437_s10 + $0x230] sm:$0xff]  ;;  %v14047_v38 = vld [vmem:[%s27437_s10 + $0x238] sm:$0xff] }
0x22f0   : > { %17489 = vmatmul.mubr.f32.vlgmr.msra.gmra.mrb[42].mxu0 %v4805_v12 }
0x22f1   : > { %20295 = vmatpush3.bf16.msra.mxu0 %v20294_v11  ;;  %17558 = vmatprep.mubr.msk.f32.mxu0 %vm21802_vm0, %v21803_v51  ;;  %v14096_v11 = vld [vmem:[%s27437_s10 + $0x2a8] sm:$0xff] }
0x22f2   : > { %20296 = vmatprep.subr.bf16.mxu0 %v21801_v3  ;;  %v20396_v12 = vpack.c.bf16 %v14096_v11, %v14095_v10 }
0x22f5   : > { %20298 = vmatpush3.bf16.msra.mxu0 %v20297_v1  ;;  %v20399_v1 = vpack.c.bf16 %v14098_v14, %v14097_v13 }
0x22f6   : > { %20299 = vmatprep.subr.bf16.mxu0 %v21801_v3 }
0x22f9   : > { %20301 = vmatpush3.bf16.msra.mxu0 %v20300_v61  ;;  %v20402_v61 = vpack.c.bf16 %v14100_v15, %v14099_v4  ;;  %v14075_v4 = vld [vmem:[%s27437_s10 + $0x80] sm:$0xff]  ;;  %v14076_v15 = vld [vmem:[%s27437_s10 + $0x88] sm:$0xff] }
0x22fa   : > { %20302 = vmatprep.subr.bf16.mxu0 %v21801_v3 }
0x22fd   : > { %20304 = vmatpush3.bf16.msra.mxu0 %v20303_v17  ;;  %v20405_v17 = vpack.c.bf16 %v14102_v6, %v14101_v16  ;;  %v20366_v16 = vpack.c.bf16 %v14076_v15, %v14075_v4  ;;  %v14150_v4 = vld [vmem:[%s27437_s10 + $0x320] sm:$0xff]  ;;  %v14151_v15 = vld [vmem:[%s27437_s10 + $0x328] sm:$0xff] }
0x22fe   : > { %20305 = vmatprep.subr.bf16.mxu0 %v21801_v3 }
0x2301   : > { %20307 = vmatpush3.bf16.msra.mxu0 %v20306_v19  ;;  %v20408_v19 = vpack.c.bf16 %v14104_v18, %v14103_v0  ;;  %v14078_v0 = vld [vmem:[%s27437_s10 + $0x98] sm:$0xff] }
0x2302   : > { %20308 = vmatprep.subr.bf16.mxu0 %v21801_v3 }
0x2305   : > { %20310 = vmatpush3.bf16.msra.mxu0 %v20309_v22  ;;  %v14040_v22 = vld [vmem:[%s27437_s10 + $0x200] sm:$0xff] }
0x2306   : > { %20311 = vmatprep.subr.bf16.mxu0 %v21801_v3  ;;  %v20318_v25 = vpack.c.bf16 %v14041_v23, %v14040_v22  ;;  %v14082_v22 = vld [vmem:[%s27437_s10 + $0xb8] sm:$0xff] }
0x2309   : > { %20313 = vmatpush3.bf16.msra.mxu0 %v20312_v27 }
0x230a   : > { %20314 = vmatprep.subr.bf16.mxu0 %v21801_v3 }
0x230d   : > { %20316 = vmatpush3.bf16.msra.mxu0 %v20315_v32  ;;  %v20321_v32 = vpack.c.bf16 %v14043_v29, %v14042_v28  ;;  %v14086_v28 = vld [vmem:[%s27437_s10 + $0xd8] sm:$0xff] }
0x230e   : > { %20341 = vmatprep.subr.bf16.mxu0 %v21801_v3 }
0x2310   : > { %17559 = vmatmul.mubr.f32.vlgmr.msra.gmra.mrb[44].mxu0 %v23919_v39 }
0x2311   : > { %20343 = vmatpush3.bf16.msra.mxu0 %v20342_v60  ;;  %17628 = vmatprep.mubr.msk.f32.mxu0 %vm21802_vm0, %v21803_v51  ;;  %v20327_v60 = vpack.c.bf16 %v14047_v38, %v14046_v37  ;;  %v14090_v37 = vld [vmem:[%s27437_s10 + $0xf8] sm:$0xff] }
0x2312   : > { %20344 = vmatprep.subr.bf16.mxu0 %v21801_v3 }
0x2315   : > { %20346 = vmatpush3.bf16.msra.mxu0 %v20345_v42  ;;  %v20330_v42 = vpack.c.bf16 %v14049_v41, %v14048_v40  ;;  %v14108_v40 = vld [vmem:[%s27437_s10 + $0x488] sm:$0xff] }
0x2316   : > { %20347 = vmatprep.subr.bf16.mxu0 %v21801_v3 }
0x2319   : > { %20349 = vmatpush3.bf16.msra.mxu0 %v20348_v45  ;;  %v20333_v45 = vpack.c.bf16 %v14051_v44, %v14050_v34  ;;  %v14110_v34 = vld [vmem:[%s27437_s10 + $0x498] sm:$0xff] }
0x231a   : > { %20350 = vmatprep.subr.bf16.mxu0 %v21801_v3 }
0x231d   : > { %20352 = vmatpush3.bf16.msra.mxu0 %v20351_v48  ;;  %v20336_v48 = vpack.c.bf16 %v14053_v47, %v14052_v46  ;;  %v14112_v46 = vld [vmem:[%s27437_s10 + $0x4a8] sm:$0xff] }
0x231e   : > { %20353 = vmatprep.subr.bf16.mxu0 %v21801_v3 }
0x2321   : > { %20355 = vmatpush3.bf16.msra.mxu0 %v20354_v31  ;;  %v20339_v31 = vpack.c.bf16 %v14055_v50, %v14054_v49  ;;  %v14114_v49 = vld [vmem:[%s27437_s10 + $0x4b8] sm:$0xff] }
0x2322   : > { %20356 = vmatprep.subr.bf16.mxu0 %v21801_v3 }
0x2325   : > { %20358 = vmatpush3.bf16.msra.mxu0 %v20357_v30 }
0x2326   : > { %20359 = vmatprep.subr.bf16.mxu0 %v21801_v3 }
0x2329   : > { %20361 = vmatpush3.bf16.msra.mxu0 %v20360_v57 }
0x232a   : > { %20362 = vmatprep.subr.bf16.mxu0 %v21801_v3 }
0x232d   : > { %20364 = vmatpush3.bf16.msra.mxu0 %v20363_v62 }
0x232e   : > { %20389 = vmatprep.subr.bf16.mxu0 %v21801_v3 }
0x2330   : > { %17629 = vmatmul.mubr.f32.vlgmr.msra.gmra.mrb[46].mxu0 %v23919_v39 }
0x2331   : > { %17708 = vmatprep.mubr.msk.f32.mxu0 %vm21802_vm0, %v21803_v51  ;;  %20391 = vmatpush3.bf16.msra.mxu0 %v20390_v5 }
0x2332   : > { %20392 = vmatprep.subr.bf16.mxu0 %v21801_v3 }
0x2335   : > { %20394 = vmatpush3.bf16.msra.mxu0 %v20393_v9 }
0x2336   : > { %20395 = vmatprep.subr.bf16.mxu0 %v21801_v3 }
0x2339   : > { %20397 = vmatpush3.bf16.msra.mxu0 %v20396_v12 }
0x233a   : > { %20398 = vmatprep.subr.bf16.mxu0 %v21801_v3 }
0x233d   : > { %20400 = vmatpush3.bf16.msra.mxu0 %v20399_v1 }
0x233e   : > { %20401 = vmatprep.subr.bf16.mxu0 %v21801_v3 }
0x2341   : > { %20403 = vmatpush3.bf16.msra.mxu0 %v20402_v61 }
0x2342   : > { %20404 = vmatprep.subr.bf16.mxu0 %v21801_v3 }
0x2345   : > { %20406 = vmatpush3.bf16.msra.mxu0 %v20405_v17  ;;  %v14077_v17 = vld [vmem:[%s27437_s10 + $0x90] sm:$0xff] }
0x2346   : > { %20407 = vmatprep.subr.bf16.mxu0 %v21801_v3  ;;  %v20369_v18 = vpack.c.bf16 %v14078_v0, %v14077_v17  ;;  %v14154_v0 = vld [vmem:[%s27437_s10 + $0x340] sm:$0xff] }
0x2349   : > { %20409 = vmatpush3.bf16.msra.mxu0 %v20408_v19  ;;  %v14079_v19 = vld [vmem:[%s27437_s10 + $0xa0] sm:$0xff] }
0x234a   : > { %20410 = vmatprep.subr.bf16.mxu0 %v21801_v3  ;;  %v20372_v56 = vpack.c.bf16 %v14080_v20, %v14079_v19  ;;  %v14156_v20 = vld [vmem:[%s27437_s10 + $0x350] sm:$0xff] }
0x234d   : > { %20412 = vmatpush3.bf16.msra.mxu0 %v20411_v21  ;;  %v14081_v21 = vld [vmem:[%s27437_s10 + $0xb0] sm:$0xff] }
0x234e   : > { %17746 = vmatprep.subr.mxu0 %v21803_v51  ;;  %v20375_v23 = vpack.c.bf16 %v14082_v22, %v14081_v21  ;;  %v14158_v22 = vld [vmem:[%s27437_s10 + $0x360] sm:$0xff] }
0x2350   : > { %17709 = vmatmul.mubr.f32.vlgmr.msra.gmra.mrb[48].mxu0 %v23919_v39 }
0x2351   : > { %17748 = vmatprep.mubr.msk.f32.mxu0 %vm21802_vm0, %v21803_v51 }
0x23c3   : > { %v4889_v24 = vpop.f32.mrb[42].mxu0 }
0x23c4   : > { %v4893_v26 = vmax.f32 %v4889_v24, 0.0  ;;  %v17490_v27 = vpop.f32.mrb[43].mxu0  ;;  %v14083_v24 = vld [vmem:[%s27437_s10 + $0xc0] sm:$0xff] }
0x23c5   : > { %v14085_v27 = vld [vmem:[%s27437_s10 + $0xd0] sm:$0xff] }
0x23c6   : > { %17524 = vmatmul.mubr.f32.vlgmr.msra.gmra.mrb[58].mxu1 %v4893_v26  ;;  %v20381_v29 = vpack.c.bf16 %v14086_v28, %v14085_v27 }
0x23c7   : > { %20319 = vmatpush3.bf16.msra.mxu1 %v20318_v25  ;;  %17593 = vmatprep.mubr.msk.f32.mxu1 %vm21802_vm0, %v21803_v51  ;;  %v14084_v25 = vld [vmem:[%s27437_s10 + $0xc8] sm:$0xff] }
0x23c8   : > { %20320 = vmatprep.subr.bf16.mxu1 %v21801_v3  ;;  %v20378_v26 = vpack.c.bf16 %v14084_v25, %v14083_v24  ;;  %v14160_v25 = vld [vmem:[%s27437_s10 + $0x370] sm:$0xff] }
0x23cb   : > { %20322 = vmatpush3.bf16.msra.mxu1 %v20321_v32  ;;  %v14087_v32 = vld [vmem:[%s27437_s10 + $0xe0] sm:$0xff] }
0x23cc   : > { %20323 = vmatprep.subr.bf16.mxu1 %v21801_v3  ;;  %v20384_v35 = vpack.c.bf16 %v14088_v33, %v14087_v32 }
0x23cf   : > { %20325 = vmatpush3.bf16.msra.mxu1 %v20324_v36  ;;  %v14089_v36 = vld [vmem:[%s27437_s10 + $0xf0] sm:$0xff] }
0x23d0   : > { %20326 = vmatprep.subr.bf16.mxu1 %v21801_v3  ;;  %v20387_v38 = vpack.c.bf16 %v14090_v37, %v14089_v36  ;;  %v14123_v37 = vld [vmem:[%s27430_s3 + $0x8] sm:$0xff] }
0x23d3   : > { %20328 = vmatpush3.bf16.msra.mxu1 %v20327_v60  ;;  %v14107_v60 = vld [vmem:[%s27437_s10 + $0x480] sm:$0xff] }
0x23d4   : > { %20329 = vmatprep.subr.bf16.mxu1 %v21801_v3  ;;  %v20414_v41 = vpack.c.bf16 %v14108_v40, %v14107_v60 }
0x23d7   : > { %20331 = vmatpush3.bf16.msra.mxu1 %v20330_v42  ;;  %v14109_v42 = vld [vmem:[%s27437_s10 + $0x490] sm:$0xff] }
0x23d8   : > { %20332 = vmatprep.subr.bf16.mxu1 %v21801_v3  ;;  %v20417_v44 = vpack.c.bf16 %v14110_v34, %v14109_v42 }
0x23db   : > { %20334 = vmatpush3.bf16.msra.mxu1 %v20333_v45  ;;  %v14111_v45 = vld [vmem:[%s27437_s10 + $0x4a0] sm:$0xff] }
0x23dc   : > { %20335 = vmatprep.subr.bf16.mxu1 %v21801_v3  ;;  %v20420_v47 = vpack.c.bf16 %v14112_v46, %v14111_v45 }
0x23df   : > { %20337 = vmatpush3.bf16.msra.mxu1 %v20336_v48  ;;  %v14113_v48 = vld [vmem:[%s27437_s10 + $0x4b0] sm:$0xff] }
0x23e0   : > { %20338 = vmatprep.subr.bf16.mxu1 %v21801_v3  ;;  %v20423_v50 = vpack.c.bf16 %v14114_v49, %v14113_v48 }
0x23e3   : > { %20340 = vmatpush3.bf16.msra.mxu1 %v20339_v31  ;;  %v5095_v52 = vpop.f32.mrb[44].mxu0  ;;  %v14115_v31 = vld [vmem:[%s27437_s10 + $0x4c0] sm:$0xff] }
0x23e4   : > { %17631 = vmatprep.subr.mxu1 %v21803_v51  ;;  %v17560_v53 = vpop.f32.mrb[45].mxu0 }
0x23e6   : > { %17594 = vmatmul.mubr.f32.vlgmr.msra.gmra.mrb[60].mxu1 %v23919_v39 }
0x23e7   : > { %17633 = vmatprep.mubr.msk.f32.mxu1 %vm21802_vm0, %v21803_v51 }
0x2403   : > { %v5269_v30 = vpop.f32.mrb[46].mxu0 }
0x2404   : > { %v17630_v54 = vpop.f32.mrb[47].mxu0 }
0x2405   : > { %v14118_v54 = vld [vmem:[%s27437_s10 + $0x4d8] sm:$0xff] }
0x2423   : > { %v5605_v55 = vpop.f32.mrb[48].mxu0 }
0x2424   : > { %v17710_v57 = vpop.f32.mrb[49].mxu0  ;;  %17747 = vmatpush3.xpose.msk.msra.mxu0 %vm865_vm1, %v5605_v55 }
0x2425   : > { %17751 = vmatprep.subr.mxu0 %v21803_v51  ;;  %v14119_v57 = vld [vmem:[%s27437_s10 + $0x4e0] sm:$0xff] }
0x2499   : > { %v24099_v58 = vpop.f32.mrb[58].mxu1 }
0x249a   : > { %v17525_v59 = vpop.f32.mrb[59].mxu1 }
0x249b   : > { %v14120_v59 = vld [vmem:[%s27437_s10 + $0x4e8] sm:$0xff] }
0x24b9   : > { %v5182_v62 = vpop.f32.mrb[60].mxu1 }
0x24ba   : > { %v17595_v43 = vpop.f32.mrb[61].mxu1  ;;  %17632 = vmatpush3.xpose.msk.msra.mxu1 %vm865_vm1, %v5182_v62  ;;  %v20432_v62 = vpack.c.bf16 %v14120_v59, %v14119_v57  ;;  %v14133_v57 = vld [vmem:[%s27437_s10 + $0x118] sm:$0xff] }
0x24bb   : > { %17636 = vmatprep.subr.mxu1 %v21803_v51  ;;  %v14121_v43 = vld [vmem:[%s27437_s10 + $0x4f0] sm:$0xff] }
0x24bd   : > { %17634 = vmatmul.mubr.msk.f32.vlgmr.msra.gmra.mrb[62].mxu1 %vm865_vm1, %v5095_v52  ;;  %v14116_v52 = vld [vmem:[%s27437_s10 + $0x4c8] sm:$0xff] }
0x24be   : > { %17637 = vmatpush3.msra.mxu1 %v5269_v30  ;;  %17638 = vmatprep.mubr.msk.f32.mxu1 %vm21802_vm0, %v21803_v51  ;;  %v20426_v53 = vpack.c.bf16 %v14116_v52, %v14115_v31  ;;  %v14117_v30 = vld [vmem:[%s27437_s10 + $0x4d0] sm:$0xff]  ;;  %v14127_v52 = vld [vmem:[%s27438_s11 + $0x8] sm:$0xff] }
0x24bf   : > { %20365 = vmatprep.subr.bf16.mxu1 %v21801_v3  ;;  %v20429_v55 = vpack.c.bf16 %v14118_v54, %v14117_v30  ;;  %v14131_v30 = vld [vmem:[%s27437_s10 + $0x108] sm:$0xff] }
0x2590   : > { %v5346_v5 = vpop.f32.mrb[62].mxu1 }
0x2591   : > { %v5347_v7 = vadd.f32 %v5346_v5, %v5273_v2  ;;  %v17635_v8 = vpop.f32.mrb[63].mxu1  ;;  %v14122_v2 = vld [vmem:[%s27437_s10 + $0x4f8] sm:$0xff] }
0x2592   : > { %v20435_v5 = vpack.c.bf16 %v14122_v2, %v14121_v43  ;;  %v14146_v8 = vld [vmem:[%s27437_s10 + $0x300] sm:$0xff] }
0x2593   : > { %v5350_v9 = vsel %vm865_vm1, %v5347_v7, -inf  ;;  %v14134_v2 = vld [vmem:[%s27437_s10 + $0x120] sm:$0xff] }
0x2594   : > { %5351 = vmax.xlane.f32.xlu1 %v5350_v9  ;;  %v14147_v9 = vld [vmem:[%s27437_s10 + $0x308] sm:$0xff] }
0x2621   : > { %v5352_v10 = vpop.xlane.xlu1 %5351 }
0x2622   : > { %v5353_v11 = vsub.f32 %v5347_v7, %v5352_v10  ;;  %v5434_v7 = vld [vmem:[%s27438_s11] sm:$0xff]  ;;  %v20462_v10 = vpack.c.bf16 %v14147_v9, %v14146_v8  ;;  %v14136_v8 = vld [vmem:[%s27437_s10 + $0x130] sm:$0xff]  ;;  %v14137_v9 = vld [vmem:[%s27437_s10 + $0x138] sm:$0xff] }
0x2624   : > { %v5354_v12 = vmul.f32 1.442695, %v5353_v11  ;;  %v14148_v11 = vld [vmem:[%s27437_s10 + $0x310] sm:$0xff] }
0x2626   : > { %21649 = vpow2.f32 %v5354_v12  ;;  %v14149_v12 = vld [vmem:[%s27437_s10 + $0x318] sm:$0xff] }
0x2630   : > { %v21650_v13 = vpop.eup %21649 }
0x2631   : > { %v5356_v14 = vsel %vm865_vm1, %v21650_v13, 0.0 }
0x2632   : > { %5357 = vadd.xlane.f32.xlu0 %v5356_v14 }
0x26bf   : > { %v5358_v1 = vpop.xlane.xlu0 %5357 }
0x26c0   : > { %21651 = vrcp.f32 %v5358_v1  ;;  %v20465_v1 = vpack.c.bf16 %v14149_v12, %v14148_v11  ;;  %v14138_v11 = vld [vmem:[%s27437_s10 + $0x140] sm:$0xff]  ;;  %v14139_v12 = vld [vmem:[%s27437_s10 + $0x148] sm:$0xff] }
0x26ca   : > { %v21652_v61 = vpop.eup %21651 }
0x26cb   : > { %v5360_v6 = vmul.f32 %v21652_v61, %v21650_v13  ;;  %v20468_v61 = vpack.c.bf16 %v14151_v15, %v14150_v4  ;;  %v14142_v15 = vld [vmem:[%s27437_s10 + $0x160] sm:$0xff] }
0x26cd   : > { %17639 = vmatmul.mubr.msk.f32.vlgmr.msra.gmra.mrb[64].mxu1 %vm865_vm1, %v5360_v6  ;;  %v14153_v6 = vld [vmem:[%s27437_s10 + $0x338] sm:$0xff] }
0x26ce   : > { %20367 = vmatpush3.bf16.msra.mxu1 %v20366_v16  ;;  %17673 = vmatprep.mubr.msk.f32.mxu1 %vm21802_vm0, %v21803_v51  ;;  %v14152_v16 = vld [vmem:[%s27437_s10 + $0x330] sm:$0xff] }
0x26cf   : > { %20368 = vmatprep.subr.bf16.mxu1 %v21801_v3  ;;  %v20471_v17 = vpack.c.bf16 %v14153_v6, %v14152_v16  ;;  %v14144_v6 = vld [vmem:[%s27437_s10 + $0x170] sm:$0xff] }
0x26d2   : > { %20370 = vmatpush3.bf16.msra.mxu1 %v20369_v18  ;;  %v14155_v18 = vld [vmem:[%s27437_s10 + $0x348] sm:$0xff] }
0x26d3   : > { %20371 = vmatprep.subr.bf16.mxu1 %v21801_v3  ;;  %v20474_v19 = vpack.c.bf16 %v14155_v18, %v14154_v0  ;;  %v14162_v18 = vld [vmem:[%s27437_s10 + $0x500] sm:$0xff] }
0x26d6   : > { %20373 = vmatpush3.bf16.msra.mxu1 %v20372_v56  ;;  %v14157_v56 = vld [vmem:[%s27437_s10 + $0x358] sm:$0xff] }
0x26d7   : > { %20374 = vmatprep.subr.bf16.mxu1 %v21801_v3  ;;  %v20477_v21 = vpack.c.bf16 %v14157_v56, %v14156_v20  ;;  %v14164_v56 = vld [vmem:[%s27437_s10 + $0x510] sm:$0xff] }
0x26da   : > { %20376 = vmatpush3.bf16.msra.mxu1 %v20375_v23  ;;  %v14159_v23 = vld [vmem:[%s27437_s10 + $0x368] sm:$0xff] }
0x26db   : > { %20377 = vmatprep.subr.bf16.mxu1 %v21801_v3  ;;  %v20480_v24 = vpack.c.bf16 %v14159_v23, %v14158_v22  ;;  %v14166_v23 = vld [vmem:[%s27437_s10 + $0x520] sm:$0xff] }
0x26de   : > { %20379 = vmatpush3.bf16.msra.mxu1 %v20378_v26  ;;  %v14161_v26 = vld [vmem:[%s27437_s10 + $0x378] sm:$0xff] }
0x26df   : > { %20380 = vmatprep.subr.bf16.mxu1 %v21801_v3  ;;  %v20483_v27 = vpack.c.bf16 %v14161_v26, %v14160_v25  ;;  %v14168_v26 = vld [vmem:[%s27437_s10 + $0x530] sm:$0xff] }
0x26e2   : > { %20382 = vmatpush3.bf16.msra.mxu1 %v20381_v29 }
0x26e3   : > { %20383 = vmatprep.subr.bf16.mxu1 %v21801_v3 }
0x26e6   : > { %20385 = vmatpush3.bf16.msra.mxu1 %v20384_v35 }
0x26e7   : > { %20386 = vmatprep.subr.bf16.mxu1 %v21801_v3 }
0x26ea   : > { %20388 = vmatpush3.bf16.msra.mxu1 %v20387_v38 }
0x26eb   : > { %20413 = vmatprep.subr.bf16.mxu1 %v21801_v3 }
0x26ed   : > { %17674 = vmatmul.mubr.f32.vlgmr.msra.gmra.mrb[66].mxu1 %v23919_v39 }
0x26ee   : > { %20415 = vmatpush3.bf16.msra.mxu1 %v20414_v41  ;;  %17743 = vmatprep.mubr.msk.f32.mxu1 %vm21802_vm0, %v21803_v51 }
0x26ef   : > { %20416 = vmatprep.subr.bf16.mxu1 %v21801_v3 }
0x26f2   : > { %20418 = vmatpush3.bf16.msra.mxu1 %v20417_v44 }
0x26f3   : > { %20419 = vmatprep.subr.bf16.mxu1 %v21801_v3 }
0x26f6   : > { %20421 = vmatpush3.bf16.msra.mxu1 %v20420_v47 }
0x26f7   : > { %20422 = vmatprep.subr.bf16.mxu1 %v21801_v3 }
0x26fa   : > { %20424 = vmatpush3.bf16.msra.mxu1 %v20423_v50 }
0x26fb   : > { %20425 = vmatprep.subr.bf16.mxu1 %v21801_v3 }
0x26fe   : > { %20427 = vmatpush3.bf16.msra.mxu1 %v20426_v53  ;;  %v14130_v53 = vld [vmem:[%s27437_s10 + $0x100] sm:$0xff] }
0x26ff   : > { %20428 = vmatprep.subr.bf16.mxu1 %v21801_v3  ;;  %v20438_v54 = vpack.c.bf16 %v14131_v30, %v14130_v53  ;;  %v14206_v30 = vld [vmem:[%s27437_s10 + $0x3b0] sm:$0xff] }
0x2702   : > { %20430 = vmatpush3.bf16.msra.mxu1 %v20429_v55  ;;  %v14132_v55 = vld [vmem:[%s27437_s10 + $0x110] sm:$0xff] }
0x2703   : > { %20431 = vmatprep.subr.bf16.mxu1 %v21801_v3  ;;  %v20441_v43 = vpack.c.bf16 %v14133_v57, %v14132_v55  ;;  %v14208_v57 = vld [vmem:[%s27437_s10 + $0x3c0] sm:$0xff] }
0x2706   : > { %20433 = vmatpush3.bf16.msra.mxu1 %v20432_v62 }
0x2707   : > { %20434 = vmatprep.subr.bf16.mxu1 %v21801_v3 }
0x270a   : > { %20436 = vmatpush3.bf16.msra.mxu1 %v20435_v5  ;;  %v14135_v5 = vld [vmem:[%s27437_s10 + $0x128] sm:$0xff] }
0x270b   : > { %17761 = vmatprep.subr.mxu1 %v21803_v51 }
0x270d   : > { %17744 = vmatmul.mubr.f32.vlgmr.msra.gmra.mrb[68].mxu1 %v23919_v39 }
0x270e   : > { %17762 = vmatpush3.msra.mxu1 %v5434_v7  ;;  %17763 = vmatprep.mubr.msk.f32.mxu1 %vm21802_vm0, %v21803_v51  ;;  %v20444_v7 = vpack.c.bf16 %v14135_v5, %v14134_v2  ;;  %v14211_v2 = vld [vmem:[%s27437_s10 + $0x3d8] sm:$0xff] }
0x270f   : > { %20461 = vmatprep.subr.bf16.mxu1 %v21801_v3 }
0x27a0   : > { %v5430_v13 = vpop.f32.mrb[64].mxu1 }
0x27a1   : > { %v17640_v14 = vpop.f32.mrb[65].mxu1  ;;  %17764 = vmatmul.mubr.msk.f32.vlgmr.msra.gmra.mrb[70].mxu1 %vm865_vm1, %v5430_v13  ;;  %v20450_v13 = vpack.c.bf16 %v14139_v12, %v14138_v11  ;;  %v14215_v11 = vld [vmem:[%s27437_s10 + $0x3f8] sm:$0xff] }
0x27a2   : > { %20463 = vmatpush3.bf16.msra.mxu1 %v20462_v10  ;;  %17833 = vmatprep.mubr.msk.f32.mxu1 %vm21802_vm0, %v21803_v51  ;;  %v20447_v10 = vpack.c.bf16 %v14137_v9, %v14136_v8  ;;  %v14140_v14 = vld [vmem:[%s27437_s10 + $0x150] sm:$0xff]  ;;  %v14213_v8 = vld [vmem:[%s27437_s10 + $0x3e8] sm:$0xff] }
0x27a3   : > { %20464 = vmatprep.subr.bf16.mxu1 %v21801_v3 }
0x27a6   : > { %20466 = vmatpush3.bf16.msra.mxu1 %v20465_v1  ;;  %v14141_v1 = vld [vmem:[%s27437_s10 + $0x158] sm:$0xff] }
0x27a7   : > { %20467 = vmatprep.subr.bf16.mxu1 %v21801_v3  ;;  %v20453_v4 = vpack.c.bf16 %v14141_v1, %v14140_v14 }
0x27aa   : > { %20469 = vmatpush3.bf16.msra.mxu1 %v20468_v61  ;;  %v14143_v61 = vld [vmem:[%s27437_s10 + $0x168] sm:$0xff] }
0x27ab   : > { %20470 = vmatprep.subr.bf16.mxu1 %v21801_v3  ;;  %v20456_v16 = vpack.c.bf16 %v14143_v61, %v14142_v15 }
0x27ae   : > { %20472 = vmatpush3.bf16.msra.mxu1 %v20471_v17  ;;  %v14145_v17 = vld [vmem:[%s27437_s10 + $0x178] sm:$0xff] }
0x27af   : > { %20473 = vmatprep.subr.bf16.mxu1 %v21801_v3  ;;  %v20459_v0 = vpack.c.bf16 %v14145_v17, %v14144_v6 }
0x27b2   : > { %20475 = vmatpush3.bf16.msra.mxu1 %v20474_v19  ;;  %v14163_v19 = vld [vmem:[%s27437_s10 + $0x508] sm:$0xff] }
0x27b3   : > { %20476 = vmatprep.subr.bf16.mxu1 %v21801_v3  ;;  %v20486_v20 = vpack.c.bf16 %v14163_v19, %v14162_v18 }
0x27b6   : > { %20478 = vmatpush3.bf16.msra.mxu1 %v20477_v21  ;;  %v14165_v21 = vld [vmem:[%s27437_s10 + $0x518] sm:$0xff] }
0x27b7   : > { %20479 = vmatprep.subr.bf16.mxu1 %v21801_v3  ;;  %v20489_v22 = vpack.c.bf16 %v14165_v21, %v14164_v56 }
0x27ba   : > { %20481 = vmatpush3.bf16.msra.mxu1 %v20480_v24  ;;  %v14167_v24 = vld [vmem:[%s27437_s10 + $0x528] sm:$0xff] }
0x27bb   : > { %20482 = vmatprep.subr.bf16.mxu1 %v21801_v3  ;;  %v20492_v25 = vpack.c.bf16 %v14167_v24, %v14166_v23 }
0x27be   : > { %20484 = vmatpush3.bf16.msra.mxu1 %v20483_v27  ;;  %v14169_v27 = vld [vmem:[%s27437_s10 + $0x538] sm:$0xff] }
0x27bf   : > { %17871 = vmatprep.subr.mxu1 %v21803_v51 }
0x27c0   : > { %v5518_v28 = vpop.f32.mrb[66].mxu1 }
0x27c1   : > { %v17675_v29 = vpop.f32.mrb[67].mxu1  ;;  %17749 = vmatmul.mubr.msk.f32.vlgmr.msra.gmra.mrb[50].mxu0 %vm865_vm1, %v5518_v28  ;;  %17834 = vmatmul.mubr.f32.vlgmr.msra.gmra.mrb[72].mxu1 %v23919_v39  ;;  %v20495_v28 = vpack.c.bf16 %v14169_v27, %v14168_v26 }
0x27c2   : > { %17753 = vmatprep.mubr.msk.f32.mxu0 %vm21802_vm0, %v21803_v51  ;;  %17873 = vmatprep.mubr.msk.f32.mxu1 %vm21802_vm0, %v21803_v51  ;;  %v14170_v29 = vld [vmem:[%s27437_s10 + $0x540] sm:$0xff] }
0x27e0   : > { %v5692_v32 = vpop.f32.mrb[68].mxu1 }
0x27e1   : > { %v17745_v33 = vpop.f32.mrb[69].mxu1  ;;  %17752 = vmatpush3.msra.mxu0 %v5692_v32  ;;  %v14171_v32 = vld [vmem:[%s27437_s10 + $0x548] sm:$0xff] }
0x27e2   : > { %17756 = vmatprep.subr.mxu0 %v21803_v51  ;;  %v20498_v33 = vpack.c.bf16 %v14171_v32, %v14170_v29  ;;  %v14184_v29 = vld [vmem:[%s27437_s10 + $0x180] sm:$0xff]  ;;  %v14185_v32 = vld [vmem:[%s27437_s10 + $0x188] sm:$0xff] }
0x2874   : > { %v24303_v35 = vpop.f32.mrb[70].mxu1 }
0x2875   : > { %v17765_v36 = vpop.f32.mrb[71].mxu1 }
0x2876   : > { %v14172_v36 = vld [vmem:[%s27437_s10 + $0x550] sm:$0xff] }
0x2894   : > { %v5770_v38 = vpop.f32.mrb[50].mxu0  ;;  %v6176_v60 = vpop.f32.mrb[72].mxu1 }
0x2895   : > { %v5771_v40 = vadd.f32 %v14123_v37, %v5770_v38  ;;  %v17750_v41 = vpop.f32.mrb[51].mxu0  ;;  %v17835_v42 = vpop.f32.mrb[73].mxu1  ;;  %17872 = vmatpush3.xpose.msk.msra.mxu1 %vm865_vm1, %v6176_v60  ;;  %v14173_v37 = vld [vmem:[%s27437_s10 + $0x558] sm:$0xff]  ;;  %v14174_v60 = vld [vmem:[%s27437_s10 + $0x560] sm:$0xff] }
0x2896   : > { %17876 = vmatprep.subr.mxu1 %v21803_v51  ;;  %v20501_v38 = vpack.c.bf16 %v14173_v37, %v14172_v36  ;;  %v14176_v42 = vld [vmem:[%s27437_s10 + $0x570] sm:$0xff]  ;;  %v14187_v37 = vld [vmem:[%s27437_s10 + $0x198] sm:$0xff] }
0x2897   : > { %v5774_v34 = vsel %vm865_vm1, %v5771_v40, -inf  ;;  %v14186_v36 = vld [vmem:[%s27437_s10 + $0x190] sm:$0xff] }
0x2898   : > { %5775 = vmax.xlane.f32.xlu1 %v5774_v34  ;;  %v14177_v34 = vld [vmem:[%s27437_s10 + $0x578] sm:$0xff] }
0x2925   : > { %v5776_v44 = vpop.xlane.xlu1 %5775 }
0x2926   : > { %v5777_v45 = vsub.f32 %v5771_v40, %v5776_v44  ;;  %v14175_v40 = vld [vmem:[%s27437_s10 + $0x568] sm:$0xff]  ;;  %v20507_v44 = vpack.c.bf16 %v14177_v34, %v14176_v42 }
0x2927   : > { %v20504_v41 = vpack.c.bf16 %v14175_v40, %v14174_v60  ;;  %v20513_v40 = vpack.c.bf16 %v14187_v37, %v14186_v36  ;;  %v14189_v42 = vld [vmem:[%s27437_s10 + $0x1a8] sm:$0xff]  ;;  %v14232_v36 = vld [vmem:[%s27430_s3 + $0x18] sm:$0xff] }
0x2928   : > { %v5778_v46 = vmul.f32 1.442695, %v5777_v45  ;;  %v14200_v45 = vld [vmem:[%s27437_s10 + $0x380] sm:$0xff] }
0x292a   : > { %21653 = vpow2.f32 %v5778_v46  ;;  %v14201_v46 = vld [vmem:[%s27437_s10 + $0x388] sm:$0xff] }
0x2934   : > { %v21654_v47 = vpop.eup %21653 }
0x2935   : > { %v5780_v48 = vsel %vm865_vm1, %v21654_v47, 0.0 }
0x2936   : > { %5781 = vadd.xlane.f32.xlu0 %v5780_v48  ;;  %v14202_v48 = vld [vmem:[%s27437_s10 + $0x390] sm:$0xff] }
0x29c3   : > { %v5782_v49 = vpop.xlane.xlu0 %5781 }
0x29c4   : > { %21655 = vrcp.f32 %v5782_v49  ;;  %v14203_v49 = vld [vmem:[%s27437_s10 + $0x398] sm:$0xff] }
0x29ce   : > { %v21656_v50 = vpop.eup %21655 }
0x29cf   : > { %v5784_v31 = vmul.f32 %v21656_v50, %v21654_v47  ;;  %v20534_v47 = vpack.c.bf16 %v14201_v46, %v14200_v45  ;;  %v20537_v50 = vpack.c.bf16 %v14203_v49, %v14202_v48  ;;  %v14191_v45 = vld [vmem:[%s27437_s10 + $0x1b8] sm:$0xff]  ;;  %v14193_v48 = vld [vmem:[%s27437_s10 + $0x1c8] sm:$0xff] }
0x29d1   : > { %17754 = vmatmul.mubr.msk.f32.vlgmr.msra.gmra.mrb[52].mxu0 %vm865_vm1, %v5784_v31  ;;  %v14204_v31 = vld [vmem:[%s27437_s10 + $0x3a0] sm:$0xff] }
0x29d2   : > { %17757 = vmatpush3.msra.mxu0 %v14127_v52  ;;  %17758 = vmatprep.mubr.msk.f32.mxu0 %vm21802_vm0, %v21803_v51  ;;  %v14205_v52 = vld [vmem:[%s27437_s10 + $0x3a8] sm:$0xff] }
0x29d3   : > { %20437 = vmatprep.subr.bf16.mxu0 %v21801_v3  ;;  %v20540_v53 = vpack.c.bf16 %v14205_v52, %v14204_v31  ;;  %v14195_v31 = vld [vmem:[%s27437_s10 + $0x1d8] sm:$0xff] }
0x2aa4   : > { %v5854_v59 = vpop.f32.mrb[52].mxu0 }
0x2aa5   : > { %v17755_v62 = vpop.f32.mrb[53].mxu0  ;;  %17759 = vmatmul.mubr.msk.f32.vlgmr.msra.gmra.mrb[54].mxu0 %vm865_vm1, %v5854_v59  ;;  %v14209_v59 = vld [vmem:[%s27437_s10 + $0x3c8] sm:$0xff] }
0x2aa6   : > { %20439 = vmatpush3.bf16.msra.mxu0 %v20438_v54  ;;  %17798 = vmatprep.mubr.msk.f32.mxu0 %vm21802_vm0, %v21803_v51  ;;  %v14207_v54 = vld [vmem:[%s27437_s10 + $0x3b8] sm:$0xff]  ;;  %v20546_v62 = vpack.c.bf16 %v14209_v59, %v14208_v57 }
0x2aa7   : > { %20440 = vmatprep.subr.bf16.mxu0 %v21801_v3  ;;  %v20543_v55 = vpack.c.bf16 %v14207_v54, %v14206_v30  ;;  %v14197_v30 = vld [vmem:[%s27437_s10 + $0x1e8] sm:$0xff]  ;;  %v14199_v57 = vld [vmem:[%s27437_s10 + $0x1f8] sm:$0xff] }
0x2aaa   : > { %20442 = vmatpush3.bf16.msra.mxu0 %v20441_v43  ;;  %v14210_v43 = vld [vmem:[%s27437_s10 + $0x3d0] sm:$0xff] }
0x2aab   : > { %20443 = vmatprep.subr.bf16.mxu0 %v21801_v3  ;;  %v20549_v5 = vpack.c.bf16 %v14211_v2, %v14210_v43  ;;  %v14217_v43 = vld [vmem:[%s27437_s10 + $0x588] sm:$0xff] }
0x2aae   : > { %20445 = vmatpush3.bf16.msra.mxu0 %v20444_v7  ;;  %v14212_v7 = vld [vmem:[%s27437_s10 + $0x3e0] sm:$0xff] }
0x2aaf   : > { %20446 = vmatprep.subr.bf16.mxu0 %v21801_v3  ;;  %v20552_v9 = vpack.c.bf16 %v14213_v8, %v14212_v7  ;;  %v14219_v7 = vld [vmem:[%s27437_s10 + $0x598] sm:$0xff] }
0x2ab2   : > { %20448 = vmatpush3.bf16.msra.mxu0 %v20447_v10  ;;  %v14214_v10 = vld [vmem:[%s27437_s10 + $0x3f0] sm:$0xff] }
0x2ab3   : > { %20449 = vmatprep.subr.bf16.mxu0 %v21801_v3  ;;  %v20555_v12 = vpack.c.bf16 %v14215_v11, %v14214_v10  ;;  %v14221_v10 = vld [vmem:[%s27437_s10 + $0x5a8] sm:$0xff] }
0x2ab6   : > { %20451 = vmatpush3.bf16.msra.mxu0 %v20450_v13 }
0x2ab7   : > { %20452 = vmatprep.subr.bf16.mxu0 %v21801_v3 }
0x2aba   : > { %20454 = vmatpush3.bf16.msra.mxu0 %v20453_v4 }
0x2abb   : > { %20455 = vmatprep.subr.bf16.mxu0 %v21801_v3 }
0x2abe   : > { %20457 = vmatpush3.bf16.msra.mxu0 %v20456_v16 }
0x2abf   : > { %20458 = vmatprep.subr.bf16.mxu0 %v21801_v3 }
0x2ac2   : > { %20460 = vmatpush3.bf16.msra.mxu0 %v20459_v0 }
0x2ac3   : > { %20485 = vmatprep.subr.bf16.mxu0 %v21801_v3 }
0x2ac5   : > { %17799 = vmatmul.mubr.f32.vlgmr.msra.gmra.mrb[56].mxu0 %v23919_v39 }
0x2ac6   : > { %20487 = vmatpush3.bf16.msra.mxu0 %v20486_v20  ;;  %17868 = vmatprep.mubr.msk.f32.mxu0 %vm21802_vm0, %v21803_v51 }
0x2ac7   : > { %20488 = vmatprep.subr.bf16.mxu0 %v21801_v3 }
0x2aca   : > { %20490 = vmatpush3.bf16.msra.mxu0 %v20489_v22 }
0x2acb   : > { %20491 = vmatprep.subr.bf16.mxu0 %v21801_v3 }
0x2ace   : > { %20493 = vmatpush3.bf16.msra.mxu0 %v20492_v25 }
0x2acf   : > { %20494 = vmatprep.subr.bf16.mxu0 %v21801_v3 }
0x2ad2   : > { %20496 = vmatpush3.bf16.msra.mxu0 %v20495_v28  ;;  %v14182_v28 = vld [vmem:[%s27438_s11 + $0x10] sm:$0xff] }
0x2ad3   : > { %20497 = vmatprep.subr.bf16.mxu0 %v21801_v3 }
0x2ad6   : > { %20499 = vmatpush3.bf16.msra.mxu0 %v20498_v33  ;;  %v20510_v33 = vpack.c.bf16 %v14185_v32, %v14184_v29  ;;  %v14243_v32 = vld [vmem:[%s27439_s12 + $0x218] sm:$0xff] }
0x2ad7   : > { %20500 = vmatprep.subr.bf16.mxu0 %v21801_v3 }
0x2ada   : > { %20502 = vmatpush3.bf16.msra.mxu0 %v20501_v38 }
0x2adb   : > { %20503 = vmatprep.subr.bf16.mxu0 %v21801_v3 }
0x2ade   : > { %20505 = vmatpush3.bf16.msra.mxu0 %v20504_v41  ;;  %v14188_v41 = vld [vmem:[%s27437_s10 + $0x1a0] sm:$0xff] }
0x2adf   : > { %20506 = vmatprep.subr.bf16.mxu0 %v21801_v3  ;;  %v20516_v34 = vpack.c.bf16 %v14189_v42, %v14188_v41 }
0x2ae2   : > { %20508 = vmatpush3.bf16.msra.mxu0 %v20507_v44  ;;  %v14190_v44 = vld [vmem:[%s27437_s10 + $0x1b0] sm:$0xff] }
0x2ae3   : > { %20533 = vmatprep.subr.bf16.mxu0 %v21801_v3  ;;  %v20519_v46 = vpack.c.bf16 %v14191_v45, %v14190_v44  ;;  %v14245_v44 = vld [vmem:[%s27439_s12 + $0x228] sm:$0xff] }
0x2ae5   : > { %17869 = vmatmul.mubr.f32.vlgmr.msra.gmra.mrb[58].mxu0 %v23919_v39 }
0x2ae6   : > { %20535 = vmatpush3.bf16.msra.mxu0 %v20534_v47  ;;  %17953 = vmatprep.mubr.msk.f32.mxu0 %vm21802_vm0, %v21803_v51  ;;  %v14192_v47 = vld [vmem:[%s27437_s10 + $0x1c0] sm:$0xff] }
0x2ae7   : > { %20536 = vmatprep.subr.bf16.mxu0 %v21801_v3  ;;  %v20522_v49 = vpack.c.bf16 %v14193_v48, %v14192_v47  ;;  %v14248_v47 = vld [vmem:[%s27439_s12 + $0x240] sm:$0xff]  ;;  %v14249_v48 = vld [vmem:[%s27439_s12 + $0x248] sm:$0xff] }
0x2aea   : > { %20538 = vmatpush3.bf16.msra.mxu0 %v20537_v50  ;;  %v14194_v50 = vld [vmem:[%s27437_s10 + $0x1d0] sm:$0xff] }
0x2aeb   : > { %20539 = vmatprep.subr.bf16.mxu0 %v21801_v3  ;;  %v20525_v52 = vpack.c.bf16 %v14195_v31, %v14194_v50  ;;  %v14250_v50 = vld [vmem:[%s27439_s12 + $0x250] sm:$0xff]  ;;  %v14251_v31 = vld [vmem:[%s27439_s12 + $0x258] sm:$0xff] }
0x2aee   : > { %20541 = vmatpush3.bf16.msra.mxu0 %v20540_v53  ;;  %v14196_v53 = vld [vmem:[%s27437_s10 + $0x1e0] sm:$0xff] }
0x2aef   : > { %20542 = vmatprep.subr.bf16.mxu0 %v21801_v3  ;;  %v20528_v54 = vpack.c.bf16 %v14197_v30, %v14196_v53  ;;  %v14252_v53 = vld [vmem:[%s27439_s12 + $0x260] sm:$0xff]  ;;  %v14253_v30 = vld [vmem:[%s27439_s12 + $0x268] sm:$0xff] }
0x2af2   : > { %20544 = vmatpush3.bf16.msra.mxu0 %v20543_v55  ;;  %v14198_v55 = vld [vmem:[%s27437_s10 + $0x1f0] sm:$0xff] }
0x2af3   : > { %20545 = vmatprep.subr.bf16.mxu0 %v21801_v3  ;;  %v20531_v59 = vpack.c.bf16 %v14199_v57, %v14198_v55  ;;  %v14254_v55 = vld [vmem:[%s27439_s12 + $0x270] sm:$0xff]  ;;  %v14255_v57 = vld [vmem:[%s27439_s12 + $0x278] sm:$0xff] }
0x2af6   : > { %20547 = vmatpush3.bf16.msra.mxu0 %v20546_v62  ;;  %v14216_v62 = vld [vmem:[%s27437_s10 + $0x580] sm:$0xff] }
0x2af7   : > { %20548 = vmatprep.subr.bf16.mxu0 %v21801_v3  ;;  %v20558_v2 = vpack.c.bf16 %v14217_v43, %v14216_v62 }
0x2afa   : > { %20550 = vmatpush3.bf16.msra.mxu0 %v20549_v5  ;;  %v14218_v5 = vld [vmem:[%s27437_s10 + $0x590] sm:$0xff] }
0x2afb   : > { %20551 = vmatprep.subr.bf16.mxu0 %v21801_v3  ;;  %v20561_v8 = vpack.c.bf16 %v14219_v7, %v14218_v5 }
0x2afe   : > { %20553 = vmatpush3.bf16.msra.mxu0 %v20552_v9  ;;  %v14220_v9 = vld [vmem:[%s27437_s10 + $0x5a0] sm:$0xff] }
0x2aff   : > { %20554 = vmatprep.subr.bf16.mxu0 %v21801_v3  ;;  %v20564_v11 = vpack.c.bf16 %v14221_v10, %v14220_v9 }
0x2b02   : > { %20556 = vmatpush3.bf16.msra.mxu0 %v20555_v12  ;;  %v14222_v12 = vld [vmem:[%s27437_s10 + $0x5b0] sm:$0xff] }
0x2b03   : > { %17991 = vmatprep.subr.mxu0 %v21803_v51 }
0x2b05   : > { %17954 = vmatmul.mubr.f32.vlgmr.msra.gmra.mrb[60].mxu0 %v23919_v39 }
0x2b06   : > { %17993 = vmatprep.mubr.msk.f32.mxu0 %vm21802_vm0, %v21803_v51 }
0x2b78   : > { %v5929_v13 = vpop.f32.mrb[54].mxu0 }
0x2b79   : > { %v24500_v14 = vadd.f32 %v24303_v35, %v5929_v13  ;;  %v17760_v1 = vpop.f32.mrb[55].mxu0  ;;  %v14178_v35 = vld [vmem:[%s27430_s3 + $0x10] sm:$0xff]  ;;  %v14223_v13 = vld [vmem:[%s27437_s10 + $0x5b8] sm:$0xff] }
0x2b7a   : > { %v20567_v1 = vpack.c.bf16 %v14223_v13, %v14222_v12  ;;  %v14038_v12 = vld [vmem:[%s27443_s16] ss:$0 sm:$0xff] }
0x2b98   : > { %v6089_v4 = vpop.f32.mrb[56].mxu0 }
0x2b99   : > { %v17800_v15 = vpop.f32.mrb[57].mxu0  ;;  %17874 = vmatmul.mubr.msk.f32.vlgmr.msra.gmra.mrb[74].mxu1 %vm865_vm1, %v6089_v4  ;;  %v14224_v4 = vld [vmem:[%s27437_s10 + $0x5c0] sm:$0xff] }
0x2b9a   : > { %17878 = vmatprep.mubr.msk.f32.mxu1 %vm21802_vm0, %v21803_v51  ;;  %v14225_v15 = vld [vmem:[%s27437_s10 + $0x5c8] sm:$0xff] }
0x2bb8   : > { %v6263_v61 = vpop.f32.mrb[58].mxu0 }
0x2bb9   : > { %v17870_v16 = vpop.f32.mrb[59].mxu0  ;;  %17877 = vmatpush3.msra.mxu1 %v6263_v61  ;;  %v20570_v61 = vpack.c.bf16 %v14225_v15, %v14224_v4 }
0x2bba   : > { %17881 = vmatprep.subr.mxu1 %v21803_v51  ;;  %v14226_v16 = vld [vmem:[%s27437_s10 + $0x5d0] sm:$0xff] }
0x2bd8   : > { %v6675_v6 = vpop.f32.mrb[60].mxu0 }
0x2bd9   : > { %v17955_v17 = vpop.f32.mrb[61].mxu0  ;;  %17992 = vmatpush3.xpose.msk.msra.mxu0 %vm865_vm1, %v6675_v6  ;;  %v14227_v6 = vld [vmem:[%s27437_s10 + $0x5d8] sm:$0xff] }
0x2bda   : > { %17996 = vmatprep.subr.mxu0 %v21803_v51  ;;  %v20573_v17 = vpack.c.bf16 %v14227_v6, %v14226_v16  ;;  %v14236_v16 = vld [vmem:[%s27438_s11 + $0x18] sm:$0xff] }
0x2c6c   : > { %v6341_v0 = vpop.f32.mrb[74].mxu1 }
0x2c6d   : > { %v6342_v18 = vadd.f32 %v14178_v35, %v6341_v0  ;;  %v17875_v19 = vpop.f32.mrb[75].mxu1  ;;  %v14228_v35 = vld [vmem:[%s27437_s10 + $0x5e0] sm:$0xff]  ;;  %v14229_v0 = vld [vmem:[%s27437_s10 + $0x5e8] sm:$0xff] }
0x2c6e   : > { %v14230_v19 = vld [vmem:[%s27437_s10 + $0x5f0] sm:$0xff] }
0x2c6f   : > { %v6345_v20 = vsel %vm865_vm1, %v6342_v18, -inf }
0x2c70   : > { %6346 = vmax.xlane.f32.xlu1 %v6345_v20  ;;  %v14231_v20 = vld [vmem:[%s27437_s10 + $0x5f8] sm:$0xff] }
0x2cfd   : > { %v6347_v56 = vpop.xlane.xlu1 %6346 }
0x2cfe   : > { %v6348_v21 = vsub.f32 %v6342_v18, %v6347_v56  ;;  %v20576_v18 = vpack.c.bf16 %v14229_v0, %v14228_v35  ;;  %v20579_v56 = vpack.c.bf16 %v14231_v20, %v14230_v19  ;;  %v7022_v19 = vld [vmem:[%s27439_s12 + $0x8] sm:$0xff]  ;;  %v7023_v20 = vld [vmem:[%s27439_s12 + $0x10] sm:$0xff] }
0x2d00   : > { %v6349_v22 = vmul.f32 1.442695, %v6348_v21 }
0x2d02   : > { %21657 = vpow2.f32 %v6349_v22 }
0x2d0c   : > { %v21658_v23 = vpop.eup %21657 }
0x2d0d   : > { %v6351_v24 = vsel %vm865_vm1, %v21658_v23, 0.0 }
0x2d0e   : > { %6352 = vadd.xlane.f32.xlu0 %v6351_v24 }
0x2d9b   : > { %v6353_v25 = vpop.xlane.xlu0 %6352 }
0x2d9c   : > { %21659 = vrcp.f32 %v6353_v25 }
0x2da6   : > { %v21660_v26 = vpop.eup %21659 }
0x2da7   : > { %v6355_v27 = vmul.f32 %v21660_v26, %v21658_v23 }
0x2da9   : > { %17879 = vmatmul.mubr.msk.f32.vlgmr.msra.gmra.mrb[76].mxu1 %vm865_vm1, %v6355_v27 }
0x2daa   : > { %17882 = vmatpush3.msra.mxu1 %v14182_v28  ;;  %17883 = vmatprep.mubr.msk.f32.mxu1 %vm21802_vm0, %v21803_v51  ;;  %v14242_v28 = vld [vmem:[%s27439_s12 + $0x210] sm:$0xff] }
0x2dab   : > { %20509 = vmatprep.subr.bf16.mxu1 %v21801_v3 }
0x2e7c   : > { %v6425_v38 = vpop.f32.mrb[76].mxu1 }
0x2e7d   : > { %v17880_v60 = vpop.f32.mrb[77].mxu1  ;;  %17884 = vmatmul.mubr.msk.f32.vlgmr.msra.gmra.mrb[78].mxu1 %vm865_vm1, %v6425_v38 }
0x2e7e   : > { %20511 = vmatpush3.bf16.msra.mxu1 %v20510_v33  ;;  %17918 = vmatprep.mubr.msk.f32.mxu1 %vm21802_vm0, %v21803_v51  ;;  %v20609_v33 = vpack.c.bf16 %v14243_v32, %v14242_v28 }
0x2e7f   : > { %20512 = vmatprep.subr.bf16.mxu1 %v21801_v3 }
0x2e82   : > { %20514 = vmatpush3.bf16.msra.mxu1 %v20513_v40  ;;  %v4981_v40 = vadd.f32 %v24099_v58, %v23740_v63  ;;  %v14246_v63 = vld [vmem:[%s27439_s12 + $0x230] sm:$0xff]  ;;  %v14247_v58 = vld [vmem:[%s27439_s12 + $0x238] sm:$0xff] }
0x2e83   : > { %20515 = vmatprep.subr.bf16.mxu1 %v21801_v3 }
0x2e84   : > { %v4983_v42 = vmul.f32 %v4981_v40, %v4981_v40 }
0x2e86   : > { %20517 = vmatpush3.bf16.msra.mxu1 %v20516_v34  ;;  %v14244_v34 = vld [vmem:[%s27439_s12 + $0x220] sm:$0xff] }
0x2e87   : > { %20518 = vmatprep.subr.bf16.mxu1 %v21801_v3  ;;  %v20612_v45 = vpack.c.bf16 %v14245_v44, %v14244_v34  ;;  %v7034_v44 = vld [vmem:[%s27439_s12 + $0x68] sm:$0xff] }
0x2e8a   : > { %20520 = vmatpush3.bf16.msra.mxu1 %v20519_v46  ;;  %v20615_v46 = vpack.c.bf16 %v14247_v58, %v14246_v63  ;;  %v7035_v63 = vld [vmem:[%s27439_s12 + $0x70] sm:$0xff]  ;;  %v7036_v58 = vld [vmem:[%s27439_s12 + $0x78] sm:$0xff] }
0x2e8b   : > { %20521 = vmatprep.subr.bf16.mxu1 %v21801_v3 }
0x2e8e   : > { %20523 = vmatpush3.bf16.msra.mxu1 %v20522_v49  ;;  %v20618_v49 = vpack.c.bf16 %v14249_v48, %v14248_v47 }
0x2e8f   : > { %20524 = vmatprep.subr.bf16.mxu1 %v21801_v3 }
0x2e92   : > { %20526 = vmatpush3.bf16.msra.mxu1 %v20525_v52  ;;  %v20621_v52 = vpack.c.bf16 %v14251_v31, %v14250_v50  ;;  %v14256_v50 = vld [vmem:[%s27439_s12 + $0x400] sm:$0xff]  ;;  %v14257_v31 = vld [vmem:[%s27439_s12 + $0x408] sm:$0xff] }
0x2e93   : > { %20527 = vmatprep.subr.bf16.mxu1 %v21801_v3 }
0x2e96   : > { %20529 = vmatpush3.bf16.msra.mxu1 %v20528_v54  ;;  %v20624_v54 = vpack.c.bf16 %v14253_v30, %v14252_v53  ;;  %v14239_v53 = vld [vmem:[%s27436_s9 + $0x1] ss:$0 sm:$0xff] }
0x2e97   : > { %20530 = vmatprep.subr.bf16.mxu1 %v21801_v3 }
0x2e9a   : > { %20532 = vmatpush3.bf16.msra.mxu1 %v20531_v59  ;;  %v20627_v59 = vpack.c.bf16 %v14255_v57, %v14254_v55  ;;  %v14258_v57 = vld [vmem:[%s27439_s12 + $0x410] sm:$0xff] }
0x2e9b   : > { %20557 = vmatprep.subr.bf16.mxu1 %v21801_v3 }
0x2e9d   : > { %17919 = vmatmul.mubr.f32.vlgmr.msra.gmra.mrb[80].mxu1 %v23919_v39 }
0x2e9e   : > { %20559 = vmatpush3.bf16.msra.mxu1 %v20558_v2  ;;  %17988 = vmatprep.mubr.msk.f32.mxu1 %vm21802_vm0, %v21803_v51 }
0x2e9f   : > { %20560 = vmatprep.subr.bf16.mxu1 %v21801_v3 }
0x2ea2   : > { %20562 = vmatpush3.bf16.msra.mxu1 %v20561_v8 }
0x2ea3   : > { %20563 = vmatprep.subr.bf16.mxu1 %v21801_v3 }
0x2ea6   : > { %20565 = vmatpush3.bf16.msra.mxu1 %v20564_v11 }
0x2ea7   : > { %20566 = vmatprep.subr.bf16.mxu1 %v21801_v3 }
0x2eaa   : > { %20568 = vmatpush3.bf16.msra.mxu1 %v20567_v1 }
0x2eab   : > { %20569 = vmatprep.subr.bf16.mxu1 %v21801_v3 }
0x2eae   : > { %20571 = vmatpush3.bf16.msra.mxu1 %v20570_v61 }
0x2eaf   : > { %20572 = vmatprep.subr.bf16.mxu1 %v21801_v3 }
0x2eb2   : > { %20574 = vmatpush3.bf16.msra.mxu1 %v20573_v17 }
0x2eb3   : > { %20575 = vmatprep.subr.bf16.mxu1 %v21801_v3 }
0x2eb6   : > { %20577 = vmatpush3.bf16.msra.mxu1 %v20576_v18  ;;  %v7021_v18 = vld [vmem:[%s27439_s12] sm:$0xff] }
0x2eb7   : > { %20578 = vmatprep.subr.bf16.mxu1 %v21801_v3 }
0x2eba   : > { %20580 = vmatpush3.bf16.msra.mxu1 %v20579_v56  ;;  %v20582_v56 = vpack.c.bf16 %v7022_v19, %v7021_v18  ;;  %v14291_v18 = vld [vmem:[%s27439_s12 + $0x280] sm:$0xff]  ;;  %v14292_v19 = vld [vmem:[%s27439_s12 + $0x288] sm:$0xff] }
0x2ebb   : > { %20605 = vmatprep.subr.bf16.mxu1 %v21801_v3 }
0x2ebd   : > { %17989 = vmatmul.mubr.f32.vlgmr.msra.gmra.mrb[82].mxu1 %v23919_v39  ;;  %v14240_v39 = vld [vmem:[%s27439_s12 + $0x200] sm:$0xff] }
0x2ebe   : > { %18073 = vmatprep.mubr.msk.f32.mxu1 %vm21802_vm0, %v21803_v51 }
0x2f50   : > { %v6500_v21 = vpop.f32.mrb[78].mxu1 }
0x2f51   : > { %v24642_v22 = vadd.f32 %v6500_v21, %v24500_v14  ;;  %v17885_v23 = vpop.f32.mrb[79].mxu1  ;;  %v14241_v14 = vld [vmem:[%s27439_s12 + $0x208] sm:$0xff]  ;;  %v7024_v21 = vld [vmem:[%s27439_s12 + $0x18] sm:$0xff] }
0x2f52   : > { %v20606_v29 = vpack.c.bf16 %v14241_v14, %v14240_v39  ;;  %v20585_v23 = vpack.c.bf16 %v7024_v21, %v7023_v20  ;;  %v7028_v39 = vld [vmem:[%s27439_s12 + $0x38] sm:$0xff]  ;;  %v20678_v20 = vpack.c.bf16 %v14292_v19, %v14291_v18  ;;  %v14287_v18 = vld [vmem:[%s27439_s12 + $0xe0] sm:$0xff]  ;;  %v14288_v19 = vld [vmem:[%s27439_s12 + $0xe8] sm:$0xff] }
0x2f53   : > { %v14294_v21 = vld [vmem:[%s27439_s12 + $0x298] sm:$0xff] }
0x2f54   : > { %20607 = vmatpush3.bf16.msra.mxu1 %v20606_v29 }
0x2f55   : > { %20608 = vmatprep.subr.bf16.mxu1 %v21801_v3 }
0x2f58   : > { %20610 = vmatpush3.bf16.msra.mxu1 %v20609_v33  ;;  %v21732_v33 = vld [vmem:[%s23784_s30] sm:$0xff] }
0x2f59   : > { %20611 = vmatprep.subr.bf16.mxu1 %v21801_v3 }
0x2f5c   : > { %20613 = vmatpush3.bf16.msra.mxu1 %v20612_v45 }
0x2f5d   : > { %20614 = vmatprep.subr.bf16.mxu1 %v21801_v3 }
0x2f60   : > { %20616 = vmatpush3.bf16.msra.mxu1 %v20615_v46  ;;  %v20603_v46 = vpack.c.bf16 %v7036_v58, %v7035_v63 }
0x2f61   : > { %20617 = vmatprep.subr.bf16.mxu1 %v21801_v3 }
0x2f64   : > { %20619 = vmatpush3.bf16.msra.mxu1 %v20618_v49 }
0x2f65   : > { %20620 = vmatprep.subr.bf16.mxu1 %v21801_v3 }
0x2f68   : > { %20622 = vmatpush3.bf16.msra.mxu1 %v20621_v52 }
0x2f69   : > { %20623 = vmatprep.subr.bf16.mxu1 %v21801_v3 }
0x2f6c   : > { %20625 = vmatpush3.bf16.msra.mxu1 %v20624_v54  ;;  %v20630_v54 = vpack.c.bf16 %v14257_v31, %v14256_v50 }
0x2f6d   : > { %20626 = vmatprep.subr.bf16.mxu1 %v21801_v3 }
0x2f70   : > { %v6588_v24 = vpop.f32.mrb[80].mxu1  ;;  %20628 = vmatpush3.bf16.msra.mxu1 %v20627_v59  ;;  %v14259_v59 = vld [vmem:[%s27439_s12 + $0x418] sm:$0xff] }
0x2f71   : > { %v17920_v25 = vpop.f32.mrb[81].mxu1  ;;  %17994 = vmatmul.mubr.msk.f32.vlgmr.msra.gmra.mrb[62].mxu0 %vm865_vm1, %v6588_v24  ;;  %18111 = vmatprep.subr.mxu1 %v21803_v51  ;;  %v7025_v24 = vld [vmem:[%s27439_s12 + $0x20] sm:$0xff] }
0x2f72   : > { %17998 = vmatprep.mubr.msk.f32.mxu0 %vm21802_vm0, %v21803_v51  ;;  %v7026_v25 = vld [vmem:[%s27439_s12 + $0x28] sm:$0xff] }
0x2f90   : > { %v6762_v26 = vpop.f32.mrb[82].mxu1 }
0x2f91   : > { %v17990_v27 = vpop.f32.mrb[83].mxu1  ;;  %17997 = vmatpush3.msra.mxu0 %v6762_v26  ;;  %v20588_v26 = vpack.c.bf16 %v7026_v25, %v7025_v24  ;;  %v14295_v24 = vld [vmem:[%s27439_s12 + $0x2a0] sm:$0xff]  ;;  %v14296_v25 = vld [vmem:[%s27439_s12 + $0x2a8] sm:$0xff] }
0x2f92   : > { %18001 = vmatprep.subr.mxu0 %v21803_v51  ;;  %v7027_v27 = vld [vmem:[%s27439_s12 + $0x30] sm:$0xff] }
0x2f93   : > { %v20591_v14 = vpack.c.bf16 %v7028_v39, %v7027_v27  ;;  %v14297_v27 = vld [vmem:[%s27439_s12 + $0x2b0] sm:$0xff]  ;;  %v14298_v39 = vld [vmem:[%s27439_s12 + $0x2b8] sm:$0xff] }
0x3044   : > { %v6840_v37 = vpop.f32.mrb[62].mxu0 }
0x3045   : > { %v6841_v38 = vadd.f32 %v14232_v36, %v6840_v37  ;;  %v17995_v60 = vpop.f32.mrb[63].mxu0 }
0x3046   : > { %v7030_v60 = vld [vmem:[%s27439_s12 + $0x48] sm:$0xff] }
0x3047   : > { %v6844_v41 = vsel %vm865_vm1, %v6841_v38, -inf }
0x3048   : > { %6845 = vmax.xlane.f32.xlu1 %v6844_v41  ;;  %v7032_v41 = vld [vmem:[%s27439_s12 + $0x58] sm:$0xff] }
0x304c   : > { %4984 = vadd.xlane.f32.xlu1 %v4983_v42  ;;  %v7033_v42 = vld [vmem:[%s27439_s12 + $0x60] sm:$0xff] }
0x304d   : > { %v20600_v45 = vpack.c.bf16 %v7034_v44, %v7033_v42  ;;  %v14306_v42 = vld [vmem:[%s27439_s12 + $0x2f8] sm:$0xff] }
0x30d5   : > { %v6846_v62 = vpop.xlane.xlu1 %6845 }
0x30d6   : > { %v6847_v43 = vsub.f32 %v6841_v38, %v6846_v62  ;;  %v7029_v38 = vld [vmem:[%s27439_s12 + $0x40] sm:$0xff]  ;;  %v20633_v62 = vpack.c.bf16 %v14259_v59, %v14258_v57 }
0x30d7   : > { %v14275_v59 = vld [vmem:[%s27439_s12 + $0x80] sm:$0xff] }
0x30d8   : > { %v6848_v2 = vmul.f32 1.442695, %v6847_v43  ;;  %v14260_v43 = vld [vmem:[%s27439_s12 + $0x420] sm:$0xff] }
0x30d9   : > { %v4985_v5 = vpop.xlane.xlu1 %4984 }
0x30da   : > { %21661 = vpow2.f32 %v6848_v2  ;;  %v4986_v7 = vmul.f32 0.03125, %v4985_v5  ;;  %v14261_v2 = vld [vmem:[%s27439_s12 + $0x428] sm:$0xff] }
0x30db   : > { %v20636_v5 = vpack.c.bf16 %v14261_v2, %v14260_v43 }
0x30dc   : > { %v4987_v8 = vadd.f32 1e-06, %v4986_v7  ;;  %v14262_v7 = vld [vmem:[%s27439_s12 + $0x430] sm:$0xff] }
0x30de   : > { %21663 = vrsqrt.f32 %v4987_v8  ;;  %v14263_v8 = vld [vmem:[%s27439_s12 + $0x438] sm:$0xff] }
0x30e4   : > { %v21662_v9 = vpop.eup %21661 }
0x30e5   : > { %v6850_v10 = vsel %vm865_vm1, %v21662_v9, 0.0 }
0x30e6   : > { %6851 = vadd.xlane.f32.xlu0 %v6850_v10  ;;  %v14264_v10 = vld [vmem:[%s27439_s12 + $0x440] sm:$0xff] }
0x30e8   : > { %v21664_v11 = vpop.eup %21663 }
0x30e9   : > { %v4989_v13 = vmul.f32 %v21664_v11, %v4981_v40  ;;  %v20594_v40 = vpack.c.bf16 %v7030_v60, %v7029_v38  ;;  %v14265_v11 = vld [vmem:[%s27439_s12 + $0x448] sm:$0xff]  ;;  %v14303_v60 = vld [vmem:[%s27439_s12 + $0x2e0] sm:$0xff] }
0x30eb   : > { %v24714_v1 = vmul.f32 %v14038_v12, %v4989_v13  ;;  %v20642_v12 = vpack.c.bf16 %v14265_v11, %v14264_v10  ;;  %v14266_v13 = vld [vmem:[%s27439_s12 + $0x450] sm:$0xff]  ;;  %v14279_v10 = vld [vmem:[%s27439_s12 + $0xa0] sm:$0xff]  ;;  %v14280_v11 = vld [vmem:[%s27439_s12 + $0xa8] sm:$0xff] }
0x30ed   : > { %18074 = vmatmul.mubr.f32.vlgmr.msra.gmra.mrb[84].mxu1 %v24714_v1 }
0x30ee   : > { %18113 = vmatprep.mubr.msk.f32.mxu1 %vm21802_vm0, %v21803_v51 }
0x3173   : > { %v6852_v4 = vpop.xlane.xlu0 %6851 }
0x3174   : > { %21665 = vrcp.f32 %v6852_v4  ;;  %v14267_v4 = vld [vmem:[%s27439_s12 + $0x458] sm:$0xff] }
0x317e   : > { %v21666_v15 = vpop.eup %21665 }
0x317f   : > { %v6854_v61 = vmul.f32 %v21666_v15, %v21662_v9  ;;  %v20639_v9 = vpack.c.bf16 %v14263_v8, %v14262_v7  ;;  %v20645_v15 = vpack.c.bf16 %v14267_v4, %v14266_v13  ;;  %v14277_v7 = vld [vmem:[%s27439_s12 + $0x90] sm:$0xff]  ;;  %v14278_v8 = vld [vmem:[%s27439_s12 + $0x98] sm:$0xff] }
0x3180   : > { %v14281_v13 = vld [vmem:[%s27439_s12 + $0xb0] sm:$0xff]  ;;  %v14282_v4 = vld [vmem:[%s27439_s12 + $0xb8] sm:$0xff] }
0x3181   : > { %17999 = vmatmul.mubr.msk.f32.vlgmr.msra.gmra.mrb[64].mxu0 %vm865_vm1, %v6854_v61  ;;  %v14268_v61 = vld [vmem:[%s27439_s12 + $0x460] sm:$0xff] }
0x3182   : > { %18002 = vmatpush3.msra.mxu0 %v14236_v16  ;;  %18003 = vmatprep.mubr.msk.f32.mxu0 %vm21802_vm0, %v21803_v51  ;;  %v14269_v16 = vld [vmem:[%s27439_s12 + $0x468] sm:$0xff] }
0x3183   : > { %20581 = vmatprep.subr.bf16.mxu0 %v21801_v3 }
0x31c0   : > { %v7190_v6 = vpop.f32.mrb[84].mxu1 }
0x31c1   : > { %v18075_v17 = vpop.f32.mrb[85].mxu1  ;;  %18112 = vmatpush3.xpose.msk.msra.mxu1 %vm865_vm1, %v7190_v6  ;;  %v20648_v6 = vpack.c.bf16 %v14269_v16, %v14268_v61  ;;  %v14283_v61 = vld [vmem:[%s27439_s12 + $0xc0] sm:$0xff]  ;;  %v14284_v16 = vld [vmem:[%s27439_s12 + $0xc8] sm:$0xff] }
0x31c2   : > { %18116 = vmatprep.subr.mxu1 %v21803_v51  ;;  %v14270_v17 = vld [vmem:[%s27439_s12 + $0x470] sm:$0xff] }
0x3254   : > { %v6924_v35 = vpop.f32.mrb[64].mxu0 }
0x3255   : > { %v18000_v0 = vpop.f32.mrb[65].mxu0  ;;  %18004 = vmatmul.mubr.msk.f32.vlgmr.msra.gmra.mrb[66].mxu0 %vm865_vm1, %v6924_v35  ;;  %v14271_v35 = vld [vmem:[%s27439_s12 + $0x478] sm:$0xff] }
0x3256   : > { %18038 = vmatprep.mubr.msk.f32.mxu0 %vm21802_vm0, %v21803_v51  ;;  %20583 = vmatpush3.bf16.msra.mxu0 %v20582_v56  ;;  %v20651_v0 = vpack.c.bf16 %v14271_v35, %v14270_v17  ;;  %v14293_v56 = vld [vmem:[%s27439_s12 + $0x290] sm:$0xff]  ;;  %v14286_v35 = vld [vmem:[%s27439_s12 + $0xd8] sm:$0xff] }
0x3257   : > { %20584 = vmatprep.subr.bf16.mxu0 %v21801_v3  ;;  %v14285_v17 = vld [vmem:[%s27439_s12 + $0xd0] sm:$0xff] }
0x325a   : > { %20586 = vmatpush3.bf16.msra.mxu0 %v20585_v23  ;;  %v20681_v23 = vpack.c.bf16 %v14294_v21, %v14293_v56  ;;  %v14289_v56 = vld [vmem:[%s27439_s12 + $0xf0] sm:$0xff]  ;;  %v14290_v21 = vld [vmem:[%s27439_s12 + $0xf8] sm:$0xff] }
0x325b   : > { %20587 = vmatprep.subr.bf16.mxu0 %v21801_v3 }
0x325e   : > { %20589 = vmatpush3.bf16.msra.mxu0 %v20588_v26  ;;  %v20684_v26 = vpack.c.bf16 %v14296_v25, %v14295_v24  ;;  %v14307_v24 = vld [vmem:[%s27439_s12 + $0x480] sm:$0xff]  ;;  %v14308_v25 = vld [vmem:[%s27439_s12 + $0x488] sm:$0xff] }
0x325f   : > { %20590 = vmatprep.subr.bf16.mxu0 %v21801_v3 }
0x3262   : > { %20592 = vmatpush3.bf16.msra.mxu0 %v20591_v14  ;;  %v20687_v14 = vpack.c.bf16 %v14298_v39, %v14297_v27  ;;  %v14309_v27 = vld [vmem:[%s27439_s12 + $0x490] sm:$0xff]  ;;  %v14310_v39 = vld [vmem:[%s27439_s12 + $0x498] sm:$0xff] }
0x3263   : > { %20593 = vmatprep.subr.bf16.mxu0 %v21801_v3 }
0x3266   : > { %20595 = vmatpush3.bf16.msra.mxu0 %v20594_v40  ;;  %v14304_v40 = vld [vmem:[%s27439_s12 + $0x2e8] sm:$0xff] }
0x3267   : > { %20596 = vmatprep.subr.bf16.mxu0 %v21801_v3 }
0x3328   : > { %v6999_v28 = vpop.f32.mrb[66].mxu0 }
0x3329   : > { %v7003_v29 = vadd.f32 %v6999_v28, %v24642_v22  ;;  %v18005_v32 = vpop.f32.mrb[67].mxu0  ;;  %v7031_v22 = vld [vmem:[%s27439_s12 + $0x50] sm:$0xff]  ;;  %v14299_v28 = vld [vmem:[%s27439_s12 + $0x2c0] sm:$0xff] }
0x332a   : > { %v20597_v34 = vpack.c.bf16 %v7032_v41, %v7031_v22  ;;  %v20696_v22 = vpack.c.bf16 %v14304_v40, %v14303_v60  ;;  %v14305_v41 = vld [vmem:[%s27439_s12 + $0x2f0] sm:$0xff]  ;;  %v14315_v60 = vld [vmem:[%s27439_s12 + $0x4c0] sm:$0xff]  ;;  %v14316_v40 = vld [vmem:[%s27439_s12 + $0x4c8] sm:$0xff] }
0x332b   : > { %v24761_v36 = vadd.f32 %v21732_v33, %v7003_v29  ;;  %v14300_v29 = vld [vmem:[%s27439_s12 + $0x2c8] sm:$0xff]  ;;  %v14301_v33 = vld [vmem:[%s27439_s12 + $0x2d0] sm:$0xff] }
0x332c   : > { %20598 = vmatpush3.bf16.msra.mxu0 %v20597_v34  ;;  %v20690_v32 = vpack.c.bf16 %v14300_v29, %v14299_v28  ;;  %v20699_v34 = vpack.c.bf16 %v14306_v42, %v14305_v41  ;;  %v14311_v28 = vld [vmem:[%s27439_s12 + $0x4a0] sm:$0xff]  ;;  %v14312_v29 = vld [vmem:[%s27439_s12 + $0x4a8] sm:$0xff]  ;;  %v14317_v41 = vld [vmem:[%s27439_s12 + $0x4d0] sm:$0xff] }
0x332d   : > { %v7007_v37 = vmul.f32 %v24761_v36, %v24761_v36  ;;  %20599 = vmatprep.subr.bf16.mxu0 %v21801_v3  ;;  %v14318_v42 = vld [vmem:[%s27439_s12 + $0x4d8] sm:$0xff] }
0x332f   : > { %7008 = vadd.xlane.f32.xlu0 %v7007_v37  ;;  %v14302_v37 = vld [vmem:[%s27439_s12 + $0x2d8] sm:$0xff] }
0x3330   : > { %20601 = vmatpush3.bf16.msra.mxu0 %v20600_v45  ;;  %v20693_v38 = vpack.c.bf16 %v14302_v37, %v14301_v33  ;;  %v14313_v33 = vld [vmem:[%s27439_s12 + $0x4b0] sm:$0xff]  ;;  %v14314_v37 = vld [vmem:[%s27439_s12 + $0x4b8] sm:$0xff] }
0x3331   : > { %20602 = vmatprep.subr.bf16.mxu0 %v21801_v3 }
0x3334   : > { %20604 = vmatpush3.bf16.msra.mxu0 %v20603_v46 }
0x3335   : > { %20629 = vmatprep.subr.bf16.mxu0 %v21801_v3 }
0x33bc   : > { %v7009_v47 = vpop.xlane.xlu0 %7008 }
0x33bd   : > { %v7010_v48 = vmul.f32 0.03125, %v7009_v47 }
0x33bf   : > { %v7011_v49 = vadd.f32 1e-06, %v7010_v48 }
0x33c1   : > { %21667 = vrsqrt.f32 %v7011_v49 }
0x33cb   : > { %v21668_v52 = vpop.eup %21667 }
0x33cc   : > { %v7013_v30 = vmul.f32 %v21668_v52, %v24761_v36 }
0x33ce   : > { %v24803_v55 = vmul.f32 %v14239_v53, %v7013_v30 }
0x33d0   : > { %18039 = vmatmul.mubr.f32.vlgmr.msra.gmra.mrb[68].mxu0 %v24803_v55 }
0x33d1   : > { %20631 = vmatpush3.bf16.msra.mxu0 %v20630_v54  ;;  %18108 = vmatprep.mubr.msk.f32.mxu0 %vm21802_vm0, %v21803_v51 }
0x33d2   : > { %20632 = vmatprep.subr.bf16.mxu0 %v21801_v3 }
0x33d5   : > { %20634 = vmatpush3.bf16.msra.mxu0 %v20633_v62  ;;  %v14276_v62 = vld [vmem:[%s27439_s12 + $0x88] sm:$0xff] }
0x33d6   : > { %20635 = vmatprep.subr.bf16.mxu0 %v21801_v3  ;;  %v20654_v2 = vpack.c.bf16 %v14276_v62, %v14275_v59  ;;  %v14349_v59 = vld [vmem:[%s27439_s12 + $0x320] sm:$0xff]  ;;  %v14350_v62 = vld [vmem:[%s27439_s12 + $0x328] sm:$0xff] }
0x33d9   : > { %20637 = vmatpush3.bf16.msra.mxu0 %v20636_v5 }
0x33da   : > { %20638 = vmatprep.subr.bf16.mxu0 %v21801_v3 }
0x33dd   : > { %20640 = vmatpush3.bf16.msra.mxu0 %v20639_v9  ;;  %v20657_v9 = vpack.c.bf16 %v14278_v8, %v14277_v7  ;;  %v14353_v8 = vld [vmem:[%s27439_s12 + $0x340] sm:$0xff] }
0x33de   : > { %20641 = vmatprep.subr.bf16.mxu0 %v21801_v3 }
0x33e1   : > { %20643 = vmatpush3.bf16.msra.mxu0 %v20642_v12  ;;  %v20660_v12 = vpack.c.bf16 %v14280_v11, %v14279_v10  ;;  %v14355_v11 = vld [vmem:[%s27439_s12 + $0x350] sm:$0xff] }
0x33e2   : > { %20644 = vmatprep.subr.bf16.mxu0 %v21801_v3 }
0x33e5   : > { %20646 = vmatpush3.bf16.msra.mxu0 %v20645_v15  ;;  %v20663_v15 = vpack.c.bf16 %v14282_v4, %v14281_v13  ;;  %v14357_v4 = vld [vmem:[%s27439_s12 + $0x360] sm:$0xff] }
0x33e6   : > { %20647 = vmatprep.subr.bf16.mxu0 %v21801_v3 }
0x33e9   : > { %20649 = vmatpush3.bf16.msra.mxu0 %v20648_v6  ;;  %v20666_v6 = vpack.c.bf16 %v14284_v16, %v14283_v61  ;;  %v14359_v16 = vld [vmem:[%s27439_s12 + $0x370] sm:$0xff] }
0x33ea   : > { %20650 = vmatprep.subr.bf16.mxu0 %v21801_v3 }
0x33ed   : > { %20652 = vmatpush3.bf16.msra.mxu0 %v20651_v0  ;;  %v20669_v0 = vpack.c.bf16 %v14286_v35, %v14285_v17 }
0x33ee   : > { %20677 = vmatprep.subr.bf16.mxu0 %v21801_v3 }
0x33f0   : > { %18109 = vmatmul.mubr.f32.vlgmr.msra.gmra.mrb[70].mxu0 %v24714_v1 }
0x33f1   : > { %20679 = vmatpush3.bf16.msra.mxu0 %v20678_v20  ;;  %18188 = vmatprep.mubr.msk.f32.mxu0 %vm21802_vm0, %v21803_v51  ;;  %v20672_v20 = vpack.c.bf16 %v14288_v19, %v14287_v18 }
0x33f2   : > { %20680 = vmatprep.subr.bf16.mxu0 %v21801_v3 }
0x33f5   : > { %20682 = vmatpush3.bf16.msra.mxu0 %v20681_v23  ;;  %v20675_v23 = vpack.c.bf16 %v14290_v21, %v14289_v56 }
0x33f6   : > { %20683 = vmatprep.subr.bf16.mxu0 %v21801_v3 }
0x33f9   : > { %20685 = vmatpush3.bf16.msra.mxu0 %v20684_v26  ;;  %v20702_v26 = vpack.c.bf16 %v14308_v25, %v14307_v24 }
0x33fa   : > { %20686 = vmatprep.subr.bf16.mxu0 %v21801_v3 }
0x33fd   : > { %20688 = vmatpush3.bf16.msra.mxu0 %v20687_v14  ;;  %v20705_v14 = vpack.c.bf16 %v14310_v39, %v14309_v27 }
0x33fe   : > { %20689 = vmatprep.subr.bf16.mxu0 %v21801_v3 }
0x3401   : > { %20691 = vmatpush3.bf16.msra.mxu0 %v20690_v32  ;;  %v20708_v32 = vpack.c.bf16 %v14312_v29, %v14311_v28 }
0x3402   : > { %20692 = vmatprep.subr.bf16.mxu0 %v21801_v3 }
0x3405   : > { %20694 = vmatpush3.bf16.msra.mxu0 %v20693_v38  ;;  %v20711_v38 = vpack.c.bf16 %v14314_v37, %v14313_v33 }
0x3406   : > { %20695 = vmatprep.subr.bf16.mxu0 %v21801_v3 }
0x3409   : > { %20697 = vmatpush3.bf16.msra.mxu0 %v20696_v22  ;;  %v20714_v22 = vpack.c.bf16 %v14316_v40, %v14315_v60  ;;  %v14329_v60 = vld [vmem:[%s27439_s12 + $0x100] sm:$0xff]  ;;  %v14330_v40 = vld [vmem:[%s27439_s12 + $0x108] sm:$0xff] }
0x340a   : > { %20698 = vmatprep.subr.bf16.mxu0 %v21801_v3 }
0x340d   : > { %20700 = vmatpush3.bf16.msra.mxu0 %v20699_v34  ;;  %v20717_v34 = vpack.c.bf16 %v14318_v42, %v14317_v41  ;;  %v14331_v41 = vld [vmem:[%s27439_s12 + $0x110] sm:$0xff]  ;;  %v14332_v42 = vld [vmem:[%s27439_s12 + $0x118] sm:$0xff] }
0x340e   : > { %18226 = vmatprep.subr.mxu0 %v21803_v51 }
0x3410   : > { %18189 = vmatmul.mubr.f32.vlgmr.msra.gmra.mrb[72].mxu0 %v24714_v1 }
0x3411   : > { %18228 = vmatprep.mubr.msk.f32.mxu0 %vm21802_vm0, %v21803_v51 }
0x34a3   : > { %v7103_v44 = vpop.f32.mrb[68].mxu0 }
0x34a4   : > { %v18040_v45 = vpop.f32.mrb[69].mxu0  ;;  %18114 = vmatmul.mubr.msk.f32.vlgmr.msra.gmra.mrb[86].mxu1 %vm865_vm1, %v7103_v44  ;;  %v14319_v44 = vld [vmem:[%s27439_s12 + $0x4e0] sm:$0xff] }
0x34a5   : > { %18118 = vmatprep.mubr.msk.f32.mxu1 %vm21802_vm0, %v21803_v51  ;;  %v14320_v45 = vld [vmem:[%s27439_s12 + $0x4e8] sm:$0xff] }
0x34c3   : > { %v7277_v63 = vpop.f32.mrb[70].mxu0 }
0x34c4   : > { %v18110_v58 = vpop.f32.mrb[71].mxu0  ;;  %18117 = vmatpush3.msra.mxu1 %v7277_v63  ;;  %v20720_v63 = vpack.c.bf16 %v14320_v45, %v14319_v44  ;;  %v20729_v45 = vpack.c.bf16 %v14332_v42, %v14331_v41  ;;  %v14406_v42 = vld [vmem:[%s27439_s12 + $0x3c0] sm:$0xff] }
0x34c5   : > { %20653 = vmatprep.subr.bf16.mxu1 %v21801_v3  ;;  %v14321_v58 = vld [vmem:[%s27439_s12 + $0x4f0] sm:$0xff] }
0x34e3   : > { %v7612_v46 = vpop.f32.mrb[72].mxu0 }
0x34e4   : > { %v18190_v47 = vpop.f32.mrb[73].mxu0  ;;  %18227 = vmatpush3.xpose.msk.msra.mxu0 %vm865_vm1, %v7612_v46  ;;  %v14322_v46 = vld [vmem:[%s27439_s12 + $0x4f8] sm:$0xff] }
0x34e5   : > { %18231 = vmatprep.subr.mxu0 %v21803_v51  ;;  %v20723_v47 = vpack.c.bf16 %v14322_v46, %v14321_v58  ;;  %v14334_v58 = vld [vmem:[%s27439_s12 + $0x128] sm:$0xff] }
0x3577   : > { %v7353_v48 = vpop.f32.mrb[86].mxu1 }
0x3578   : > { %v18115_v49 = vpop.f32.mrb[87].mxu1  ;;  %v7357_v50 = vsel %vm865_vm1, %v7353_v48, -inf }
0x3579   : > { %7358 = vmax.xlane.f32.xlu1 %v7357_v50  ;;  %v14345_v49 = vld [vmem:[%s27439_s12 + $0x300] sm:$0xff]  ;;  %v14346_v50 = vld [vmem:[%s27439_s12 + $0x308] sm:$0xff] }
0x3606   : > { %v7359_v31 = vpop.xlane.xlu1 %7358 }
0x3607   : > { %v7360_v52 = vsub.f32 %v7353_v48, %v7359_v31  ;;  %v7441_v48 = vld [vmem:[%s27440_s13] sm:$0xff]  ;;  %v20750_v31 = vpack.c.bf16 %v14346_v50, %v14345_v49 }
0x3608   : > { %v14337_v50 = vld [vmem:[%s27439_s12 + $0x140] sm:$0xff] }
0x3609   : > { %v7361_v53 = vmul.f32 1.442695, %v7360_v52  ;;  %v14347_v52 = vld [vmem:[%s27439_s12 + $0x310] sm:$0xff] }
0x360b   : > { %21669 = vpow2.f32 %v7361_v53  ;;  %v14348_v53 = vld [vmem:[%s27439_s12 + $0x318] sm:$0xff] }
0x3615   : > { %v21670_v30 = vpop.eup %21669 }
0x3616   : > { %v7363_v54 = vsel %vm865_vm1, %v21670_v30, 0.0 }
0x3617   : > { %7364 = vadd.xlane.f32.xlu0 %v7363_v54 }
0x36a4   : > { %v7365_v57 = vpop.xlane.xlu0 %7364 }
0x36a5   : > { %21671 = vrcp.f32 %v7365_v57  ;;  %v20753_v57 = vpack.c.bf16 %v14348_v53, %v14347_v52  ;;  %v14339_v53 = vld [vmem:[%s27439_s12 + $0x150] sm:$0xff] }
0x36af   : > { %v21672_v43 = vpop.eup %21671 }
0x36b0   : > { %v7367_v5 = vmul.f32 %v21672_v43, %v21670_v30  ;;  %v20756_v43 = vpack.c.bf16 %v14350_v62, %v14349_v59  ;;  %v14342_v59 = vld [vmem:[%s27439_s12 + $0x168] sm:$0xff] }
0x36b2   : > { %18119 = vmatmul.mubr.msk.f32.vlgmr.msra.gmra.mrb[88].mxu1 %vm865_vm1, %v7367_v5  ;;  %v14352_v5 = vld [vmem:[%s27439_s12 + $0x338] sm:$0xff] }
0x36b3   : > { %20655 = vmatpush3.bf16.msra.mxu1 %v20654_v2  ;;  %18153 = vmatprep.mubr.msk.f32.mxu1 %vm21802_vm0, %v21803_v51  ;;  %v14351_v2 = vld [vmem:[%s27439_s12 + $0x330] sm:$0xff] }
0x36b4   : > { %20656 = vmatprep.subr.bf16.mxu1 %v21801_v3  ;;  %v20759_v7 = vpack.c.bf16 %v14352_v5, %v14351_v2  ;;  %v14344_v2 = vld [vmem:[%s27439_s12 + $0x178] sm:$0xff] }
0x36b7   : > { %20658 = vmatpush3.bf16.msra.mxu1 %v20657_v9  ;;  %v14354_v9 = vld [vmem:[%s27439_s12 + $0x348] sm:$0xff] }
0x36b8   : > { %20659 = vmatprep.subr.bf16.mxu1 %v21801_v3  ;;  %v20762_v10 = vpack.c.bf16 %v14354_v9, %v14353_v8  ;;  %v14362_v8 = vld [vmem:[%s27439_s12 + $0x508] sm:$0xff] }
0x36bb   : > { %20661 = vmatpush3.bf16.msra.mxu1 %v20660_v12  ;;  %v14356_v12 = vld [vmem:[%s27439_s12 + $0x358] sm:$0xff] }
0x36bc   : > { %20662 = vmatprep.subr.bf16.mxu1 %v21801_v3  ;;  %v20765_v13 = vpack.c.bf16 %v14356_v12, %v14355_v11  ;;  %v14364_v11 = vld [vmem:[%s27439_s12 + $0x518] sm:$0xff] }
0x36bf   : > { %20664 = vmatpush3.bf16.msra.mxu1 %v20663_v15  ;;  %v14358_v15 = vld [vmem:[%s27439_s12 + $0x368] sm:$0xff] }
0x36c0   : > { %20665 = vmatprep.subr.bf16.mxu1 %v21801_v3  ;;  %v20768_v61 = vpack.c.bf16 %v14358_v15, %v14357_v4  ;;  %v14366_v4 = vld [vmem:[%s27439_s12 + $0x528] sm:$0xff] }
0x36c3   : > { %20667 = vmatpush3.bf16.msra.mxu1 %v20666_v6  ;;  %v14360_v6 = vld [vmem:[%s27439_s12 + $0x378] sm:$0xff] }
0x36c4   : > { %20668 = vmatprep.subr.bf16.mxu1 %v21801_v3  ;;  %v20771_v17 = vpack.c.bf16 %v14360_v6, %v14359_v16  ;;  %v14368_v16 = vld [vmem:[%s27439_s12 + $0x538] sm:$0xff] }
0x36c7   : > { %20670 = vmatpush3.bf16.msra.mxu1 %v20669_v0 }
0x36c8   : > { %20671 = vmatprep.subr.bf16.mxu1 %v21801_v3 }
0x36cb   : > { %20673 = vmatpush3.bf16.msra.mxu1 %v20672_v20 }
0x36cc   : > { %20674 = vmatprep.subr.bf16.mxu1 %v21801_v3 }
0x36cf   : > { %20676 = vmatpush3.bf16.msra.mxu1 %v20675_v23 }
0x36d0   : > { %20701 = vmatprep.subr.bf16.mxu1 %v21801_v3 }
0x36d2   : > { %18154 = vmatmul.mubr.f32.vlgmr.msra.gmra.mrb[90].mxu1 %v24803_v55 }
0x36d3   : > { %20703 = vmatpush3.bf16.msra.mxu1 %v20702_v26  ;;  %18223 = vmatprep.mubr.msk.f32.mxu1 %vm21802_vm0, %v21803_v51 }
0x36d4   : > { %20704 = vmatprep.subr.bf16.mxu1 %v21801_v3 }
0x36d7   : > { %20706 = vmatpush3.bf16.msra.mxu1 %v20705_v14 }
0x36d8   : > { %20707 = vmatprep.subr.bf16.mxu1 %v21801_v3 }
0x36db   : > { %20709 = vmatpush3.bf16.msra.mxu1 %v20708_v32 }
0x36dc   : > { %20710 = vmatprep.subr.bf16.mxu1 %v21801_v3 }
0x36df   : > { %20712 = vmatpush3.bf16.msra.mxu1 %v20711_v38  ;;  %v14326_v38 = vld [vmem:[%s27440_s13 + $0x8] sm:$0xff] }
0x36e0   : > { %20713 = vmatprep.subr.bf16.mxu1 %v21801_v3 }
0x36e3   : > { %20715 = vmatpush3.bf16.msra.mxu1 %v20714_v22  ;;  %v20726_v22 = vpack.c.bf16 %v14330_v40, %v14329_v60  ;;  %v14404_v40 = vld [vmem:[%s27439_s12 + $0x3b0] sm:$0xff] }
0x36e4   : > { %20716 = vmatprep.subr.bf16.mxu1 %v21801_v3 }
0x36e7   : > { %20718 = vmatpush3.bf16.msra.mxu1 %v20717_v34 }
0x36e8   : > { %20719 = vmatprep.subr.bf16.mxu1 %v21801_v3 }
0x36eb   : > { %20721 = vmatpush3.bf16.msra.mxu1 %v20720_v63  ;;  %v14333_v63 = vld [vmem:[%s27439_s12 + $0x120] sm:$0xff] }
0x36ec   : > { %20722 = vmatprep.subr.bf16.mxu1 %v21801_v3  ;;  %v20732_v46 = vpack.c.bf16 %v14334_v58, %v14333_v63  ;;  %v14409_v63 = vld [vmem:[%s27439_s12 + $0x3d8] sm:$0xff] }
0x36ef   : > { %20724 = vmatpush3.bf16.msra.mxu1 %v20723_v47  ;;  %v14335_v47 = vld [vmem:[%s27439_s12 + $0x130] sm:$0xff] }
0x36f0   : > { %18241 = vmatprep.subr.mxu1 %v21803_v51 }
0x36f2   : > { %18224 = vmatmul.mubr.f32.vlgmr.msra.gmra.mrb[92].mxu1 %v24714_v1 }
0x36f3   : > { %18242 = vmatpush3.msra.mxu1 %v7441_v48  ;;  %18243 = vmatprep.mubr.msk.f32.mxu1 %vm21802_vm0, %v21803_v51  ;;  %v14336_v48 = vld [vmem:[%s27439_s12 + $0x138] sm:$0xff] }
0x36f4   : > { %20749 = vmatprep.subr.bf16.mxu1 %v21801_v3  ;;  %v20735_v49 = vpack.c.bf16 %v14336_v48, %v14335_v47  ;;  %v14411_v47 = vld [vmem:[%s27439_s12 + $0x3e8] sm:$0xff] }
0x3785   : > { %v7437_v30 = vpop.f32.mrb[88].mxu1 }
0x3786   : > { %v18120_v54 = vpop.f32.mrb[89].mxu1  ;;  %18244 = vmatmul.mubr.msk.f32.vlgmr.msra.gmra.mrb[94].mxu1 %vm865_vm1, %v7437_v30  ;;  %v14340_v30 = vld [vmem:[%s27439_s12 + $0x158] sm:$0xff] }
0x3787   : > { %20751 = vmatpush3.bf16.msra.mxu1 %v20750_v31  ;;  %18313 = vmatprep.mubr.msk.f32.mxu1 %vm21802_vm0, %v21803_v51  ;;  %v14338_v31 = vld [vmem:[%s27439_s12 + $0x148] sm:$0xff]  ;;  %v20741_v54 = vpack.c.bf16 %v14340_v30, %v14339_v53 }
0x3788   : > { %20752 = vmatprep.subr.bf16.mxu1 %v21801_v3  ;;  %v20738_v52 = vpack.c.bf16 %v14338_v31, %v14337_v50  ;;  %v14413_v50 = vld [vmem:[%s27439_s12 + $0x3f8] sm:$0xff] }
0x378b   : > { %20754 = vmatpush3.bf16.msra.mxu1 %v20753_v57  ;;  %v14341_v57 = vld [vmem:[%s27439_s12 + $0x160] sm:$0xff] }
0x378c   : > { %20755 = vmatprep.subr.bf16.mxu1 %v21801_v3  ;;  %v20744_v62 = vpack.c.bf16 %v14342_v59, %v14341_v57 }
0x378f   : > { %20757 = vmatpush3.bf16.msra.mxu1 %v20756_v43  ;;  %v14343_v43 = vld [vmem:[%s27439_s12 + $0x170] sm:$0xff] }
0x3790   : > { %20758 = vmatprep.subr.bf16.mxu1 %v21801_v3  ;;  %v20747_v5 = vpack.c.bf16 %v14344_v2, %v14343_v43 }
0x3793   : > { %20760 = vmatpush3.bf16.msra.mxu1 %v20759_v7  ;;  %v14361_v7 = vld [vmem:[%s27439_s12 + $0x500] sm:$0xff] }
0x3794   : > { %20761 = vmatprep.subr.bf16.mxu1 %v21801_v3  ;;  %v20774_v9 = vpack.c.bf16 %v14362_v8, %v14361_v7 }
0x3797   : > { %20763 = vmatpush3.bf16.msra.mxu1 %v20762_v10  ;;  %v14363_v10 = vld [vmem:[%s27439_s12 + $0x510] sm:$0xff] }
0x3798   : > { %20764 = vmatprep.subr.bf16.mxu1 %v21801_v3  ;;  %v20777_v12 = vpack.c.bf16 %v14364_v11, %v14363_v10 }
0x379b   : > { %20766 = vmatpush3.bf16.msra.mxu1 %v20765_v13  ;;  %v14365_v13 = vld [vmem:[%s27439_s12 + $0x520] sm:$0xff] }
0x379c   : > { %20767 = vmatprep.subr.bf16.mxu1 %v21801_v3  ;;  %v20780_v15 = vpack.c.bf16 %v14366_v4, %v14365_v13 }
0x379f   : > { %20769 = vmatpush3.bf16.msra.mxu1 %v20768_v61  ;;  %v14367_v61 = vld [vmem:[%s27439_s12 + $0x530] sm:$0xff] }
0x37a0   : > { %20770 = vmatprep.subr.bf16.mxu1 %v21801_v3  ;;  %v20783_v6 = vpack.c.bf16 %v14368_v16, %v14367_v61  ;;  %v14380_v61 = vld [vmem:[%s27440_s13 + $0x10] sm:$0xff]  ;;  %v14382_v16 = vld [vmem:[%s27439_s12 + $0x180] sm:$0xff] }
0x37a3   : > { %20772 = vmatpush3.bf16.msra.mxu1 %v20771_v17  ;;  %v14369_v17 = vld [vmem:[%s27439_s12 + $0x540] sm:$0xff] }
0x37a4   : > { %18351 = vmatprep.subr.mxu1 %v21803_v51 }
0x37a5   : > { %v7525_v35 = vpop.f32.mrb[90].mxu1 }
0x37a6   : > { %v18155_v0 = vpop.f32.mrb[91].mxu1  ;;  %18229 = vmatmul.mubr.msk.f32.vlgmr.msra.gmra.mrb[74].mxu0 %vm865_vm1, %v7525_v35  ;;  %18314 = vmatmul.mubr.f32.vlgmr.msra.gmra.mrb[96].mxu1 %v24714_v1  ;;  %v14370_v35 = vld [vmem:[%s27439_s12 + $0x548] sm:$0xff] }
0x37a7   : > { %18233 = vmatprep.mubr.msk.f32.mxu0 %vm21802_vm0, %v21803_v51  ;;  %18353 = vmatprep.mubr.msk.f32.mxu1 %vm21802_vm0, %v21803_v51  ;;  %v20786_v0 = vpack.c.bf16 %v14370_v35, %v14369_v17  ;;  %v14384_v35 = vld [vmem:[%s27439_s12 + $0x190] sm:$0xff] }
0x37c5   : > { %v7699_v18 = vpop.f32.mrb[92].mxu1 }
0x37c6   : > { %v18225_v19 = vpop.f32.mrb[93].mxu1  ;;  %18232 = vmatpush3.msra.mxu0 %v7699_v18  ;;  %v14371_v18 = vld [vmem:[%s27439_s12 + $0x550] sm:$0xff] }
0x37c7   : > { %18236 = vmatprep.subr.mxu0 %v21803_v51  ;;  %v14372_v19 = vld [vmem:[%s27439_s12 + $0x558] sm:$0xff] }
0x3859   : > { %v25119_v20 = vpop.f32.mrb[94].mxu1 }
0x385a   : > { %v18245_v56 = vpop.f32.mrb[95].mxu1 }
0x385b   : > { %v20789_v56 = vpack.c.bf16 %v14372_v19, %v14371_v18 }
0x3879   : > { %v7775_v21 = vpop.f32.mrb[74].mxu0  ;;  %v8181_v23 = vpop.f32.mrb[96].mxu1 }
0x387a   : > { %v18230_v24 = vpop.f32.mrb[75].mxu0  ;;  %v18315_v25 = vpop.f32.mrb[97].mxu1  ;;  %18352 = vmatpush3.xpose.msk.msra.mxu1 %vm865_vm1, %v8181_v23  ;;  %v7779_v26 = vsel %vm865_vm1, %v7775_v21, -inf  ;;  %v14374_v23 = vld [vmem:[%s27439_s12 + $0x568] sm:$0xff] }
0x387b   : > { %7780 = vmax.xlane.f32.xlu1 %v7779_v26  ;;  %18356 = vmatprep.subr.mxu1 %v21803_v51  ;;  %v14375_v25 = vld [vmem:[%s27439_s12 + $0x570] sm:$0xff]  ;;  %v14376_v26 = vld [vmem:[%s27439_s12 + $0x578] sm:$0xff] }
0x3908   : > { %v7781_v27 = vpop.xlane.xlu1 %7780 }
0x3909   : > { %v7782_v39 = vsub.f32 %v7775_v21, %v7781_v27  ;;  %v14373_v21 = vld [vmem:[%s27439_s12 + $0x560] sm:$0xff]  ;;  %v20795_v27 = vpack.c.bf16 %v14376_v26, %v14375_v25  ;;  %v14388_v25 = vld [vmem:[%s27439_s12 + $0x1b0] sm:$0xff]  ;;  %v14389_v26 = vld [vmem:[%s27439_s12 + $0x1b8] sm:$0xff] }
0x390a   : > { %v20792_v24 = vpack.c.bf16 %v14374_v23, %v14373_v21  ;;  %v14386_v21 = vld [vmem:[%s27439_s12 + $0x1a0] sm:$0xff]  ;;  %v14387_v23 = vld [vmem:[%s27439_s12 + $0x1a8] sm:$0xff] }
0x390b   : > { %v7783_v14 = vmul.f32 1.442695, %v7782_v39  ;;  %v14398_v39 = vld [vmem:[%s27439_s12 + $0x380] sm:$0xff] }
0x390d   : > { %21673 = vpow2.f32 %v7783_v14  ;;  %v14399_v14 = vld [vmem:[%s27439_s12 + $0x388] sm:$0xff] }
0x3917   : > { %v21674_v28 = vpop.eup %21673 }
0x3918   : > { %v7785_v29 = vsel %vm865_vm1, %v21674_v28, 0.0 }
0x3919   : > { %7786 = vadd.xlane.f32.xlu0 %v7785_v29  ;;  %v14400_v29 = vld [vmem:[%s27439_s12 + $0x390] sm:$0xff] }
0x39a6   : > { %v7787_v32 = vpop.xlane.xlu0 %7786 }
0x39a7   : > { %21675 = vrcp.f32 %v7787_v32  ;;  %v14401_v32 = vld [vmem:[%s27439_s12 + $0x398] sm:$0xff] }
0x39b1   : > { %v21676_v33 = vpop.eup %21675 }
0x39b2   : > { %v7789_v37 = vmul.f32 %v21676_v33, %v21674_v28  ;;  %v20822_v28 = vpack.c.bf16 %v14399_v14, %v14398_v39  ;;  %v20825_v33 = vpack.c.bf16 %v14401_v32, %v14400_v29  ;;  %v14390_v39 = vld [vmem:[%s27439_s12 + $0x1c0] sm:$0xff]  ;;  %v14391_v14 = vld [vmem:[%s27439_s12 + $0x1c8] sm:$0xff]  ;;  %v14392_v29 = vld [vmem:[%s27439_s12 + $0x1d0] sm:$0xff] }
0x39b3   : > { %v14393_v32 = vld [vmem:[%s27439_s12 + $0x1d8] sm:$0xff] }
0x39b4   : > { %18234 = vmatmul.mubr.msk.f32.vlgmr.msra.gmra.mrb[76].mxu0 %vm865_vm1, %v7789_v37  ;;  %v14402_v37 = vld [vmem:[%s27439_s12 + $0x3a0] sm:$0xff] }
0x39b5   : > { %18237 = vmatpush3.msra.mxu0 %v14326_v38  ;;  %18238 = vmatprep.mubr.msk.f32.mxu0 %vm21802_vm0, %v21803_v51  ;;  %v14403_v38 = vld [vmem:[%s27439_s12 + $0x3a8] sm:$0xff] }
0x39b6   : > { %20725 = vmatprep.subr.bf16.mxu0 %v21801_v3  ;;  %v20828_v60 = vpack.c.bf16 %v14403_v38, %v14402_v37  ;;  %v14394_v37 = vld [vmem:[%s27439_s12 + $0x1e0] sm:$0xff]  ;;  %v14395_v38 = vld [vmem:[%s27439_s12 + $0x1e8] sm:$0xff] }
0x3a87   : > { %v7859_v34 = vpop.f32.mrb[76].mxu0 }
0x3a88   : > { %v18235_v44 = vpop.f32.mrb[77].mxu0  ;;  %18239 = vmatmul.mubr.msk.f32.vlgmr.msra.gmra.mrb[78].mxu0 %vm865_vm1, %v7859_v34  ;;  %v14407_v34 = vld [vmem:[%s27439_s12 + $0x3c8] sm:$0xff] }
0x3a89   : > { %20727 = vmatpush3.bf16.msra.mxu0 %v20726_v22  ;;  %18278 = vmatprep.mubr.msk.f32.mxu0 %vm21802_vm0, %v21803_v51  ;;  %v14405_v22 = vld [vmem:[%s27439_s12 + $0x3b8] sm:$0xff]  ;;  %v20834_v44 = vpack.c.bf16 %v14407_v34, %v14406_v42  ;;  %v14414_v42 = vld [vmem:[%s27439_s12 + $0x580] sm:$0xff]  ;;  %v14415_v34 = vld [vmem:[%s27439_s12 + $0x588] sm:$0xff] }
0x3a8a   : > { %20728 = vmatprep.subr.bf16.mxu0 %v21801_v3  ;;  %v20831_v41 = vpack.c.bf16 %v14405_v22, %v14404_v40  ;;  %v14396_v40 = vld [vmem:[%s27439_s12 + $0x1f0] sm:$0xff]  ;;  %v14397_v22 = vld [vmem:[%s27439_s12 + $0x1f8] sm:$0xff] }
0x3a8d   : > { %20730 = vmatpush3.bf16.msra.mxu0 %v20729_v45  ;;  %v14408_v45 = vld [vmem:[%s27439_s12 + $0x3d0] sm:$0xff] }
0x3a8e   : > { %20731 = vmatprep.subr.bf16.mxu0 %v21801_v3  ;;  %v20837_v58 = vpack.c.bf16 %v14409_v63, %v14408_v45  ;;  %v14416_v45 = vld [vmem:[%s27439_s12 + $0x590] sm:$0xff]  ;;  %v14417_v63 = vld [vmem:[%s27439_s12 + $0x598] sm:$0xff] }
0x3a91   : > { %20733 = vmatpush3.bf16.msra.mxu0 %v20732_v46  ;;  %v14410_v46 = vld [vmem:[%s27439_s12 + $0x3e0] sm:$0xff] }
0x3a92   : > { %20734 = vmatprep.subr.bf16.mxu0 %v21801_v3  ;;  %v20840_v48 = vpack.c.bf16 %v14411_v47, %v14410_v46  ;;  %v14418_v46 = vld [vmem:[%s27439_s12 + $0x5a0] sm:$0xff]  ;;  %v14419_v47 = vld [vmem:[%s27439_s12 + $0x5a8] sm:$0xff] }
0x3a95   : > { %20736 = vmatpush3.bf16.msra.mxu0 %v20735_v49  ;;  %v14412_v49 = vld [vmem:[%s27439_s12 + $0x3f0] sm:$0xff] }
0x3a96   : > { %20737 = vmatprep.subr.bf16.mxu0 %v21801_v3  ;;  %v20843_v31 = vpack.c.bf16 %v14413_v50, %v14412_v49  ;;  %v14421_v49 = vld [vmem:[%s27439_s12 + $0x5b8] sm:$0xff] }
0x3a99   : > { %20739 = vmatpush3.bf16.msra.mxu0 %v20738_v52 }
0x3a9a   : > { %20740 = vmatprep.subr.bf16.mxu0 %v21801_v3 }
0x3a9d   : > { %20742 = vmatpush3.bf16.msra.mxu0 %v20741_v54 }
0x3a9e   : > { %20743 = vmatprep.subr.bf16.mxu0 %v21801_v3 }
0x3aa1   : > { %20745 = vmatpush3.bf16.msra.mxu0 %v20744_v62 }
0x3aa2   : > { %20746 = vmatprep.subr.bf16.mxu0 %v21801_v3 }
0x3aa5   : > { %20748 = vmatpush3.bf16.msra.mxu0 %v20747_v5 }
0x3aa6   : > { %20773 = vmatprep.subr.bf16.mxu0 %v21801_v3 }
0x3aa8   : > { %18279 = vmatmul.mubr.f32.vlgmr.msra.gmra.mrb[80].mxu0 %v24803_v55 }
0x3aa9   : > { %20775 = vmatpush3.bf16.msra.mxu0 %v20774_v9  ;;  %18348 = vmatprep.mubr.msk.f32.mxu0 %vm21802_vm0, %v21803_v51 }
0x3aaa   : > { %20776 = vmatprep.subr.bf16.mxu0 %v21801_v3 }
0x3aad   : > { %20778 = vmatpush3.bf16.msra.mxu0 %v20777_v12 }
0x3aae   : > { %20779 = vmatprep.subr.bf16.mxu0 %v21801_v3 }
0x3ab1   : > { %20781 = vmatpush3.bf16.msra.mxu0 %v20780_v15 }
0x3ab2   : > { %20782 = vmatprep.subr.bf16.mxu0 %v21801_v3 }
0x3ab5   : > { %20784 = vmatpush3.bf16.msra.mxu0 %v20783_v6  ;;  %v14383_v6 = vld [vmem:[%s27439_s12 + $0x188] sm:$0xff] }
0x3ab6   : > { %20785 = vmatprep.subr.bf16.mxu0 %v21801_v3  ;;  %v20798_v17 = vpack.c.bf16 %v14383_v6, %v14382_v16 }
0x3ab9   : > { %20787 = vmatpush3.bf16.msra.mxu0 %v20786_v0  ;;  %v14385_v0 = vld [vmem:[%s27439_s12 + $0x198] sm:$0xff] }
0x3aba   : > { %20788 = vmatprep.subr.bf16.mxu0 %v21801_v3 }
0x3abd   : > { %20790 = vmatpush3.bf16.msra.mxu0 %v20789_v56  ;;  %v20801_v56 = vpack.c.bf16 %v14385_v0, %v14384_v35 }
0x3abe   : > { %20791 = vmatprep.subr.bf16.mxu0 %v21801_v3 }
0x3ac1   : > { %20793 = vmatpush3.bf16.msra.mxu0 %v20792_v24  ;;  %v20804_v24 = vpack.c.bf16 %v14387_v23, %v14386_v21  ;;  %v14433_v21 = vld [vmem:[%s27440_s13 + $0x18] sm:$0xff] }
0x3ac2   : > { %20794 = vmatprep.subr.bf16.mxu0 %v21801_v3 }
0x3ac5   : > { %20796 = vmatpush3.bf16.msra.mxu0 %v20795_v27  ;;  %v20807_v27 = vpack.c.bf16 %v14389_v26, %v14388_v25  ;;  %v9022_v25 = vld [vmem:[%s27441_s14] sm:$0xff]  ;;  %v9023_v26 = vld [vmem:[%s27441_s14 + $0x8] sm:$0xff] }
0x3ac6   : > { %20821 = vmatprep.subr.bf16.mxu0 %v21801_v3 }
0x3ac8   : > { %18349 = vmatmul.mubr.f32.vlgmr.msra.gmra.mrb[82].mxu0 %v24714_v1 }
0x3ac9   : > { %20823 = vmatpush3.bf16.msra.mxu0 %v20822_v28  ;;  %18433 = vmatprep.mubr.msk.f32.mxu0 %vm21802_vm0, %v21803_v51  ;;  %v20810_v28 = vpack.c.bf16 %v14391_v14, %v14390_v39  ;;  %v20870_v39 = vpack.c.bf16 %v9023_v26, %v9022_v25  ;;  %v9025_v14 = vld [vmem:[%s27441_s14 + $0x18] sm:$0xff] }
0x3aca   : > { %20824 = vmatprep.subr.bf16.mxu0 %v21801_v3 }
0x3acd   : > { %20826 = vmatpush3.bf16.msra.mxu0 %v20825_v33  ;;  %v20813_v33 = vpack.c.bf16 %v14393_v32, %v14392_v29  ;;  %v9026_v29 = vld [vmem:[%s27441_s14 + $0x20] sm:$0xff]  ;;  %v9027_v32 = vld [vmem:[%s27441_s14 + $0x28] sm:$0xff] }
0x3ace   : > { %20827 = vmatprep.subr.bf16.mxu0 %v21801_v3 }
0x3ad1   : > { %20829 = vmatpush3.bf16.msra.mxu0 %v20828_v60  ;;  %v20816_v60 = vpack.c.bf16 %v14395_v38, %v14394_v37 }
0x3ad2   : > { %20830 = vmatprep.subr.bf16.mxu0 %v21801_v3 }
0x3ad5   : > { %20832 = vmatpush3.bf16.msra.mxu0 %v20831_v41  ;;  %v20819_v41 = vpack.c.bf16 %v14397_v22, %v14396_v40 }
0x3ad6   : > { %20833 = vmatprep.subr.bf16.mxu0 %v21801_v3 }
0x3ad9   : > { %20835 = vmatpush3.bf16.msra.mxu0 %v20834_v44  ;;  %v20846_v44 = vpack.c.bf16 %v14415_v34, %v14414_v42  ;;  %v9029_v42 = vld [vmem:[%s27441_s14 + $0x38] sm:$0xff] }
0x3ada   : > { %20836 = vmatprep.subr.bf16.mxu0 %v21801_v3 }
0x3add   : > { %20838 = vmatpush3.bf16.msra.mxu0 %v20837_v58  ;;  %v20849_v58 = vpack.c.bf16 %v14417_v63, %v14416_v45  ;;  %v9032_v63 = vld [vmem:[%s27441_s14 + $0x50] sm:$0xff] }
0x3ade   : > { %20839 = vmatprep.subr.bf16.mxu0 %v21801_v3 }
0x3ae1   : > { %20841 = vmatpush3.bf16.msra.mxu0 %v20840_v48  ;;  %v20852_v48 = vpack.c.bf16 %v14419_v47, %v14418_v46  ;;  %v9034_v47 = vld [vmem:[%s27441_s14 + $0x60] sm:$0xff] }
0x3ae2   : > { %20842 = vmatprep.subr.bf16.mxu0 %v21801_v3 }
0x3ae5   : > { %20844 = vmatpush3.bf16.msra.mxu0 %v20843_v31  ;;  %v14422_v31 = vld [vmem:[%s27439_s12 + $0x5c0] sm:$0xff] }
0x3ae6   : > { %18471 = vmatprep.subr.mxu0 %v21803_v51 }
0x3ae8   : > { %18434 = vmatmul.mubr.f32.vlgmr.msra.gmra.mrb[84].mxu0 %v24714_v1 }
0x3ae9   : > { %18473 = vmatprep.mubr.msk.f32.mxu0 %vm21802_vm0, %v21803_v51 }
0x3b5b   : > { %v7934_v52 = vpop.f32.mrb[78].mxu0 }
0x3b5c   : > { %v25313_v53 = vadd.f32 %v25119_v20, %v7934_v52  ;;  %v18240_v30 = vpop.f32.mrb[79].mxu0  ;;  %v14423_v52 = vld [vmem:[%s27439_s12 + $0x5c8] sm:$0xff] }
0x3b5d   : > { %v20858_v30 = vpack.c.bf16 %v14423_v52, %v14422_v31  ;;  %v9109_v52 = vld [vmem:[%s27442_s15] sm:$0xff] }
0x3b7b   : > { %v8094_v54 = vpop.f32.mrb[80].mxu0 }
0x3b7c   : > { %v18280_v57 = vpop.f32.mrb[81].mxu0  ;;  %18354 = vmatmul.mubr.msk.f32.vlgmr.msra.gmra.mrb[98].mxu1 %vm865_vm1, %v8094_v54  ;;  %v14424_v54 = vld [vmem:[%s27439_s12 + $0x5d0] sm:$0xff] }
0x3b7d   : > { %18358 = vmatprep.mubr.msk.f32.mxu1 %vm21802_vm0, %v21803_v51  ;;  %v14425_v57 = vld [vmem:[%s27439_s12 + $0x5d8] sm:$0xff] }
0x3b9b   : > { %v8268_v59 = vpop.f32.mrb[82].mxu0 }
0x3b9c   : > { %v18350_v62 = vpop.f32.mrb[83].mxu0  ;;  %18357 = vmatpush3.msra.mxu1 %v8268_v59  ;;  %v20861_v59 = vpack.c.bf16 %v14425_v57, %v14424_v54  ;;  %v9111_v54 = vld [vmem:[%s27442_s15 + $0x10] sm:$0xff] }
0x3b9d   : > { %18361 = vmatprep.subr.mxu1 %v21803_v51  ;;  %v14426_v62 = vld [vmem:[%s27439_s12 + $0x5e0] sm:$0xff] }
0x3bbb   : > { %v8678_v43 = vpop.f32.mrb[84].mxu0 }
0x3bbc   : > { %v18435_v2 = vpop.f32.mrb[85].mxu0  ;;  %18472 = vmatpush3.xpose.msk.msra.mxu0 %vm865_vm1, %v8678_v43  ;;  %v14427_v43 = vld [vmem:[%s27439_s12 + $0x5e8] sm:$0xff] }
0x3bbd   : > { %18476 = vmatprep.subr.mxu0 %v21803_v51  ;;  %v20864_v2 = vpack.c.bf16 %v14427_v43, %v14426_v62  ;;  %v9113_v43 = vld [vmem:[%s27442_s15 + $0x20] sm:$0xff] }
0x3c4f   : > { %v8344_v20 = vpop.f32.mrb[98].mxu1 }
0x3c50   : > { %v18355_v5 = vpop.f32.mrb[99].mxu1  ;;  %v8348_v7 = vsel %vm865_vm1, %v8344_v20, -inf }
0x3c51   : > { %8349 = vmax.xlane.f32.xlu1 %v8348_v7  ;;  %v14429_v5 = vld [vmem:[%s27439_s12 + $0x5f8] sm:$0xff] }
0x3cde   : > { %v8350_v8 = vpop.xlane.xlu1 %8349 }
0x3cdf   : > { %v8351_v9 = vsub.f32 %v8344_v20, %v8350_v8  ;;  %v14428_v20 = vld [vmem:[%s27439_s12 + $0x5f0] sm:$0xff] }
0x3ce0   : > { %v20867_v7 = vpack.c.bf16 %v14429_v5, %v14428_v20  ;;  %v9115_v5 = vld [vmem:[%s27442_s15 + $0x30] sm:$0xff] }
0x3ce1   : > { %v8352_v10 = vmul.f32 1.442695, %v8351_v9 }
0x3ce3   : > { %21677 = vpow2.f32 %v8352_v10 }
0x3ced   : > { %v21678_v11 = vpop.eup %21677 }
0x3cee   : > { %v8354_v12 = vsel %vm865_vm1, %v21678_v11, 0.0 }
0x3cef   : > { %8355 = vadd.xlane.f32.xlu0 %v8354_v12 }
0x3d7c   : > { %v8356_v13 = vpop.xlane.xlu0 %8355 }
0x3d7d   : > { %21679 = vrcp.f32 %v8356_v13 }
0x3d87   : > { %v21680_v4 = vpop.eup %21679 }
0x3d88   : > { %v8358_v15 = vmul.f32 %v21680_v4, %v21678_v11 }
0x3d8a   : > { %18359 = vmatmul.mubr.msk.f32.vlgmr.msra.gmra.mrb[100].mxu1 %vm865_vm1, %v8358_v15 }
0x3d8b   : > { %18362 = vmatpush3.msra.mxu1 %v14380_v61  ;;  %18363 = vmatprep.mubr.msk.f32.mxu1 %vm21802_vm0, %v21803_v51 }
0x3d8c   : > { %20797 = vmatprep.subr.bf16.mxu1 %v21801_v3 }
0x3e5d   : > { %v8428_v18 = vpop.f32.mrb[100].mxu1 }
0x3e5e   : > { %v18360_v19 = vpop.f32.mrb[101].mxu1  ;;  %18364 = vmatmul.mubr.msk.f32.vlgmr.msra.gmra.mrb[102].mxu1 %vm865_vm1, %v8428_v18 }
0x3e5f   : > { %20799 = vmatpush3.bf16.msra.mxu1 %v20798_v17  ;;  %18398 = vmatprep.mubr.msk.f32.mxu1 %vm21802_vm0, %v21803_v51 }
0x3e60   : > { %20800 = vmatprep.subr.bf16.mxu1 %v21801_v3 }
0x3e63   : > { %20802 = vmatpush3.bf16.msra.mxu1 %v20801_v56 }
0x3e64   : > { %20803 = vmatprep.subr.bf16.mxu1 %v21801_v3 }
0x3e67   : > { %20805 = vmatpush3.bf16.msra.mxu1 %v20804_v24 }
0x3e68   : > { %20806 = vmatprep.subr.bf16.mxu1 %v21801_v3 }
0x3e6b   : > { %20808 = vmatpush3.bf16.msra.mxu1 %v20807_v27  ;;  %v9024_v27 = vld [vmem:[%s27441_s14 + $0x10] sm:$0xff] }
0x3e6c   : > { %20809 = vmatprep.subr.bf16.mxu1 %v21801_v3 }
0x3e6f   : > { %20811 = vmatpush3.bf16.msra.mxu1 %v20810_v28  ;;  %v20873_v28 = vpack.c.bf16 %v9025_v14, %v9024_v27  ;;  %v14439_v27 = vld [vmem:[%s27437_s10 + $0x600] sm:$0xff] }
0x3e70   : > { %20812 = vmatprep.subr.bf16.mxu1 %v21801_v3  ;;  %v14455_v14 = vld [vmem:[%s27437_s10 + $0x800] sm:$0xff] }
0x3e73   : > { %20814 = vmatpush3.bf16.msra.mxu1 %v20813_v33  ;;  %v20876_v33 = vpack.c.bf16 %v9027_v32, %v9026_v29  ;;  %v14456_v29 = vld [vmem:[%s27437_s10 + $0x808] sm:$0xff]  ;;  %v14441_v32 = vld [vmem:[%s27437_s10 + $0x610] sm:$0xff] }
0x3e74   : > { %20815 = vmatprep.subr.bf16.mxu1 %v21801_v3 }
0x3e77   : > { %20817 = vmatpush3.bf16.msra.mxu1 %v20816_v60 }
0x3e78   : > { %20818 = vmatprep.subr.bf16.mxu1 %v21801_v3 }
0x3e7b   : > { %20820 = vmatpush3.bf16.msra.mxu1 %v20819_v41  ;;  %v9028_v41 = vld [vmem:[%s27441_s14 + $0x30] sm:$0xff] }
0x3e7c   : > { %20845 = vmatprep.subr.bf16.mxu1 %v21801_v3  ;;  %v20879_v34 = vpack.c.bf16 %v9029_v42, %v9028_v41  ;;  %v14443_v42 = vld [vmem:[%s27437_s10 + $0x620] sm:$0xff] }
0x3e7e   : > { %18399 = vmatmul.mubr.f32.vlgmr.msra.gmra.mrb[104].mxu1 %v24803_v55  ;;  %v14420_v55 = vld [vmem:[%s27439_s12 + $0x5b0] sm:$0xff] }
0x3e7f   : > { %20847 = vmatpush3.bf16.msra.mxu1 %v20846_v44  ;;  %18468 = vmatprep.mubr.msk.f32.mxu1 %vm21802_vm0, %v21803_v51  ;;  %v20855_v50 = vpack.c.bf16 %v14421_v49, %v14420_v55  ;;  %v9031_v44 = vld [vmem:[%s27441_s14 + $0x48] sm:$0xff]  ;;  %v9036_v49 = vld [vmem:[%s27441_s14 + $0x70] sm:$0xff] }
0x3e80   : > { %20848 = vmatprep.subr.bf16.mxu1 %v21801_v3 }
0x3e83   : > { %20850 = vmatpush3.bf16.msra.mxu1 %v20849_v58  ;;  %v9033_v58 = vld [vmem:[%s27441_s14 + $0x58] sm:$0xff] }
0x3e84   : > { %20851 = vmatprep.subr.bf16.mxu1 %v21801_v3  ;;  %v20885_v46 = vpack.c.bf16 %v9033_v58, %v9032_v63  ;;  %v14445_v58 = vld [vmem:[%s27437_s10 + $0x630] sm:$0xff] }
0x3e87   : > { %20853 = vmatpush3.bf16.msra.mxu1 %v20852_v48  ;;  %v9035_v48 = vld [vmem:[%s27441_s14 + $0x68] sm:$0xff] }
0x3e88   : > { %20854 = vmatprep.subr.bf16.mxu1 %v21801_v3  ;;  %v20888_v55 = vpack.c.bf16 %v9035_v48, %v9034_v47 }
0x3e8b   : > { %20856 = vmatpush3.bf16.msra.mxu1 %v20855_v50  ;;  %v9037_v50 = vld [vmem:[%s27441_s14 + $0x78] sm:$0xff] }
0x3e8c   : > { %20857 = vmatprep.subr.bf16.mxu1 %v21801_v3  ;;  %v20891_v31 = vpack.c.bf16 %v9037_v50, %v9036_v49 }
0x3e8f   : > { %20859 = vmatpush3.bf16.msra.mxu1 %v20858_v30  ;;  %v9110_v30 = vld [vmem:[%s27442_s15 + $0x8] sm:$0xff] }
0x3e90   : > { %20860 = vmatprep.subr.bf16.mxu1 %v21801_v3  ;;  %v20894_v57 = vpack.c.bf16 %v9110_v30, %v9109_v52  ;;  %v14462_v52 = vld [vmem:[%s27437_s10 + $0x838] sm:$0xff] }
0x3e93   : > { %20862 = vmatpush3.bf16.msra.mxu1 %v20861_v59  ;;  %v9112_v59 = vld [vmem:[%s27442_s15 + $0x18] sm:$0xff] }
0x3e94   : > { %20863 = vmatprep.subr.bf16.mxu1 %v21801_v3  ;;  %v20897_v62 = vpack.c.bf16 %v9112_v59, %v9111_v54  ;;  %v14448_v54 = vld [vmem:[%s27437_s10 + $0x648] sm:$0xff]  ;;  %v14463_v59 = vld [vmem:[%s27437_s10 + $0x840] sm:$0xff] }
0x3e97   : > { %20865 = vmatpush3.bf16.msra.mxu1 %v20864_v2  ;;  %v9114_v2 = vld [vmem:[%s27442_s15 + $0x28] sm:$0xff] }
0x3e98   : > { %20866 = vmatprep.subr.bf16.mxu1 %v21801_v3  ;;  %v20900_v20 = vpack.c.bf16 %v9114_v2, %v9113_v43  ;;  %v14449_v2 = vld [vmem:[%s27437_s10 + $0x650] sm:$0xff] }
0x3e9b   : > { %20868 = vmatpush3.bf16.msra.mxu1 %v20867_v7  ;;  %v9116_v7 = vld [vmem:[%s27442_s15 + $0x38] sm:$0xff] }
0x3e9c   : > { %20893 = vmatprep.subr.bf16.mxu1 %v21801_v3 }
0x3e9e   : > { %18469 = vmatmul.mubr.f32.vlgmr.msra.gmra.mrb[106].mxu1 %v24714_v1 }
0x3e9f   : > { %18553 = vmatprep.mubr.msk.f32.mxu1 %vm21802_vm0, %v21803_v51  ;;  %20895 = vmatpush3.bf16.msra.mxu1 %v20894_v57 }
0x3ea0   : > { %20896 = vmatprep.subr.bf16.mxu1 %v21801_v3 }
0x3ea3   : > { %20898 = vmatpush3.bf16.msra.mxu1 %v20897_v62  ;;  %v14464_v62 = vld [vmem:[%s27437_s10 + $0x848] sm:$0xff] }
0x3ea4   : > { %20899 = vmatprep.subr.bf16.mxu1 %v21801_v3  ;;  %v20954_v43 = vpack.c.bf16 %v14464_v62, %v14463_v59  ;;  %v14513_v62 = vld [vmem:[%s27437_s10 + $0x8b0] sm:$0xff] }
0x3ea7   : > { %20901 = vmatpush3.bf16.msra.mxu1 %v20900_v20  ;;  %v14450_v20 = vld [vmem:[%s27437_s10 + $0x658] sm:$0xff] }
0x3ea8   : > { %20902 = vmatprep.subr.bf16.mxu1 %v21801_v3 }
0x3f31   : > { %v8503_v8 = vpop.f32.mrb[102].mxu1 }
0x3f32   : > { %v8507_v9 = vadd.f32 %v8503_v8, %v25313_v53  ;;  %v18365_v10 = vpop.f32.mrb[103].mxu1  ;;  %v20903_v8 = vpack.c.bf16 %v9116_v7, %v9115_v5  ;;  %v20933_v5 = vpack.c.bf16 %v14450_v20, %v14449_v2  ;;  %v14465_v7 = vld [vmem:[%s27437_s10 + $0x850] sm:$0xff]  ;;  %v14515_v20 = vld [vmem:[%s27437_s10 + $0x8c0] sm:$0xff] }
0x3f33   : > { %v9118_v10 = vld [vmem:[%s27442_s15 + $0x48] sm:$0xff] }
0x3f34   : > { %20904 = vmatpush3.bf16.msra.mxu1 %v20903_v8  ;;  %v14466_v8 = vld [vmem:[%s27437_s10 + $0x858] sm:$0xff] }
0x3f35   : > { %20905 = vmatprep.subr.bf16.mxu1 %v21801_v3 }
0x3f51   : > { %v8591_v11 = vpop.f32.mrb[104].mxu1 }
0x3f52   : > { %v18400_v12 = vpop.f32.mrb[105].mxu1  ;;  %18474 = vmatmul.mubr.msk.f32.vlgmr.msra.gmra.mrb[86].mxu0 %vm865_vm1, %v8591_v11 }
0x3f53   : > { %18478 = vmatprep.mubr.msk.f32.mxu0 %vm21802_vm0, %v21803_v51  ;;  %v9119_v12 = vld [vmem:[%s27442_s15 + $0x50] sm:$0xff] }
0x3f71   : > { %v8765_v13 = vpop.f32.mrb[106].mxu1 }
0x3f72   : > { %v18470_v4 = vpop.f32.mrb[107].mxu1  ;;  %18477 = vmatpush3.msra.mxu0 %v8765_v13  ;;  %v9120_v13 = vld [vmem:[%s27442_s15 + $0x58] sm:$0xff] }
0x3f73   : > { %18481 = vmatprep.subr.mxu0 %v21803_v51  ;;  %v20909_v4 = vpack.c.bf16 %v9120_v13, %v9119_v12  ;;  %v14467_v13 = vld [vmem:[%s27437_s10 + $0x860] sm:$0xff] }
0x4025   : > { %v8841_v15 = vpop.f32.mrb[86].mxu0 }
0x4026   : > { %v18475_v61 = vpop.f32.mrb[87].mxu0  ;;  %v8845_v16 = vsel %vm865_vm1, %v8841_v15, -inf }
0x4027   : > { %8846 = vmax.xlane.f32.xlu1 %v8845_v16  ;;  %v9122_v61 = vld [vmem:[%s27442_s15 + $0x68] sm:$0xff] }
0x40b4   : > { %v8847_v6 = vpop.xlane.xlu1 %8846 }
0x40b5   : > { %v8848_v53 = vsub.f32 %v8841_v15, %v8847_v6  ;;  %v9121_v15 = vld [vmem:[%s27442_s15 + $0x60] sm:$0xff] }
0x40b6   : > { %v20912_v16 = vpack.c.bf16 %v9122_v61, %v9121_v15  ;;  %v14453_v61 = vld [vmem:[%s27437_s10 + $0x670] sm:$0xff] }
0x40b7   : > { %v8849_v17 = vmul.f32 1.442695, %v8848_v53 }
0x40b9   : > { %21681 = vpow2.f32 %v8849_v17 }
0x40c3   : > { %v21682_v35 = vpop.eup %21681 }
0x40c4   : > { %v8851_v0 = vsel %vm865_vm1, %v21682_v35, 0.0 }
0x40c5   : > { %8852 = vadd.xlane.f32.xlu0 %v8851_v0  ;;  %v14436_v0 = vld [vmem:[%s27436_s9 + $0x2] ss:$0 sm:$0xff] }
0x4152   : > { %v8853_v18 = vpop.xlane.xlu0 %8852 }
0x4153   : > { %21683 = vrcp.f32 %v8853_v18 }
0x415d   : > { %v21684_v19 = vpop.eup %21683 }
0x415e   : > { %v8855_v56 = vmul.f32 %v21684_v19, %v21682_v35 }
0x4160   : > { %18479 = vmatmul.mubr.msk.f32.vlgmr.msra.gmra.mrb[88].mxu0 %vm865_vm1, %v8855_v56  ;;  %v9123_v56 = vld [vmem:[%s27442_s15 + $0x70] sm:$0xff] }
0x4161   : > { %18482 = vmatpush3.msra.mxu0 %v14433_v21  ;;  %18483 = vmatprep.mubr.msk.f32.mxu0 %vm21802_vm0, %v21803_v51  ;;  %v9124_v21 = vld [vmem:[%s27442_s15 + $0x78] sm:$0xff] }
0x4162   : > { %20869 = vmatprep.subr.bf16.mxu0 %v21801_v3 }
0x4233   : > { %v8925_v23 = vpop.f32.mrb[88].mxu0 }
0x4234   : > { %v18480_v24 = vpop.f32.mrb[89].mxu0  ;;  %18484 = vmatmul.mubr.msk.f32.vlgmr.msra.gmra.mrb[90].mxu0 %vm865_vm1, %v8925_v23  ;;  %v20915_v23 = vpack.c.bf16 %v9124_v21, %v9123_v56  ;;  %v14471_v56 = vld [vmem:[%s27437_s10 + $0xa00] sm:$0xff]  ;;  %v14472_v21 = vld [vmem:[%s27437_s10 + $0xa08] sm:$0xff] }
0x4235   : > { %18518 = vmatprep.mubr.msk.f32.mxu0 %vm21802_vm0, %v21803_v51  ;;  %20871 = vmatpush3.bf16.msra.mxu0 %v20870_v39  ;;  %v14440_v39 = vld [vmem:[%s27437_s10 + $0x608] sm:$0xff] }
0x4236   : > { %20872 = vmatprep.subr.bf16.mxu0 %v21801_v3 }
0x4239   : > { %20874 = vmatpush3.bf16.msra.mxu0 %v20873_v28  ;;  %v20918_v28 = vpack.c.bf16 %v14440_v39, %v14439_v27  ;;  %v14473_v39 = vld [vmem:[%s27437_s10 + $0xa10] sm:$0xff] }
0x423a   : > { %20875 = vmatprep.subr.bf16.mxu0 %v21801_v3 }
0x423d   : > { %20877 = vmatpush3.bf16.msra.mxu0 %v20876_v33  ;;  %v14442_v33 = vld [vmem:[%s27437_s10 + $0x618] sm:$0xff] }
0x423e   : > { %20878 = vmatprep.subr.bf16.mxu0 %v21801_v3 }
0x4241   : > { %20880 = vmatpush3.bf16.msra.mxu0 %v20879_v34  ;;  %v14444_v34 = vld [vmem:[%s27437_s10 + $0x628] sm:$0xff] }
0x4242   : > { %20881 = vmatprep.subr.bf16.mxu0 %v21801_v3 }
0x4307   : > { %v9000_v37 = vpop.f32.mrb[90].mxu0 }
0x4308   : > { %v9004_v38 = vadd.f32 %v9000_v37, %v8507_v9  ;;  %v18485_v60 = vpop.f32.mrb[91].mxu0  ;;  %v9117_v9 = vld [vmem:[%s27442_s15 + $0x40] sm:$0xff]  ;;  %v20942_v37 = vpack.c.bf16 %v14456_v29, %v14455_v14  ;;  %v14474_v14 = vld [vmem:[%s27437_s10 + $0xa18] sm:$0xff] }
0x4309   : > { %v20906_v11 = vpack.c.bf16 %v9118_v10, %v9117_v9  ;;  %v14458_v60 = vld [vmem:[%s27437_s10 + $0x818] sm:$0xff]  ;;  %v20957_v9 = vpack.c.bf16 %v14466_v8, %v14465_v7  ;;  %v14451_v10 = vld [vmem:[%s27437_s10 + $0x660] sm:$0xff]  ;;  %v14517_v8 = vld [vmem:[%s27437_s10 + $0x8d0] sm:$0xff] }
0x430a   : > { %v25490_v40 = vadd.f32 %v9004_v38, %v24761_v36  ;;  %v9030_v36 = vld [vmem:[%s27441_s14 + $0x40] sm:$0xff]  ;;  %v14457_v38 = vld [vmem:[%s27437_s10 + $0x810] sm:$0xff] }
0x430b   : > { %v20882_v45 = vpack.c.bf16 %v9031_v44, %v9030_v36  ;;  %20907 = vmatpush3.bf16.msra.mxu1 %v20906_v11  ;;  %v20945_v41 = vpack.c.bf16 %v14458_v60, %v14457_v38  ;;  %v14459_v36 = vld [vmem:[%s27437_s10 + $0x820] sm:$0xff]  ;;  %v14460_v44 = vld [vmem:[%s27437_s10 + $0x828] sm:$0xff]  ;;  %v14478_v38 = vld [vmem:[%s27437_s10 + $0xa38] sm:$0xff] }
0x430c   : > { %v9008_v22 = vmul.f32 %v25490_v40, %v25490_v40  ;;  %20908 = vmatprep.subr.bf16.mxu1 %v21801_v3  ;;  %v20948_v63 = vpack.c.bf16 %v14460_v44, %v14459_v36  ;;  %v14452_v11 = vld [vmem:[%s27437_s10 + $0x668] sm:$0xff]  ;;  %v14475_v29 = vld [vmem:[%s27437_s10 + $0xa20] sm:$0xff]  ;;  %v14482_v36 = vld [vmem:[%s27437_s10 + $0xa58] sm:$0xff] }
0x430d   : > { %20883 = vmatpush3.bf16.msra.mxu0 %v20882_v45  ;;  %v20924_v45 = vpack.c.bf16 %v14444_v34, %v14443_v42  ;;  %v20936_v12 = vpack.c.bf16 %v14452_v11, %v14451_v10  ;;  %v14481_v34 = vld [vmem:[%s27437_s10 + $0xa50] sm:$0xff]  ;;  %v14519_v11 = vld [vmem:[%s27437_s10 + $0x8e0] sm:$0xff] }
0x430e   : > { %9009 = vadd.xlane.f32.xlu1 %v9008_v22  ;;  %20884 = vmatprep.subr.bf16.mxu0 %v21801_v3  ;;  %v20921_v22 = vpack.c.bf16 %v14442_v33, %v14441_v32  ;;  %v14476_v32 = vld [vmem:[%s27437_s10 + $0xa28] sm:$0xff]  ;;  %v20981_v44 = vpack.c.bf16 %v14482_v36, %v14481_v34  ;;  %v14495_v36 = vld [vmem:[%s27437_s10 + $0x6a0] sm:$0xff] }
0x430f   : > { %20910 = vmatpush3.bf16.msra.mxu1 %v20909_v4  ;;  %v14468_v4 = vld [vmem:[%s27437_s10 + $0x868] sm:$0xff]  ;;  %v20972_v33 = vpack.c.bf16 %v14476_v32, %v14475_v29 }
0x4310   : > { %20911 = vmatprep.subr.bf16.mxu1 %v21801_v3  ;;  %v20960_v15 = vpack.c.bf16 %v14468_v4, %v14467_v13  ;;  %v14521_v4 = vld [vmem:[%s27437_s10 + $0x8f0] sm:$0xff] }
0x4311   : > { %20886 = vmatpush3.bf16.msra.mxu0 %v20885_v46  ;;  %v14446_v46 = vld [vmem:[%s27437_s10 + $0x638] sm:$0xff] }
0x4312   : > { %20887 = vmatprep.subr.bf16.mxu0 %v21801_v3  ;;  %v20927_v47 = vpack.c.bf16 %v14446_v46, %v14445_v58  ;;  %v14485_v46 = vld [vmem:[%s27437_s10 + $0xa70] sm:$0xff] }
0x4313   : > { %20913 = vmatpush3.bf16.msra.mxu1 %v20912_v16  ;;  %v14454_v16 = vld [vmem:[%s27437_s10 + $0x678] sm:$0xff] }
0x4314   : > { %20914 = vmatprep.subr.bf16.mxu1 %v21801_v3 }
0x4315   : > { %20889 = vmatpush3.bf16.msra.mxu0 %v20888_v55 }
0x4316   : > { %20890 = vmatprep.subr.bf16.mxu0 %v21801_v3 }
0x4317   : > { %20916 = vmatpush3.bf16.msra.mxu1 %v20915_v23 }
0x4318   : > { %20941 = vmatprep.subr.bf16.mxu1 %v21801_v3 }
0x4319   : > { %20892 = vmatpush3.bf16.msra.mxu0 %v20891_v31  ;;  %v14461_v31 = vld [vmem:[%s27437_s10 + $0x830] sm:$0xff] }
0x431a   : > { %20917 = vmatprep.subr.bf16.mxu0 %v21801_v3  ;;  %v20951_v30 = vpack.c.bf16 %v14462_v52, %v14461_v31  ;;  %v14509_v52 = vld [vmem:[%s27437_s10 + $0x890] sm:$0xff] }
0x439b   : > { %v9010_v6 = vpop.xlane.xlu1 %9009 }
0x439c   : > { %v9011_v53 = vmul.f32 0.03125, %v9010_v6  ;;  %v20939_v6 = vpack.c.bf16 %v14454_v16, %v14453_v61 }
0x439e   : > { %v9012_v17 = vadd.f32 1e-06, %v9011_v53  ;;  %v14469_v53 = vld [vmem:[%s27437_s10 + $0x870] sm:$0xff] }
0x43a0   : > { %21685 = vrsqrt.f32 %v9012_v17  ;;  %v14470_v17 = vld [vmem:[%s27437_s10 + $0x878] sm:$0xff] }
0x43aa   : > { %v21686_v35 = vpop.eup %21685 }
0x43ab   : > { %v9014_v18 = vmul.f32 %v21686_v35, %v25490_v40  ;;  %v20963_v35 = vpack.c.bf16 %v14470_v17, %v14469_v53 }
0x43ad   : > { %v9021_v19 = vmul.f32 %v14436_v0, %v9014_v18 }
0x43af   : > { %18519 = vmatmul.mubr.f32.vlgmr.msra.gmra.mrb[92].mxu0 %v9021_v19 }
0x43b0   : > { %18588 = vmatprep.mubr.msk.f32.mxu0 %vm21802_vm0, %v21803_v51  ;;  %20919 = vmatpush3.bf16.msra.mxu0 %v20918_v28  ;;  %v20969_v28 = vpack.c.bf16 %v14474_v14, %v14473_v39 }
0x43b1   : > { %20920 = vmatprep.subr.bf16.mxu0 %v21801_v3 }
0x43b4   : > { %20922 = vmatpush3.bf16.msra.mxu0 %v20921_v22  ;;  %v14479_v22 = vld [vmem:[%s27437_s10 + $0xa40] sm:$0xff] }
0x43b5   : > { %20923 = vmatprep.subr.bf16.mxu0 %v21801_v3 }
0x43b8   : > { %20925 = vmatpush3.bf16.msra.mxu0 %v20924_v45  ;;  %v14483_v45 = vld [vmem:[%s27437_s10 + $0xa60] sm:$0xff] }
0x43b9   : > { %20926 = vmatprep.subr.bf16.mxu0 %v21801_v3 }
0x43bc   : > { %20928 = vmatpush3.bf16.msra.mxu0 %v20927_v47  ;;  %v14486_v47 = vld [vmem:[%s27437_s10 + $0xa78] sm:$0xff] }
0x43bd   : > { %20929 = vmatprep.subr.bf16.mxu0 %v21801_v3 }
0x4482   : > { %v9104_v24 = vpop.f32.mrb[92].mxu0 }
0x4483   : > { %v9108_v25 = vmax.f32 %v9104_v24, 0.0  ;;  %v18520_v26 = vpop.f32.mrb[93].mxu0  ;;  %v14438_v24 = vld [vmem:[%s27436_s9 + $0x3] ss:$0 sm:$0xff] }
0x4484   : > { %v20966_v26 = vpack.c.bf16 %v14472_v21, %v14471_v56  ;;  %v21733_v21 = vld [vmem:[%s27430_s3] sm:$0xff] }
0x4485   : > { %18554 = vmatmul.mubr.f32.vlgmr.msra.gmra.mrb[108].mxu1 %v9108_v25 }
0x4486   : > { %18623 = vmatprep.mubr.msk.f32.mxu1 %vm21802_vm0, %v21803_v51  ;;  %20943 = vmatpush3.bf16.msra.mxu1 %v20942_v37  ;;  %v14477_v37 = vld [vmem:[%s27437_s10 + $0xa30] sm:$0xff] }
0x4487   : > { %20944 = vmatprep.subr.bf16.mxu1 %v21801_v3  ;;  %v20975_v60 = vpack.c.bf16 %v14478_v38, %v14477_v37  ;;  %v14492_v37 = vld [vmem:[%s27437_s10 + $0x688] sm:$0xff] }
0x448a   : > { %20946 = vmatpush3.bf16.msra.mxu1 %v20945_v41  ;;  %v14480_v41 = vld [vmem:[%s27437_s10 + $0xa48] sm:$0xff] }
0x448b   : > { %20947 = vmatprep.subr.bf16.mxu1 %v21801_v3  ;;  %v20978_v42 = vpack.c.bf16 %v14480_v41, %v14479_v22  ;;  %v14493_v41 = vld [vmem:[%s27437_s10 + $0x690] sm:$0xff] }
0x448e   : > { %20949 = vmatpush3.bf16.msra.mxu1 %v20948_v63  ;;  %v14484_v63 = vld [vmem:[%s27437_s10 + $0xa68] sm:$0xff] }
0x448f   : > { %20950 = vmatprep.subr.bf16.mxu1 %v21801_v3  ;;  %v20984_v58 = vpack.c.bf16 %v14484_v63, %v14483_v45  ;;  %v14497_v63 = vld [vmem:[%s27437_s10 + $0x6b0] sm:$0xff] }
0x4492   : > { %20952 = vmatpush3.bf16.msra.mxu1 %v20951_v30  ;;  %v14510_v30 = vld [vmem:[%s27437_s10 + $0x898] sm:$0xff] }
0x4493   : > { %20953 = vmatprep.subr.bf16.mxu1 %v21801_v3 }
0x4496   : > { %20955 = vmatpush3.bf16.msra.mxu1 %v20954_v43  ;;  %v14514_v43 = vld [vmem:[%s27437_s10 + $0x8b8] sm:$0xff] }
0x4497   : > { %20956 = vmatprep.subr.bf16.mxu1 %v21801_v3  ;;  %v21023_v2 = vpack.c.bf16 %v14514_v43, %v14513_v62  ;;  %v14523_v43 = vld [vmem:[%s27437_s10 + $0xa80] sm:$0xff] }
0x449a   : > { %20958 = vmatpush3.bf16.msra.mxu1 %v20957_v9  ;;  %v14518_v9 = vld [vmem:[%s27437_s10 + $0x8d8] sm:$0xff] }
0x449b   : > { %20959 = vmatprep.subr.bf16.mxu1 %v21801_v3  ;;  %v21029_v10 = vpack.c.bf16 %v14518_v9, %v14517_v8  ;;  %v14527_v9 = vld [vmem:[%s27437_s10 + $0xaa0] sm:$0xff] }
0x449e   : > { %20961 = vmatpush3.bf16.msra.mxu1 %v20960_v15  ;;  %v14522_v15 = vld [vmem:[%s27437_s10 + $0x8f8] sm:$0xff] }
0x449f   : > { %20962 = vmatprep.subr.bf16.mxu1 %v21801_v3  ;;  %v21035_v61 = vpack.c.bf16 %v14522_v15, %v14521_v4  ;;  %v14531_v15 = vld [vmem:[%s27437_s10 + $0xac0] sm:$0xff] }
0x44a2   : > { %20964 = vmatpush3.bf16.msra.mxu1 %v20963_v35 }
0x44a3   : > { %18661 = vmatprep.subr.mxu1 %v21803_v51 }
0x4558   : > { %v9191_v48 = vpop.f32.mrb[108].mxu1 }
0x4559   : > { %v25643_v55 = vadd.f32 %v9191_v48, %v25490_v40  ;;  %v18555_v49 = vpop.f32.mrb[109].mxu1  ;;  %v14447_v40 = vld [vmem:[%s27437_s10 + $0x640] sm:$0xff]  ;;  %v20987_v48 = vpack.c.bf16 %v14486_v47, %v14485_v46 }
0x455a   : > { %v20930_v57 = vpack.c.bf16 %v14448_v54, %v14447_v40  ;;  %v14507_v49 = vld [vmem:[%s27437_s10 + $0x880] sm:$0xff]  ;;  %v21017_v40 = vpack.c.bf16 %v14510_v30, %v14509_v52 }
0x455b   : > { %v9198_v50 = vmul.f32 %v25643_v55, %v25643_v55  ;;  %v14511_v54 = vld [vmem:[%s27437_s10 + $0x8a0] sm:$0xff] }
0x455c   : > { %20931 = vmatpush3.bf16.msra.mxu0 %v20930_v57  ;;  %v14512_v57 = vld [vmem:[%s27437_s10 + $0x8a8] sm:$0xff]  ;;  %v14499_v47 = vld [vmem:[%s27437_s10 + $0x6c0] sm:$0xff] }
0x455d   : > { %9199 = vadd.xlane.f32.xlu0 %v9198_v50  ;;  %20932 = vmatprep.subr.bf16.mxu0 %v21801_v3  ;;  %v14508_v50 = vld [vmem:[%s27437_s10 + $0x888] sm:$0xff]  ;;  %v21020_v59 = vpack.c.bf16 %v14512_v57, %v14511_v54  ;;  %v14503_v30 = vld [vmem:[%s27437_s10 + $0x6e0] sm:$0xff]  ;;  %v14505_v57 = vld [vmem:[%s27437_s10 + $0x6f0] sm:$0xff] }
0x455e   : > { %v21014_v31 = vpack.c.bf16 %v14508_v50, %v14507_v49  ;;  %v14501_v50 = vld [vmem:[%s27437_s10 + $0x6d0] sm:$0xff] }
0x4560   : > { %20934 = vmatpush3.bf16.msra.mxu0 %v20933_v5  ;;  %v14516_v5 = vld [vmem:[%s27437_s10 + $0x8c8] sm:$0xff] }
0x4561   : > { %20935 = vmatprep.subr.bf16.mxu0 %v21801_v3  ;;  %v21026_v7 = vpack.c.bf16 %v14516_v5, %v14515_v20  ;;  %v14525_v5 = vld [vmem:[%s27437_s10 + $0xa90] sm:$0xff] }
0x4564   : > { %20937 = vmatpush3.bf16.msra.mxu0 %v20936_v12  ;;  %v14520_v12 = vld [vmem:[%s27437_s10 + $0x8e8] sm:$0xff] }
0x4565   : > { %20938 = vmatprep.subr.bf16.mxu0 %v21801_v3  ;;  %v21032_v13 = vpack.c.bf16 %v14520_v12, %v14519_v11  ;;  %v14529_v12 = vld [vmem:[%s27437_s10 + $0xab0] sm:$0xff] }
0x4568   : > { %20940 = vmatpush3.bf16.msra.mxu0 %v20939_v6 }
0x4569   : > { %20965 = vmatprep.subr.bf16.mxu0 %v21801_v3 }
0x45ea   : > { %v9200_v0 = vpop.xlane.xlu0 %9199 }
0x45eb   : > { %v9201_v18 = vmul.f32 0.03125, %v9200_v0 }
0x45ed   : > { %v9202_v19 = vadd.f32 1e-06, %v9201_v18 }
0x45ef   : > { %21687 = vrsqrt.f32 %v9202_v19 }
0x45f9   : > { %v21688_v23 = vpop.eup %21687 }
0x45fa   : > { %v9204_v25 = vmul.f32 %v21688_v23, %v25643_v55 }
0x45fc   : > { %v25720_v27 = vmul.f32 %v14438_v24, %v9204_v25 }
0x45fe   : > { %18589 = vmatmul.mubr.f32.vlgmr.msra.gmra.mrb[94].mxu0 %v25720_v27  ;;  %18624 = vmatmul.mubr.f32.vlgmr.msra.gmra.mrb[110].mxu1 %v25720_v27 }
0x45ff   : > { %20967 = vmatpush3.bf16.msra.mxu0 %v20966_v26  ;;  %18658 = vmatprep.mubr.msk.f32.mxu0 %vm21802_vm0, %v21803_v51 }
0x4600   : > { %20968 = vmatprep.subr.bf16.mxu0 %v21801_v3  ;;  %18663 = vmatprep.mubr.msk.f32.mxu1 %vm21802_vm0, %v21803_v51 }
0x4603   : > { %20970 = vmatpush3.bf16.msra.mxu0 %v20969_v28 }
0x4604   : > { %20971 = vmatprep.subr.bf16.mxu0 %v21801_v3 }
0x4607   : > { %20973 = vmatpush3.bf16.msra.mxu0 %v20972_v33  ;;  %v14491_v33 = vld [vmem:[%s27437_s10 + $0x680] sm:$0xff] }
0x4608   : > { %20974 = vmatprep.subr.bf16.mxu0 %v21801_v3 }
0x460b   : > { %20976 = vmatpush3.bf16.msra.mxu0 %v20975_v60  ;;  %v20990_v60 = vpack.c.bf16 %v14492_v37, %v14491_v33  ;;  %v14565_v33 = vld [vmem:[%s27437_s10 + $0x920] sm:$0xff]  ;;  %v14566_v37 = vld [vmem:[%s27437_s10 + $0x928] sm:$0xff] }
0x460c   : > { %20977 = vmatprep.subr.bf16.mxu0 %v21801_v3 }
0x460f   : > { %20979 = vmatpush3.bf16.msra.mxu0 %v20978_v42  ;;  %v14494_v42 = vld [vmem:[%s27437_s10 + $0x698] sm:$0xff] }
0x4610   : > { %20980 = vmatprep.subr.bf16.mxu0 %v21801_v3  ;;  %v20993_v34 = vpack.c.bf16 %v14494_v42, %v14493_v41  ;;  %v14569_v42 = vld [vmem:[%s27437_s10 + $0x940] sm:$0xff] }
0x4613   : > { %20982 = vmatpush3.bf16.msra.mxu0 %v20981_v44  ;;  %v14496_v44 = vld [vmem:[%s27437_s10 + $0x6a8] sm:$0xff] }
0x4614   : > { %20983 = vmatprep.subr.bf16.mxu0 %v21801_v3  ;;  %v20996_v45 = vpack.c.bf16 %v14496_v44, %v14495_v36  ;;  %v14571_v44 = vld [vmem:[%s27437_s10 + $0x950] sm:$0xff] }
0x4617   : > { %20985 = vmatpush3.bf16.msra.mxu0 %v20984_v58  ;;  %v14498_v58 = vld [vmem:[%s27437_s10 + $0x6b8] sm:$0xff] }
0x4618   : > { %20986 = vmatprep.subr.bf16.mxu0 %v21801_v3  ;;  %v20999_v46 = vpack.c.bf16 %v14498_v58, %v14497_v63  ;;  %v14573_v58 = vld [vmem:[%s27437_s10 + $0x960] sm:$0xff] }
0x461b   : > { %20988 = vmatpush3.bf16.msra.mxu0 %v20987_v48  ;;  %v14500_v48 = vld [vmem:[%s27437_s10 + $0x6c8] sm:$0xff] }
0x461c   : > { %21013 = vmatprep.subr.bf16.mxu0 %v21801_v3  ;;  %v21002_v49 = vpack.c.bf16 %v14500_v48, %v14499_v47  ;;  %v14575_v48 = vld [vmem:[%s27437_s10 + $0x970] sm:$0xff] }
0x461e   : > { %18659 = vmatmul.mubr.f32.vlgmr.msra.gmra.mrb[96].mxu0 %v25720_v27 }
0x461f   : > { %21015 = vmatpush3.bf16.msra.mxu0 %v21014_v31  ;;  %18738 = vmatprep.mubr.msk.f32.mxu0 %vm21802_vm0, %v21803_v51  ;;  %v14502_v31 = vld [vmem:[%s27437_s10 + $0x6d8] sm:$0xff] }
0x4620   : > { %21016 = vmatprep.subr.bf16.mxu0 %v21801_v3  ;;  %v21005_v52 = vpack.c.bf16 %v14502_v31, %v14501_v50 }
0x4623   : > { %21018 = vmatpush3.bf16.msra.mxu0 %v21017_v40  ;;  %v14504_v40 = vld [vmem:[%s27437_s10 + $0x6e8] sm:$0xff] }
0x4624   : > { %21019 = vmatprep.subr.bf16.mxu0 %v21801_v3  ;;  %v21008_v54 = vpack.c.bf16 %v14504_v40, %v14503_v30 }
0x4627   : > { %21021 = vmatpush3.bf16.msra.mxu0 %v21020_v59  ;;  %v14506_v59 = vld [vmem:[%s27437_s10 + $0x6f8] sm:$0xff] }
0x4628   : > { %21022 = vmatprep.subr.bf16.mxu0 %v21801_v3  ;;  %v21011_v62 = vpack.c.bf16 %v14506_v59, %v14505_v57 }
0x462b   : > { %21024 = vmatpush3.bf16.msra.mxu0 %v21023_v2  ;;  %v14524_v2 = vld [vmem:[%s27437_s10 + $0xa88] sm:$0xff] }
0x462c   : > { %21025 = vmatprep.subr.bf16.mxu0 %v21801_v3  ;;  %v21038_v20 = vpack.c.bf16 %v14524_v2, %v14523_v43  ;;  %v21734_v43 = vld [vmem:[%s27430_s3 + $0x8] sm:$0xff] }
0x462f   : > { %21027 = vmatpush3.bf16.msra.mxu0 %v21026_v7  ;;  %v14526_v7 = vld [vmem:[%s27437_s10 + $0xa98] sm:$0xff] }
0x4630   : > { %21028 = vmatprep.subr.bf16.mxu0 %v21801_v3  ;;  %v21041_v8 = vpack.c.bf16 %v14526_v7, %v14525_v5 }
0x4633   : > { %21030 = vmatpush3.bf16.msra.mxu0 %v21029_v10  ;;  %v14528_v10 = vld [vmem:[%s27437_s10 + $0xaa8] sm:$0xff] }
0x4634   : > { %21031 = vmatprep.subr.bf16.mxu0 %v21801_v3  ;;  %v21044_v11 = vpack.c.bf16 %v14528_v10, %v14527_v9 }
0x4637   : > { %21033 = vmatpush3.bf16.msra.mxu0 %v21032_v13  ;;  %v14530_v13 = vld [vmem:[%s27437_s10 + $0xab8] sm:$0xff] }
0x4638   : > { %21034 = vmatprep.subr.bf16.mxu0 %v21801_v3  ;;  %v21047_v4 = vpack.c.bf16 %v14530_v13, %v14529_v12 }
0x463b   : > { %21036 = vmatpush3.bf16.msra.mxu0 %v21035_v61  ;;  %v14532_v61 = vld [vmem:[%s27437_s10 + $0xac8] sm:$0xff] }
0x463c   : > { %18776 = vmatprep.subr.mxu0 %v21803_v51 }
0x463e   : > { %18739 = vmatmul.mubr.f32.vlgmr.msra.gmra.mrb[98].mxu0 %v25720_v27 }
0x463f   : > { %18778 = vmatprep.mubr.msk.f32.mxu0 %vm21802_vm0, %v21803_v51 }
0x46d1   : > { %v9295_v16 = vpop.f32.mrb[94].mxu0  ;;  %v9382_v6 = vpop.f32.mrb[110].mxu1 }
0x46d2   : > { %v18590_v53 = vpop.f32.mrb[95].mxu0  ;;  %v18625_v17 = vpop.f32.mrb[111].mxu1  ;;  %18662 = vmatpush3.xpose.msk.msra.mxu1 %vm865_vm1, %v9382_v6  ;;  %v14533_v6 = vld [vmem:[%s27437_s10 + $0xad0] sm:$0xff] }
0x46d3   : > { %18666 = vmatprep.subr.mxu1 %v21803_v51  ;;  %v14534_v53 = vld [vmem:[%s27437_s10 + $0xad8] sm:$0xff] }
0x46d4   : > { %v21053_v17 = vpack.c.bf16 %v14534_v53, %v14533_v6  ;;  %v14546_v6 = vld [vmem:[%s27437_s10 + $0x708] sm:$0xff] }
0x46d5   : > { %18664 = vmatmul.mubr.msk.f32.vlgmr.msra.gmra.mrb[112].mxu1 %vm865_vm1, %v9295_v16  ;;  %v21050_v16 = vpack.c.bf16 %v14532_v61, %v14531_v15  ;;  %v14542_v61 = vld [vmem:[%s27438_s11 + $0x28] sm:$0xff] }
0x46d6   : > { %18668 = vmatprep.mubr.msk.f32.mxu1 %vm21802_vm0, %v21803_v51 }
0x46f1   : > { %v9469_v35 = vpop.f32.mrb[96].mxu0 }
0x46f2   : > { %v18660_v0 = vpop.f32.mrb[97].mxu0  ;;  %18667 = vmatpush3.msra.mxu1 %v9469_v35  ;;  %v14535_v35 = vld [vmem:[%s27437_s10 + $0xae0] sm:$0xff] }
0x46f3   : > { %20989 = vmatprep.subr.bf16.mxu1 %v21801_v3  ;;  %v14536_v0 = vld [vmem:[%s27437_s10 + $0xae8] sm:$0xff] }
0x4711   : > { %v9805_v18 = vpop.f32.mrb[98].mxu0 }
0x4712   : > { %v18740_v19 = vpop.f32.mrb[99].mxu0  ;;  %18777 = vmatpush3.xpose.msk.msra.mxu0 %vm865_vm1, %v9805_v18  ;;  %v21056_v18 = vpack.c.bf16 %v14536_v0, %v14535_v35  ;;  %v14548_v35 = vld [vmem:[%s27437_s10 + $0x718] sm:$0xff] }
0x4713   : > { %18781 = vmatprep.subr.mxu0 %v21803_v51  ;;  %v14537_v19 = vld [vmem:[%s27437_s10 + $0xaf0] sm:$0xff] }
0x47a8   : > { %v9545_v56 = vpop.f32.mrb[112].mxu1 }
0x47a9   : > { %v9546_v23 = vadd.f32 %v21733_v21, %v9545_v56  ;;  %v18665_v24 = vpop.f32.mrb[113].mxu1  ;;  %v14538_v56 = vld [vmem:[%s27437_s10 + $0xaf8] sm:$0xff] }
0x47aa   : > { %v21059_v21 = vpack.c.bf16 %v14538_v56, %v14537_v19  ;;  %v14561_v24 = vld [vmem:[%s27437_s10 + $0x900] sm:$0xff] }
0x47ab   : > { %v9549_v25 = vsel %vm865_vm1, %v9546_v23, -inf  ;;  %v14549_v56 = vld [vmem:[%s27437_s10 + $0x720] sm:$0xff] }
0x47ac   : > { %9550 = vmax.xlane.f32.xlu1 %v9549_v25  ;;  %v14562_v25 = vld [vmem:[%s27437_s10 + $0x908] sm:$0xff] }
0x4839   : > { %v9551_v26 = vpop.xlane.xlu1 %9550 }
0x483a   : > { %v9552_v39 = vsub.f32 %v9546_v23, %v9551_v26  ;;  %v14490_v23 = vld [vmem:[%s27438_s11 + $0x20] sm:$0xff]  ;;  %v21086_v26 = vpack.c.bf16 %v14562_v25, %v14561_v24  ;;  %v14551_v24 = vld [vmem:[%s27437_s10 + $0x730] sm:$0xff]  ;;  %v14552_v25 = vld [vmem:[%s27437_s10 + $0x738] sm:$0xff] }
0x483c   : > { %v9553_v14 = vmul.f32 1.442695, %v9552_v39  ;;  %v14563_v39 = vld [vmem:[%s27437_s10 + $0x910] sm:$0xff] }
0x483e   : > { %21689 = vpow2.f32 %v9553_v14  ;;  %v14564_v14 = vld [vmem:[%s27437_s10 + $0x918] sm:$0xff] }
0x4848   : > { %v21690_v28 = vpop.eup %21689 }
0x4849   : > { %v9555_v29 = vsel %vm865_vm1, %v21690_v28, 0.0 }
0x484a   : > { %9556 = vadd.xlane.f32.xlu0 %v9555_v29 }
0x48d7   : > { %v9557_v32 = vpop.xlane.xlu0 %9556 }
0x48d8   : > { %21691 = vrcp.f32 %v9557_v32  ;;  %v21089_v32 = vpack.c.bf16 %v14564_v14, %v14563_v39  ;;  %v14553_v39 = vld [vmem:[%s27437_s10 + $0x740] sm:$0xff]  ;;  %v14554_v14 = vld [vmem:[%s27437_s10 + $0x748] sm:$0xff] }
0x48e2   : > { %v21692_v38 = vpop.eup %21691 }
0x48e3   : > { %v9559_v22 = vmul.f32 %v21692_v38, %v21690_v28  ;;  %v21092_v38 = vpack.c.bf16 %v14566_v37, %v14565_v33  ;;  %v14557_v37 = vld [vmem:[%s27437_s10 + $0x760] sm:$0xff] }
0x48e5   : > { %18669 = vmatmul.mubr.msk.f32.vlgmr.msra.gmra.mrb[114].mxu1 %vm865_vm1, %v9559_v22  ;;  %v14568_v22 = vld [vmem:[%s27437_s10 + $0x938] sm:$0xff] }
0x48e6   : > { %20991 = vmatpush3.bf16.msra.mxu1 %v20990_v60  ;;  %18703 = vmatprep.mubr.msk.f32.mxu1 %vm21802_vm0, %v21803_v51  ;;  %v14567_v60 = vld [vmem:[%s27437_s10 + $0x930] sm:$0xff] }
0x48e7   : > { %20992 = vmatprep.subr.bf16.mxu1 %v21801_v3  ;;  %v21095_v41 = vpack.c.bf16 %v14568_v22, %v14567_v60  ;;  %v14559_v22 = vld [vmem:[%s27437_s10 + $0x770] sm:$0xff] }
0x48ea   : > { %20994 = vmatpush3.bf16.msra.mxu1 %v20993_v34  ;;  %v14570_v34 = vld [vmem:[%s27437_s10 + $0x948] sm:$0xff] }
0x48eb   : > { %20995 = vmatprep.subr.bf16.mxu1 %v21801_v3  ;;  %v21098_v36 = vpack.c.bf16 %v14570_v34, %v14569_v42  ;;  %v14577_v34 = vld [vmem:[%s27437_s10 + $0xb00] sm:$0xff] }
0x48ee   : > { %20997 = vmatpush3.bf16.msra.mxu1 %v20996_v45  ;;  %v14572_v45 = vld [vmem:[%s27437_s10 + $0x958] sm:$0xff] }
0x48ef   : > { %20998 = vmatprep.subr.bf16.mxu1 %v21801_v3  ;;  %v21101_v63 = vpack.c.bf16 %v14572_v45, %v14571_v44  ;;  %v14579_v45 = vld [vmem:[%s27437_s10 + $0xb10] sm:$0xff] }
0x48f2   : > { %21000 = vmatpush3.bf16.msra.mxu1 %v20999_v46  ;;  %v14574_v46 = vld [vmem:[%s27437_s10 + $0x968] sm:$0xff] }
0x48f3   : > { %21001 = vmatprep.subr.bf16.mxu1 %v21801_v3  ;;  %v21104_v47 = vpack.c.bf16 %v14574_v46, %v14573_v58  ;;  %v14581_v46 = vld [vmem:[%s27437_s10 + $0xb20] sm:$0xff] }
0x48f6   : > { %21003 = vmatpush3.bf16.msra.mxu1 %v21002_v49  ;;  %v14576_v49 = vld [vmem:[%s27437_s10 + $0x978] sm:$0xff] }
0x48f7   : > { %21004 = vmatprep.subr.bf16.mxu1 %v21801_v3  ;;  %v21107_v50 = vpack.c.bf16 %v14576_v49, %v14575_v48  ;;  %v14583_v49 = vld [vmem:[%s27437_s10 + $0xb30] sm:$0xff] }
0x48fa   : > { %21006 = vmatpush3.bf16.msra.mxu1 %v21005_v52 }
0x48fb   : > { %21007 = vmatprep.subr.bf16.mxu1 %v21801_v3 }
0x48fe   : > { %21009 = vmatpush3.bf16.msra.mxu1 %v21008_v54 }
0x48ff   : > { %21010 = vmatprep.subr.bf16.mxu1 %v21801_v3 }
0x4902   : > { %21012 = vmatpush3.bf16.msra.mxu1 %v21011_v62 }
0x4903   : > { %21037 = vmatprep.subr.bf16.mxu1 %v21801_v3 }
0x4905   : > { %18704 = vmatmul.mubr.f32.vlgmr.msra.gmra.mrb[116].mxu1 %v25720_v27 }
0x4906   : > { %21039 = vmatpush3.bf16.msra.mxu1 %v21038_v20  ;;  %18773 = vmatprep.mubr.msk.f32.mxu1 %vm21802_vm0, %v21803_v51 }
0x4907   : > { %21040 = vmatprep.subr.bf16.mxu1 %v21801_v3 }
0x490a   : > { %21042 = vmatpush3.bf16.msra.mxu1 %v21041_v8 }
0x490b   : > { %21043 = vmatprep.subr.bf16.mxu1 %v21801_v3 }
0x490e   : > { %21045 = vmatpush3.bf16.msra.mxu1 %v21044_v11 }
0x490f   : > { %21046 = vmatprep.subr.bf16.mxu1 %v21801_v3 }
0x4912   : > { %21048 = vmatpush3.bf16.msra.mxu1 %v21047_v4 }
0x4913   : > { %21049 = vmatprep.subr.bf16.mxu1 %v21801_v3 }
0x4916   : > { %21051 = vmatpush3.bf16.msra.mxu1 %v21050_v16  ;;  %v14545_v16 = vld [vmem:[%s27437_s10 + $0x700] sm:$0xff] }
0x4917   : > { %21052 = vmatprep.subr.bf16.mxu1 %v21801_v3  ;;  %v21062_v53 = vpack.c.bf16 %v14546_v6, %v14545_v16  ;;  %v14620_v6 = vld [vmem:[%s27437_s10 + $0x9b0] sm:$0xff] }
0x491a   : > { %21054 = vmatpush3.bf16.msra.mxu1 %v21053_v17  ;;  %v14547_v17 = vld [vmem:[%s27437_s10 + $0x710] sm:$0xff] }
0x491b   : > { %21055 = vmatprep.subr.bf16.mxu1 %v21801_v3  ;;  %v21065_v19 = vpack.c.bf16 %v14548_v35, %v14547_v17  ;;  %v14622_v35 = vld [vmem:[%s27437_s10 + $0x9c0] sm:$0xff] }
0x491e   : > { %21057 = vmatpush3.bf16.msra.mxu1 %v21056_v18 }
0x491f   : > { %21058 = vmatprep.subr.bf16.mxu1 %v21801_v3 }
0x4922   : > { %21060 = vmatpush3.bf16.msra.mxu1 %v21059_v21  ;;  %v14550_v21 = vld [vmem:[%s27437_s10 + $0x728] sm:$0xff] }
0x4923   : > { %18791 = vmatprep.subr.mxu1 %v21803_v51 }
0x4925   : > { %18774 = vmatmul.mubr.f32.vlgmr.msra.gmra.mrb[118].mxu1 %v25720_v27 }
0x4926   : > { %18792 = vmatpush3.msra.mxu1 %v14490_v23  ;;  %18793 = vmatprep.mubr.msk.f32.mxu1 %vm21802_vm0, %v21803_v51  ;;  %v21068_v23 = vpack.c.bf16 %v14550_v21, %v14549_v56  ;;  %v14625_v56 = vld [vmem:[%s27437_s10 + $0x9d8] sm:$0xff] }
0x4927   : > { %21085 = vmatprep.subr.bf16.mxu1 %v21801_v3 }
0x49b8   : > { %v9629_v28 = vpop.f32.mrb[114].mxu1 }
0x49b9   : > { %v18670_v29 = vpop.f32.mrb[115].mxu1  ;;  %18794 = vmatmul.mubr.msk.f32.vlgmr.msra.gmra.mrb[120].mxu1 %vm865_vm1, %v9629_v28  ;;  %v21074_v28 = vpack.c.bf16 %v14554_v14, %v14553_v39  ;;  %v14629_v39 = vld [vmem:[%s27437_s10 + $0x9f8] sm:$0xff] }
0x49ba   : > { %21087 = vmatpush3.bf16.msra.mxu1 %v21086_v26  ;;  %18863 = vmatprep.mubr.msk.f32.mxu1 %vm21802_vm0, %v21803_v51  ;;  %v21071_v26 = vpack.c.bf16 %v14552_v25, %v14551_v24  ;;  %v14555_v29 = vld [vmem:[%s27437_s10 + $0x750] sm:$0xff]  ;;  %v14627_v24 = vld [vmem:[%s27437_s10 + $0x9e8] sm:$0xff] }
0x49bb   : > { %21088 = vmatprep.subr.bf16.mxu1 %v21801_v3 }
0x49be   : > { %21090 = vmatpush3.bf16.msra.mxu1 %v21089_v32  ;;  %v14556_v32 = vld [vmem:[%s27437_s10 + $0x758] sm:$0xff] }
0x49bf   : > { %21091 = vmatprep.subr.bf16.mxu1 %v21801_v3  ;;  %v21077_v33 = vpack.c.bf16 %v14556_v32, %v14555_v29 }
0x49c2   : > { %21093 = vmatpush3.bf16.msra.mxu1 %v21092_v38  ;;  %v14558_v38 = vld [vmem:[%s27437_s10 + $0x768] sm:$0xff] }
0x49c3   : > { %21094 = vmatprep.subr.bf16.mxu1 %v21801_v3  ;;  %v21080_v60 = vpack.c.bf16 %v14558_v38, %v14557_v37 }
0x49c6   : > { %21096 = vmatpush3.bf16.msra.mxu1 %v21095_v41  ;;  %v14560_v41 = vld [vmem:[%s27437_s10 + $0x778] sm:$0xff] }
0x49c7   : > { %21097 = vmatprep.subr.bf16.mxu1 %v21801_v3  ;;  %v21083_v42 = vpack.c.bf16 %v14560_v41, %v14559_v22 }
0x49ca   : > { %21099 = vmatpush3.bf16.msra.mxu1 %v21098_v36  ;;  %v14578_v36 = vld [vmem:[%s27437_s10 + $0xb08] sm:$0xff] }
0x49cb   : > { %21100 = vmatprep.subr.bf16.mxu1 %v21801_v3  ;;  %v21110_v44 = vpack.c.bf16 %v14578_v36, %v14577_v34 }
0x49ce   : > { %21102 = vmatpush3.bf16.msra.mxu1 %v21101_v63  ;;  %v14580_v63 = vld [vmem:[%s27437_s10 + $0xb18] sm:$0xff] }
0x49cf   : > { %21103 = vmatprep.subr.bf16.mxu1 %v21801_v3  ;;  %v21113_v58 = vpack.c.bf16 %v14580_v63, %v14579_v45 }
0x49d2   : > { %21105 = vmatpush3.bf16.msra.mxu1 %v21104_v47  ;;  %v14582_v47 = vld [vmem:[%s27437_s10 + $0xb28] sm:$0xff] }
0x49d3   : > { %21106 = vmatprep.subr.bf16.mxu1 %v21801_v3  ;;  %v21116_v48 = vpack.c.bf16 %v14582_v47, %v14581_v46 }
0x49d6   : > { %21108 = vmatpush3.bf16.msra.mxu1 %v21107_v50  ;;  %v14584_v50 = vld [vmem:[%s27437_s10 + $0xb38] sm:$0xff] }
0x49d7   : > { %18901 = vmatprep.subr.mxu1 %v21803_v51 }
0x49d8   : > { %v9718_v31 = vpop.f32.mrb[116].mxu1 }
0x49d9   : > { %v18705_v52 = vpop.f32.mrb[117].mxu1  ;;  %18779 = vmatmul.mubr.msk.f32.vlgmr.msra.gmra.mrb[100].mxu0 %vm865_vm1, %v9718_v31  ;;  %18864 = vmatmul.mubr.f32.vlgmr.msra.gmra.mrb[122].mxu1 %v25720_v27  ;;  %v21119_v31 = vpack.c.bf16 %v14584_v50, %v14583_v49 }
0x49da   : > { %18783 = vmatprep.mubr.msk.f32.mxu0 %vm21802_vm0, %v21803_v51  ;;  %18903 = vmatprep.mubr.msk.f32.mxu1 %vm21802_vm0, %v21803_v51  ;;  %v14585_v52 = vld [vmem:[%s27437_s10 + $0xb40] sm:$0xff] }
0x49f8   : > { %v9892_v30 = vpop.f32.mrb[118].mxu1 }
0x49f9   : > { %v18775_v40 = vpop.f32.mrb[119].mxu1  ;;  %18782 = vmatpush3.msra.mxu0 %v9892_v30  ;;  %v14586_v30 = vld [vmem:[%s27437_s10 + $0xb48] sm:$0xff] }
0x49fa   : > { %18786 = vmatprep.subr.mxu0 %v21803_v51  ;;  %v21122_v40 = vpack.c.bf16 %v14586_v30, %v14585_v52  ;;  %v14598_v52 = vld [vmem:[%s27437_s10 + $0x780] sm:$0xff]  ;;  %v14599_v30 = vld [vmem:[%s27437_s10 + $0x788] sm:$0xff] }
0x4a8c   : > { %v26044_v54 = vpop.f32.mrb[120].mxu1 }
0x4a8d   : > { %v18795_v57 = vpop.f32.mrb[121].mxu1 }
0x4a8e   : > { %v14587_v57 = vld [vmem:[%s27437_s10 + $0xb50] sm:$0xff] }
0x4aac   : > { %v9968_v59 = vpop.f32.mrb[100].mxu0  ;;  %v10374_v62 = vpop.f32.mrb[122].mxu1 }
0x4aad   : > { %v9969_v2 = vadd.f32 %v21734_v43, %v9968_v59  ;;  %v18780_v20 = vpop.f32.mrb[101].mxu0  ;;  %v18865_v5 = vpop.f32.mrb[123].mxu1  ;;  %18902 = vmatpush3.xpose.msk.msra.mxu1 %vm865_vm1, %v10374_v62  ;;  %v14588_v59 = vld [vmem:[%s27437_s10 + $0xb58] sm:$0xff]  ;;  %v14589_v43 = vld [vmem:[%s27437_s10 + $0xb60] sm:$0xff] }
0x4aae   : > { %18906 = vmatprep.subr.mxu1 %v21803_v51  ;;  %v21125_v62 = vpack.c.bf16 %v14588_v59, %v14587_v57  ;;  %v14591_v5 = vld [vmem:[%s27437_s10 + $0xb70] sm:$0xff]  ;;  %v14601_v59 = vld [vmem:[%s27437_s10 + $0x798] sm:$0xff] }
0x4aaf   : > { %v9972_v7 = vsel %vm865_vm1, %v9969_v2, -inf  ;;  %v14600_v57 = vld [vmem:[%s27437_s10 + $0x790] sm:$0xff] }
0x4ab0   : > { %9973 = vmax.xlane.f32.xlu1 %v9972_v7  ;;  %v14592_v7 = vld [vmem:[%s27437_s10 + $0xb78] sm:$0xff] }
0x4b3d   : > { %v9974_v8 = vpop.xlane.xlu1 %9973 }
0x4b3e   : > { %v9975_v9 = vsub.f32 %v9969_v2, %v9974_v8  ;;  %v14590_v2 = vld [vmem:[%s27437_s10 + $0xb68] sm:$0xff]  ;;  %v21131_v8 = vpack.c.bf16 %v14592_v7, %v14591_v5 }
0x4b3f   : > { %v21128_v20 = vpack.c.bf16 %v14590_v2, %v14589_v43  ;;  %v21137_v2 = vpack.c.bf16 %v14601_v59, %v14600_v57  ;;  %v14603_v5 = vld [vmem:[%s27437_s10 + $0x7a8] sm:$0xff]  ;;  %v14677_v57 = vld [vmem:[%s27439_s12 + $0x840] sm:$0xff] }
0x4b40   : > { %v9976_v10 = vmul.f32 1.442695, %v9975_v9  ;;  %v14614_v9 = vld [vmem:[%s27437_s10 + $0x980] sm:$0xff]  ;;  %v14678_v59 = vld [vmem:[%s27439_s12 + $0x848] sm:$0xff] }
0x4b42   : > { %21693 = vpow2.f32 %v9976_v10  ;;  %v14615_v10 = vld [vmem:[%s27437_s10 + $0x988] sm:$0xff] }
0x4b4c   : > { %v21694_v11 = vpop.eup %21693 }
0x4b4d   : > { %v9978_v12 = vsel %vm865_vm1, %v21694_v11, 0.0 }
0x4b4e   : > { %9979 = vadd.xlane.f32.xlu0 %v9978_v12  ;;  %v14616_v12 = vld [vmem:[%s27437_s10 + $0x990] sm:$0xff] }
0x4bdb   : > { %v9980_v13 = vpop.xlane.xlu0 %9979 }
0x4bdc   : > { %21695 = vrcp.f32 %v9980_v13  ;;  %v14617_v13 = vld [vmem:[%s27437_s10 + $0x998] sm:$0xff] }
0x4be6   : > { %v21696_v4 = vpop.eup %21695 }
0x4be7   : > { %v9982_v15 = vmul.f32 %v21696_v4, %v21694_v11  ;;  %v21158_v11 = vpack.c.bf16 %v14615_v10, %v14614_v9  ;;  %v21161_v4 = vpack.c.bf16 %v14617_v13, %v14616_v12  ;;  %v14605_v9 = vld [vmem:[%s27437_s10 + $0x7b8] sm:$0xff]  ;;  %v14607_v12 = vld [vmem:[%s27437_s10 + $0x7c8] sm:$0xff] }
0x4be9   : > { %18784 = vmatmul.mubr.msk.f32.vlgmr.msra.gmra.mrb[102].mxu0 %vm865_vm1, %v9982_v15  ;;  %v14618_v15 = vld [vmem:[%s27437_s10 + $0x9a0] sm:$0xff] }
0x4bea   : > { %18787 = vmatpush3.msra.mxu0 %v14542_v61  ;;  %18788 = vmatprep.mubr.msk.f32.mxu0 %vm21802_vm0, %v21803_v51  ;;  %v14619_v61 = vld [vmem:[%s27437_s10 + $0x9a8] sm:$0xff] }
0x4beb   : > { %21061 = vmatprep.subr.bf16.mxu0 %v21801_v3  ;;  %v21164_v16 = vpack.c.bf16 %v14619_v61, %v14618_v15  ;;  %v14609_v15 = vld [vmem:[%s27437_s10 + $0x7d8] sm:$0xff] }
0x4cbc   : > { %v10052_v0 = vpop.f32.mrb[102].mxu0 }
0x4cbd   : > { %v18785_v18 = vpop.f32.mrb[103].mxu0  ;;  %18789 = vmatmul.mubr.msk.f32.vlgmr.msra.gmra.mrb[104].mxu0 %vm865_vm1, %v10052_v0  ;;  %v14623_v0 = vld [vmem:[%s27437_s10 + $0x9c8] sm:$0xff] }
0x4cbe   : > { %21063 = vmatpush3.bf16.msra.mxu0 %v21062_v53  ;;  %18828 = vmatprep.mubr.msk.f32.mxu0 %vm21802_vm0, %v21803_v51  ;;  %v14621_v53 = vld [vmem:[%s27437_s10 + $0x9b8] sm:$0xff]  ;;  %v21170_v18 = vpack.c.bf16 %v14623_v0, %v14622_v35 }
0x4cbf   : > { %21064 = vmatprep.subr.bf16.mxu0 %v21801_v3  ;;  %v21167_v17 = vpack.c.bf16 %v14621_v53, %v14620_v6  ;;  %v14611_v6 = vld [vmem:[%s27437_s10 + $0x7e8] sm:$0xff]  ;;  %v14613_v35 = vld [vmem:[%s27437_s10 + $0x7f8] sm:$0xff] }
0x4cc2   : > { %21066 = vmatpush3.bf16.msra.mxu0 %v21065_v19  ;;  %v14624_v19 = vld [vmem:[%s27437_s10 + $0x9d0] sm:$0xff] }
0x4cc3   : > { %21067 = vmatprep.subr.bf16.mxu0 %v21801_v3  ;;  %v21173_v21 = vpack.c.bf16 %v14625_v56, %v14624_v19  ;;  %v14631_v19 = vld [vmem:[%s27437_s10 + $0xb88] sm:$0xff] }
0x4cc6   : > { %21069 = vmatpush3.bf16.msra.mxu0 %v21068_v23  ;;  %v14626_v23 = vld [vmem:[%s27437_s10 + $0x9e0] sm:$0xff] }
0x4cc7   : > { %21070 = vmatprep.subr.bf16.mxu0 %v21801_v3  ;;  %v21176_v25 = vpack.c.bf16 %v14627_v24, %v14626_v23  ;;  %v14633_v23 = vld [vmem:[%s27437_s10 + $0xb98] sm:$0xff] }
0x4cca   : > { %21072 = vmatpush3.bf16.msra.mxu0 %v21071_v26  ;;  %v14628_v26 = vld [vmem:[%s27437_s10 + $0x9f0] sm:$0xff] }
0x4ccb   : > { %21073 = vmatprep.subr.bf16.mxu0 %v21801_v3  ;;  %v21179_v14 = vpack.c.bf16 %v14629_v39, %v14628_v26  ;;  %v14635_v26 = vld [vmem:[%s27437_s10 + $0xba8] sm:$0xff] }
0x4cce   : > { %21075 = vmatpush3.bf16.msra.mxu0 %v21074_v28 }
0x4ccf   : > { %21076 = vmatprep.subr.bf16.mxu0 %v21801_v3 }
0x4cd2   : > { %21078 = vmatpush3.bf16.msra.mxu0 %v21077_v33 }
0x4cd3   : > { %21079 = vmatprep.subr.bf16.mxu0 %v21801_v3 }
0x4cd6   : > { %21081 = vmatpush3.bf16.msra.mxu0 %v21080_v60 }
0x4cd7   : > { %21082 = vmatprep.subr.bf16.mxu0 %v21801_v3 }
0x4cda   : > { %21084 = vmatpush3.bf16.msra.mxu0 %v21083_v42  ;;  %v21735_v42 = vld [vmem:[%s27430_s3 + $0x10] sm:$0xff] }
0x4cdb   : > { %21109 = vmatprep.subr.bf16.mxu0 %v21801_v3 }
0x4cdd   : > { %18829 = vmatmul.mubr.f32.vlgmr.msra.gmra.mrb[106].mxu0 %v25720_v27 }
0x4cde   : > { %21111 = vmatpush3.bf16.msra.mxu0 %v21110_v44  ;;  %18898 = vmatprep.mubr.msk.f32.mxu0 %vm21802_vm0, %v21803_v51 }
0x4cdf   : > { %21112 = vmatprep.subr.bf16.mxu0 %v21801_v3 }
0x4ce2   : > { %21114 = vmatpush3.bf16.msra.mxu0 %v21113_v58 }
0x4ce3   : > { %21115 = vmatprep.subr.bf16.mxu0 %v21801_v3 }
0x4ce6   : > { %21117 = vmatpush3.bf16.msra.mxu0 %v21116_v48 }
0x4ce7   : > { %21118 = vmatprep.subr.bf16.mxu0 %v21801_v3 }
0x4cea   : > { %21120 = vmatpush3.bf16.msra.mxu0 %v21119_v31  ;;  %v14596_v31 = vld [vmem:[%s27438_s11 + $0x30] sm:$0xff] }
0x4ceb   : > { %21121 = vmatprep.subr.bf16.mxu0 %v21801_v3 }
0x4cee   : > { %21123 = vmatpush3.bf16.msra.mxu0 %v21122_v40  ;;  %v21134_v40 = vpack.c.bf16 %v14599_v30, %v14598_v52  ;;  %v14676_v30 = vld [vmem:[%s27439_s12 + $0x838] sm:$0xff] }
0x4cef   : > { %21124 = vmatprep.subr.bf16.mxu0 %v21801_v3 }
0x4cf2   : > { %21126 = vmatpush3.bf16.msra.mxu0 %v21125_v62 }
0x4cf3   : > { %21127 = vmatprep.subr.bf16.mxu0 %v21801_v3 }
0x4cf6   : > { %21129 = vmatpush3.bf16.msra.mxu0 %v21128_v20  ;;  %v14602_v20 = vld [vmem:[%s27437_s10 + $0x7a0] sm:$0xff] }
0x4cf7   : > { %21130 = vmatprep.subr.bf16.mxu0 %v21801_v3  ;;  %v21140_v7 = vpack.c.bf16 %v14603_v5, %v14602_v20  ;;  %v14681_v5 = vld [vmem:[%s27439_s12 + $0x860] sm:$0xff] }
0x4cfa   : > { %21132 = vmatpush3.bf16.msra.mxu0 %v21131_v8  ;;  %v14604_v8 = vld [vmem:[%s27437_s10 + $0x7b0] sm:$0xff] }
0x4cfb   : > { %21157 = vmatprep.subr.bf16.mxu0 %v21801_v3  ;;  %v21143_v10 = vpack.c.bf16 %v14605_v9, %v14604_v8  ;;  %v14683_v9 = vld [vmem:[%s27439_s12 + $0x870] sm:$0xff] }
0x4cfd   : > { %18899 = vmatmul.mubr.f32.vlgmr.msra.gmra.mrb[108].mxu0 %v25720_v27 }
0x4cfe   : > { %21159 = vmatpush3.bf16.msra.mxu0 %v21158_v11  ;;  %18983 = vmatprep.mubr.msk.f32.mxu0 %vm21802_vm0, %v21803_v51  ;;  %v14606_v11 = vld [vmem:[%s27437_s10 + $0x7c0] sm:$0xff] }
0x4cff   : > { %21160 = vmatprep.subr.bf16.mxu0 %v21801_v3  ;;  %v21146_v13 = vpack.c.bf16 %v14607_v12, %v14606_v11 }
0x4d02   : > { %21162 = vmatpush3.bf16.msra.mxu0 %v21161_v4  ;;  %v14608_v4 = vld [vmem:[%s27437_s10 + $0x7d0] sm:$0xff] }
0x4d03   : > { %21163 = vmatprep.subr.bf16.mxu0 %v21801_v3  ;;  %v21149_v61 = vpack.c.bf16 %v14609_v15, %v14608_v4 }
0x4d06   : > { %21165 = vmatpush3.bf16.msra.mxu0 %v21164_v16  ;;  %v14610_v16 = vld [vmem:[%s27437_s10 + $0x7e0] sm:$0xff] }
0x4d07   : > { %21166 = vmatprep.subr.bf16.mxu0 %v21801_v3  ;;  %v21152_v53 = vpack.c.bf16 %v14611_v6, %v14610_v16 }
0x4d0a   : > { %21168 = vmatpush3.bf16.msra.mxu0 %v21167_v17  ;;  %v14612_v17 = vld [vmem:[%s27437_s10 + $0x7f0] sm:$0xff] }
0x4d0b   : > { %21169 = vmatprep.subr.bf16.mxu0 %v21801_v3  ;;  %v21155_v0 = vpack.c.bf16 %v14613_v35, %v14612_v17  ;;  %v21736_v35 = vld [vmem:[%s27430_s3 + $0x18] sm:$0xff] }
0x4d0e   : > { %21171 = vmatpush3.bf16.msra.mxu0 %v21170_v18  ;;  %v14630_v18 = vld [vmem:[%s27437_s10 + $0xb80] sm:$0xff] }
0x4d0f   : > { %21172 = vmatprep.subr.bf16.mxu0 %v21801_v3  ;;  %v21182_v56 = vpack.c.bf16 %v14631_v19, %v14630_v18 }
0x4d12   : > { %21174 = vmatpush3.bf16.msra.mxu0 %v21173_v21  ;;  %v14632_v21 = vld [vmem:[%s27437_s10 + $0xb90] sm:$0xff] }
0x4d13   : > { %21175 = vmatprep.subr.bf16.mxu0 %v21801_v3  ;;  %v21185_v24 = vpack.c.bf16 %v14633_v23, %v14632_v21 }
0x4d16   : > { %21177 = vmatpush3.bf16.msra.mxu0 %v21176_v25  ;;  %v14634_v25 = vld [vmem:[%s27437_s10 + $0xba0] sm:$0xff] }
0x4d17   : > { %21178 = vmatprep.subr.bf16.mxu0 %v21801_v3  ;;  %v21188_v39 = vpack.c.bf16 %v14635_v26, %v14634_v25 }
0x4d1a   : > { %21180 = vmatpush3.bf16.msra.mxu0 %v21179_v14  ;;  %v14636_v14 = vld [vmem:[%s27437_s10 + $0xbb0] sm:$0xff] }
0x4d1b   : > { %19021 = vmatprep.subr.mxu0 %v21803_v51 }
0x4d1d   : > { %18984 = vmatmul.mubr.f32.vlgmr.msra.gmra.mrb[110].mxu0 %v25720_v27 }
0x4d1e   : > { %19023 = vmatprep.mubr.msk.f32.mxu0 %vm21802_vm0, %v21803_v51 }
0x4d90   : > { %v10127_v28 = vpop.f32.mrb[104].mxu0 }
0x4d91   : > { %v26241_v29 = vadd.f32 %v26044_v54, %v10127_v28  ;;  %v18790_v32 = vpop.f32.mrb[105].mxu0  ;;  %v14637_v28 = vld [vmem:[%s27437_s10 + $0xbb8] sm:$0xff] }
0x4d92   : > { %v21191_v32 = vpack.c.bf16 %v14637_v28, %v14636_v14  ;;  %v14649_v28 = vld [vmem:[%s27438_s11 + $0x38] sm:$0xff] }
0x4db0   : > { %v10287_v33 = vpop.f32.mrb[106].mxu0 }
0x4db1   : > { %v18830_v37 = vpop.f32.mrb[107].mxu0  ;;  %18904 = vmatmul.mubr.msk.f32.vlgmr.msra.gmra.mrb[124].mxu1 %vm865_vm1, %v10287_v33  ;;  %v14638_v33 = vld [vmem:[%s27437_s10 + $0xbc0] sm:$0xff] }
0x4db2   : > { %18908 = vmatprep.mubr.msk.f32.mxu1 %vm21802_vm0, %v21803_v51  ;;  %v14639_v37 = vld [vmem:[%s27437_s10 + $0xbc8] sm:$0xff] }
0x4dd0   : > { %v10461_v38 = vpop.f32.mrb[108].mxu0 }
0x4dd1   : > { %v18900_v60 = vpop.f32.mrb[109].mxu0  ;;  %18907 = vmatpush3.msra.mxu1 %v10461_v38  ;;  %v21194_v38 = vpack.c.bf16 %v14639_v37, %v14638_v33  ;;  %v14653_v37 = vld [vmem:[%s27439_s12 + $0x600] sm:$0xff] }
0x4dd2   : > { %18911 = vmatprep.subr.mxu1 %v21803_v51  ;;  %v14640_v60 = vld [vmem:[%s27437_s10 + $0xbd0] sm:$0xff] }
0x4df0   : > { %v10871_v22 = vpop.f32.mrb[110].mxu0 }
0x4df1   : > { %v18985_v41 = vpop.f32.mrb[111].mxu0  ;;  %19022 = vmatpush3.xpose.msk.msra.mxu0 %vm865_vm1, %v10871_v22  ;;  %v14641_v22 = vld [vmem:[%s27437_s10 + $0xbd8] sm:$0xff] }
0x4df2   : > { %19026 = vmatprep.subr.mxu0 %v21803_v51  ;;  %v21197_v41 = vpack.c.bf16 %v14641_v22, %v14640_v60  ;;  %v14655_v60 = vld [vmem:[%s27439_s12 + $0x610] sm:$0xff] }
0x4e84   : > { %v10537_v54 = vpop.f32.mrb[124].mxu1 }
0x4e85   : > { %v10538_v34 = vadd.f32 %v21735_v42, %v10537_v54  ;;  %v18905_v36 = vpop.f32.mrb[125].mxu1  ;;  %v14642_v54 = vld [vmem:[%s27437_s10 + $0xbe0] sm:$0xff]  ;;  %v14643_v42 = vld [vmem:[%s27437_s10 + $0xbe8] sm:$0xff] }
0x4e86   : > { %v14644_v36 = vld [vmem:[%s27437_s10 + $0xbf0] sm:$0xff] }
0x4e87   : > { %v10541_v44 = vsel %vm865_vm1, %v10538_v34, -inf }
0x4e88   : > { %10542 = vmax.xlane.f32.xlu1 %v10541_v44  ;;  %v14645_v44 = vld [vmem:[%s27437_s10 + $0xbf8] sm:$0xff] }
0x4f15   : > { %v10543_v45 = vpop.xlane.xlu1 %10542 }
0x4f16   : > { %v10544_v63 = vsub.f32 %v10538_v34, %v10543_v45  ;;  %v21200_v34 = vpack.c.bf16 %v14643_v42, %v14642_v54  ;;  %v21203_v45 = vpack.c.bf16 %v14645_v44, %v14644_v36  ;;  %v14657_v42 = vld [vmem:[%s27439_s12 + $0x620] sm:$0xff]  ;;  %v14659_v44 = vld [vmem:[%s27439_s12 + $0x630] sm:$0xff] }
0x4f18   : > { %v10545_v58 = vmul.f32 1.442695, %v10544_v63  ;;  %v14669_v63 = vld [vmem:[%s27439_s12 + $0x800] sm:$0xff] }
0x4f1a   : > { %21697 = vpow2.f32 %v10545_v58  ;;  %v14670_v58 = vld [vmem:[%s27439_s12 + $0x808] sm:$0xff] }
0x4f24   : > { %v21698_v46 = vpop.eup %21697 }
0x4f25   : > { %v10547_v47 = vsel %vm865_vm1, %v21698_v46, 0.0 }
0x4f26   : > { %10548 = vadd.xlane.f32.xlu0 %v10547_v47  ;;  %v14671_v47 = vld [vmem:[%s27439_s12 + $0x810] sm:$0xff] }
0x4fb3   : > { %v10549_v48 = vpop.xlane.xlu0 %10548 }
0x4fb4   : > { %21699 = vrcp.f32 %v10549_v48  ;;  %v14672_v48 = vld [vmem:[%s27439_s12 + $0x818] sm:$0xff] }
0x4fbe   : > { %v21700_v49 = vpop.eup %21699 }
0x4fbf   : > { %v10551_v50 = vmul.f32 %v21700_v49, %v21698_v46  ;;  %v21230_v46 = vpack.c.bf16 %v14670_v58, %v14669_v63  ;;  %v21233_v49 = vpack.c.bf16 %v14672_v48, %v14671_v47 }
0x4fc1   : > { %18909 = vmatmul.mubr.msk.f32.vlgmr.msra.gmra.mrb[126].mxu1 %vm865_vm1, %v10551_v50  ;;  %v14673_v50 = vld [vmem:[%s27439_s12 + $0x820] sm:$0xff] }
0x4fc2   : > { %18912 = vmatpush3.msra.mxu1 %v14596_v31  ;;  %18913 = vmatprep.mubr.msk.f32.mxu1 %vm21802_vm0, %v21803_v51  ;;  %v14674_v31 = vld [vmem:[%s27439_s12 + $0x828] sm:$0xff] }
0x4fc3   : > { %21133 = vmatprep.subr.bf16.mxu1 %v21801_v3  ;;  %v21236_v52 = vpack.c.bf16 %v14674_v31, %v14673_v50  ;;  %v14661_v50 = vld [vmem:[%s27439_s12 + $0x640] sm:$0xff]  ;;  %v14662_v31 = vld [vmem:[%s27439_s12 + $0x648] sm:$0xff] }
0x5094   : > { %v10621_v62 = vpop.f32.mrb[126].mxu1 }
0x5095   : > { %v18910_v43 = vpop.f32.mrb[127].mxu1  ;;  %18914 = vmatmul.mubr.msk.f32.vlgmr.msra.gmra.mrb[128].mxu1 %vm865_vm1, %v10621_v62  ;;  %v21242_v62 = vpack.c.bf16 %v14678_v59, %v14677_v57  ;;  %v14666_v57 = vld [vmem:[%s27439_s12 + $0x668] sm:$0xff] }
0x5096   : > { %21135 = vmatpush3.bf16.msra.mxu1 %v21134_v40  ;;  %18948 = vmatprep.mubr.msk.f32.mxu1 %vm21802_vm0, %v21803_v51  ;;  %v14679_v43 = vld [vmem:[%s27439_s12 + $0x850] sm:$0xff] }
0x5097   : > { %21136 = vmatprep.subr.bf16.mxu1 %v21801_v3 }
0x509a   : > { %21138 = vmatpush3.bf16.msra.mxu1 %v21137_v2  ;;  %v14680_v2 = vld [vmem:[%s27439_s12 + $0x858] sm:$0xff] }
0x509b   : > { %21139 = vmatprep.subr.bf16.mxu1 %v21801_v3  ;;  %v21245_v20 = vpack.c.bf16 %v14680_v2, %v14679_v43  ;;  %v14668_v43 = vld [vmem:[%s27439_s12 + $0x678] sm:$0xff] }
0x509e   : > { %21141 = vmatpush3.bf16.msra.mxu1 %v21140_v7  ;;  %v14682_v7 = vld [vmem:[%s27439_s12 + $0x868] sm:$0xff] }
0x509f   : > { %21142 = vmatprep.subr.bf16.mxu1 %v21801_v3  ;;  %v21248_v8 = vpack.c.bf16 %v14682_v7, %v14681_v5 }
0x50a2   : > { %21144 = vmatpush3.bf16.msra.mxu1 %v21143_v10  ;;  %v14684_v10 = vld [vmem:[%s27439_s12 + $0x878] sm:$0xff] }
0x50a3   : > { %21145 = vmatprep.subr.bf16.mxu1 %v21801_v3  ;;  %v21251_v11 = vpack.c.bf16 %v14684_v10, %v14683_v9  ;;  %v14686_v9 = vld [vmem:[%s27439_s12 + $0xa08] sm:$0xff] }
0x50a6   : > { %21147 = vmatpush3.bf16.msra.mxu1 %v21146_v13 }
0x50a7   : > { %21148 = vmatprep.subr.bf16.mxu1 %v21801_v3 }
0x50aa   : > { %21150 = vmatpush3.bf16.msra.mxu1 %v21149_v61 }
0x50ab   : > { %21151 = vmatprep.subr.bf16.mxu1 %v21801_v3 }
0x50ae   : > { %21153 = vmatpush3.bf16.msra.mxu1 %v21152_v53 }
0x50af   : > { %21154 = vmatprep.subr.bf16.mxu1 %v21801_v3 }
0x50b2   : > { %21156 = vmatpush3.bf16.msra.mxu1 %v21155_v0 }
0x50b3   : > { %21181 = vmatprep.subr.bf16.mxu1 %v21801_v3 }
0x50b5   : > { %18949 = vmatmul.mubr.f32.vlgmr.msra.gmra.mrb[130].mxu1 %v25720_v27 }
0x50b6   : > { %21183 = vmatpush3.bf16.msra.mxu1 %v21182_v56  ;;  %19018 = vmatprep.mubr.msk.f32.mxu1 %vm21802_vm0, %v21803_v51 }
0x50b7   : > { %21184 = vmatprep.subr.bf16.mxu1 %v21801_v3 }
0x50ba   : > { %21186 = vmatpush3.bf16.msra.mxu1 %v21185_v24 }
0x50bb   : > { %21187 = vmatprep.subr.bf16.mxu1 %v21801_v3 }
0x50be   : > { %21189 = vmatpush3.bf16.msra.mxu1 %v21188_v39 }
0x50bf   : > { %21190 = vmatprep.subr.bf16.mxu1 %v21801_v3 }
0x50c2   : > { %21192 = vmatpush3.bf16.msra.mxu1 %v21191_v32 }
0x50c3   : > { %21193 = vmatprep.subr.bf16.mxu1 %v21801_v3 }
0x50c6   : > { %21195 = vmatpush3.bf16.msra.mxu1 %v21194_v38  ;;  %v14654_v38 = vld [vmem:[%s27439_s12 + $0x608] sm:$0xff] }
0x50c7   : > { %21196 = vmatprep.subr.bf16.mxu1 %v21801_v3  ;;  %v21206_v22 = vpack.c.bf16 %v14654_v38, %v14653_v37  ;;  %v14722_v37 = vld [vmem:[%s27439_s12 + $0x888] sm:$0xff] }
0x50ca   : > { %21198 = vmatpush3.bf16.msra.mxu1 %v21197_v41  ;;  %v14656_v41 = vld [vmem:[%s27439_s12 + $0x618] sm:$0xff] }
0x50cb   : > { %21199 = vmatprep.subr.bf16.mxu1 %v21801_v3  ;;  %v21209_v54 = vpack.c.bf16 %v14656_v41, %v14655_v60  ;;  %v14723_v60 = vld [vmem:[%s27439_s12 + $0x890] sm:$0xff] }
0x50ce   : > { %21201 = vmatpush3.bf16.msra.mxu1 %v21200_v34  ;;  %v14658_v34 = vld [vmem:[%s27439_s12 + $0x628] sm:$0xff] }
0x50cf   : > { %21202 = vmatprep.subr.bf16.mxu1 %v21801_v3  ;;  %v21212_v36 = vpack.c.bf16 %v14658_v34, %v14657_v42  ;;  %v14726_v42 = vld [vmem:[%s27439_s12 + $0x8a8] sm:$0xff] }
0x50d2   : > { %21204 = vmatpush3.bf16.msra.mxu1 %v21203_v45  ;;  %v14660_v45 = vld [vmem:[%s27439_s12 + $0x638] sm:$0xff] }
0x50d3   : > { %21229 = vmatprep.subr.bf16.mxu1 %v21801_v3  ;;  %v21215_v63 = vpack.c.bf16 %v14660_v45, %v14659_v44  ;;  %v14728_v44 = vld [vmem:[%s27439_s12 + $0x8b8] sm:$0xff] }
0x50d5   : > { %19019 = vmatmul.mubr.f32.vlgmr.msra.gmra.mrb[132].mxu1 %v25720_v27  ;;  %v14675_v27 = vld [vmem:[%s27439_s12 + $0x830] sm:$0xff] }
0x50d6   : > { %21231 = vmatpush3.bf16.msra.mxu1 %v21230_v46  ;;  %19103 = vmatprep.mubr.msk.f32.mxu1 %vm21802_vm0, %v21803_v51  ;;  %v21239_v40 = vpack.c.bf16 %v14676_v30, %v14675_v27  ;;  %v14664_v27 = vld [vmem:[%s27439_s12 + $0x658] sm:$0xff]  ;;  %v14665_v30 = vld [vmem:[%s27439_s12 + $0x660] sm:$0xff] }
0x50d7   : > { %21232 = vmatprep.subr.bf16.mxu1 %v21801_v3  ;;  %v21224_v59 = vpack.c.bf16 %v14666_v57, %v14665_v30  ;;  %v14736_v30 = vld [vmem:[%s27439_s12 + $0x8f8] sm:$0xff] }
0x50da   : > { %21234 = vmatpush3.bf16.msra.mxu1 %v21233_v49 }
0x50db   : > { %21235 = vmatprep.subr.bf16.mxu1 %v21801_v3 }
0x50de   : > { %21237 = vmatpush3.bf16.msra.mxu1 %v21236_v52  ;;  %v21218_v52 = vpack.c.bf16 %v14662_v31, %v14661_v50  ;;  %v14733_v31 = vld [vmem:[%s27439_s12 + $0x8e0] sm:$0xff] }
0x50df   : > { %21238 = vmatprep.subr.bf16.mxu1 %v21801_v3 }
0x50e2   : > { %21240 = vmatpush3.bf16.msra.mxu1 %v21239_v40 }
0x50e3   : > { %21241 = vmatprep.subr.bf16.mxu1 %v21801_v3 }
0x50e6   : > { %21243 = vmatpush3.bf16.msra.mxu1 %v21242_v62  ;;  %v14667_v62 = vld [vmem:[%s27439_s12 + $0x670] sm:$0xff] }
0x50e7   : > { %21244 = vmatprep.subr.bf16.mxu1 %v21801_v3  ;;  %v21227_v2 = vpack.c.bf16 %v14668_v43, %v14667_v62 }
0x50ea   : > { %21246 = vmatpush3.bf16.msra.mxu1 %v21245_v20 }
0x50eb   : > { %21247 = vmatprep.subr.bf16.mxu1 %v21801_v3 }
0x50ee   : > { %21249 = vmatpush3.bf16.msra.mxu1 %v21248_v8  ;;  %v14685_v8 = vld [vmem:[%s27439_s12 + $0xa00] sm:$0xff] }
0x50ef   : > { %21250 = vmatprep.subr.bf16.mxu1 %v21801_v3 }
0x50f2   : > { %21252 = vmatpush3.bf16.msra.mxu1 %v21251_v11  ;;  %v14652_v11 = vld [vmem:[%s27436_s9 + $0x4] ss:$0 sm:$0xff] }
0x50f3   : > { %19141 = vmatprep.subr.mxu1 %v21803_v51 }
0x50f5   : > { %19104 = vmatmul.mubr.f32.vlgmr.msra.gmra.mrb[134].mxu1 %v24714_v1 }
0x50f6   : > { %19143 = vmatprep.mubr.msk.f32.mxu1 %vm21802_vm0, %v21803_v51 }
0x5168   : > { %v10696_v12 = vpop.f32.mrb[128].mxu1 }
0x5169   : > { %v10700_v13 = vadd.f32 %v10696_v12, %v26241_v29  ;;  %v18915_v4 = vpop.f32.mrb[129].mxu1 }
0x5188   : > { %v10784_v15 = vpop.f32.mrb[130].mxu1 }
0x5189   : > { %v18950_v61 = vpop.f32.mrb[131].mxu1  ;;  %19024 = vmatmul.mubr.msk.f32.vlgmr.msra.gmra.mrb[112].mxu0 %vm865_vm1, %v10784_v15  ;;  %v14687_v15 = vld [vmem:[%s27439_s12 + $0xa10] sm:$0xff] }
0x518a   : > { %19028 = vmatprep.mubr.msk.f32.mxu0 %vm21802_vm0, %v21803_v51  ;;  %v14688_v61 = vld [vmem:[%s27439_s12 + $0xa18] sm:$0xff] }
0x51a8   : > { %v10958_v16 = vpop.f32.mrb[132].mxu1 }
0x51a9   : > { %v19020_v6 = vpop.f32.mrb[133].mxu1  ;;  %19027 = vmatpush3.msra.mxu0 %v10958_v16  ;;  %v21257_v16 = vpack.c.bf16 %v14688_v61, %v14687_v15  ;;  %v14705_v61 = vld [vmem:[%s27439_s12 + $0x680] sm:$0xff] }
0x51aa   : > { %19031 = vmatprep.subr.mxu0 %v21803_v51  ;;  %v14689_v6 = vld [vmem:[%s27439_s12 + $0xa20] sm:$0xff] }
0x51c8   : > { %v11385_v53 = vpop.f32.mrb[134].mxu1 }
0x51c9   : > { %v19105_v17 = vpop.f32.mrb[135].mxu1  ;;  %19142 = vmatpush3.xpose.msk.msra.mxu1 %vm865_vm1, %v11385_v53  ;;  %v14690_v53 = vld [vmem:[%s27439_s12 + $0xa28] sm:$0xff] }
0x51ca   : > { %19146 = vmatprep.subr.mxu1 %v21803_v51  ;;  %v21260_v17 = vpack.c.bf16 %v14690_v53, %v14689_v6 }
0x525c   : > { %v11034_v29 = vpop.f32.mrb[112].mxu0 }
0x525d   : > { %v11035_v0 = vadd.f32 %v21736_v35, %v11034_v29  ;;  %v19025_v18 = vpop.f32.mrb[113].mxu0  ;;  %v14691_v29 = vld [vmem:[%s27439_s12 + $0xa30] sm:$0xff]  ;;  %v14692_v35 = vld [vmem:[%s27439_s12 + $0xa38] sm:$0xff] }
0x525e   : > { %v14693_v18 = vld [vmem:[%s27439_s12 + $0xa40] sm:$0xff] }
0x525f   : > { %v11038_v19 = vsel %vm865_vm1, %v11035_v0, -inf }
0x5260   : > { %11039 = vmax.xlane.f32.xlu1 %v11038_v19  ;;  %v14694_v19 = vld [vmem:[%s27439_s12 + $0xa48] sm:$0xff] }
0x52ed   : > { %v11040_v56 = vpop.xlane.xlu1 %11039 }
0x52ee   : > { %v11041_v21 = vsub.f32 %v11035_v0, %v11040_v56  ;;  %v21263_v0 = vpack.c.bf16 %v14692_v35, %v14691_v29  ;;  %v21266_v56 = vpack.c.bf16 %v14694_v19, %v14693_v18  ;;  %v14707_v29 = vld [vmem:[%s27439_s12 + $0x690] sm:$0xff]  ;;  %v14708_v35 = vld [vmem:[%s27439_s12 + $0x698] sm:$0xff]  ;;  %v14709_v18 = vld [vmem:[%s27439_s12 + $0x6a0] sm:$0xff] }
0x52ef   : > { %v14710_v19 = vld [vmem:[%s27439_s12 + $0x6a8] sm:$0xff] }
0x52f0   : > { %v11042_v23 = vmul.f32 1.442695, %v11041_v21  ;;  %v14695_v21 = vld [vmem:[%s27439_s12 + $0xa50] sm:$0xff] }
0x52f2   : > { %21701 = vpow2.f32 %v11042_v23  ;;  %v14696_v23 = vld [vmem:[%s27439_s12 + $0xa58] sm:$0xff] }
0x52fc   : > { %v21702_v24 = vpop.eup %21701 }
0x52fd   : > { %v11044_v25 = vsel %vm865_vm1, %v21702_v24, 0.0 }
0x52fe   : > { %11045 = vadd.xlane.f32.xlu0 %v11044_v25  ;;  %v14697_v25 = vld [vmem:[%s27439_s12 + $0xa60] sm:$0xff] }
0x538b   : > { %v11046_v26 = vpop.xlane.xlu0 %11045 }
0x538c   : > { %21703 = vrcp.f32 %v11046_v26  ;;  %v14698_v26 = vld [vmem:[%s27439_s12 + $0xa68] sm:$0xff] }
0x5396   : > { %v21704_v39 = vpop.eup %21703 }
0x5397   : > { %v11048_v14 = vmul.f32 %v21704_v39, %v21702_v24  ;;  %v21269_v24 = vpack.c.bf16 %v14696_v23, %v14695_v21  ;;  %v21272_v39 = vpack.c.bf16 %v14698_v26, %v14697_v25  ;;  %v14711_v21 = vld [vmem:[%s27439_s12 + $0x6b0] sm:$0xff]  ;;  %v14712_v23 = vld [vmem:[%s27439_s12 + $0x6b8] sm:$0xff]  ;;  %v14713_v25 = vld [vmem:[%s27439_s12 + $0x6c0] sm:$0xff] }
0x5398   : > { %v14714_v26 = vld [vmem:[%s27439_s12 + $0x6c8] sm:$0xff] }
0x5399   : > { %19029 = vmatmul.mubr.msk.f32.vlgmr.msra.gmra.mrb[114].mxu0 %vm865_vm1, %v11048_v14  ;;  %v14699_v14 = vld [vmem:[%s27439_s12 + $0xa70] sm:$0xff] }
0x539a   : > { %19032 = vmatpush3.msra.mxu0 %v14649_v28  ;;  %19033 = vmatprep.mubr.msk.f32.mxu0 %vm21802_vm0, %v21803_v51  ;;  %v14700_v28 = vld [vmem:[%s27439_s12 + $0xa78] sm:$0xff] }
0x539b   : > { %21205 = vmatprep.subr.bf16.mxu0 %v21801_v3 }
0x546c   : > { %v11118_v32 = vpop.f32.mrb[114].mxu0 }
0x546d   : > { %v19030_v33 = vpop.f32.mrb[115].mxu0  ;;  %19034 = vmatmul.mubr.msk.f32.vlgmr.msra.gmra.mrb[116].mxu0 %vm865_vm1, %v11118_v32  ;;  %v21275_v32 = vpack.c.bf16 %v14700_v28, %v14699_v14  ;;  %v14715_v14 = vld [vmem:[%s27439_s12 + $0x6d0] sm:$0xff]  ;;  %v14716_v28 = vld [vmem:[%s27439_s12 + $0x6d8] sm:$0xff] }
0x546e   : > { %19068 = vmatprep.mubr.msk.f32.mxu0 %vm21802_vm0, %v21803_v51  ;;  %21207 = vmatpush3.bf16.msra.mxu0 %v21206_v22  ;;  %v14721_v33 = vld [vmem:[%s27439_s12 + $0x880] sm:$0xff]  ;;  %v14724_v22 = vld [vmem:[%s27439_s12 + $0x898] sm:$0xff] }
0x546f   : > { %21208 = vmatprep.subr.bf16.mxu0 %v21801_v3  ;;  %v21302_v38 = vpack.c.bf16 %v14722_v37, %v14721_v33  ;;  %v21305_v41 = vpack.c.bf16 %v14724_v22, %v14723_v60  ;;  %v14717_v33 = vld [vmem:[%s27439_s12 + $0x6e0] sm:$0xff]  ;;  %v14718_v37 = vld [vmem:[%s27439_s12 + $0x6e8] sm:$0xff]  ;;  %v14719_v60 = vld [vmem:[%s27439_s12 + $0x6f0] sm:$0xff] }
0x5470   : > { %v14720_v22 = vld [vmem:[%s27439_s12 + $0x6f8] sm:$0xff] }
0x5472   : > { %21210 = vmatpush3.bf16.msra.mxu0 %v21209_v54  ;;  %v14725_v54 = vld [vmem:[%s27439_s12 + $0x8a0] sm:$0xff] }
0x5473   : > { %21211 = vmatprep.subr.bf16.mxu0 %v21801_v3  ;;  %v21308_v34 = vpack.c.bf16 %v14726_v42, %v14725_v54  ;;  %v14737_v54 = vld [vmem:[%s27439_s12 + $0xa80] sm:$0xff]  ;;  %v14738_v42 = vld [vmem:[%s27439_s12 + $0xa88] sm:$0xff] }
0x5476   : > { %21213 = vmatpush3.bf16.msra.mxu0 %v21212_v36  ;;  %v14727_v36 = vld [vmem:[%s27439_s12 + $0x8b0] sm:$0xff] }
0x5477   : > { %21214 = vmatprep.subr.bf16.mxu0 %v21801_v3  ;;  %v21311_v45 = vpack.c.bf16 %v14728_v44, %v14727_v36  ;;  %v14739_v36 = vld [vmem:[%s27439_s12 + $0xa90] sm:$0xff]  ;;  %v14740_v44 = vld [vmem:[%s27439_s12 + $0xa98] sm:$0xff] }
0x547a   : > { %21216 = vmatpush3.bf16.msra.mxu0 %v21215_v63  ;;  %v14729_v63 = vld [vmem:[%s27439_s12 + $0x8c0] sm:$0xff] }
0x547b   : > { %21217 = vmatprep.subr.bf16.mxu0 %v21801_v3 }
0x547e   : > { %21219 = vmatpush3.bf16.msra.mxu0 %v21218_v52  ;;  %v14734_v52 = vld [vmem:[%s27439_s12 + $0x8e8] sm:$0xff] }
0x547f   : > { %21220 = vmatprep.subr.bf16.mxu0 %v21801_v3 }
0x5540   : > { %v11193_v58 = vpop.f32.mrb[116].mxu0 }
0x5541   : > { %v11197_v46 = vadd.f32 %v11193_v58, %v10700_v13  ;;  %v19035_v47 = vpop.f32.mrb[117].mxu0  ;;  %v21254_v13 = vpack.c.bf16 %v14686_v9, %v14685_v8  ;;  %v14730_v58 = vld [vmem:[%s27439_s12 + $0x8c8] sm:$0xff] }
0x5542   : > { %v14731_v47 = vld [vmem:[%s27439_s12 + $0x8d0] sm:$0xff] }
0x5543   : > { %v26492_v48 = vadd.f32 %v11197_v46, %v25643_v55  ;;  %v14663_v55 = vld [vmem:[%s27439_s12 + $0x650] sm:$0xff]  ;;  %v21314_v46 = vpack.c.bf16 %v14730_v58, %v14729_v63  ;;  %v14741_v63 = vld [vmem:[%s27439_s12 + $0xaa0] sm:$0xff]  ;;  %v14742_v58 = vld [vmem:[%s27439_s12 + $0xaa8] sm:$0xff] }
0x5544   : > { %v21221_v40 = vpack.c.bf16 %v14664_v27, %v14663_v55  ;;  %v21320_v55 = vpack.c.bf16 %v14734_v52, %v14733_v31  ;;  %v14735_v27 = vld [vmem:[%s27439_s12 + $0x8f0] sm:$0xff]  ;;  %v14745_v31 = vld [vmem:[%s27439_s12 + $0xac0] sm:$0xff]  ;;  %v14746_v52 = vld [vmem:[%s27439_s12 + $0xac8] sm:$0xff] }
0x5545   : > { %v11201_v49 = vmul.f32 %v26492_v48, %v26492_v48 }
0x5546   : > { %21222 = vmatpush3.bf16.msra.mxu0 %v21221_v40  ;;  %v21323_v40 = vpack.c.bf16 %v14736_v30, %v14735_v27  ;;  %v14747_v27 = vld [vmem:[%s27439_s12 + $0xad0] sm:$0xff]  ;;  %v14748_v30 = vld [vmem:[%s27439_s12 + $0xad8] sm:$0xff] }
0x5547   : > { %11202 = vadd.xlane.f32.xlu1 %v11201_v49  ;;  %21223 = vmatprep.subr.bf16.mxu0 %v21801_v3  ;;  %v14732_v49 = vld [vmem:[%s27439_s12 + $0x8d8] sm:$0xff] }
0x5548   : > { %v21317_v50 = vpack.c.bf16 %v14732_v49, %v14731_v47  ;;  %v14743_v47 = vld [vmem:[%s27439_s12 + $0xab0] sm:$0xff]  ;;  %v14744_v49 = vld [vmem:[%s27439_s12 + $0xab8] sm:$0xff] }
0x554a   : > { %21225 = vmatpush3.bf16.msra.mxu0 %v21224_v59 }
0x554b   : > { %21226 = vmatprep.subr.bf16.mxu0 %v21801_v3 }
0x554e   : > { %21228 = vmatpush3.bf16.msra.mxu0 %v21227_v2 }
0x554f   : > { %21253 = vmatprep.subr.bf16.mxu0 %v21801_v3 }
0x55d4   : > { %v11203_v20 = vpop.xlane.xlu1 %11202 }
0x55d5   : > { %v11204_v5 = vmul.f32 0.03125, %v11203_v20 }
0x55d7   : > { %v11205_v7 = vadd.f32 1e-06, %v11204_v5 }
0x55d9   : > { %21705 = vrsqrt.f32 %v11205_v7 }
0x55e3   : > { %v21706_v10 = vpop.eup %21705 }
0x55e4   : > { %v11207_v12 = vmul.f32 %v21706_v10, %v26492_v48 }
0x55e6   : > { %v26534_v4 = vmul.f32 %v14652_v11, %v11207_v12 }
0x55e8   : > { %19069 = vmatmul.mubr.f32.vlgmr.msra.gmra.mrb[118].mxu0 %v26534_v4 }
0x55e9   : > { %21255 = vmatpush3.bf16.msra.mxu0 %v21254_v13  ;;  %19138 = vmatprep.mubr.msk.f32.mxu0 %vm21802_vm0, %v21803_v51 }
0x55ea   : > { %21256 = vmatprep.subr.bf16.mxu0 %v21801_v3 }
0x55ed   : > { %21258 = vmatpush3.bf16.msra.mxu0 %v21257_v16  ;;  %v14706_v16 = vld [vmem:[%s27439_s12 + $0x688] sm:$0xff] }
0x55ee   : > { %21259 = vmatprep.subr.bf16.mxu0 %v21801_v3  ;;  %v21278_v53 = vpack.c.bf16 %v14706_v16, %v14705_v61  ;;  %v14779_v61 = vld [vmem:[%s27439_s12 + $0x920] sm:$0xff]  ;;  %v14780_v16 = vld [vmem:[%s27439_s12 + $0x928] sm:$0xff] }
0x55f1   : > { %21261 = vmatpush3.bf16.msra.mxu0 %v21260_v17 }
0x55f2   : > { %21262 = vmatprep.subr.bf16.mxu0 %v21801_v3 }
0x55f5   : > { %21264 = vmatpush3.bf16.msra.mxu0 %v21263_v0  ;;  %v21281_v0 = vpack.c.bf16 %v14708_v35, %v14707_v29  ;;  %v14783_v35 = vld [vmem:[%s27439_s12 + $0x940] sm:$0xff] }
0x55f6   : > { %21265 = vmatprep.subr.bf16.mxu0 %v21801_v3 }
0x55f9   : > { %21267 = vmatpush3.bf16.msra.mxu0 %v21266_v56  ;;  %v21284_v56 = vpack.c.bf16 %v14710_v19, %v14709_v18  ;;  %v14785_v19 = vld [vmem:[%s27439_s12 + $0x950] sm:$0xff] }
0x55fa   : > { %21268 = vmatprep.subr.bf16.mxu0 %v21801_v3 }
0x55fd   : > { %21270 = vmatpush3.bf16.msra.mxu0 %v21269_v24  ;;  %v21287_v24 = vpack.c.bf16 %v14712_v23, %v14711_v21  ;;  %v14787_v23 = vld [vmem:[%s27439_s12 + $0x960] sm:$0xff] }
0x55fe   : > { %21271 = vmatprep.subr.bf16.mxu0 %v21801_v3 }
0x5601   : > { %21273 = vmatpush3.bf16.msra.mxu0 %v21272_v39  ;;  %v21290_v39 = vpack.c.bf16 %v14714_v26, %v14713_v25  ;;  %v14789_v26 = vld [vmem:[%s27439_s12 + $0x970] sm:$0xff] }
0x5602   : > { %21274 = vmatprep.subr.bf16.mxu0 %v21801_v3 }
0x5605   : > { %21276 = vmatpush3.bf16.msra.mxu0 %v21275_v32  ;;  %v21293_v32 = vpack.c.bf16 %v14716_v28, %v14715_v14 }
0x5606   : > { %21301 = vmatprep.subr.bf16.mxu0 %v21801_v3 }
0x5608   : > { %19139 = vmatmul.mubr.f32.vlgmr.msra.gmra.mrb[120].mxu0 %v24714_v1 }
0x5609   : > { %21303 = vmatpush3.bf16.msra.mxu0 %v21302_v38  ;;  %19218 = vmatprep.mubr.msk.f32.mxu0 %vm21802_vm0, %v21803_v51  ;;  %v21296_v38 = vpack.c.bf16 %v14718_v37, %v14717_v33 }
0x560a   : > { %21304 = vmatprep.subr.bf16.mxu0 %v21801_v3 }
0x560d   : > { %21306 = vmatpush3.bf16.msra.mxu0 %v21305_v41  ;;  %v21299_v41 = vpack.c.bf16 %v14720_v22, %v14719_v60 }
0x560e   : > { %21307 = vmatprep.subr.bf16.mxu0 %v21801_v3 }
0x5611   : > { %21309 = vmatpush3.bf16.msra.mxu0 %v21308_v34  ;;  %v21326_v34 = vpack.c.bf16 %v14738_v42, %v14737_v54 }
0x5612   : > { %21310 = vmatprep.subr.bf16.mxu0 %v21801_v3 }
0x5615   : > { %21312 = vmatpush3.bf16.msra.mxu0 %v21311_v45  ;;  %v21329_v45 = vpack.c.bf16 %v14740_v44, %v14739_v36 }
0x5616   : > { %21313 = vmatprep.subr.bf16.mxu0 %v21801_v3 }
0x5619   : > { %21315 = vmatpush3.bf16.msra.mxu0 %v21314_v46  ;;  %v21332_v46 = vpack.c.bf16 %v14742_v58, %v14741_v63 }
0x561a   : > { %21316 = vmatprep.subr.bf16.mxu0 %v21801_v3 }
0x561d   : > { %21318 = vmatpush3.bf16.msra.mxu0 %v21317_v50  ;;  %v21335_v50 = vpack.c.bf16 %v14744_v49, %v14743_v47 }
0x561e   : > { %21319 = vmatprep.subr.bf16.mxu0 %v21801_v3 }
0x5621   : > { %21321 = vmatpush3.bf16.msra.mxu0 %v21320_v55  ;;  %v21338_v55 = vpack.c.bf16 %v14746_v52, %v14745_v31  ;;  %v14759_v31 = vld [vmem:[%s27439_s12 + $0x700] sm:$0xff]  ;;  %v14760_v52 = vld [vmem:[%s27439_s12 + $0x708] sm:$0xff] }
0x5622   : > { %21322 = vmatprep.subr.bf16.mxu0 %v21801_v3 }
0x5625   : > { %21324 = vmatpush3.bf16.msra.mxu0 %v21323_v40  ;;  %v21341_v40 = vpack.c.bf16 %v14748_v30, %v14747_v27  ;;  %v14761_v27 = vld [vmem:[%s27439_s12 + $0x710] sm:$0xff]  ;;  %v14762_v30 = vld [vmem:[%s27439_s12 + $0x718] sm:$0xff] }
0x5626   : > { %19256 = vmatprep.subr.mxu0 %v21803_v51 }
0x5628   : > { %19219 = vmatmul.mubr.f32.vlgmr.msra.gmra.mrb[122].mxu0 %v24714_v1 }
0x5629   : > { %19258 = vmatprep.mubr.msk.f32.mxu0 %vm21802_vm0, %v21803_v51 }
0x56bb   : > { %v11298_v57 = vpop.f32.mrb[118].mxu0 }
0x56bc   : > { %v19070_v59 = vpop.f32.mrb[119].mxu0  ;;  %19144 = vmatmul.mubr.msk.f32.vlgmr.msra.gmra.mrb[136].mxu1 %vm865_vm1, %v11298_v57  ;;  %v14749_v57 = vld [vmem:[%s27439_s12 + $0xae0] sm:$0xff] }
0x56bd   : > { %19148 = vmatprep.mubr.msk.f32.mxu1 %vm21802_vm0, %v21803_v51  ;;  %v14750_v59 = vld [vmem:[%s27439_s12 + $0xae8] sm:$0xff] }
0x56db   : > { %v11472_v62 = vpop.f32.mrb[120].mxu0 }
0x56dc   : > { %v19140_v43 = vpop.f32.mrb[121].mxu0  ;;  %19147 = vmatpush3.msra.mxu1 %v11472_v62  ;;  %v21344_v62 = vpack.c.bf16 %v14750_v59, %v14749_v57  ;;  %v21353_v59 = vpack.c.bf16 %v14762_v30, %v14761_v27  ;;  %v14836_v30 = vld [vmem:[%s27439_s12 + $0x9c0] sm:$0xff] }
0x56dd   : > { %21277 = vmatprep.subr.bf16.mxu1 %v21801_v3  ;;  %v14751_v43 = vld [vmem:[%s27439_s12 + $0xaf0] sm:$0xff] }
0x56fb   : > { %v11808_v2 = vpop.f32.mrb[122].mxu0 }
0x56fc   : > { %v19220_v20 = vpop.f32.mrb[123].mxu0  ;;  %19257 = vmatpush3.xpose.msk.msra.mxu0 %vm865_vm1, %v11808_v2  ;;  %v14752_v2 = vld [vmem:[%s27439_s12 + $0xaf8] sm:$0xff] }
0x56fd   : > { %19261 = vmatprep.subr.mxu0 %v21803_v51  ;;  %v21347_v20 = vpack.c.bf16 %v14752_v2, %v14751_v43  ;;  %v14764_v43 = vld [vmem:[%s27439_s12 + $0x728] sm:$0xff] }
0x578f   : > { %v11548_v5 = vpop.f32.mrb[136].mxu1 }
0x5790   : > { %v19145_v7 = vpop.f32.mrb[137].mxu1  ;;  %v11552_v8 = vsel %vm865_vm1, %v11548_v5, -inf }
0x5791   : > { %11553 = vmax.xlane.f32.xlu0 %v11552_v8  ;;  %v14775_v7 = vld [vmem:[%s27439_s12 + $0x900] sm:$0xff]  ;;  %v14776_v8 = vld [vmem:[%s27439_s12 + $0x908] sm:$0xff] }
0x581e   : > { %v11554_v9 = vpop.xlane.xlu0 %11553 }
0x581f   : > { %v11555_v10 = vsub.f32 %v11548_v5, %v11554_v9  ;;  %v14704_v5 = vld [vmem:[%s27440_s13 + $0x20] sm:$0xff]  ;;  %v21374_v9 = vpack.c.bf16 %v14776_v8, %v14775_v7 }
0x5820   : > { %v14767_v8 = vld [vmem:[%s27439_s12 + $0x740] sm:$0xff] }
0x5821   : > { %v11556_v11 = vmul.f32 1.442695, %v11555_v10  ;;  %v14777_v10 = vld [vmem:[%s27439_s12 + $0x910] sm:$0xff] }
0x5823   : > { %21707 = vpow2.f32 %v11556_v11  ;;  %v14778_v11 = vld [vmem:[%s27439_s12 + $0x918] sm:$0xff] }
0x582d   : > { %v21708_v12 = vpop.eup %21707 }
0x582e   : > { %v11558_v13 = vsel %vm865_vm1, %v21708_v12, 0.0 }
0x582f   : > { %11559 = vadd.xlane.f32.xlu1 %v11558_v13 }
0x58bc   : > { %v11560_v15 = vpop.xlane.xlu1 %11559 }
0x58bd   : > { %21709 = vrcp.f32 %v11560_v15  ;;  %v21377_v15 = vpack.c.bf16 %v14778_v11, %v14777_v10  ;;  %v14769_v11 = vld [vmem:[%s27439_s12 + $0x750] sm:$0xff] }
0x58c7   : > { %v21710_v6 = vpop.eup %21709 }
0x58c8   : > { %v11562_v17 = vmul.f32 %v21710_v6, %v21708_v12  ;;  %v21380_v6 = vpack.c.bf16 %v14780_v16, %v14779_v61  ;;  %v14772_v61 = vld [vmem:[%s27439_s12 + $0x768] sm:$0xff] }
0x58ca   : > { %19149 = vmatmul.mubr.msk.f32.vlgmr.msra.gmra.mrb[138].mxu1 %vm865_vm1, %v11562_v17  ;;  %v14782_v17 = vld [vmem:[%s27439_s12 + $0x938] sm:$0xff] }
0x58cb   : > { %21279 = vmatpush3.bf16.msra.mxu1 %v21278_v53  ;;  %19183 = vmatprep.mubr.msk.f32.mxu1 %vm21802_vm0, %v21803_v51  ;;  %v14781_v53 = vld [vmem:[%s27439_s12 + $0x930] sm:$0xff] }
0x58cc   : > { %21280 = vmatprep.subr.bf16.mxu1 %v21801_v3  ;;  %v21383_v29 = vpack.c.bf16 %v14782_v17, %v14781_v53  ;;  %v14774_v53 = vld [vmem:[%s27439_s12 + $0x778] sm:$0xff] }
0x58cf   : > { %21282 = vmatpush3.bf16.msra.mxu1 %v21281_v0  ;;  %v14784_v0 = vld [vmem:[%s27439_s12 + $0x948] sm:$0xff] }
0x58d0   : > { %21283 = vmatprep.subr.bf16.mxu1 %v21801_v3  ;;  %v21386_v18 = vpack.c.bf16 %v14784_v0, %v14783_v35  ;;  %v14792_v35 = vld [vmem:[%s27439_s12 + $0xb08] sm:$0xff] }
0x58d3   : > { %21285 = vmatpush3.bf16.msra.mxu1 %v21284_v56  ;;  %v14786_v56 = vld [vmem:[%s27439_s12 + $0x958] sm:$0xff] }
0x58d4   : > { %21286 = vmatprep.subr.bf16.mxu1 %v21801_v3  ;;  %v21389_v21 = vpack.c.bf16 %v14786_v56, %v14785_v19  ;;  %v14794_v19 = vld [vmem:[%s27439_s12 + $0xb18] sm:$0xff] }
0x58d7   : > { %21288 = vmatpush3.bf16.msra.mxu1 %v21287_v24  ;;  %v14788_v24 = vld [vmem:[%s27439_s12 + $0x968] sm:$0xff] }
0x58d8   : > { %21289 = vmatprep.subr.bf16.mxu1 %v21801_v3  ;;  %v21392_v25 = vpack.c.bf16 %v14788_v24, %v14787_v23  ;;  %v14796_v23 = vld [vmem:[%s27439_s12 + $0xb28] sm:$0xff] }
0x58db   : > { %21291 = vmatpush3.bf16.msra.mxu1 %v21290_v39  ;;  %v14790_v39 = vld [vmem:[%s27439_s12 + $0x978] sm:$0xff] }
0x58dc   : > { %21292 = vmatprep.subr.bf16.mxu1 %v21801_v3  ;;  %v21395_v14 = vpack.c.bf16 %v14790_v39, %v14789_v26  ;;  %v14798_v26 = vld [vmem:[%s27439_s12 + $0xb38] sm:$0xff] }
0x58df   : > { %21294 = vmatpush3.bf16.msra.mxu1 %v21293_v32 }
0x58e0   : > { %21295 = vmatprep.subr.bf16.mxu1 %v21801_v3 }
0x58e3   : > { %21297 = vmatpush3.bf16.msra.mxu1 %v21296_v38 }
0x58e4   : > { %21298 = vmatprep.subr.bf16.mxu1 %v21801_v3 }
0x58e7   : > { %21300 = vmatpush3.bf16.msra.mxu1 %v21299_v41 }
0x58e8   : > { %21325 = vmatprep.subr.bf16.mxu1 %v21801_v3 }
0x58ea   : > { %19184 = vmatmul.mubr.f32.vlgmr.msra.gmra.mrb[140].mxu1 %v26534_v4 }
0x58eb   : > { %21327 = vmatpush3.bf16.msra.mxu1 %v21326_v34  ;;  %19253 = vmatprep.mubr.msk.f32.mxu1 %vm21802_vm0, %v21803_v51 }
0x58ec   : > { %21328 = vmatprep.subr.bf16.mxu1 %v21801_v3 }
0x58ef   : > { %21330 = vmatpush3.bf16.msra.mxu1 %v21329_v45 }
0x58f0   : > { %21331 = vmatprep.subr.bf16.mxu1 %v21801_v3 }
0x58f3   : > { %21333 = vmatpush3.bf16.msra.mxu1 %v21332_v46 }
0x58f4   : > { %21334 = vmatprep.subr.bf16.mxu1 %v21801_v3 }
0x58f7   : > { %21336 = vmatpush3.bf16.msra.mxu1 %v21335_v50  ;;  %v14756_v50 = vld [vmem:[%s27440_s13 + $0x28] sm:$0xff] }
0x58f8   : > { %21337 = vmatprep.subr.bf16.mxu1 %v21801_v3 }
0x58fb   : > { %21339 = vmatpush3.bf16.msra.mxu1 %v21338_v55  ;;  %v21350_v55 = vpack.c.bf16 %v14760_v52, %v14759_v31  ;;  %v14834_v52 = vld [vmem:[%s27439_s12 + $0x9b0] sm:$0xff] }
0x58fc   : > { %21340 = vmatprep.subr.bf16.mxu1 %v21801_v3 }
0x58ff   : > { %21342 = vmatpush3.bf16.msra.mxu1 %v21341_v40 }
0x5900   : > { %21343 = vmatprep.subr.bf16.mxu1 %v21801_v3 }
0x5903   : > { %21345 = vmatpush3.bf16.msra.mxu1 %v21344_v62  ;;  %v14763_v62 = vld [vmem:[%s27439_s12 + $0x720] sm:$0xff] }
0x5904   : > { %21346 = vmatprep.subr.bf16.mxu1 %v21801_v3  ;;  %v21356_v2 = vpack.c.bf16 %v14764_v43, %v14763_v62  ;;  %v14839_v62 = vld [vmem:[%s27439_s12 + $0x9d8] sm:$0xff] }
0x5907   : > { %21348 = vmatpush3.bf16.msra.mxu1 %v21347_v20  ;;  %v14765_v20 = vld [vmem:[%s27439_s12 + $0x730] sm:$0xff] }
0x5908   : > { %19271 = vmatprep.subr.mxu1 %v21803_v51 }
0x590a   : > { %19254 = vmatmul.mubr.f32.vlgmr.msra.gmra.mrb[142].mxu1 %v24714_v1 }
0x590b   : > { %19272 = vmatpush3.msra.mxu1 %v14704_v5  ;;  %19273 = vmatprep.mubr.msk.f32.mxu1 %vm21802_vm0, %v21803_v51  ;;  %v14766_v5 = vld [vmem:[%s27439_s12 + $0x738] sm:$0xff] }
0x590c   : > { %21373 = vmatprep.subr.bf16.mxu1 %v21801_v3  ;;  %v21359_v7 = vpack.c.bf16 %v14766_v5, %v14765_v20  ;;  %v14841_v20 = vld [vmem:[%s27439_s12 + $0x9e8] sm:$0xff] }
0x599d   : > { %v11632_v12 = vpop.f32.mrb[138].mxu1 }
0x599e   : > { %v19150_v13 = vpop.f32.mrb[139].mxu1  ;;  %19274 = vmatmul.mubr.msk.f32.vlgmr.msra.gmra.mrb[144].mxu1 %vm865_vm1, %v11632_v12  ;;  %v14770_v12 = vld [vmem:[%s27439_s12 + $0x758] sm:$0xff] }
0x599f   : > { %21375 = vmatpush3.bf16.msra.mxu1 %v21374_v9  ;;  %19343 = vmatprep.mubr.msk.f32.mxu1 %vm21802_vm0, %v21803_v51  ;;  %v14768_v9 = vld [vmem:[%s27439_s12 + $0x748] sm:$0xff]  ;;  %v21365_v13 = vpack.c.bf16 %v14770_v12, %v14769_v11 }
0x59a0   : > { %21376 = vmatprep.subr.bf16.mxu1 %v21801_v3  ;;  %v21362_v10 = vpack.c.bf16 %v14768_v9, %v14767_v8  ;;  %v14843_v8 = vld [vmem:[%s27439_s12 + $0x9f8] sm:$0xff] }
0x59a3   : > { %21378 = vmatpush3.bf16.msra.mxu1 %v21377_v15  ;;  %v14771_v15 = vld [vmem:[%s27439_s12 + $0x760] sm:$0xff] }
0x59a4   : > { %21379 = vmatprep.subr.bf16.mxu1 %v21801_v3  ;;  %v21368_v16 = vpack.c.bf16 %v14772_v61, %v14771_v15 }
0x59a7   : > { %21381 = vmatpush3.bf16.msra.mxu1 %v21380_v6  ;;  %v14773_v6 = vld [vmem:[%s27439_s12 + $0x770] sm:$0xff] }
0x59a8   : > { %21382 = vmatprep.subr.bf16.mxu1 %v21801_v3  ;;  %v21371_v17 = vpack.c.bf16 %v14774_v53, %v14773_v6 }
0x59ab   : > { %21384 = vmatpush3.bf16.msra.mxu1 %v21383_v29  ;;  %v14791_v29 = vld [vmem:[%s27439_s12 + $0xb00] sm:$0xff] }
0x59ac   : > { %21385 = vmatprep.subr.bf16.mxu1 %v21801_v3  ;;  %v21398_v0 = vpack.c.bf16 %v14792_v35, %v14791_v29 }
0x59af   : > { %21387 = vmatpush3.bf16.msra.mxu1 %v21386_v18  ;;  %v14793_v18 = vld [vmem:[%s27439_s12 + $0xb10] sm:$0xff] }
0x59b0   : > { %21388 = vmatprep.subr.bf16.mxu1 %v21801_v3  ;;  %v21401_v56 = vpack.c.bf16 %v14794_v19, %v14793_v18 }
0x59b3   : > { %21390 = vmatpush3.bf16.msra.mxu1 %v21389_v21  ;;  %v14795_v21 = vld [vmem:[%s27439_s12 + $0xb20] sm:$0xff] }
0x59b4   : > { %21391 = vmatprep.subr.bf16.mxu1 %v21801_v3  ;;  %v21404_v24 = vpack.c.bf16 %v14796_v23, %v14795_v21 }
0x59b7   : > { %21393 = vmatpush3.bf16.msra.mxu1 %v21392_v25  ;;  %v14797_v25 = vld [vmem:[%s27439_s12 + $0xb30] sm:$0xff] }
0x59b8   : > { %21394 = vmatprep.subr.bf16.mxu1 %v21801_v3  ;;  %v21407_v39 = vpack.c.bf16 %v14798_v26, %v14797_v25  ;;  %v14810_v25 = vld [vmem:[%s27440_s13 + $0x30] sm:$0xff]  ;;  %v14812_v26 = vld [vmem:[%s27439_s12 + $0x780] sm:$0xff] }
0x59bb   : > { %21396 = vmatpush3.bf16.msra.mxu1 %v21395_v14  ;;  %v14799_v14 = vld [vmem:[%s27439_s12 + $0xb40] sm:$0xff] }
0x59bc   : > { %19381 = vmatprep.subr.mxu1 %v21803_v51 }
0x59bd   : > { %v11721_v28 = vpop.f32.mrb[140].mxu1 }
0x59be   : > { %v19185_v32 = vpop.f32.mrb[141].mxu1  ;;  %19259 = vmatmul.mubr.msk.f32.vlgmr.msra.gmra.mrb[124].mxu0 %vm865_vm1, %v11721_v28  ;;  %19344 = vmatmul.mubr.f32.vlgmr.msra.gmra.mrb[146].mxu1 %v24714_v1  ;;  %v14800_v28 = vld [vmem:[%s27439_s12 + $0xb48] sm:$0xff] }
0x59bf   : > { %19263 = vmatprep.mubr.msk.f32.mxu0 %vm21802_vm0, %v21803_v51  ;;  %19383 = vmatprep.mubr.msk.f32.mxu1 %vm21802_vm0, %v21803_v51  ;;  %v21410_v32 = vpack.c.bf16 %v14800_v28, %v14799_v14  ;;  %v14814_v28 = vld [vmem:[%s27439_s12 + $0x790] sm:$0xff] }
0x59dd   : > { %v11895_v33 = vpop.f32.mrb[142].mxu1 }
0x59de   : > { %v19255_v37 = vpop.f32.mrb[143].mxu1  ;;  %19262 = vmatpush3.msra.mxu0 %v11895_v33  ;;  %v14801_v33 = vld [vmem:[%s27439_s12 + $0xb50] sm:$0xff] }
0x59df   : > { %19266 = vmatprep.subr.mxu0 %v21803_v51  ;;  %v14802_v37 = vld [vmem:[%s27439_s12 + $0xb58] sm:$0xff] }
0x5a71   : > { %v26850_v38 = vpop.f32.mrb[144].mxu1 }
0x5a72   : > { %v19275_v60 = vpop.f32.mrb[145].mxu1 }
0x5a73   : > { %v21413_v60 = vpack.c.bf16 %v14802_v37, %v14801_v33 }
0x5a91   : > { %v11971_v22 = vpop.f32.mrb[124].mxu0  ;;  %v12377_v41 = vpop.f32.mrb[146].mxu1 }
0x5a92   : > { %v19260_v54 = vpop.f32.mrb[125].mxu0  ;;  %v19345_v42 = vpop.f32.mrb[147].mxu1  ;;  %19382 = vmatpush3.xpose.msk.msra.mxu1 %vm865_vm1, %v12377_v41  ;;  %v11975_v34 = vsel %vm865_vm1, %v11971_v22, -inf  ;;  %v14804_v41 = vld [vmem:[%s27439_s12 + $0xb68] sm:$0xff] }
0x5a93   : > { %11976 = vmax.xlane.f32.xlu0 %v11975_v34  ;;  %19386 = vmatprep.subr.mxu1 %v21803_v51  ;;  %v14805_v42 = vld [vmem:[%s27439_s12 + $0xb70] sm:$0xff]  ;;  %v14806_v34 = vld [vmem:[%s27439_s12 + $0xb78] sm:$0xff] }
0x5b20   : > { %v11977_v36 = vpop.xlane.xlu0 %11976 }
0x5b21   : > { %v11978_v44 = vsub.f32 %v11971_v22, %v11977_v36  ;;  %v14803_v22 = vld [vmem:[%s27439_s12 + $0xb60] sm:$0xff]  ;;  %v21419_v36 = vpack.c.bf16 %v14806_v34, %v14805_v42  ;;  %v14818_v42 = vld [vmem:[%s27439_s12 + $0x7b0] sm:$0xff]  ;;  %v14819_v34 = vld [vmem:[%s27439_s12 + $0x7b8] sm:$0xff] }
0x5b22   : > { %v21416_v54 = vpack.c.bf16 %v14804_v41, %v14803_v22  ;;  %v14816_v22 = vld [vmem:[%s27439_s12 + $0x7a0] sm:$0xff]  ;;  %v14817_v41 = vld [vmem:[%s27439_s12 + $0x7a8] sm:$0xff] }
0x5b23   : > { %v11979_v45 = vmul.f32 1.442695, %v11978_v44  ;;  %v14828_v44 = vld [vmem:[%s27439_s12 + $0x980] sm:$0xff] }
0x5b25   : > { %21711 = vpow2.f32 %v11979_v45  ;;  %v14829_v45 = vld [vmem:[%s27439_s12 + $0x988] sm:$0xff] }
0x5b2f   : > { %v21712_v63 = vpop.eup %21711 }
0x5b30   : > { %v11981_v58 = vsel %vm865_vm1, %v21712_v63, 0.0 }
0x5b31   : > { %11982 = vadd.xlane.f32.xlu1 %v11981_v58  ;;  %v14830_v58 = vld [vmem:[%s27439_s12 + $0x990] sm:$0xff] }
0x5bbe   : > { %v11983_v46 = vpop.xlane.xlu1 %11982 }
0x5bbf   : > { %21713 = vrcp.f32 %v11983_v46  ;;  %v14831_v46 = vld [vmem:[%s27439_s12 + $0x998] sm:$0xff] }
0x5bc9   : > { %v21714_v47 = vpop.eup %21713 }
0x5bca   : > { %v11985_v49 = vmul.f32 %v21714_v47, %v21712_v63  ;;  %v21446_v63 = vpack.c.bf16 %v14829_v45, %v14828_v44  ;;  %v21449_v47 = vpack.c.bf16 %v14831_v46, %v14830_v58  ;;  %v14820_v44 = vld [vmem:[%s27439_s12 + $0x7c0] sm:$0xff]  ;;  %v14821_v45 = vld [vmem:[%s27439_s12 + $0x7c8] sm:$0xff]  ;;  %v14822_v58 = vld [vmem:[%s27439_s12 + $0x7d0] sm:$0xff] }
0x5bcb   : > { %v14823_v46 = vld [vmem:[%s27439_s12 + $0x7d8] sm:$0xff] }
0x5bcc   : > { %19264 = vmatmul.mubr.msk.f32.vlgmr.msra.gmra.mrb[126].mxu0 %vm865_vm1, %v11985_v49  ;;  %v14832_v49 = vld [vmem:[%s27439_s12 + $0x9a0] sm:$0xff] }
0x5bcd   : > { %19267 = vmatpush3.msra.mxu0 %v14756_v50  ;;  %19268 = vmatprep.mubr.msk.f32.mxu0 %vm21802_vm0, %v21803_v51  ;;  %v14833_v50 = vld [vmem:[%s27439_s12 + $0x9a8] sm:$0xff] }
0x5bce   : > { %21349 = vmatprep.subr.bf16.mxu0 %v21801_v3  ;;  %v21452_v31 = vpack.c.bf16 %v14833_v50, %v14832_v49  ;;  %v14824_v49 = vld [vmem:[%s27439_s12 + $0x7e0] sm:$0xff]  ;;  %v14825_v50 = vld [vmem:[%s27439_s12 + $0x7e8] sm:$0xff] }
0x5c9f   : > { %v12055_v40 = vpop.f32.mrb[126].mxu0 }
0x5ca0   : > { %v19265_v57 = vpop.f32.mrb[127].mxu0  ;;  %19269 = vmatmul.mubr.msk.f32.vlgmr.msra.gmra.mrb[128].mxu0 %vm865_vm1, %v12055_v40  ;;  %v14837_v40 = vld [vmem:[%s27439_s12 + $0x9c8] sm:$0xff] }
0x5ca1   : > { %21351 = vmatpush3.bf16.msra.mxu0 %v21350_v55  ;;  %19308 = vmatprep.mubr.msk.f32.mxu0 %vm21802_vm0, %v21803_v51  ;;  %v14835_v55 = vld [vmem:[%s27439_s12 + $0x9b8] sm:$0xff]  ;;  %v21458_v57 = vpack.c.bf16 %v14837_v40, %v14836_v30  ;;  %v14844_v30 = vld [vmem:[%s27439_s12 + $0xb80] sm:$0xff]  ;;  %v14845_v40 = vld [vmem:[%s27439_s12 + $0xb88] sm:$0xff] }
0x5ca2   : > { %21352 = vmatprep.subr.bf16.mxu0 %v21801_v3  ;;  %v21455_v27 = vpack.c.bf16 %v14835_v55, %v14834_v52  ;;  %v14826_v52 = vld [vmem:[%s27439_s12 + $0x7f0] sm:$0xff]  ;;  %v14827_v55 = vld [vmem:[%s27439_s12 + $0x7f8] sm:$0xff] }
0x5ca5   : > { %21354 = vmatpush3.bf16.msra.mxu0 %v21353_v59  ;;  %v14838_v59 = vld [vmem:[%s27439_s12 + $0x9d0] sm:$0xff] }
0x5ca6   : > { %21355 = vmatprep.subr.bf16.mxu0 %v21801_v3  ;;  %v21461_v43 = vpack.c.bf16 %v14839_v62, %v14838_v59  ;;  %v14846_v59 = vld [vmem:[%s27439_s12 + $0xb90] sm:$0xff]  ;;  %v14847_v62 = vld [vmem:[%s27439_s12 + $0xb98] sm:$0xff] }
0x5ca9   : > { %21357 = vmatpush3.bf16.msra.mxu0 %v21356_v2  ;;  %v14840_v2 = vld [vmem:[%s27439_s12 + $0x9e0] sm:$0xff] }
0x5caa   : > { %21358 = vmatprep.subr.bf16.mxu0 %v21801_v3  ;;  %v21464_v5 = vpack.c.bf16 %v14841_v20, %v14840_v2  ;;  %v14848_v2 = vld [vmem:[%s27439_s12 + $0xba0] sm:$0xff]  ;;  %v14849_v20 = vld [vmem:[%s27439_s12 + $0xba8] sm:$0xff] }
0x5cad   : > { %21360 = vmatpush3.bf16.msra.mxu0 %v21359_v7  ;;  %v14842_v7 = vld [vmem:[%s27439_s12 + $0x9f0] sm:$0xff] }
0x5cae   : > { %21361 = vmatprep.subr.bf16.mxu0 %v21801_v3  ;;  %v21467_v9 = vpack.c.bf16 %v14843_v8, %v14842_v7  ;;  %v14851_v7 = vld [vmem:[%s27439_s12 + $0xbb8] sm:$0xff] }
0x5cb1   : > { %21363 = vmatpush3.bf16.msra.mxu0 %v21362_v10 }
0x5cb2   : > { %21364 = vmatprep.subr.bf16.mxu0 %v21801_v3 }
0x5cb5   : > { %21366 = vmatpush3.bf16.msra.mxu0 %v21365_v13 }
0x5cb6   : > { %21367 = vmatprep.subr.bf16.mxu0 %v21801_v3 }
0x5cb9   : > { %21369 = vmatpush3.bf16.msra.mxu0 %v21368_v16 }
0x5cba   : > { %21370 = vmatprep.subr.bf16.mxu0 %v21801_v3 }
0x5cbd   : > { %21372 = vmatpush3.bf16.msra.mxu0 %v21371_v17 }
0x5cbe   : > { %21397 = vmatprep.subr.bf16.mxu0 %v21801_v3 }
0x5cc0   : > { %19309 = vmatmul.mubr.f32.vlgmr.msra.gmra.mrb[130].mxu0 %v26534_v4 }
0x5cc1   : > { %21399 = vmatpush3.bf16.msra.mxu0 %v21398_v0  ;;  %19378 = vmatprep.mubr.msk.f32.mxu0 %vm21802_vm0, %v21803_v51 }
0x5cc2   : > { %21400 = vmatprep.subr.bf16.mxu0 %v21801_v3 }
0x5cc5   : > { %21402 = vmatpush3.bf16.msra.mxu0 %v21401_v56 }
0x5cc6   : > { %21403 = vmatprep.subr.bf16.mxu0 %v21801_v3 }
0x5cc9   : > { %21405 = vmatpush3.bf16.msra.mxu0 %v21404_v24 }
0x5cca   : > { %21406 = vmatprep.subr.bf16.mxu0 %v21801_v3 }
0x5ccd   : > { %21408 = vmatpush3.bf16.msra.mxu0 %v21407_v39  ;;  %v14813_v39 = vld [vmem:[%s27439_s12 + $0x788] sm:$0xff] }
0x5cce   : > { %21409 = vmatprep.subr.bf16.mxu0 %v21801_v3  ;;  %v21422_v14 = vpack.c.bf16 %v14813_v39, %v14812_v26 }
0x5cd1   : > { %21411 = vmatpush3.bf16.msra.mxu0 %v21410_v32  ;;  %v14815_v32 = vld [vmem:[%s27439_s12 + $0x798] sm:$0xff] }
0x5cd2   : > { %21412 = vmatprep.subr.bf16.mxu0 %v21801_v3 }
0x5cd5   : > { %21414 = vmatpush3.bf16.msra.mxu0 %v21413_v60  ;;  %v21425_v60 = vpack.c.bf16 %v14815_v32, %v14814_v28 }
0x5cd6   : > { %21415 = vmatprep.subr.bf16.mxu0 %v21801_v3 }
0x5cd9   : > { %21417 = vmatpush3.bf16.msra.mxu0 %v21416_v54  ;;  %v21428_v54 = vpack.c.bf16 %v14817_v41, %v14816_v22 }
0x5cda   : > { %21418 = vmatprep.subr.bf16.mxu0 %v21801_v3 }
0x5cdd   : > { %21420 = vmatpush3.bf16.msra.mxu0 %v21419_v36  ;;  %v21431_v36 = vpack.c.bf16 %v14819_v34, %v14818_v42  ;;  %v14868_v42 = vld [vmem:[%s27441_s14 + $0x88] sm:$0xff]  ;;  %v14869_v34 = vld [vmem:[%s27441_s14 + $0x90] sm:$0xff] }
0x5cde   : > { %21445 = vmatprep.subr.bf16.mxu0 %v21801_v3 }
0x5ce0   : > { %19379 = vmatmul.mubr.f32.vlgmr.msra.gmra.mrb[132].mxu0 %v24714_v1 }
0x5ce1   : > { %21447 = vmatpush3.bf16.msra.mxu0 %v21446_v63  ;;  %19463 = vmatprep.mubr.msk.f32.mxu0 %vm21802_vm0, %v21803_v51  ;;  %v21434_v63 = vpack.c.bf16 %v14821_v45, %v14820_v44  ;;  %v14870_v44 = vld [vmem:[%s27441_s14 + $0x98] sm:$0xff] }
0x5ce2   : > { %21448 = vmatprep.subr.bf16.mxu0 %v21801_v3  ;;  %v21497_v45 = vpack.c.bf16 %v14870_v44, %v14869_v34  ;;  %v13412_v34 = vld [vmem:[%s27444_s17 + $0x10] sm:$0xff]  ;;  %v13413_v44 = vld [vmem:[%s27444_s17 + $0x18] sm:$0xff] }
0x5ce5   : > { %21450 = vmatpush3.bf16.msra.mxu0 %v21449_v47  ;;  %v21437_v47 = vpack.c.bf16 %v14823_v46, %v14822_v58  ;;  %v14872_v58 = vld [vmem:[%s27441_s14 + $0xa8] sm:$0xff] }
0x5ce6   : > { %21451 = vmatprep.subr.bf16.mxu0 %v21801_v3 }
0x5ce9   : > { %21453 = vmatpush3.bf16.msra.mxu0 %v21452_v31  ;;  %v21440_v31 = vpack.c.bf16 %v14825_v50, %v14824_v49 }
0x5cea   : > { %21454 = vmatprep.subr.bf16.mxu0 %v21801_v3 }
0x5ced   : > { %21456 = vmatpush3.bf16.msra.mxu0 %v21455_v27  ;;  %v21443_v27 = vpack.c.bf16 %v14827_v55, %v14826_v52  ;;  %v14873_v55 = vld [vmem:[%s27441_s14 + $0xb0] sm:$0xff] }
0x5cee   : > { %21457 = vmatprep.subr.bf16.mxu0 %v21801_v3 }
0x5cf1   : > { %21459 = vmatpush3.bf16.msra.mxu0 %v21458_v57  ;;  %v21470_v57 = vpack.c.bf16 %v14845_v40, %v14844_v30  ;;  %v14876_v40 = vld [vmem:[%s27441_s14 + $0xc8] sm:$0xff] }
0x5cf2   : > { %21460 = vmatprep.subr.bf16.mxu0 %v21801_v3 }
0x5cf5   : > { %21462 = vmatpush3.bf16.msra.mxu0 %v21461_v43  ;;  %v21473_v43 = vpack.c.bf16 %v14847_v62, %v14846_v59  ;;  %v14877_v59 = vld [vmem:[%s27441_s14 + $0xd0] sm:$0xff]  ;;  %v14878_v62 = vld [vmem:[%s27441_s14 + $0xd8] sm:$0xff] }
0x5cf6   : > { %21463 = vmatprep.subr.bf16.mxu0 %v21801_v3 }
0x5cf9   : > { %21465 = vmatpush3.bf16.msra.mxu0 %v21464_v5  ;;  %v21476_v5 = vpack.c.bf16 %v14849_v20, %v14848_v2  ;;  %v14879_v2 = vld [vmem:[%s27441_s14 + $0xe0] sm:$0xff]  ;;  %v14880_v20 = vld [vmem:[%s27441_s14 + $0xe8] sm:$0xff] }
0x5cfa   : > { %21466 = vmatprep.subr.bf16.mxu0 %v21801_v3 }
0x5cfd   : > { %21468 = vmatpush3.bf16.msra.mxu0 %v21467_v9  ;;  %v14852_v9 = vld [vmem:[%s27439_s12 + $0xbc0] sm:$0xff] }
0x5cfe   : > { %19501 = vmatprep.subr.mxu0 %v21803_v51 }
0x5d00   : > { %19464 = vmatmul.mubr.f32.vlgmr.msra.gmra.mrb[134].mxu0 %v24714_v1 }
0x5d01   : > { %19503 = vmatprep.mubr.msk.f32.mxu0 %vm21802_vm0, %v21803_v51 }
0x5d73   : > { %v12130_v10 = vpop.f32.mrb[128].mxu0 }
0x5d74   : > { %v27044_v11 = vadd.f32 %v26850_v38, %v12130_v10  ;;  %v19270_v12 = vpop.f32.mrb[129].mxu0  ;;  %v14853_v10 = vld [vmem:[%s27439_s12 + $0xbc8] sm:$0xff] }
0x5d75   : > { %v21482_v12 = vpack.c.bf16 %v14853_v10, %v14852_v9  ;;  %v14883_v9 = vld [vmem:[%s27442_s15 + $0x80] sm:$0xff]  ;;  %v14884_v10 = vld [vmem:[%s27442_s15 + $0x88] sm:$0xff] }
0x5d93   : > { %v12290_v13 = vpop.f32.mrb[130].mxu0 }
0x5d94   : > { %v19310_v15 = vpop.f32.mrb[131].mxu0  ;;  %19384 = vmatmul.mubr.msk.f32.vlgmr.msra.gmra.mrb[148].mxu1 %vm865_vm1, %v12290_v13  ;;  %v14854_v13 = vld [vmem:[%s27439_s12 + $0xbd0] sm:$0xff] }
0x5d95   : > { %19388 = vmatprep.mubr.msk.f32.mxu1 %vm21802_vm0, %v21803_v51  ;;  %v14855_v15 = vld [vmem:[%s27439_s12 + $0xbd8] sm:$0xff] }
0x5db3   : > { %v12464_v61 = vpop.f32.mrb[132].mxu0 }
0x5db4   : > { %v19380_v16 = vpop.f32.mrb[133].mxu0  ;;  %19387 = vmatpush3.msra.mxu1 %v12464_v61  ;;  %v21485_v61 = vpack.c.bf16 %v14855_v15, %v14854_v13  ;;  %v21518_v13 = vpack.c.bf16 %v14884_v10, %v14883_v9  ;;  %v14886_v15 = vld [vmem:[%s27442_s15 + $0x98] sm:$0xff] }
0x5db5   : > { %19391 = vmatprep.subr.mxu1 %v21803_v51  ;;  %v14856_v16 = vld [vmem:[%s27439_s12 + $0xbe0] sm:$0xff] }
0x5dd3   : > { %v12874_v6 = vpop.f32.mrb[134].mxu0 }
0x5dd4   : > { %v19465_v53 = vpop.f32.mrb[135].mxu0  ;;  %19502 = vmatpush3.xpose.msk.msra.mxu0 %vm865_vm1, %v12874_v6  ;;  %v14857_v6 = vld [vmem:[%s27439_s12 + $0xbe8] sm:$0xff] }
0x5dd5   : > { %19506 = vmatprep.subr.mxu0 %v21803_v51  ;;  %v21488_v53 = vpack.c.bf16 %v14857_v6, %v14856_v16  ;;  %v14887_v16 = vld [vmem:[%s27442_s15 + $0xa0] sm:$0xff]  ;;  %v14888_v6 = vld [vmem:[%s27442_s15 + $0xa8] sm:$0xff] }
0x5e67   : > { %v12540_v38 = vpop.f32.mrb[148].mxu1 }
0x5e68   : > { %v19385_v17 = vpop.f32.mrb[149].mxu1  ;;  %v12544_v29 = vsel %vm865_vm1, %v12540_v38, -inf }
0x5e69   : > { %12545 = vmax.xlane.f32.xlu0 %v12544_v29  ;;  %v14859_v17 = vld [vmem:[%s27439_s12 + $0xbf8] sm:$0xff] }
0x5ef6   : > { %v12546_v35 = vpop.xlane.xlu0 %12545 }
0x5ef7   : > { %v12547_v0 = vsub.f32 %v12540_v38, %v12546_v35  ;;  %v14858_v38 = vld [vmem:[%s27439_s12 + $0xbf0] sm:$0xff] }
0x5ef8   : > { %v21491_v29 = vpack.c.bf16 %v14859_v17, %v14858_v38  ;;  %v14889_v38 = vld [vmem:[%s27442_s15 + $0xb0] sm:$0xff]  ;;  %v14890_v17 = vld [vmem:[%s27442_s15 + $0xb8] sm:$0xff] }
0x5ef9   : > { %v12548_v18 = vmul.f32 1.442695, %v12547_v0 }
0x5efb   : > { %21715 = vpow2.f32 %v12548_v18 }
0x5f05   : > { %v21716_v19 = vpop.eup %21715 }
0x5f06   : > { %v12550_v56 = vsel %vm865_vm1, %v21716_v19, 0.0 }
0x5f07   : > { %12551 = vadd.xlane.f32.xlu1 %v12550_v56 }
0x5f94   : > { %v12552_v21 = vpop.xlane.xlu1 %12551 }
0x5f95   : > { %21717 = vrcp.f32 %v12552_v21 }
0x5f9f   : > { %v21718_v23 = vpop.eup %21717 }
0x5fa0   : > { %v12554_v24 = vmul.f32 %v21718_v23, %v21716_v19 }
0x5fa2   : > { %19389 = vmatmul.mubr.msk.f32.vlgmr.msra.gmra.mrb[150].mxu1 %vm865_vm1, %v12554_v24 }
0x5fa3   : > { %19392 = vmatpush3.msra.mxu1 %v14810_v25  ;;  %19393 = vmatprep.mubr.msk.f32.mxu1 %vm21802_vm0, %v21803_v51 }
0x5fa4   : > { %21421 = vmatprep.subr.bf16.mxu1 %v21801_v3 }
0x6075   : > { %v12624_v33 = vpop.f32.mrb[150].mxu1 }
0x6076   : > { %v19390_v37 = vpop.f32.mrb[151].mxu1  ;;  %19394 = vmatmul.mubr.msk.f32.vlgmr.msra.gmra.mrb[152].mxu1 %vm865_vm1, %v12624_v33 }
0x6077   : > { %21423 = vmatpush3.bf16.msra.mxu1 %v21422_v14  ;;  %19428 = vmatprep.mubr.msk.f32.mxu1 %vm21802_vm0, %v21803_v51 }
0x6078   : > { %21424 = vmatprep.subr.bf16.mxu1 %v21801_v3 }
0x607b   : > { %21426 = vmatpush3.bf16.msra.mxu1 %v21425_v60  ;;  %v14863_v60 = vld [vmem:[%s27440_s13 + $0x38] sm:$0xff] }
0x607c   : > { %21427 = vmatprep.subr.bf16.mxu1 %v21801_v3 }
0x607f   : > { %21429 = vmatpush3.bf16.msra.mxu1 %v21428_v54  ;;  %v14867_v54 = vld [vmem:[%s27441_s14 + $0x80] sm:$0xff] }
0x6080   : > { %21430 = vmatprep.subr.bf16.mxu1 %v21801_v3 }
0x6083   : > { %21432 = vmatpush3.bf16.msra.mxu1 %v21431_v36  ;;  %v21494_v36 = vpack.c.bf16 %v14868_v42, %v14867_v54  ;;  %v13410_v42 = vld [vmem:[%s27444_s17] sm:$0xff] }
0x6084   : > { %21433 = vmatprep.subr.bf16.mxu1 %v21801_v3 }
0x6087   : > { %21435 = vmatpush3.bf16.msra.mxu1 %v21434_v63  ;;  %v14871_v63 = vld [vmem:[%s27441_s14 + $0xa0] sm:$0xff] }
0x6088   : > { %21436 = vmatprep.subr.bf16.mxu1 %v21801_v3  ;;  %v21500_v46 = vpack.c.bf16 %v14872_v58, %v14871_v63  ;;  %v13414_v63 = vld [vmem:[%s27444_s17 + $0x20] sm:$0xff]  ;;  %v13415_v58 = vld [vmem:[%s27444_s17 + $0x28] sm:$0xff] }
0x608b   : > { %21438 = vmatpush3.bf16.msra.mxu1 %v21437_v47 }
0x608c   : > { %21439 = vmatprep.subr.bf16.mxu1 %v21801_v3 }
0x608f   : > { %21441 = vmatpush3.bf16.msra.mxu1 %v21440_v31 }
0x6090   : > { %21442 = vmatprep.subr.bf16.mxu1 %v21801_v3 }
0x6093   : > { %21444 = vmatpush3.bf16.msra.mxu1 %v21443_v27  ;;  %v14874_v27 = vld [vmem:[%s27441_s14 + $0xb8] sm:$0xff] }
0x6094   : > { %21469 = vmatprep.subr.bf16.mxu1 %v21801_v3  ;;  %v21503_v30 = vpack.c.bf16 %v14874_v27, %v14873_v55  ;;  %v13416_v55 = vld [vmem:[%s27444_s17 + $0x30] sm:$0xff]  ;;  %v13417_v27 = vld [vmem:[%s27444_s17 + $0x38] sm:$0xff] }
0x6096   : > { %19429 = vmatmul.mubr.f32.vlgmr.msra.gmra.mrb[154].mxu1 %v26534_v4  ;;  %v14850_v4 = vld [vmem:[%s27439_s12 + $0xbb0] sm:$0xff] }
0x6097   : > { %21471 = vmatpush3.bf16.msra.mxu1 %v21470_v57  ;;  %19498 = vmatprep.mubr.msk.f32.mxu1 %vm21802_vm0, %v21803_v51  ;;  %v21479_v8 = vpack.c.bf16 %v14851_v7, %v14850_v4  ;;  %v14881_v4 = vld [vmem:[%s27441_s14 + $0xf0] sm:$0xff]  ;;  %v14882_v7 = vld [vmem:[%s27441_s14 + $0xf8] sm:$0xff] }
0x6098   : > { %21472 = vmatprep.subr.bf16.mxu1 %v21801_v3 }
0x609b   : > { %21474 = vmatpush3.bf16.msra.mxu1 %v21473_v43  ;;  %v21509_v43 = vpack.c.bf16 %v14878_v62, %v14877_v59  ;;  %v13421_v59 = vld [vmem:[%s27444_s17 + $0x58] sm:$0xff] }
0x609c   : > { %21475 = vmatprep.subr.bf16.mxu1 %v21801_v3 }
0x609f   : > { %21477 = vmatpush3.bf16.msra.mxu1 %v21476_v5  ;;  %v21512_v5 = vpack.c.bf16 %v14880_v20, %v14879_v2  ;;  %v13423_v2 = vld [vmem:[%s27444_s17 + $0x68] sm:$0xff] }
0x60a0   : > { %21478 = vmatprep.subr.bf16.mxu1 %v21801_v3 }
0x60a3   : > { %21480 = vmatpush3.bf16.msra.mxu1 %v21479_v8  ;;  %v21515_v8 = vpack.c.bf16 %v14882_v7, %v14881_v4  ;;  %v13425_v4 = vld [vmem:[%s27444_s17 + $0x78] sm:$0xff] }
0x60a4   : > { %21481 = vmatprep.subr.bf16.mxu1 %v21801_v3 }
0x60a7   : > { %21483 = vmatpush3.bf16.msra.mxu1 %v21482_v12  ;;  %v14885_v12 = vld [vmem:[%s27442_s15 + $0x90] sm:$0xff] }
0x60a8   : > { %21484 = vmatprep.subr.bf16.mxu1 %v21801_v3 }
0x60ab   : > { %21486 = vmatpush3.bf16.msra.mxu1 %v21485_v61  ;;  %v21521_v61 = vpack.c.bf16 %v14886_v15, %v14885_v12 }
0x60ac   : > { %21487 = vmatprep.subr.bf16.mxu1 %v21801_v3 }
0x60af   : > { %21489 = vmatpush3.bf16.msra.mxu1 %v21488_v53  ;;  %v21524_v53 = vpack.c.bf16 %v14888_v6, %v14887_v16 }
0x60b0   : > { %21490 = vmatprep.subr.bf16.mxu1 %v21801_v3 }
0x60b3   : > { %21492 = vmatpush3.bf16.msra.mxu1 %v21491_v29  ;;  %v21527_v29 = vpack.c.bf16 %v14890_v17, %v14889_v38 }
0x60b4   : > { %21517 = vmatprep.subr.bf16.mxu1 %v21801_v3 }
0x60b6   : > { %19499 = vmatmul.mubr.f32.vlgmr.msra.gmra.mrb[156].mxu1 %v24714_v1 }
0x60b7   : > { %19583 = vmatprep.mubr.msk.f32.mxu1 %vm21802_vm0, %v21803_v51  ;;  %21519 = vmatpush3.bf16.msra.mxu1 %v21518_v13  ;;  %v14900_v13 = vld [vmem:[%s27443_s16 + $0x1] ss:$0 sm:$0xff] }
0x60b8   : > { %21520 = vmatprep.subr.bf16.mxu1 %v21801_v3 }
0x60bb   : > { %21522 = vmatpush3.bf16.msra.mxu1 %v21521_v61 }
0x60bc   : > { %21523 = vmatprep.subr.bf16.mxu1 %v21801_v3 }
0x60bf   : > { %21525 = vmatpush3.bf16.msra.mxu1 %v21524_v53 }
0x60c0   : > { %21526 = vmatprep.subr.bf16.mxu1 %v21801_v3 }
0x60c3   : > { %21528 = vmatpush3.bf16.msra.mxu1 %v21527_v29 }
0x60c4   : > { %21529 = vmatprep.subr.bf16.mxu1 %v21801_v3 }
0x6149   : > { %v12699_v35 = vpop.f32.mrb[152].mxu1 }
0x614a   : > { %v12703_v0 = vadd.f32 %v12699_v35, %v27044_v11  ;;  %v19395_v18 = vpop.f32.mrb[153].mxu1  ;;  %v14891_v35 = vld [vmem:[%s27442_s15 + $0xc0] sm:$0xff] }
0x6169   : > { %v12787_v19 = vpop.f32.mrb[154].mxu1 }
0x616a   : > { %v19430_v56 = vpop.f32.mrb[155].mxu1  ;;  %19504 = vmatmul.mubr.msk.f32.vlgmr.msra.gmra.mrb[136].mxu0 %vm865_vm1, %v12787_v19  ;;  %v14893_v19 = vld [vmem:[%s27442_s15 + $0xd0] sm:$0xff] }
0x616b   : > { %19508 = vmatprep.mubr.msk.f32.mxu0 %vm21802_vm0, %v21803_v51  ;;  %v14894_v56 = vld [vmem:[%s27442_s15 + $0xd8] sm:$0xff] }
0x6189   : > { %v12961_v21 = vpop.f32.mrb[156].mxu1 }
0x618a   : > { %v19500_v23 = vpop.f32.mrb[157].mxu1  ;;  %19507 = vmatpush3.msra.mxu0 %v12961_v21  ;;  %v21533_v21 = vpack.c.bf16 %v14894_v56, %v14893_v19 }
0x618b   : > { %19511 = vmatprep.subr.mxu0 %v21803_v51  ;;  %v14895_v23 = vld [vmem:[%s27442_s15 + $0xe0] sm:$0xff] }
0x623d   : > { %v13037_v1 = vpop.f32.mrb[136].mxu0 }
0x623e   : > { %v19505_v24 = vpop.f32.mrb[137].mxu0  ;;  %v13041_v25 = vsel %vm865_vm1, %v13037_v1, -inf }
0x623f   : > { %13042 = vmax.xlane.f32.xlu0 %v13041_v25 }
0x62cc   : > { %v13043_v26 = vpop.xlane.xlu0 %13042 }
0x62cd   : > { %v13044_v11 = vsub.f32 %v13037_v1, %v13043_v26  ;;  %v14896_v1 = vld [vmem:[%s27442_s15 + $0xe8] sm:$0xff] }
0x62ce   : > { %v21536_v24 = vpack.c.bf16 %v14896_v1, %v14895_v23 }
0x62cf   : > { %v13045_v39 = vmul.f32 1.442695, %v13044_v11 }
0x62d1   : > { %21719 = vpow2.f32 %v13045_v39 }
0x62db   : > { %v21720_v14 = vpop.eup %21719 }
0x62dc   : > { %v13047_v28 = vsel %vm865_vm1, %v21720_v14, 0.0 }
0x62dd   : > { %13048 = vadd.xlane.f32.xlu1 %v13047_v28 }
0x636a   : > { %v13049_v32 = vpop.xlane.xlu1 %13048 }
0x636b   : > { %21721 = vrcp.f32 %v13049_v32 }
0x6375   : > { %v21722_v33 = vpop.eup %21721 }
0x6376   : > { %v13051_v37 = vmul.f32 %v21722_v33, %v21720_v14  ;;  %v14866_v14 = vld [vmem:[%s27436_s9 + $0x5] ss:$0 sm:$0xff]  ;;  %v14897_v33 = vld [vmem:[%s27442_s15 + $0xf0] sm:$0xff] }
0x6378   : > { %19509 = vmatmul.mubr.msk.f32.vlgmr.msra.gmra.mrb[138].mxu0 %vm865_vm1, %v13051_v37  ;;  %v14898_v37 = vld [vmem:[%s27442_s15 + $0xf8] sm:$0xff] }
0x6379   : > { %19512 = vmatpush3.msra.mxu0 %v14863_v60  ;;  %19513 = vmatprep.mubr.msk.f32.mxu0 %vm21802_vm0, %v21803_v51  ;;  %v21539_v60 = vpack.c.bf16 %v14898_v37, %v14897_v33 }
0x637a   : > { %21493 = vmatprep.subr.bf16.mxu0 %v21801_v3 }
0x644b   : > { %v13121_v22 = vpop.f32.mrb[138].mxu0 }
0x644c   : > { %v19510_v41 = vpop.f32.mrb[139].mxu0  ;;  %19514 = vmatmul.mubr.msk.f32.vlgmr.msra.gmra.mrb[140].mxu0 %vm865_vm1, %v13121_v22 }
0x644d   : > { %19548 = vmatprep.mubr.msk.f32.mxu0 %vm21802_vm0, %v21803_v51  ;;  %21495 = vmatpush3.bf16.msra.mxu0 %v21494_v36 }
0x644e   : > { %21496 = vmatprep.subr.bf16.mxu0 %v21801_v3 }
0x6451   : > { %21498 = vmatpush3.bf16.msra.mxu0 %v21497_v45  ;;  %v21545_v45 = vpack.c.bf16 %v13413_v44, %v13412_v34 }
0x6452   : > { %21499 = vmatprep.subr.bf16.mxu0 %v21801_v3 }
0x6455   : > { %21501 = vmatpush3.bf16.msra.mxu0 %v21500_v46  ;;  %v21548_v46 = vpack.c.bf16 %v13415_v58, %v13414_v63 }
0x6456   : > { %21502 = vmatprep.subr.bf16.mxu0 %v21801_v3 }
0x6459   : > { %21504 = vmatpush3.bf16.msra.mxu0 %v21503_v30  ;;  %v21551_v30 = vpack.c.bf16 %v13417_v27, %v13416_v55 }
0x645a   : > { %21505 = vmatprep.subr.bf16.mxu0 %v21801_v3 }
0x651f   : > { %v13196_v47 = vpop.f32.mrb[140].mxu0 }
0x6520   : > { %v13200_v49 = vadd.f32 %v13196_v47, %v12703_v0  ;;  %v19515_v50 = vpop.f32.mrb[141].mxu0  ;;  %v14892_v0 = vld [vmem:[%s27442_s15 + $0xc8] sm:$0xff] }
0x6521   : > { %v21530_v18 = vpack.c.bf16 %v14892_v0, %v14891_v35 }
0x6522   : > { %v27221_v31 = vadd.f32 %v13200_v49, %v26492_v48  ;;  %v14875_v48 = vld [vmem:[%s27441_s14 + $0xc0] sm:$0xff] }
0x6523   : > { %v21506_v57 = vpack.c.bf16 %v14876_v40, %v14875_v48  ;;  %21531 = vmatpush3.bf16.msra.mxu1 %v21530_v18  ;;  %v13418_v48 = vld [vmem:[%s27444_s17 + $0x40] sm:$0xff] }
0x6524   : > { %v13204_v52 = vmul.f32 %v27221_v31, %v27221_v31  ;;  %21532 = vmatprep.subr.bf16.mxu1 %v21801_v3 }
0x6525   : > { %21507 = vmatpush3.bf16.msra.mxu0 %v21506_v57  ;;  %v13420_v57 = vld [vmem:[%s27444_s17 + $0x50] sm:$0xff] }
0x6526   : > { %13205 = vadd.xlane.f32.xlu0 %v13204_v52  ;;  %21508 = vmatprep.subr.bf16.mxu0 %v21801_v3  ;;  %v21557_v62 = vpack.c.bf16 %v13421_v59, %v13420_v57 }
0x6527   : > { %21534 = vmatpush3.bf16.msra.mxu1 %v21533_v21 }
0x6528   : > { %21535 = vmatprep.subr.bf16.mxu1 %v21801_v3 }
0x6529   : > { %21510 = vmatpush3.bf16.msra.mxu0 %v21509_v43  ;;  %v13422_v43 = vld [vmem:[%s27444_s17 + $0x60] sm:$0xff] }
0x652a   : > { %21511 = vmatprep.subr.bf16.mxu0 %v21801_v3  ;;  %v21560_v20 = vpack.c.bf16 %v13423_v2, %v13422_v43 }
0x652b   : > { %21537 = vmatpush3.bf16.msra.mxu1 %v21536_v24 }
0x652c   : > { %21538 = vmatprep.subr.bf16.mxu1 %v21801_v3 }
0x652d   : > { %21513 = vmatpush3.bf16.msra.mxu0 %v21512_v5  ;;  %v13424_v5 = vld [vmem:[%s27444_s17 + $0x70] sm:$0xff] }
0x652e   : > { %21514 = vmatprep.subr.bf16.mxu0 %v21801_v3  ;;  %v21563_v7 = vpack.c.bf16 %v13425_v4, %v13424_v5 }
0x652f   : > { %21540 = vmatpush3.bf16.msra.mxu1 %v21539_v60 }
0x6531   : > { %21516 = vmatpush3.bf16.msra.mxu0 %v21515_v8 }
0x6532   : > { %21541 = vmatprep.subr.bf16.mxu0 %v21801_v3 }
0x65b3   : > { %v13206_v25 = vpop.xlane.xlu0 %13205 }
0x65b4   : > { %v13207_v26 = vmul.f32 0.03125, %v13206_v25 }
0x65b6   : > { %v13208_v11 = vadd.f32 1e-06, %v13207_v26 }
0x65b8   : > { %21723 = vrsqrt.f32 %v13208_v11 }
0x65c2   : > { %v21724_v39 = vpop.eup %21723 }
0x65c3   : > { %v13210_v28 = vmul.f32 %v21724_v39, %v27221_v31 }
0x65c5   : > { %v13217_v32 = vmul.f32 %v14866_v14, %v13210_v28 }
0x65c7   : > { %19549 = vmatmul.mubr.f32.vlgmr.msra.gmra.mrb[142].mxu0 %v13217_v32 }
0x65c8   : > { %19618 = vmatprep.mubr.msk.f32.mxu0 %vm21802_vm0, %v21803_v51  ;;  %v13411_v51 = vld [vmem:[%s27444_s17 + $0x8] sm:$0xff] }
0x65c9   : > { %v21542_v36 = vpack.c.bf16 %v13411_v51, %v13410_v42 }
0x65cb   : > { %21543 = vmatpush3.bf16.msra.mxu0 %v21542_v36 }
0x65cc   : > { %21544 = vmatprep.subr.bf16.mxu0 %v21801_v3 }
0x65cf   : > { %21546 = vmatpush3.bf16.msra.mxu0 %v21545_v45 }
0x65d0   : > { %21547 = vmatprep.subr.bf16.mxu0 %v21801_v3 }
0x65d3   : > { %21549 = vmatpush3.bf16.msra.mxu0 %v21548_v46 }
0x65d4   : > { %21550 = vmatprep.subr.bf16.mxu0 %v21801_v3 }
0x65d7   : > { %21552 = vmatpush3.bf16.msra.mxu0 %v21551_v30 }
0x65d8   : > { %21553 = vmatprep.subr.bf16.mxu0 %v21801_v3 }
0x669a   : > { %v13301_v22 = vpop.f32.mrb[142].mxu0 }
0x669b   : > { %v13305_v41 = vmax.f32 %v13301_v22, 0.0  ;;  %v19550_v54 = vpop.f32.mrb[143].mxu0 }
0x669d   : > { %19584 = vmatmul.mubr.f32.vlgmr.msra.gmra.mrb[158].mxu1 %v13305_v41 }
0x6770   : > { %v13389_v47 = vpop.f32.mrb[158].mxu1 }
0x6771   : > { %v13393_v49 = vadd.f32 %v13389_v47, %v27221_v31  ;;  %v19585_v50 = vpop.f32.mrb[159].mxu1  ;;  %v13419_v31 = vld [vmem:[%s27444_s17 + $0x48] sm:$0xff] }
0x6772   : > { %v21554_v40 = vpack.c.bf16 %v13419_v31, %v13418_v48 }
0x6773   : > { %v13396_v52 = vmul.f32 %v13393_v49, %v13393_v49 }
0x6774   : > { %21555 = vmatpush3.bf16.msra.mxu0 %v21554_v40 }
0x6775   : > { %13397 = vadd.xlane.f32.xlu1 %v13396_v52  ;;  %21556 = vmatprep.subr.bf16.mxu0 %v21801_v3 }
0x6778   : > { %21558 = vmatpush3.bf16.msra.mxu0 %v21557_v62 }
0x6779   : > { %21559 = vmatprep.subr.bf16.mxu0 %v21801_v3 }
0x677c   : > { %21561 = vmatpush3.bf16.msra.mxu0 %v21560_v20 }
0x677d   : > { %21562 = vmatprep.subr.bf16.mxu0 %v21801_v3 }
0x6780   : > { %21564 = vmatpush3.bf16.msra.mxu0 %v21563_v7 }
0x6802   : > { %v13398_v8 = vpop.xlane.xlu1 %13397 }
0x6803   : > { %v13399_v9 = vmul.f32 0.03125, %v13398_v8 }
0x6805   : > { %v13400_v10 = vadd.f32 1e-06, %v13399_v9 }
0x6807   : > { %21725 = vrsqrt.f32 %v13400_v10 }
0x6811   : > { %v21726_v12 = vpop.eup %21725 }
0x6812   : > { %v13402_v15 = vmul.f32 %v21726_v12, %v13393_v49 }
0x6814   : > { %v13409_v61 = vmul.f32 %v14900_v13, %v13402_v15 }
0x6816   : > { %19619 = vmatmul.mubr.f32.vlgmr.msra.gmra.mrb[144].mxu0 %v13409_v61 }
0x68e9   : > { %v13492_v3 = vpop.f32.mrb[144].mxu0 }
0x68ea   : > { %13496 = vst [vmem:[%s579_s20] sm:$0xff] %v13492_v3  ;;  %v19620_v16 = vpop.f32.mrb[145].mxu0 }
0x68eb   : > { %21750 = shalt.err (!%p21747_p3)
}
0x68ec   : > { %s21751_s29 = scalar_lea.hbm %s27387_s22, 128  ;;  %s21755_s30 = scalar_lea.hbm %s27471_s26, 256 }
0x68ed   : > { %p21752_p4 = scmp.ne.s32.totalorder %s27387_s22, %s21751_s29  ;;  %p21756_p9 = scmp.lt.u32.totalorder %s27387_s22, %s27471_s26 }
0x68ee   : > { %p21757_p10 = scmp.lt.u32.totalorder %s21755_s30, %s21751_s29  ;;  %p21759_p12 = scmp.lt.u32.totalorder %s21751_s29, %s27387_s22 }
0x68ef   : > { %p21753_p7 = pnand %p21752_p4, %p21938_p5 }
0x68f0   : > { %p21758_p11 = por %p21757_p10, %p21756_p9 }
0x68f1   : > { %p21754_p8 = pneg %p21753_p7 }
0x68f2   : > { %p21760_p13 = por %p21759_p12, %p21758_p11 }
0x68f4   : > { %p21761_p0 = pnand %p21760_p13, %p21754_p8 }
0x68f6   : > { %21764 = shalt.err (!%p21761_p0)
}
0x68f7   : > { %21565 = dma.vmem_to_hbm [thread:$0]  (%p21938_p5), %s27382_s23, 128, %s27387_s22, %s13498_s27  }
0x68f8 PF: > { %s27472_s19 = sld [smem:[#allocation7_spill]]  ;;  %s27473_s1 = sld [smem:[#allocation5_spill]] }
0x68fe   : > { %p21571_p1 = scmp.ge.s32.totalorder %s27472_s19, 2  ;;  %s13523_s20 = sand.u32 1, %s27473_s1  }
0x68ff   : > { %s13524_s24 = scalar_lea.sflag [#allocation3], %s13523_s20 }
0x6900   : > { %p21568_p2 = pnand %p21571_p1, %p21942_p6 }
0x6902   : > { %21782 = dma.done.wait (!%p21568_p2), %s13524_s24, 128  }
0x6903   : > { %21784 = vsyncadd (!%p21568_p2), %s13524_s24, 4294967168  ;;  %s27475_s30 = sld [smem:[#allocation8_spill]]  ;;  %s27476_s29 = sld [smem:[#allocation6_spill]] }
0x6904   : > { %s27477_s25 = sld [smem:[#allocation9_spill]]  ;;  %s27478_s27 = smov %s21791_s28 }
0x6909   : > { %p28_p3 = scmp.ge.s32.totalorder %s27475_s30, 4   ;;  %s27479_s28 = smov %s27476_s29 }
0x690a   : > { %s27480_s29 = smov %s27477_s25 }
0x690b   :  { %30 = sbr.rel (!%p28_p3) target bundleno = 8 (0x8), region = 239 }
0x6912   :  { %13529 = vsyncpa [#allocation3], 1 }
0x6913   :  { %13531 = vsyncpa [#allocation3 + $0x1], 1 }

</bundles_post_ra>
